<compile_context>
chip_gen: v5e
topology: v5e:2x2
jax: 0.10.0
libtpu: 0.0.40
codegen_flags: <defaults>
</compile_context>

<pallas_src>
import numpy as np
import jax
import jax.numpy as jnp
from jax import lax
from jax.experimental import pallas as pl
from jax.experimental.pallas import tpu as pltpu

_PREC = jax.lax.Precision.HIGHEST  # used only by the pure-JAX reference


# ----------------------------------------------------------------------------
# Host-side (glue) constant-matrix builders
# ----------------------------------------------------------------------------
def _round_up(x, m):
    return ((x + m - 1) // m) * m


def _conv_select_matrices(h_in, w_in, kh, kw, stride, pad):
    """One-hot selection matrices S[k] (Ho*Wo, Hin*Win), one per conv tap."""
    h_out = (h_in + 2 * pad - kh) // stride + 1
    w_out = (w_in + 2 * pad - kw) // stride + 1
    S = np.zeros((kh * kw, h_out * w_out, h_in * w_in), np.float32)
    for di in range(kh):
        for dj in range(kw):
            k = di * kw + dj
            for oy in range(h_out):
                for ox in range(w_out):
                    iy = oy * stride + di - pad
                    ix = ox * stride + dj - pad
                    if 0 <= iy < h_in and 0 <= ix < w_in:
                        S[k, oy * w_out + ox, iy * w_in + ix] = 1.0
    return S, h_out, w_out


def _pool_separable_matrices(h_in, w_in, k, stride):
    """Separable kxk/stride max-pool: horizontal taps then vertical taps."""
    h_out = (h_in - k) // stride + 1
    w_out = (w_in - k) // stride + 1
    HS = np.zeros((k, h_in * w_out, h_in * w_in), np.float32)
    for dx in range(k):
        for y in range(h_in):
            for ox in range(w_out):
                HS[dx, y * w_out + ox, y * w_in + ox * stride + dx] = 1.0
    VS = np.zeros((k, h_out * w_out, h_in * w_out), np.float32)
    for dy in range(k):
        for oy in range(h_out):
            for ox in range(w_out):
                VS[dy, oy * w_out + ox, (oy * stride + dy) * w_out + ox] = 1.0
    return HS, VS, h_out, w_out


def _bilinear_axis_weights(out_size, in_size):
    """PyTorch F.interpolate(mode='bilinear', align_corners=False) 1-D weights."""
    A = np.zeros((out_size, in_size), np.float32)
    scale = in_size / out_size
    for i in range(out_size):
        src = max((i + 0.5) * scale - 0.5, 0.0)
        i0 = min(int(np.floor(src)), in_size - 1)
        i1 = min(i0 + 1, in_size - 1)
        l1 = src - i0
        A[i, i0] += 1.0 - l1
        A[i, i1] += l1
    return A


def _bilinear_matrix(h_out, w_out, h_in, w_in):
    Ah = _bilinear_axis_weights(h_out, h_in)
    Aw = _bilinear_axis_weights(w_out, w_in)
    M = np.einsum("ir,jc->ijrc", Ah, Aw).reshape(h_out * w_out, h_in * w_in)
    return M.astype(np.float32)


def _pick_batch_group(n, f, target_rows=128):
    """Largest divisor NB of n with NB*f <= target_rows, keeping >=2 groups."""
    cap = max(1, target_rows // max(f, 1))
    best = 1
    for nb in range(1, n + 1):
        if n % nb == 0 and nb <= cap and (n // nb >= 2 or n == 1):
            best = nb
    return best


# ----------------------------------------------------------------------------
# Pallas ESA
# ----------------------------------------------------------------------------
def esa_pallas(x, params):
    """x: (N, C, H, W) float32 (NCHW like PyTorch).  Returns (N, C, H, W)."""
    N, C, H, W = x.shape
    F_ = params["w1"].shape[0]          # esa_channels
    HW = H * W

    NB = _pick_batch_group(N, F_)       # batch elements stacked per grid step
    G = N // NB
    NBF = NB * F_
    NBC = NB * C

    # ---- constant spatial gather matrices (host glue, bf16, zero-padded) ----
    S2, h2, w2d = _conv_select_matrices(H, W, 3, 3, stride=2, pad=0)   # conv2
    N2 = h2 * w2d
    N2p = _round_up(N2, 128)
    s2t_cat = np.zeros((HW, 9 * N2p), np.float32)        # taps concat along N
    for k in range(9):
        s2t_cat[:, k * N2p:k * N2p + N2] = S2[k].T

    HS, VS, hp, wp = _pool_separable_matrices(h2, w2d, 7, 3)           # pool
    NH = h2 * wp
    NP = hp * wp
    NHp = _round_up(NH, 128)
    NPp = _round_up(NP, 128)
    hst_cat = np.zeros((N2p, 7 * NHp), np.float32)       # 7 taps x 128 slabs
    vst_cat = np.zeros((NHp, 7 * NPp), np.float32)
    for k in range(7):
        hst_cat[:N2, k * NHp:k * NHp + NH] = HS[k].T
        vst_cat[:NH, k * NPp:k * NPp + NP] = VS[k].T

    S3, h3, w3d = _conv_select_matrices(hp, wp, 3, 3, stride=1, pad=1)  # conv3
    M = _bilinear_matrix(H, W, h3, w3d)                  # (HW, NP), rows sum 1
    M3T = np.einsum("pr,krs->ksp", M, S3)                # (9, NP, HW)
    m3t_cat = M3T.reshape(9 * NP, HW)                    # taps stacked along K

    s2tc = jnp.asarray(s2t_cat, jnp.bfloat16)            # (HW, 9*N2p)
    hstc = jnp.asarray(hst_cat, jnp.bfloat16)            # (N2p, 7*NHp)
    vstc = jnp.asarray(vst_cat, jnp.bfloat16)            # (NHp, 7*NPp)
    m3tc = jnp.asarray(m3t_cat, jnp.bfloat16)            # (9*NP, HW)

    # ---- weights: block-diagonal over the NB stacked batch elements ----
    eye = jnp.eye(NB, dtype=jnp.float32)

    def blk(w):                                          # (o,i)->(NB*o, NB*i)
        return jnp.kron(eye, w)

    w1b = blk(params["w1"][:, :, 0, 0]).astype(jnp.bfloat16)        # (NBF,NBC)
    wfb = blk(params["wf"][:, :, 0, 0]).astype(jnp.bfloat16)        # (NBF,NBF)
    w4b = blk(params["w4"][:, :, 0, 0]).astype(jnp.bfloat16)        # (NBC,NBF)
    w2t = jnp.transpose(params["w2"], (2, 3, 0, 1)).reshape(9, F_, F_)
    w3t = jnp.transpose(params["w3"], (2, 3, 0, 1)).reshape(9, F_, F_)
    w2c = jnp.concatenate([blk(w2t[k]) for k in range(9)],
                          axis=1).astype(jnp.bfloat16)              # (NBF,9NBF)
    w3s = jnp.concatenate([blk(w3t[k]) for k in range(9)],
                          axis=0).astype(jnp.bfloat16)              # (9NBF,NBF)

    def stk(b, rep):
        return jnp.tile(b.reshape(-1, 1), (rep, 1)).astype(jnp.float32)

    b1s, b2s, b3s = stk(params["b1"], NB), stk(params["b2"], NB), stk(params["b3"], NB)
    bfs, b4s = stk(params["bf"], NB), stk(params["b4"], NB)

    # Pure reshape of NCHW: batches stacked on sublanes, spatial on lanes.
    xg = x.reshape(G, NBC, HW).astype(jnp.float32)

    def kernel(x_ref, w1_ref, b1_ref, s2t_ref, w2c_ref, b2_ref,
               hst_ref, vst_ref, w3s_ref, b3_ref, m3t_ref,
               wf_ref, bf_ref, w4_ref, b4_ref, out_ref):
        xv = x_ref[0]                                     # (NBC, HW) f32
        xb = xv.astype(jnp.bfloat16)

        # conv1 (1x1): block-diag channel mix, NB batches stacked on M.
        c1_ = jnp.dot(w1_ref[...], xb,
                      preferred_element_type=jnp.float32) + b1_ref[...]
        c1b = c1_.astype(jnp.bfloat16)                    # (NBF, HW)

        # conv2 (3x3, stride 2, valid): ONE concatenated one-hot gather
        # matmul, then all 9 channel mixes folded into a single matmul by
        # restacking the 256-aligned tap slabs along K.
        patches = jnp.dot(c1b, s2t_ref[...],
                          preferred_element_type=jnp.float32)   # (NBF, 9*N2p)
        pstack = jnp.concatenate(
            [patches[:, k * N2p:(k + 1) * N2p] for k in range(9)],
            axis=0).astype(jnp.bfloat16)                        # (9*NBF, N2p)
        c2 = jnp.dot(w2c_ref[...], pstack,
                     preferred_element_type=jnp.float32) + b2_ref[...]

        # max_pool2d (kernel 7, stride 3), separable: one matmul per stage,
        # maxima over 128-aligned lane slabs (one tap per slab).
        c2b = c2.astype(jnp.bfloat16)                           # (NBF, N2p)
        hall = jnp.dot(c2b, hst_ref[...],
                       preferred_element_type=jnp.float32)      # (NBF, 7*NHp)
        hmax = hall[:, :NHp]
        for dx in range(1, 7):
            hmax = jnp.maximum(hmax, hall[:, dx * NHp:(dx + 1) * NHp])
        vall = jnp.dot(hmax.astype(jnp.bfloat16), vst_ref[...],
                       preferred_element_type=jnp.float32)      # (NBF, 7*NPp)
        pooled = vall[:, :NPp]
        for dy in range(1, 7):
            pooled = jnp.maximum(pooled, vall[:, dy * NPp:(dy + 1) * NPp])

        # conv3 (3x3, pad 1) fused with the bilinear upsample: one stacked
        # channel-mix matmul (all taps on M), lane-concat to (NBF, 9*NP),
        # then a single fused (9*NP, HW) lane-dense matmul.
        pv = pooled[:, :NP].astype(jnp.bfloat16)                # (NBF, NP)
        t = jnp.dot(w3s_ref[...], pv,
                    preferred_element_type=jnp.float32)         # (9*NBF, NP)
        t2 = jnp.concatenate(
            [t[k * NBF:(k + 1) * NBF, :] for k in range(9)],
            axis=1).astype(jnp.bfloat16)                        # (NBF, 9*NP)
        up = jnp.dot(t2, m3t_ref[...],
                     preferred_element_type=jnp.float32) + b3_ref[...]

        # conv_f (1x1) full-res branch, conv4 (1x1), sigmoid gating.
        cf = jnp.dot(wf_ref[...], c1b,
                     preferred_element_type=jnp.float32) + bf_ref[...]
        c4 = jnp.dot(w4_ref[...], (up + cf).astype(jnp.bfloat16),
                     preferred_element_type=jnp.float32) + b4_ref[...]
        out_ref[0] = xv * jax.nn.sigmoid(c4)

    args = (xg, w1b, b1s, s2tc, w2c, b2s, hstc, vstc, w3s, b3s, m3tc,
            wfb, bfs, w4b, b4s)

    def const_spec(a):
        nd = a.ndim
        return pl.BlockSpec(a.shape, lambda g, nd=nd: (0,) * nd)

    in_specs = [pl.BlockSpec((1, NBC, HW), lambda g: (g, 0, 0))]
    in_specs += [const_spec(a) for a in args[1:]]
    out_specs = pl.BlockSpec((1, NBC, HW), lambda g: (g, 0, 0))

    out_flat = pl.pallas_call(
        kernel,
        out_shape=jax.ShapeDtypeStruct((G, NBC, HW), jnp.float32),
        grid_spec=pltpu.PrefetchScalarGridSpec(
            num_scalar_prefetch=0,
            grid=(G,),
            in_specs=in_specs,
            out_specs=out_specs,
        ),
        compiler_params=pltpu.CompilerParams(
            dimension_semantics=("parallel",),     # batch groups across cores
            vmem_limit_bytes=32 * 1024 * 1024,     # fits v7x's 64 MiB VMEM
        ),
    )(*args)

    return out_flat.reshape(N, C, H, W)


# ----------------------------------------------------------------------------
# Pure-JAX reference (for correctness check)
# ----------------------------------------------------------------------------
def _conv2d_ref(x, w, b, stride=1, pad=0):
    y = lax.conv_general_dilated(
        x, w, (stride, stride), [(pad, pad), (pad, pad)],
        dimension_numbers=("NCHW", "OIHW", "NCHW"), precision=_PREC)
    return y + b[None, :, None, None]


def esa_ref(x, params):
    N, C, H, W = x.shape
    c1_ = _conv2d_ref(x, params["w1"], params["b1"])
    c1 = _conv2d_ref(c1_, params["w2"], params["b2"], stride=2, pad=0)
    vmax = lax.reduce_window(c1, -jnp.inf, lax.max,
                             (1, 1, 7, 7), (1, 1, 3, 3), "VALID")
    c3 = _conv2d_ref(vmax, params["w3"], params["b3"], pad=1)
    n, f, hp, wp = c3.shape
    M = jnp.asarray(_bilinear_matrix(H, W, hp, wp))
    c3u = jnp.einsum("pk,nfk->nfp", M, c3.reshape(n, f, hp * wp),
                     precision=_PREC).reshape(n, f, H, W)
    cf = _conv2d_ref(c1_, params["wf"], params["bf"])
    c4 = _conv2d_ref(c3u + cf, params["w4"], params["b4"])
    return x * jax.nn.sigmoid(c4)


# ----------------------------------------------------------------------------
if __name__ == "__main__":
    N, C, H, W = 4, 8, 32, 32   # n_feats = 8; N=4 -> 2 groups of 2 batches
    F_ = 4                      # esa_channels = 4

    key = jax.random.PRNGKey(0)
    ks = jax.random.split(key, 11)

    def nrm(k, shape, s=0.1):
        return s * jax.random.normal(k, shape, jnp.float32)

    params = {
        "w1": nrm(ks[0], (F_, C, 1, 1)), "b1": nrm(ks[1], (F_,)),
        "wf": nrm(ks[2], (F_, F_, 1, 1)), "bf": nrm(ks[3], (F_,)),
        "w2": nrm(ks[4], (F_, F_, 3, 3)), "b2": nrm(ks[5], (F_,)),
        "w3": nrm(ks[6], (F_, F_, 3, 3)), "b3": nrm(ks[7], (F_,)),
        "w4": nrm(ks[8], (C, F_, 1, 1)), "b4": nrm(ks[9], (C,)),
    }
    x = jax.random.normal(ks[10], (N, C, H, W), jnp.float32)

    out = esa_pallas(x, params)
    out = jax.block_until_ready(out)

    ref = esa_ref(x, params)
    # Tolerance relaxed vs. the f32-HIGHEST reference: selection / bilinear /
    # channel matmuls intentionally run as single-pass bf16 MXU ops.
    err = float(jnp.max(jnp.abs(out - ref)))
    assert err < 5e-3, f"mismatch vs reference: max abs err = {err}"
    print("KERNEL_OK")
</pallas_src>

<mosaic_0001>
module attributes {stable_mosaic.version = 11 : i64} {
  func.func @kernel(%arg0: i32, %arg1: memref<1x16x1024xf32, #tpu.memory_space<vmem>>, %arg2: memref<8x16xbf16, #tpu.memory_space<vmem>>, %arg3: memref<8x1xf32, #tpu.memory_space<vmem>>, %arg4: memref<1024x2304xbf16, #tpu.memory_space<vmem>>, %arg5: memref<8x72xbf16, #tpu.memory_space<vmem>>, %arg6: memref<8x1xf32, #tpu.memory_space<vmem>>, %arg7: memref<256x896xbf16, #tpu.memory_space<vmem>>, %arg8: memref<128x896xbf16, #tpu.memory_space<vmem>>, %arg9: memref<72x8xbf16, #tpu.memory_space<vmem>>, %arg10: memref<8x1xf32, #tpu.memory_space<vmem>>, %arg11: memref<81x1024xbf16, #tpu.memory_space<vmem>>, %arg12: memref<8x8xbf16, #tpu.memory_space<vmem>>, %arg13: memref<8x1xf32, #tpu.memory_space<vmem>>, %arg14: memref<16x8xbf16, #tpu.memory_space<vmem>>, %arg15: memref<16x1xf32, #tpu.memory_space<vmem>>, %arg16: memref<1x16x1024xf32, #tpu.memory_space<vmem>>) attributes {dimension_semantics = [#tpu.dimension_semantics<parallel>], iteration_bounds = array<i64: 2>, scalar_prefetch = 0 : i64, scratch_operands = 0 : i64, tpu.core_type = #tpu.core_type<tc>, window_params = [{transform_indices = @transform_0, window_bounds = array<i64: 1, 16, 1024>}, {pipeline_mode = #tpu.pipeline_mode<synchronous>, transform_indices = @transform_1, window_bounds = array<i64: 8, 16>}, {pipeline_mode = #tpu.pipeline_mode<synchronous>, transform_indices = @transform_2, window_bounds = array<i64: 8, 1>}, {pipeline_mode = #tpu.pipeline_mode<synchronous>, transform_indices = @transform_3, window_bounds = array<i64: 1024, 2304>}, {pipeline_mode = #tpu.pipeline_mode<synchronous>, transform_indices = @transform_4, window_bounds = array<i64: 8, 72>}, {pipeline_mode = #tpu.pipeline_mode<synchronous>, transform_indices = @transform_5, window_bounds = array<i64: 8, 1>}, {pipeline_mode = #tpu.pipeline_mode<synchronous>, transform_indices = @transform_6, window_bounds = array<i64: 256, 896>}, {pipeline_mode = #tpu.pipeline_mode<synchronous>, transform_indices = @transform_7, window_bounds = array<i64: 128, 896>}, {pipeline_mode = #tpu.pipeline_mode<synchronous>, transform_indices = @transform_8, window_bounds = array<i64: 72, 8>}, {pipeline_mode = #tpu.pipeline_mode<synchronous>, transform_indices = @transform_9, window_bounds = array<i64: 8, 1>}, {pipeline_mode = #tpu.pipeline_mode<synchronous>, transform_indices = @transform_10, window_bounds = array<i64: 81, 1024>}, {pipeline_mode = #tpu.pipeline_mode<synchronous>, transform_indices = @transform_11, window_bounds = array<i64: 8, 8>}, {pipeline_mode = #tpu.pipeline_mode<synchronous>, transform_indices = @transform_12, window_bounds = array<i64: 8, 1>}, {pipeline_mode = #tpu.pipeline_mode<synchronous>, transform_indices = @transform_13, window_bounds = array<i64: 16, 8>}, {pipeline_mode = #tpu.pipeline_mode<synchronous>, transform_indices = @transform_14, window_bounds = array<i64: 16, 1>}, {transform_indices = @transform_15, window_bounds = array<i64: 1, 16, 1024>}]} {
    %c0 = arith.constant 0 : index
    %c0_0 = arith.constant 0 : index
    %c0_1 = arith.constant 0 : index
    %0 = vector.load %arg1[%c0, %c0_0, %c0_1] : memref<1x16x1024xf32, #tpu.memory_space<vmem>>, vector<1x16x1024xf32>
    %1 = vector.shape_cast %0 : vector<1x16x1024xf32> to vector<16x1024xf32>
    %2 = arith.truncf %1 : vector<16x1024xf32> to vector<16x1024xbf16>
    %c0_2 = arith.constant 0 : index
    %c0_3 = arith.constant 0 : index
    %3 = vector.load %arg2[%c0_2, %c0_3] : memref<8x16xbf16, #tpu.memory_space<vmem>>, vector<8x16xbf16>
    %cst = arith.constant dense<0.000000e+00> : vector<8x1024xf32>
    %4 = tpu.matmul %3, %2, %cst {dimension_numbers = #tpu.dot_dimension_numbers<[1], [0], [0], [1], [0, 0, 1, 1], [], []>} : vector<8x16xbf16>, vector<16x1024xbf16>, vector<8x1024xf32> -> vector<8x1024xf32>
    %c0_4 = arith.constant 0 : index
    %c0_5 = arith.constant 0 : index
    %5 = vector.load %arg3[%c0_4, %c0_5] : memref<8x1xf32, #tpu.memory_space<vmem>>, vector<8x1xf32>
    %6 = vector.broadcast %5 : vector<8x1xf32> to vector<8x1024xf32>
    %7 = arith.addf %4, %6 : vector<8x1024xf32>
    %8 = arith.truncf %7 : vector<8x1024xf32> to vector<8x1024xbf16>
    %c0_6 = arith.constant 0 : index
    %c0_7 = arith.constant 0 : index
    %9 = vector.load %arg4[%c0_6, %c0_7] : memref<1024x2304xbf16, #tpu.memory_space<vmem>>, vector<1024x2304xbf16>
    %cst_8 = arith.constant dense<0.000000e+00> : vector<8x2304xf32>
    %10 = tpu.matmul %8, %9, %cst_8 {dimension_numbers = #tpu.dot_dimension_numbers<[1], [0], [0], [1], [0, 0, 1, 1], [], []>} : vector<8x1024xbf16>, vector<1024x2304xbf16>, vector<8x2304xf32> -> vector<8x2304xf32>
    %11 = vector.extract_strided_slice %10 {offsets = [0, 0], sizes = [8, 256], strides = [1, 1]} : vector<8x2304xf32> to vector<8x256xf32>
    %12 = vector.extract_strided_slice %10 {offsets = [0, 256], sizes = [8, 256], strides = [1, 1]} : vector<8x2304xf32> to vector<8x256xf32>
    %13 = vector.extract_strided_slice %10 {offsets = [0, 512], sizes = [8, 256], strides = [1, 1]} : vector<8x2304xf32> to vector<8x256xf32>
    %14 = vector.extract_strided_slice %10 {offsets = [0, 768], sizes = [8, 256], strides = [1, 1]} : vector<8x2304xf32> to vector<8x256xf32>
    %15 = vector.extract_strided_slice %10 {offsets = [0, 1024], sizes = [8, 256], strides = [1, 1]} : vector<8x2304xf32> to vector<8x256xf32>
    %16 = vector.extract_strided_slice %10 {offsets = [0, 1280], sizes = [8, 256], strides = [1, 1]} : vector<8x2304xf32> to vector<8x256xf32>
    %17 = vector.extract_strided_slice %10 {offsets = [0, 1536], sizes = [8, 256], strides = [1, 1]} : vector<8x2304xf32> to vector<8x256xf32>
    %18 = vector.extract_strided_slice %10 {offsets = [0, 1792], sizes = [8, 256], strides = [1, 1]} : vector<8x2304xf32> to vector<8x256xf32>
    %19 = vector.extract_strided_slice %10 {offsets = [0, 2048], sizes = [8, 256], strides = [1, 1]} : vector<8x2304xf32> to vector<8x256xf32>
    %20 = tpu.concatenate %11, %12, %13, %14, %15, %16, %17, %18, %19 in 0 : vector<8x256xf32>, vector<8x256xf32>, vector<8x256xf32>, vector<8x256xf32>, vector<8x256xf32>, vector<8x256xf32>, vector<8x256xf32>, vector<8x256xf32>, vector<8x256xf32> -> vector<72x256xf32>
    %21 = arith.truncf %20 : vector<72x256xf32> to vector<72x256xbf16>
    %c0_9 = arith.constant 0 : index
    %c0_10 = arith.constant 0 : index
    %22 = vector.load %arg5[%c0_9, %c0_10] : memref<8x72xbf16, #tpu.memory_space<vmem>>, vector<8x72xbf16>
    %cst_11 = arith.constant dense<0.000000e+00> : vector<8x256xf32>
    %23 = tpu.matmul %22, %21, %cst_11 {dimension_numbers = #tpu.dot_dimension_numbers<[1], [0], [0], [1], [0, 0, 1, 1], [], []>} : vector<8x72xbf16>, vector<72x256xbf16>, vector<8x256xf32> -> vector<8x256xf32>
    %c0_12 = arith.constant 0 : index
    %c0_13 = arith.constant 0 : index
    %24 = vector.load %arg6[%c0_12, %c0_13] : memref<8x1xf32, #tpu.memory_space<vmem>>, vector<8x1xf32>
    %25 = vector.broadcast %24 : vector<8x1xf32> to vector<8x256xf32>
    %26 = arith.addf %23, %25 : vector<8x256xf32>
    %27 = arith.truncf %26 : vector<8x256xf32> to vector<8x256xbf16>
    %c0_14 = arith.constant 0 : index
    %c0_15 = arith.constant 0 : index
    %28 = vector.load %arg7[%c0_14, %c0_15] : memref<256x896xbf16, #tpu.memory_space<vmem>>, vector<256x896xbf16>
    %cst_16 = arith.constant dense<0.000000e+00> : vector<8x896xf32>
    %29 = tpu.matmul %27, %28, %cst_16 {dimension_numbers = #tpu.dot_dimension_numbers<[1], [0], [0], [1], [0, 0, 1, 1], [], []>} : vector<8x256xbf16>, vector<256x896xbf16>, vector<8x896xf32> -> vector<8x896xf32>
    %30 = vector.extract_strided_slice %29 {offsets = [0, 0], sizes = [8, 128], strides = [1, 1]} : vector<8x896xf32> to vector<8x128xf32>
    %31 = vector.extract_strided_slice %29 {offsets = [0, 128], sizes = [8, 128], strides = [1, 1]} : vector<8x896xf32> to vector<8x128xf32>
    %32 = arith.maximumf %30, %31 : vector<8x128xf32>
    %33 = vector.extract_strided_slice %29 {offsets = [0, 256], sizes = [8, 128], strides = [1, 1]} : vector<8x896xf32> to vector<8x128xf32>
    %34 = arith.maximumf %32, %33 : vector<8x128xf32>
    %35 = vector.extract_strided_slice %29 {offsets = [0, 384], sizes = [8, 128], strides = [1, 1]} : vector<8x896xf32> to vector<8x128xf32>
    %36 = arith.maximumf %34, %35 : vector<8x128xf32>
    %37 = vector.extract_strided_slice %29 {offsets = [0, 512], sizes = [8, 128], strides = [1, 1]} : vector<8x896xf32> to vector<8x128xf32>
    %38 = arith.maximumf %36, %37 : vector<8x128xf32>
    %39 = vector.extract_strided_slice %29 {offsets = [0, 640], sizes = [8, 128], strides = [1, 1]} : vector<8x896xf32> to vector<8x128xf32>
    %40 = arith.maximumf %38, %39 : vector<8x128xf32>
    %41 = vector.extract_strided_slice %29 {offsets = [0, 768], sizes = [8, 128], strides = [1, 1]} : vector<8x896xf32> to vector<8x128xf32>
    %42 = arith.maximumf %40, %41 : vector<8x128xf32>
    %43 = arith.truncf %42 : vector<8x128xf32> to vector<8x128xbf16>
    %c0_17 = arith.constant 0 : index
    %c0_18 = arith.constant 0 : index
    %44 = vector.load %arg8[%c0_17, %c0_18] : memref<128x896xbf16, #tpu.memory_space<vmem>>, vector<128x896xbf16>
    %cst_19 = arith.constant dense<0.000000e+00> : vector<8x896xf32>
    %45 = tpu.matmul %43, %44, %cst_19 {dimension_numbers = #tpu.dot_dimension_numbers<[1], [0], [0], [1], [0, 0, 1, 1], [], []>} : vector<8x128xbf16>, vector<128x896xbf16>, vector<8x896xf32> -> vector<8x896xf32>
    %46 = vector.extract_strided_slice %45 {offsets = [0, 0], sizes = [8, 128], strides = [1, 1]} : vector<8x896xf32> to vector<8x128xf32>
    %47 = vector.extract_strided_slice %45 {offsets = [0, 128], sizes = [8, 128], strides = [1, 1]} : vector<8x896xf32> to vector<8x128xf32>
    %48 = arith.maximumf %46, %47 : vector<8x128xf32>
    %49 = vector.extract_strided_slice %45 {offsets = [0, 256], sizes = [8, 128], strides = [1, 1]} : vector<8x896xf32> to vector<8x128xf32>
    %50 = arith.maximumf %48, %49 : vector<8x128xf32>
    %51 = vector.extract_strided_slice %45 {offsets = [0, 384], sizes = [8, 128], strides = [1, 1]} : vector<8x896xf32> to vector<8x128xf32>
    %52 = arith.maximumf %50, %51 : vector<8x128xf32>
    %53 = vector.extract_strided_slice %45 {offsets = [0, 512], sizes = [8, 128], strides = [1, 1]} : vector<8x896xf32> to vector<8x128xf32>
    %54 = arith.maximumf %52, %53 : vector<8x128xf32>
    %55 = vector.extract_strided_slice %45 {offsets = [0, 640], sizes = [8, 128], strides = [1, 1]} : vector<8x896xf32> to vector<8x128xf32>
    %56 = arith.maximumf %54, %55 : vector<8x128xf32>
    %57 = vector.extract_strided_slice %45 {offsets = [0, 768], sizes = [8, 128], strides = [1, 1]} : vector<8x896xf32> to vector<8x128xf32>
    %58 = arith.maximumf %56, %57 : vector<8x128xf32>
    %59 = vector.extract_strided_slice %58 {offsets = [0, 0], sizes = [8, 9], strides = [1, 1]} : vector<8x128xf32> to vector<8x9xf32>
    %60 = arith.truncf %59 : vector<8x9xf32> to vector<8x9xbf16>
    %c0_20 = arith.constant 0 : index
    %c0_21 = arith.constant 0 : index
    %61 = vector.load %arg9[%c0_20, %c0_21] : memref<72x8xbf16, #tpu.memory_space<vmem>>, vector<72x8xbf16>
    %cst_22 = arith.constant dense<0.000000e+00> : vector<72x9xf32>
    %62 = tpu.matmul %61, %60, %cst_22 {dimension_numbers = #tpu.dot_dimension_numbers<[1], [0], [0], [1], [0, 0, 1, 1], [], []>} : vector<72x8xbf16>, vector<8x9xbf16>, vector<72x9xf32> -> vector<72x9xf32>
    %63 = vector.extract_strided_slice %62 {offsets = [0, 0], sizes = [8, 9], strides = [1, 1]} : vector<72x9xf32> to vector<8x9xf32>
    %64 = vector.extract_strided_slice %62 {offsets = [8, 0], sizes = [8, 9], strides = [1, 1]} : vector<72x9xf32> to vector<8x9xf32>
    %65 = vector.extract_strided_slice %62 {offsets = [16, 0], sizes = [8, 9], strides = [1, 1]} : vector<72x9xf32> to vector<8x9xf32>
    %66 = vector.extract_strided_slice %62 {offsets = [24, 0], sizes = [8, 9], strides = [1, 1]} : vector<72x9xf32> to vector<8x9xf32>
    %67 = vector.extract_strided_slice %62 {offsets = [32, 0], sizes = [8, 9], strides = [1, 1]} : vector<72x9xf32> to vector<8x9xf32>
    %68 = vector.extract_strided_slice %62 {offsets = [40, 0], sizes = [8, 9], strides = [1, 1]} : vector<72x9xf32> to vector<8x9xf32>
    %69 = vector.extract_strided_slice %62 {offsets = [48, 0], sizes = [8, 9], strides = [1, 1]} : vector<72x9xf32> to vector<8x9xf32>
    %70 = vector.extract_strided_slice %62 {offsets = [56, 0], sizes = [8, 9], strides = [1, 1]} : vector<72x9xf32> to vector<8x9xf32>
    %71 = vector.extract_strided_slice %62 {offsets = [64, 0], sizes = [8, 9], strides = [1, 1]} : vector<72x9xf32> to vector<8x9xf32>
    %72 = tpu.concatenate %63, %64, %65, %66, %67, %68, %69, %70, %71 in 1 : vector<8x9xf32>, vector<8x9xf32>, vector<8x9xf32>, vector<8x9xf32>, vector<8x9xf32>, vector<8x9xf32>, vector<8x9xf32>, vector<8x9xf32>, vector<8x9xf32> -> vector<8x81xf32>
    %73 = arith.truncf %72 : vector<8x81xf32> to vector<8x81xbf16>
    %c0_23 = arith.constant 0 : index
    %c0_24 = arith.constant 0 : index
    %74 = vector.load %arg11[%c0_23, %c0_24] : memref<81x1024xbf16, #tpu.memory_space<vmem>>, vector<81x1024xbf16>
    %cst_25 = arith.constant dense<0.000000e+00> : vector<8x1024xf32>
    %75 = tpu.matmul %73, %74, %cst_25 {dimension_numbers = #tpu.dot_dimension_numbers<[1], [0], [0], [1], [0, 0, 1, 1], [], []>} : vector<8x81xbf16>, vector<81x1024xbf16>, vector<8x1024xf32> -> vector<8x1024xf32>
    %c0_26 = arith.constant 0 : index
    %c0_27 = arith.constant 0 : index
    %76 = vector.load %arg10[%c0_26, %c0_27] : memref<8x1xf32, #tpu.memory_space<vmem>>, vector<8x1xf32>
    %77 = vector.broadcast %76 : vector<8x1xf32> to vector<8x1024xf32>
    %78 = arith.addf %75, %77 : vector<8x1024xf32>
    %c0_28 = arith.constant 0 : index
    %c0_29 = arith.constant 0 : index
    %79 = vector.load %arg12[%c0_28, %c0_29] : memref<8x8xbf16, #tpu.memory_space<vmem>>, vector<8x8xbf16>
    %cst_30 = arith.constant dense<0.000000e+00> : vector<8x1024xf32>
    %80 = tpu.matmul %79, %8, %cst_30 {dimension_numbers = #tpu.dot_dimension_numbers<[1], [0], [0], [1], [0, 0, 1, 1], [], []>} : vector<8x8xbf16>, vector<8x1024xbf16>, vector<8x1024xf32> -> vector<8x1024xf32>
    %c0_31 = arith.constant 0 : index
    %c0_32 = arith.constant 0 : index
    %81 = vector.load %arg13[%c0_31, %c0_32] : memref<8x1xf32, #tpu.memory_space<vmem>>, vector<8x1xf32>
    %82 = vector.broadcast %81 : vector<8x1xf32> to vector<8x1024xf32>
    %83 = arith.addf %80, %82 : vector<8x1024xf32>
    %c0_33 = arith.constant 0 : index
    %c0_34 = arith.constant 0 : index
    %84 = vector.load %arg14[%c0_33, %c0_34] : memref<16x8xbf16, #tpu.memory_space<vmem>>, vector<16x8xbf16>
    %85 = arith.addf %78, %83 : vector<8x1024xf32>
    %86 = arith.truncf %85 : vector<8x1024xf32> to vector<8x1024xbf16>
    %cst_35 = arith.constant dense<0.000000e+00> : vector<16x1024xf32>
    %87 = tpu.matmul %84, %86, %cst_35 {dimension_numbers = #tpu.dot_dimension_numbers<[1], [0], [0], [1], [0, 0, 1, 1], [], []>} : vector<16x8xbf16>, vector<8x1024xbf16>, vector<16x1024xf32> -> vector<16x1024xf32>
    %c0_36 = arith.constant 0 : index
    %c0_37 = arith.constant 0 : index
    %88 = vector.load %arg15[%c0_36, %c0_37] : memref<16x1xf32, #tpu.memory_space<vmem>>, vector<16x1xf32>
    %89 = vector.broadcast %88 : vector<16x1xf32> to vector<16x1024xf32>
    %90 = arith.addf %87, %89 : vector<16x1024xf32>
    %91 = arith.negf %90 : vector<16x1024xf32>
    %92 = math.exp %91 : vector<16x1024xf32>
    %cst_38 = arith.constant 1.000000e+00 : f32
    %93 = vector.broadcast %cst_38 : f32 to vector<16x1024xf32>
    %94 = arith.addf %93, %92 : vector<16x1024xf32>
    %95 = arith.divf %93, %94 : vector<16x1024xf32>
    %96 = arith.mulf %1, %95 : vector<16x1024xf32>
    %c0_39 = arith.constant 0 : index
    %c0_40 = arith.constant 0 : index
    %c0_41 = arith.constant 0 : index
    %97 = vector.load %arg16[%c0_39, %c0_40, %c0_41] : memref<1x16x1024xf32, #tpu.memory_space<vmem>>, vector<1x16x1024xf32>
    %98 = vector.shape_cast %97 : vector<1x16x1024xf32> to vector<16x1024xf32>
    %99 = vector.shape_cast %96 : vector<16x1024xf32> to vector<1x16x1024xf32>
    tpu.vector_store %arg16[%c0_39, %c0_40, %c0_41], %99 {strides = array<i32>} : memref<1x16x1024xf32, #tpu.memory_space<vmem>>, vector<1x16x1024xf32>,
    return
  }
  func.func @transform_0(%arg0: i32) -> (i32, i32, i32) {
    %c0_i32 = arith.constant 0 : i32
    %c0_i32_0 = arith.constant 0 : i32
    %c0_i32_1 = arith.constant 0 : i32
    return %arg0, %c0_i32, %c0_i32_0 : i32, i32, i32
  }
  func.func @transform_1(%arg0: i32) -> (i32, i32) {
    %c0_i32 = arith.constant 0 : i32
    %c0_i32_0 = arith.constant 0 : i32
    %c0_i32_1 = arith.constant 0 : i32
    return %c0_i32, %c0_i32_0 : i32, i32
  }
  func.func @transform_2(%arg0: i32) -> (i32, i32) {
    %c0_i32 = arith.constant 0 : i32
    %c0_i32_0 = arith.constant 0 : i32
    %c0_i32_1 = arith.constant 0 : i32
    return %c0_i32, %c0_i32_0 : i32, i32
  }
  func.func @transform_3(%arg0: i32) -> (i32, i32) {
    %c0_i32 = arith.constant 0 : i32
    %c0_i32_0 = arith.constant 0 : i32
    %c0_i32_1 = arith.constant 0 : i32
    return %c0_i32, %c0_i32_0 : i32, i32
  }
  func.func @transform_4(%arg0: i32) -> (i32, i32) {
    %c0_i32 = arith.constant 0 : i32
    %c0_i32_0 = arith.constant 0 : i32
    %c0_i32_1 = arith.constant 0 : i32
    return %c0_i32, %c0_i32_0 : i32, i32
  }
  func.func @transform_5(%arg0: i32) -> (i32, i32) {
    %c0_i32 = arith.constant 0 : i32
    %c0_i32_0 = arith.constant 0 : i32
    %c0_i32_1 = arith.constant 0 : i32
    return %c0_i32, %c0_i32_0 : i32, i32
  }
  func.func @transform_6(%arg0: i32) -> (i32, i32) {
    %c0_i32 = arith.constant 0 : i32
    %c0_i32_0 = arith.constant 0 : i32
    %c0_i32_1 = arith.constant 0 : i32
    return %c0_i32, %c0_i32_0 : i32, i32
  }
  func.func @transform_7(%arg0: i32) -> (i32, i32) {
    %c0_i32 = arith.constant 0 : i32
    %c0_i32_0 = arith.constant 0 : i32
    %c0_i32_1 = arith.constant 0 : i32
    return %c0_i32, %c0_i32_0 : i32, i32
  }
  func.func @transform_8(%arg0: i32) -> (i32, i32) {
    %c0_i32 = arith.constant 0 : i32
    %c0_i32_0 = arith.constant 0 : i32
    %c0_i32_1 = arith.constant 0 : i32
    return %c0_i32, %c0_i32_0 : i32, i32
  }
  func.func @transform_9(%arg0: i32) -> (i32, i32) {
    %c0_i32 = arith.constant 0 : i32
    %c0_i32_0 = arith.constant 0 : i32
    %c0_i32_1 = arith.constant 0 : i32
    return %c0_i32, %c0_i32_0 : i32, i32
  }
  func.func @transform_10(%arg0: i32) -> (i32, i32) {
    %c0_i32 = arith.constant 0 : i32
    %c0_i32_0 = arith.constant 0 : i32
    %c0_i32_1 = arith.constant 0 : i32
    return %c0_i32, %c0_i32_0 : i32, i32
  }
  func.func @transform_11(%arg0: i32) -> (i32, i32) {
    %c0_i32 = arith.constant 0 : i32
    %c0_i32_0 = arith.constant 0 : i32
    %c0_i32_1 = arith.constant 0 : i32
    return %c0_i32, %c0_i32_0 : i32, i32
  }
  func.func @transform_12(%arg0: i32) -> (i32, i32) {
    %c0_i32 = arith.constant 0 : i32
    %c0_i32_0 = arith.constant 0 : i32
    %c0_i32_1 = arith.constant 0 : i32
    return %c0_i32, %c0_i32_0 : i32, i32
  }
  func.func @transform_13(%arg0: i32) -> (i32, i32) {
    %c0_i32 = arith.constant 0 : i32
    %c0_i32_0 = arith.constant 0 : i32
    %c0_i32_1 = arith.constant 0 : i32
    return %c0_i32, %c0_i32_0 : i32, i32
  }
  func.func @transform_14(%arg0: i32) -> (i32, i32) {
    %c0_i32 = arith.constant 0 : i32
    %c0_i32_0 = arith.constant 0 : i32
    %c0_i32_1 = arith.constant 0 : i32
    return %c0_i32, %c0_i32_0 : i32, i32
  }
  func.func @transform_15(%arg0: i32) -> (i32, i32, i32) {
    %c0_i32 = arith.constant 0 : i32
    %c0_i32_0 = arith.constant 0 : i32
    %c0_i32_1 = arith.constant 0 : i32
    return %arg0, %c0_i32, %c0_i32_0 : i32, i32, i32
  }
}

</mosaic_0001>

<bundles_post_ra>
// kernel: tpu_custom_call.1
= control target key start
LH: loop header
LB: loop body
LE: loop exit
PB: predicated region body
PF: predicated region fallthrough
CT: control target
= control target key end

     0   :  { %s20773_s0 = inlined_call_operand.hbm [shape: f32[2,16,1024], index: 0, kind: input, shape index: {}]   ;;  %s20774_s1 = inlined_call_operand.hbm [shape: bf16[8,16], index: 1, kind: input, shape index: {}]   ;;  %s20775_s2 = inlined_call_operand.vmem [shape: f32[8,1], index: 2, kind: input, shape index: {}]   ;;  %s20776_s3 = inlined_call_operand.hbm [shape: bf16[1024,2304], index: 3, kind: input, shape index: {}]   ;;  %s20777_s4 = inlined_call_operand.hbm [shape: bf16[8,72], index: 4, kind: input, shape index: {}]   ;;  %s20778_s5 = inlined_call_operand.vmem [shape: f32[8,1], index: 5, kind: input, shape index: {}]   ;;  %s20779_s6 = inlined_call_operand.hbm [shape: bf16[256,896], index: 6, kind: input, shape index: {}]   ;;  %s20780_s7 = inlined_call_operand.hbm [shape: bf16[128,896], index: 7, kind: input, shape index: {}]   ;;  %s20781_s8 = inlined_call_operand.vmem [shape: bf16[72,8], index: 8, kind: input, shape index: {}]   ;;  %s20782_s9 = inlined_call_operand.vmem [shape: f32[8,1], index: 9, kind: input, shape index: {}]   ;;  %s20783_s10 = inlined_call_operand.hbm [shape: bf16[81,1024], index: 10, kind: input, shape index: {}]   ;;  %s20784_s11 = inlined_call_operand.hbm [shape: bf16[8,8], index: 11, kind: input, shape index: {}]   ;;  %s20785_s12 = inlined_call_operand.vmem [shape: f32[8,1], index: 12, kind: input, shape index: {}]   ;;  %s20786_s13 = inlined_call_operand.vmem [shape: bf16[16,8], index: 13, kind: input, shape index: {}]   ;;  %s20787_s14 = inlined_call_operand.vmem [shape: f32[16,1], index: 14, kind: input, shape index: {}]   ;;  %s20788_s15 = inlined_call_operand.hbm [shape: f32[2,16,1024], index: 15, kind: output, shape index: {}]  }
   0x1   :  { %20790 = sst [smem:[#allocation23_spill]] %s20774_s1 }
   0x2   :  { %20791 = sst [smem:[#allocation24_spill]] %s20776_s3 }
   0x3   :  { %20792 = sst [smem:[#allocation25_spill]] %s20777_s4 }
   0x4   :  { %20793 = sst [smem:[#allocation26_spill]] %s20779_s6 }
   0x5   :  { %20794 = sst [smem:[#allocation27_spill]] %s20780_s7 }
   0x6   :  { %20795 = sst [smem:[#allocation28_spill]] %s20782_s9 }
   0x7   :  { %20796 = sst [smem:[#allocation29_spill]] %s20783_s10 }
   0x8   :  { %20797 = sst [smem:[#allocation30_spill]] %s20785_s12 }
   0x9   :  { %20798 = sst [smem:[#allocation31_spill]] %s20786_s13 }
   0xa   :  { %20799 = sst [smem:[#allocation32_spill]] %s20788_s15 }
   0xb   :  { %20 = vsyncpa [#allocation3], 0 }
   0xc   :  { %22 = vsyncpa [#allocation3 + $0x1], 0 }
   0xd   :  { %23 = vsyncpa [#allocation6], 0 }
   0xe   :  { %24 = vsyncpa [#allocation9], 0 }
   0xf   :  { %25 = vsyncpa [#allocation12], 0 }
  0x10   :  { %26 = vsyncpa [#allocation15], 0 }
  0x11   :  { %27 = vsyncpa [#allocation4], 0 }
  0x12   :  { %29 = vsyncpa [#allocation4 + $0x1], 0  ;;  %s19856_s18 = smov 0   ;;  %s19858_s19 = smov 0  }
  0x13   :  { %s19860_s20 = smov 0   ;;  %s19862_s21 = smov 0  }
  0x14 LB: > { %s20800_s1 = sld [smem:[#allocation23_spill]]  ;;  %s19880_s25 = sadd.s32 4294967295, %s19748_s21   ;;  %s19748_s21 = sphi %s19862_s21, %s20831_s21   ;;  %s19744_s20 = sphi %s19860_s20, %s20830_s20   ;;  %s19740_s19 = sphi %s19858_s19, %s20829_s19   ;;  %s19736_s18 = sphi %s19856_s18, %s20828_s18  }
  0x15   : > { %p12298_p0 = scmp.ge.s32.totalorder %s19748_s21, 1  ;;  %p56_p1 = scmp.eq.s32.totalorder %s19880_s25, 0 }
  0x16   : > { %p386_p2 = scmp.lt.s32.totalorder %s19748_s21, 3  ;;  %s19750_s27 = smov [#allocation5]  }
  0x17   : > { %s400_s28 = sshll.u32 %s19750_s27, 4  ;;  %s20802_s4 = sld [smem:[#allocation25_spill]]  ;;  %s401_s28 = int_to_ptr.vmem [resolvable:$true] %s400_s28 }
  0x18   : > { %p19885_p3 = pnand %p12298_p0, %p386_p2  ;;  %s19751_s22 = smov [#allocation8]  }
  0x19   : > { %s429_s23 = sshll.u32 %s19751_s22, 4  ;;  %s20804_s7 = sld [smem:[#allocation27_spill]]  ;;  %s430_s23 = int_to_ptr.vmem [resolvable:$true] %s429_s23 }
  0x1a   : > { %s398_s24 = sshll.u32 %s20800_s1, 4  ;;  %p19239_p5 = pneg %p19885_p3  ;;  %s399_s24 = int_to_ptr.hbm [resolvable:$true] %s398_s24 }
  0x1b   : > { %s19752_s30 = smov [#allocation11]   ;;  %s20805_s3 = sld [smem:[#allocation24_spill]] }
  0x1c   : > { %p19897_p6 = pnand %p19239_p5, %p56_p1  ;;  %s19753_s9 = smov 448  }
  0x1d   : > { %s427_s16 = sshll.u32 %s20802_s4, 4  ;;  %s457_s4 = sshll.u32 %s19752_s30, 4  ;;  %s428_s16 = int_to_ptr.hbm [resolvable:$true] %s427_s16  ;;  %s458_s4 = int_to_ptr.vmem [resolvable:$true] %s457_s4 }
  0x1e   : > { %19242 = dma.hbm_to_vmem [thread:$0]  (!%p19897_p6), %s399_s24, 64, %s401_s28, [#allocation6]  }
  0x1f   : > { %19248 = dma.hbm_to_vmem [thread:$0]  (!%p19897_p6), %s428_s16, 64, %s430_s23, [#allocation9]  }
  0x20   : > { %s455_s29 = sshll.u32 %s20804_s7, 4  ;;  %s19754_s22 = smov 28   ;;  %s456_s29 = int_to_ptr.hbm [resolvable:$true] %s455_s29 }
  0x21   : > { %s412_s12 = sshll.u32 %s20805_s3, 4  ;;  %s19755_s24 = smov [#allocation7]   ;;  %s413_s12 = int_to_ptr.hbm [resolvable:$true] %s412_s12 }
  0x22   : > { %19254 = dma.hbm_to_vmem [thread:$0]  (!%p19897_p6), %s456_s29, 7168, %s458_s4, [#allocation12], %s19753_s9, %s19753_s9, %s19754_s22  }
  0x23   : > { %s414_s28 = sshll.u32 %s19755_s24, 4  ;;  %s19756_s1 = smov 1152   ;;  %s415_s28 = int_to_ptr.vmem [resolvable:$true] %s414_s28 }
  0x24   : > { %s19757_s16 = smov 72   ;;  %s20806_s6 = sld [smem:[#allocation26_spill]] }
  0x25   : > { %19245 = dma.hbm_to_vmem [thread:$0]  (!%p19897_p6), %s413_s12, 147456, %s415_s28, [#allocation6], %s19756_s1, %s19756_s1, %s19757_s16  }
  0x26   : > { %s19758_s13 = smov [#allocation10]   ;;  %s20807_s10 = sld [smem:[#allocation29_spill]] }
  0x27   : > { %s443_s15 = sshll.u32 %s19758_s13, 4  ;;  %s19759_s12 = smov [#allocation13]   ;;  %s444_s15 = int_to_ptr.vmem [resolvable:$true] %s443_s15 }
  0x28   : > { %s477_s24 = sshll.u32 %s19759_s12, 4  ;;  %s19760_s28 = smov 512   ;;  %s478_s24 = int_to_ptr.vmem [resolvable:$true] %s477_s24 }
  0x29   : > { %s19761_s1 = smov 32   ;;  %s12297_s27 = sadd.s32 4294967294, %s19748_s21  }
  0x2a   : > { %s441_s30 = sshll.u32 %s20806_s6, 4  ;;  %s42_s13 = sadd.s32 1, %s19744_s20  ;;  %s442_s30 = int_to_ptr.hbm [resolvable:$true] %s441_s30 }
  0x2b   : > { %19251 = dma.hbm_to_vmem [thread:$0]  (!%p19897_p6), %s442_s30, 14336, %s444_s15, [#allocation9], %s19753_s9, %s19753_s9, %s19754_s22  }
  0x2c   : > { %s475_s29 = sshll.u32 %s20807_s10, 4  ;;  %s490_s9 = sshll.u32 %s20784_s11, 4  ;;  %s476_s29 = int_to_ptr.hbm [resolvable:$true] %s475_s29  ;;  %s491_s9 = int_to_ptr.hbm [resolvable:$true] %s490_s9 }
  0x2d   : > { %19257 = dma.hbm_to_vmem [thread:$0]  (!%p19897_p6), %s476_s29, 5632, %s478_s24, [#allocation12], %s19760_s28, %s19760_s28, %s19761_s1  }
  0x2e   : > { %s19762_s22 = smov [#allocation14]   ;;  %s19932_s30 = sadd.s32 1, %s19748_s21  }
  0x2f   : > { %s492_s23 = sshll.u32 %s19762_s22, 4  ;;  %s39_s15 = ssub.s32 %s19748_s21, %s19932_s30  ;;  %s493_s23 = int_to_ptr.vmem [resolvable:$true] %s492_s23 }
  0x30   : > { %19260 = dma.hbm_to_vmem [thread:$0]  (!%p19897_p6), %s491_s9, 64, %s493_s23, [#allocation15]  }
  0x31   : > { %p49_p7 = scmp.ne.s32.totalorder %s19744_s20, %s19740_s19  ;;  %p40_p8 = scmp.eq.s32.totalorder %s39_s15, 0 }
  0x32   : > { %p50_p9 = scmp.eq.s32.totalorder %s19748_s21, 0  ;;  %p55_p10 = scmp.ne.s32.totalorder %s19740_s19, %s19736_s18 }
  0x33   : > { %p373_p11 = scmp.eq.s32.totalorder %s19880_s25, 1  ;;  %p379_p2 = scmp.eq.s32.totalorder %s12297_s27, 1 }
  0x34   : > { %s19944_s4 = scalar_select %p40_p8, %s19744_s20, %s42_s13  }
  0x35   : > { %p19946_p12 = por %p50_p9, %p49_p7  ;;  %p19952_p13 = por %p56_p1, %p55_p10 }
  0x36   : > { %p19956_p0 = por %p373_p11, %p49_p7  ;;  %p19276_p5 = scmp.lt.s32.totalorder %s19748_s21, 2 }
  0x37   : > { %s512_s24 = sand.u32 1, %s19744_s20   ;;  %p19962_p6 = por %p379_p2, %p55_p10 }
  0x38   : > { %s12307_s1 = sshll.u32 %s512_s24, 7  ;;  %s17840_s3 = sshll.u32 %s19748_s21, 7 }
  0x39   : > { %s521_s22 = scalar_lea.hbm %s20773_s0, %s17840_s3  ;;  %s516_s13 = scalar_lea.vmem [#allocation2], %s12307_s1 }
  0x3a   : > { %s522_s23 = sshll.u32 %s521_s22, 4  ;;  %s524_s15 = sshll.u32 %s516_s13, 4  ;;  %s523_s23 = int_to_ptr.hbm [resolvable:$true] %s522_s23  ;;  %s525_s15 = int_to_ptr.vmem [resolvable:$true] %s524_s15 }
  0x3b   : > { %p19972_p7 = pnand %p19276_p5, %p19946_p12  ;;  %s513_s6 = scalar_lea.sflag [#allocation3], %s512_s24 }
  0x3c   : > { %s19636_s7 = sshra.s32 %s523_s23, 4  ;;  %s19643_s16 = scalar_lea.hbm %s20773_s0, 256  ;;  %s19637_s7 = int_to_ptr.hbm [resolvable:$true] %s19636_s7 }
  0x3d   : > { %s19638_s10 = scalar_lea.hbm %s19637_s7, 128  ;;  %p19640_p9 = pneg %p19972_p7 }
  0x3e   : > { %p19639_p8 = scmp.ne.s32.totalorder %s19637_s7, %s19638_s10  ;;  %p19644_p12 = scmp.lt.s32.totalorder %s19637_s7, %s20773_s0 }
  0x3f   : > { %p19645_p2 = scmp.lt.s32.totalorder %s19643_s16, %s19638_s10 }
  0x40   : > { %p19641_p10 = pnand %p19640_p9, %p19639_p8 }
  0x41   : > { %p19646_p5 = por %p19645_p2, %p19644_p12 }
  0x42   : > { %p19642_p11 = pneg %p19641_p10 }
  0x44   : > { %p19647_p4 = pnand %p19646_p5, %p19642_p11 }
  0x46   : > { %19650 = shalt.err (!%p19647_p4)
}
  0x47   : > { %s19763_s24 = smov 1024   ;;  %s19764_s22 = smov 64  }
  0x48   : > { %19264 = dma.hbm_to_vmem [thread:$0]  (!%p19972_p7), %s523_s23, 2048, %s525_s15, %s513_s6, %s19763_s24, %s19763_s24, %s19764_s22  }
  0x49   : > { %536 = sbr.rel (%p19885_p3) target bundleno = 2662 (0xa66), region = 80  ;;  %s19989_s13 = sand.u32 (!%p19885_p3), 1, %s19740_s19  }
  0x4a   : > { %s12311_s7 = sshll.u32 (!%p19885_p3), %s19989_s13, 7  ;;  %s539_s10 = scalar_lea.sflag (!%p19885_p3), [#allocation3], %s19989_s13 }
  0x4b   : > { %s19995_s3 = scalar_lea.vmem (!%p19885_p3), [#allocation2], %s12311_s7 }
  0x4e   : > { %19711 = dma.done.wait (%p19952_p13), %s539_s10, 2048  }
  0x4f   : > { %19713 = vsyncadd (%p19952_p13), %s539_s10, 4294965248 }
  0x50   : > { %19715 = dma.done.wait (%p56_p1), [#allocation6], 147520  }
  0x51   : > { %19717 = vsyncadd (%p56_p1), [#allocation6], 4294819776 }
  0x52   : > { %19719 = dma.done.wait (%p56_p1), [#allocation9], 14400  }
  0x53   : > { %19721 = vsyncadd (%p56_p1), [#allocation9], 4294952896 }
  0x54   : > { %19723 = dma.done.wait (%p56_p1), [#allocation12], 12800  }
  0x55   : > { %19725 = vsyncadd (%p56_p1), [#allocation12], 4294954496 }
  0x56   : > { %19727 = dma.done.wait (%p56_p1), [#allocation15], 64  }
  0x57   : > { %19729 = vsyncadd (%p56_p1), [#allocation15], 4294967232  ;;  %v19765_v0 = vmov 0   ;;  %v626_v1 = vld [vmem:[%s19995_s3] sm:$0xff]  ;;  %v627_v3 = vld [vmem:[%s19995_s3 + $0x8] sm:$0xff]  ;;  %vm657_vm0 = vcmask 130048  }
  0x58   : > { %19343 = vset.pattern.permute.xlu0 %v19765_v0  ;;  %19344 = vset.pattern.permute.xlu1 %v19765_v0  ;;  %v634_v2 = vld [vmem:[%s19995_s3 + $0x40] sm:$0xff]  ;;  %v635_v5 = vld [vmem:[%s19995_s3 + $0x48] sm:$0xff]  ;;  %v628_v6 = vld [vmem:[%s19995_s3 + $0x10] sm:$0xff]  ;;  %vm9578_vm1 = vcmask 1043456   ;;  %vm9574_vm2 = vcmask 588800   ;;  %vm10988_vm3 = vcmask 64512  }
  0x59   : > { %19345 = vset.pattern.permute.xlu2 %v19765_v0  ;;  %v642_v4 = vpack.c.bf16 %v634_v2, %v626_v1  ;;  %v636_v7 = vld [vmem:[%s19995_s3 + $0x50] sm:$0xff]  ;;  %v643_v8 = vpack.c.bf16 %v635_v5, %v627_v3  ;;  %v629_v10 = vld [vmem:[%s19995_s3 + $0x18] sm:$0xff]  ;;  %v20028_v12 = vld [vmem:[#allocation5] sm:$0xf]  ;;  %s19766_s26 = smov 9   ;;  %s19767_s17 = smov 18  }
  0x5a   : > { %v644_v9 = vpack.c.bf16 %v636_v7, %v628_v6  ;;  %v637_v11 = vld [vmem:[%s19995_s3 + $0x58] sm:$0xff]  ;;  %v651_v14 = vld [vmem:[%s20775_s2] sm:$0xff]  ;;  %v631_v18 = vld [vmem:[%s19995_s3 + $0x28] sm:$0xff]  ;;  %s19768_s23 = smov 27   ;;  %s19769_s15 = smov 36   ;;  %vm11362_vm4 = vcmask 1040384  }
  0x5b   : > { %668 = vmatpush.bf16.msra.mxu0 %v642_v4  ;;  %v645_v13 = vpack.c.bf16 %v637_v11, %v629_v10  ;;  %v630_v15 = vld [vmem:[%s19995_s3 + $0x20] sm:$0xff]  ;;  %681 = vmatpush.bf16.msra.mxu1 %v643_v8  ;;  %v639_v19 = vld [vmem:[%s19995_s3 + $0x68] sm:$0xff]  ;;  %v632_v20 = vld [vmem:[%s19995_s3 + $0x30] sm:$0xff]  ;;  %s19770_s27 = smov 45   ;;  %s19771_s1 = smov 54   ;;  %vm11072_vm5 = vcmask 72704  }
  0x5c   : > { %v638_v16 = vld [vmem:[%s19995_s3 + $0x60] sm:$0xff]  ;;  %694 = vmatpush.bf16.msra.mxu2 %v644_v9  ;;  %654 = vperm.xlu0 %19343, %v651_v14   ;;  %v647_v21 = vpack.c.bf16 %v639_v19, %v631_v18  ;;  %v640_v22 = vld [vmem:[%s19995_s3 + $0x70] sm:$0xff]  ;;  %v633_v23 = vld [vmem:[%s19995_s3 + $0x38] sm:$0xff]  ;;  %s19772_s16 = smov 63   ;;  %s19773_s9 = smov 72   ;;  %vm11074_vm6 = vcmask 146432  }
  0x5d   : > { %v646_v17 = vpack.c.bf16 %v638_v16, %v630_v15  ;;  %707 = vmatpush.bf16.msra.mxu3 %v645_v13  ;;  %v641_v24 = vld [vmem:[%s19995_s3 + $0x78] sm:$0xff]  ;;  %v648_v25 = vpack.c.bf16 %v640_v22, %v632_v20  ;;  %v12834_v27 = vld [vmem:[#allocation7 + $0x3f0] sm:$0xf]  ;;  %v12762_v32 = vld [vmem:[#allocation7 + $0x360] sm:$0xf]  ;;  %s20813_s6 = sld [smem:[#allocation28_spill]] }
  0x5e   : > { %12320 = vmatmul.msk.bf16.vlgmr.msra.gmra.mxu0 %vm657_vm0, %v20028_v12  ;;  %v649_v26 = vpack.c.bf16 %v641_v24, %v633_v23  ;;  %v17976_v28 = vld [vmem:[#allocation7 + $0x434] sm:$0xf0]  ;;  %12321 = vmatmul.msk.bf16.vlgmr.msra.gmra.mxu1 %vm657_vm0, %v20028_v12  ;;  %v13410_v30 = vld [vmem:[#allocation7 + $0x870] sm:$0xf]  ;;  %v9568_v33 = vld [vmem:[%s20778_s5] sm:$0xff]  ;;  %vm11076_vm7 = vcmask 220160  }
  0x5f   : > { %12322 = vmatmul.msk.bf16.vlgmr.msra.gmra.mxu2 %vm657_vm0, %v20028_v12  ;;  %v12835_v29 = vor.u32 %v17976_v28, %v12834_v27  ;;  %v18120_v31 = vld [vmem:[#allocation7 + $0x8b4] sm:$0xf0]  ;;  %720 = vmatpush.bf16.msrb.mxu0 %v646_v17  ;;  %v17958_v35 = vld [vmem:[#allocation7 + $0x3a4] sm:$0xf0]  ;;  %v13338_v36 = vld [vmem:[#allocation7 + $0x7e0] sm:$0xf] }
  0x60   : > { %12323 = vmatmul.msk.bf16.vlgmr.msra.gmra.mxu3 %vm657_vm0, %v20028_v12  ;;  %v13411_v34 = vor.u32 %v18120_v31, %v13410_v30  ;;  %v18102_v37 = vld [vmem:[#allocation7 + $0x824] sm:$0xf0]  ;;  %733 = vmatpush.bf16.msrb.mxu1 %v647_v21  ;;  %v13986_v38 = vld [vmem:[#allocation7 + $0xcf0] sm:$0xf]  ;;  %v18264_v39 = vld [vmem:[#allocation7 + $0xd34] sm:$0xf0]  ;;  %v12763_v41 = vor.u32 %v17958_v35, %v12762_v32 }
  0x61   : > { %746 = vmatpush.bf16.msrb.mxu2 %v648_v25  ;;  %v14562_v40 = vld [vmem:[#allocation7 + $0x1170] sm:$0xf]  ;;  %759 = vmatpush.bf16.msrb.mxu3 %v649_v26  ;;  %v13987_v42 = vor.u32 %v18264_v39, %v13986_v38  ;;  %v18408_v43 = vld [vmem:[#allocation7 + $0x11b4] sm:$0xf0]  ;;  %v13339_v46 = vor.u32 %v18102_v37, %v13338_v36  ;;  %v13914_v50 = vld [vmem:[#allocation7 + $0xc60] sm:$0xf] }
  0x62   : > { %v12690_v44 = vld [vmem:[#allocation7 + $0x2d0] sm:$0xf]  ;;  %v17940_v45 = vld [vmem:[#allocation7 + $0x314] sm:$0xf0]  ;;  %v14563_v47 = vor.u32 %v18408_v43, %v14562_v40  ;;  %v18246_v51 = vld [vmem:[#allocation7 + $0xca4] sm:$0xf0] }
  0x63   : > { %7685 = vmatpush.bf16.msra.mxu0 %v12835_v29  ;;  %v13266_v48 = vld [vmem:[#allocation7 + $0x750] sm:$0xf]  ;;  %v18084_v49 = vld [vmem:[#allocation7 + $0x794] sm:$0xf0]  ;;  %v14490_v52 = vld [vmem:[#allocation7 + $0x10e0] sm:$0xf]  ;;  %v13915_v54 = vor.u32 %v18246_v51, %v13914_v50  ;;  %v12691_v56 = vor.u32 %v17940_v45, %v12690_v44 }
  0x64   : > { %7698 = vmatpush.bf16.msra.mxu1 %v13411_v34  ;;  %v18390_v53 = vld [vmem:[#allocation7 + $0x1124] sm:$0xf0]  ;;  %9571 = vperm.xlu0 %19343, %v9568_v33   ;;  %v13842_v57 = vld [vmem:[#allocation7 + $0xbd0] sm:$0xf]  ;;  %v18228_v58 = vld [vmem:[#allocation7 + $0xc14] sm:$0xf0]  ;;  %v13267_v59 = vor.u32 %v18084_v49, %v13266_v48 }
  0x65   : > { %7711 = vmatpush.bf16.msra.mxu2 %v13987_v42  ;;  %7724 = vmatpush.bf16.msra.mxu3 %v14563_v47  ;;  %v14491_v55 = vor.u32 %v18390_v53, %v14490_v52  ;;  %v14418_v60 = vld [vmem:[#allocation7 + $0x1050] sm:$0xf]  ;;  %v18372_v61 = vld [vmem:[#allocation7 + $0x1094] sm:$0xf0]  ;;  %v13843_v62 = vor.u32 %v18228_v58, %v13842_v57  ;;  %v12618_v63 = vld [vmem:[#allocation7 + $0x240] sm:$0xf] }
  0x66   : > { %v17922_v1 = vld [vmem:[#allocation7 + $0x284] sm:$0xf0]  ;;  %v13194_v2 = vld [vmem:[#allocation7 + $0x6c0] sm:$0xf]  ;;  %v14419_v3 = vor.u32 %v18372_v61, %v14418_v60  ;;  %v12546_v11 = vld [vmem:[#allocation7 + $0x1b0] sm:$0xf] }
  0x67   : > { %7686 = vmatpush.bf16.msra.mxu0 %v12763_v41  ;;  %v18066_v4 = vld [vmem:[#allocation7 + $0x704] sm:$0xf0]  ;;  %v13770_v5 = vld [vmem:[#allocation7 + $0xb40] sm:$0xf]  ;;  %v12619_v9 = vor.u32 %v17922_v1, %v12618_v63  ;;  %v17904_v13 = vld [vmem:[#allocation7 + $0x1f4] sm:$0xf0] }
  0x68   : > { %7699 = vmatpush.bf16.msra.mxu1 %v13339_v46  ;;  %v18210_v6 = vld [vmem:[#allocation7 + $0xb84] sm:$0xf0]  ;;  %v14346_v7 = vld [vmem:[#allocation7 + $0xfc0] sm:$0xf]  ;;  %v13195_v10 = vor.u32 %v18066_v4, %v13194_v2  ;;  %v13122_v14 = vld [vmem:[#allocation7 + $0x630] sm:$0xf]  ;;  %v12547_v22 = vor.u32 %v17904_v13, %v12546_v11 }
  0x69   : > { %7712 = vmatpush.bf16.msra.mxu2 %v13915_v54  ;;  %7725 = vmatpush.bf16.msra.mxu3 %v14491_v55  ;;  %v18354_v8 = vld [vmem:[#allocation7 + $0x1004] sm:$0xf0]  ;;  %v13771_v15 = vor.u32 %v18210_v6, %v13770_v5  ;;  %v18048_v16 = vld [vmem:[#allocation7 + $0x674] sm:$0xf0]  ;;  %v13698_v18 = vld [vmem:[#allocation7 + $0xab0] sm:$0xf] }
  0x6a   : > { %v14347_v17 = vor.u32 %v18354_v8, %v14346_v7  ;;  %v18192_v19 = vld [vmem:[#allocation7 + $0xaf4] sm:$0xf0]  ;;  %v14274_v20 = vld [vmem:[#allocation7 + $0xf30] sm:$0xf]  ;;  %v13123_v23 = vor.u32 %v18048_v16, %v13122_v14  ;;  %v12474_v24 = vld [vmem:[#allocation7 + $0x120] sm:$0xf] }
  0x6b   : > { %7687 = vmatpush.bf16.msra.mxu0 %v12691_v56  ;;  %v18336_v21 = vld [vmem:[#allocation7 + $0xf74] sm:$0xf0]  ;;  %v17886_v25 = vld [vmem:[#allocation7 + $0x164] sm:$0xf0]  ;;  %v13050_v26 = vld [vmem:[#allocation7 + $0x5a0] sm:$0xf]  ;;  %v13699_v27 = vor.u32 %v18192_v19, %v13698_v18 }
  0x6c   : > { %7700 = vmatpush.bf16.msra.mxu1 %v13267_v59  ;;  %v18030_v28 = vld [vmem:[#allocation7 + $0x5e4] sm:$0xf0]  ;;  %v14275_v29 = vor.u32 %v18336_v21, %v14274_v20  ;;  %v13626_v30 = vld [vmem:[#allocation7 + $0xa20] sm:$0xf]  ;;  %v12475_v34 = vor.u32 %v17886_v25, %v12474_v24  ;;  %v12402_v35 = vld [vmem:[#allocation7 + $0x90] sm:$0xf] }
  0x6d   : > { %7713 = vmatpush.bf16.msra.mxu2 %v13843_v62  ;;  %7726 = vmatpush.bf16.msra.mxu3 %v14419_v3  ;;  %v18174_v31 = vld [vmem:[#allocation7 + $0xa64] sm:$0xf0]  ;;  %v14202_v32 = vld [vmem:[#allocation7 + $0xea0] sm:$0xf]  ;;  %v17868_v36 = vld [vmem:[#allocation7 + $0xd4] sm:$0xf0] }
  0x6e   : > { %12324 = vmatmul.msk.bf16.vlgmr.msrb.gmra.mxu0 %vm657_vm0, %v20028_v12  ;;  %12325 = vmatmul.msk.bf16.vlgmr.msrb.gmra.mxu1 %vm657_vm0, %v20028_v12  ;;  %v18318_v33 = vld [vmem:[#allocation7 + $0xee4] sm:$0xf0]  ;;  %v12978_v37 = vld [vmem:[#allocation7 + $0x510] sm:$0xf]  ;;  %v13627_v38 = vor.u32 %v18174_v31, %v13626_v30  ;;  %v18012_v39 = vld [vmem:[#allocation7 + $0x554] sm:$0xf0]  ;;  %v12403_v45 = vor.u32 %v17868_v36, %v12402_v35 }
  0x6f   : > { %12326 = vmatmul.msk.bf16.vlgmr.msrb.gmra.mxu2 %vm657_vm0, %v20028_v12  ;;  %7688 = vmatpush.bf16.msra.mxu0 %v12619_v9  ;;  %v14203_v40 = vor.u32 %v18318_v33, %v14202_v32  ;;  %v13554_v41 = vld [vmem:[#allocation7 + $0x990] sm:$0xf]  ;;  %v18156_v42 = vld [vmem:[#allocation7 + $0x9d4] sm:$0xf0]  ;;  %v12330_v46 = vld [vmem:[#allocation7] sm:$0xf]  ;;  %v12979_v48 = vor.u32 %v18012_v39, %v12978_v37 }
  0x70   : > { %12327 = vmatmul.msk.bf16.vlgmr.msrb.gmra.mxu3 %vm657_vm0, %v20028_v12  ;;  %7701 = vmatpush.bf16.msra.mxu1 %v13195_v10  ;;  %v13051_v12 = vor.u32 %v18030_v28, %v13050_v26  ;;  %v14130_v43 = vld [vmem:[#allocation7 + $0xe10] sm:$0xf]  ;;  %v18300_v44 = vld [vmem:[#allocation7 + $0xe54] sm:$0xf0]  ;;  %v17850_v47 = vld [vmem:[#allocation7 + $0x44] sm:$0xf0]  ;;  %v13555_v52 = vor.u32 %v18156_v42, %v13554_v41 }
  0x71   : > { %7714 = vmatpush.bf16.msra.mxu2 %v13771_v15  ;;  %7727 = vmatpush.bf16.msra.mxu3 %v14347_v17  ;;  %v12906_v49 = vld [vmem:[#allocation7 + $0x480] sm:$0xf]  ;;  %v17994_v50 = vld [vmem:[#allocation7 + $0x4c4] sm:$0xf0]  ;;  %v15138_v51 = vld [vmem:[#allocation7 + $0x15f0] sm:$0xf]  ;;  %v14131_v56 = vor.u32 %v18300_v44, %v14130_v43  ;;  %v12331_v60 = vor.u32 %v17850_v47, %v12330_v46 }
  0x72   : > { %v18552_v53 = vld [vmem:[#allocation7 + $0x1634] sm:$0xf0]  ;;  %v15714_v54 = vld [vmem:[#allocation7 + $0x1a70] sm:$0xf]  ;;  %v13482_v57 = vld [vmem:[#allocation7 + $0x900] sm:$0xf]  ;;  %v12907_v1 = vor.u32 %v17994_v50, %v12906_v49 }
  0x73   : > { %7689 = vmatpush.bf16.msra.mxu0 %v12547_v22  ;;  %v18696_v55 = vld [vmem:[#allocation7 + $0x1ab4] sm:$0xf0]  ;;  %v18138_v58 = vld [vmem:[#allocation7 + $0x944] sm:$0xf0]  ;;  %v14058_v59 = vld [vmem:[#allocation7 + $0xd80] sm:$0xf]  ;;  %v15139_v2 = vor.u32 %v18552_v53, %v15138_v51 }
  0x74   : > { %7702 = vmatpush.bf16.msra.mxu1 %v13123_v23  ;;  %v18282_v61 = vld [vmem:[#allocation7 + $0xdc4] sm:$0xf0]  ;;  %v16290_v62 = vld [vmem:[#allocation7 + $0x1ef0] sm:$0xf]  ;;  %v18840_v63 = vld [vmem:[#allocation7 + $0x1f34] sm:$0xf0]  ;;  %v15715_v5 = vor.u32 %v18696_v55, %v15714_v54  ;;  %v13483_v8 = vor.u32 %v18138_v58, %v13482_v57 }
  0x75   : > { %7715 = vmatpush.bf16.msra.mxu2 %v13699_v27  ;;  %7728 = vmatpush.bf16.msra.mxu3 %v14275_v29  ;;  %v16866_v3 = vld [vmem:[#allocation7 + $0x2370] sm:$0xf]  ;;  %v18984_v4 = vld [vmem:[#allocation7 + $0x23b4] sm:$0xf0]  ;;  %v15066_v6 = vld [vmem:[#allocation7 + $0x1560] sm:$0xf]  ;;  %v14059_v11 = vor.u32 %v18282_v61, %v14058_v59  ;;  %v16291_v13 = vor.u32 %v18840_v63, %v16290_v62 }
  0x76   : > { %v18534_v7 = vld [vmem:[#allocation7 + $0x15a4] sm:$0xf0]  ;;  %v15642_v9 = vld [vmem:[#allocation7 + $0x19e0] sm:$0xf]  ;;  %v16867_v14 = vor.u32 %v18984_v4, %v16866_v3  ;;  %v14994_v21 = vld [vmem:[#allocation7 + $0x14d0] sm:$0xf] }
  0x77   : > { %7690 = vmatpush.bf16.msra.mxu0 %v12475_v34  ;;  %v18678_v10 = vld [vmem:[#allocation7 + $0x1a24] sm:$0xf0]  ;;  %v16218_v15 = vld [vmem:[#allocation7 + $0x1e60] sm:$0xf]  ;;  %v15067_v17 = vor.u32 %v18534_v7, %v15066_v6  ;;  %v18516_v22 = vld [vmem:[#allocation7 + $0x1514] sm:$0xf0] }
  0x78   : > { %7703 = vmatpush.bf16.msra.mxu1 %v13051_v12  ;;  %v18822_v16 = vld [vmem:[#allocation7 + $0x1ea4] sm:$0xf0]  ;;  %v16794_v18 = vld [vmem:[#allocation7 + $0x22e0] sm:$0xf]  ;;  %v15643_v20 = vor.u32 %v18678_v10, %v15642_v9  ;;  %v15570_v23 = vld [vmem:[#allocation7 + $0x1950] sm:$0xf]  ;;  %v14995_v29 = vor.u32 %v18516_v22, %v14994_v21 }
  0x79   : > { %7716 = vmatpush.bf16.msra.mxu2 %v13627_v38  ;;  %7729 = vmatpush.bf16.msra.mxu3 %v14203_v40  ;;  %v18966_v19 = vld [vmem:[#allocation7 + $0x2324] sm:$0xf0]  ;;  %v18660_v24 = vld [vmem:[#allocation7 + $0x1994] sm:$0xf0]  ;;  %v16219_v25 = vor.u32 %v18822_v16, %v16218_v15  ;;  %v16146_v27 = vld [vmem:[#allocation7 + $0x1dd0] sm:$0xf] }
  0x7a   : > { %v16795_v26 = vor.u32 %v18966_v19, %v16794_v18  ;;  %v18804_v28 = vld [vmem:[#allocation7 + $0x1e14] sm:$0xf0]  ;;  %v16722_v30 = vld [vmem:[#allocation7 + $0x2250] sm:$0xf]  ;;  %v15571_v32 = vor.u32 %v18660_v24, %v15570_v23  ;;  %v14922_v33 = vld [vmem:[#allocation7 + $0x1440] sm:$0xf] }
  0x7b   : > { %7691 = vmatpush.bf16.msra.mxu0 %v12403_v45  ;;  %v18948_v31 = vld [vmem:[#allocation7 + $0x2294] sm:$0xf0]  ;;  %v18498_v34 = vld [vmem:[#allocation7 + $0x1484] sm:$0xf0]  ;;  %v15498_v12 = vld [vmem:[#allocation7 + $0x18c0] sm:$0xf]  ;;  %v16147_v36 = vor.u32 %v18804_v28, %v16146_v27 }
  0x7c   : > { %7704 = vmatpush.bf16.msra.mxu1 %v12979_v48  ;;  %v18642_v35 = vld [vmem:[#allocation7 + $0x1904] sm:$0xf0]  ;;  %v16723_v37 = vor.u32 %v18948_v31, %v16722_v30  ;;  %v16074_v38 = vld [vmem:[#allocation7 + $0x1d40] sm:$0xf]  ;;  %v14923_v40 = vor.u32 %v18498_v34, %v14922_v33  ;;  %v14850_v44 = vld [vmem:[#allocation7 + $0x13b0] sm:$0xf] }
  0x7d   : > { %7717 = vmatpush.bf16.msra.mxu2 %v13555_v52  ;;  %7730 = vmatpush.bf16.msra.mxu3 %v14131_v56  ;;  %v18786_v39 = vld [vmem:[#allocation7 + $0x1d84] sm:$0xf0]  ;;  %v16650_v41 = vld [vmem:[#allocation7 + $0x21c0] sm:$0xf]  ;;  %v15499_v43 = vor.u32 %v18642_v35, %v15498_v12  ;;  %v18480_v45 = vld [vmem:[#allocation7 + $0x13f4] sm:$0xf0] }
  0x7e   : > { %v18930_v42 = vld [vmem:[#allocation7 + $0x2204] sm:$0xf0]  ;;  %v15426_v46 = vld [vmem:[#allocation7 + $0x1830] sm:$0xf]  ;;  %v18624_v47 = vld [vmem:[#allocation7 + $0x1874] sm:$0xf0]  ;;  %v16075_v48 = vor.u32 %v18786_v39, %v16074_v38  ;;  %v14851_v50 = vor.u32 %v18480_v45, %v14850_v44 }
  0x7f   : > { %7692 = vmatpush.bf16.msra.mxu0 %v12331_v60  ;;  %v16651_v49 = vor.u32 %v18930_v42, %v16650_v41  ;;  %v15427_v51 = vor.u32 %v18624_v47, %v15426_v46  ;;  %v14778_v52 = vld [vmem:[#allocation7 + $0x1320] sm:$0xf]  ;;  %v18462_v53 = vld [vmem:[#allocation7 + $0x1364] sm:$0xf0]  ;;  %v16002_v58 = vld [vmem:[#allocation7 + $0x1cb0] sm:$0xf] }
  0x80   : > { %7705 = vmatpush.bf16.msra.mxu1 %v12907_v1  ;;  %v15354_v54 = vld [vmem:[#allocation7 + $0x17a0] sm:$0xf]  ;;  %v18606_v55 = vld [vmem:[#allocation7 + $0x17e4] sm:$0xf0]  ;;  %v14779_v56 = vor.u32 %v18462_v53, %v14778_v52  ;;  %v18768_v59 = vld [vmem:[#allocation7 + $0x1cf4] sm:$0xf0] }
  0x81   : > { %7718 = vmatpush.bf16.msra.mxu2 %v13483_v8  ;;  %7731 = vmatpush.bf16.msra.mxu3 %v14059_v11  ;;  %v15355_v57 = vor.u32 %v18606_v55, %v15354_v54  ;;  %v16578_v60 = vld [vmem:[#allocation7 + $0x2130] sm:$0xf]  ;;  %v16003_v61 = vor.u32 %v18768_v59, %v16002_v58  ;;  %v18912_v62 = vld [vmem:[#allocation7 + $0x2174] sm:$0xf0]  ;;  %v15930_v7 = vld [vmem:[#allocation7 + $0x1c20] sm:$0xf] }
  0x82   : > { %v16579_v63 = vor.u32 %v18912_v62, %v16578_v60  ;;  %v14706_v1 = vld [vmem:[#allocation7 + $0x1290] sm:$0xf]  ;;  %v18750_v8 = vld [vmem:[#allocation7 + $0x1c64] sm:$0xf0]  ;;  %v16506_v9 = vld [vmem:[#allocation7 + $0x20a0] sm:$0xf] }
  0x83   : > { %7737 = vmatpush.bf16.msrb.mxu0 %v15139_v2  ;;  %v18444_v2 = vld [vmem:[#allocation7 + $0x12d4] sm:$0xf0]  ;;  %v15282_v3 = vld [vmem:[#allocation7 + $0x1710] sm:$0xf]  ;;  %v15931_v10 = vor.u32 %v18750_v8, %v15930_v7  ;;  %v18894_v11 = vld [vmem:[#allocation7 + $0x20e4] sm:$0xf0] }
  0x84   : > { %7750 = vmatpush.bf16.msrb.mxu1 %v15715_v5  ;;  %v14707_v4 = vor.u32 %v18444_v2, %v14706_v1  ;;  %v18588_v5 = vld [vmem:[#allocation7 + $0x1754] sm:$0xf0]  ;;  %v18426_v15 = vld [vmem:[#allocation7 + $0x1244] sm:$0xf0]  ;;  %v15210_v16 = vld [vmem:[#allocation7 + $0x1680] sm:$0xf] }
  0x85   : > { %7763 = vmatpush.bf16.msrb.mxu2 %v16291_v13  ;;  %7776 = vmatpush.bf16.msrb.mxu3 %v16867_v14  ;;  %v15283_v6 = vor.u32 %v18588_v5, %v15282_v3  ;;  %v16507_v13 = vor.u32 %v18894_v11, %v16506_v9  ;;  %v14634_v14 = vld [vmem:[#allocation7 + $0x1200] sm:$0xf]  ;;  %v18570_v18 = vld [vmem:[#allocation7 + $0x16c4] sm:$0xf0]  ;;  %v18732_v21 = vld [vmem:[#allocation7 + $0x1bd4] sm:$0xf0] }
  0x86   : > { %v15211_v19 = vor.u32 %v18570_v18, %v15210_v16  ;;  %v16434_v22 = vld [vmem:[#allocation7 + $0x2010] sm:$0xf]  ;;  %v18876_v23 = vld [vmem:[#allocation7 + $0x2054] sm:$0xf0]  ;;  %v18714_v27 = vld [vmem:[#allocation7 + $0x1b44] sm:$0xf0] }
  0x87   : > { %7738 = vmatpush.bf16.msrb.mxu0 %v15067_v17  ;;  %v14635_v17 = vor.u32 %v18426_v15, %v14634_v14  ;;  %v18858_v30 = vld [vmem:[#allocation7 + $0x1fc4] sm:$0xf0]  ;;  %v12836_v33 = vld [vmem:[#allocation7 + $0x438] sm:$0xf0]  ;;  %v18111_v35 = vld [vmem:[#allocation7 + $0x874] sm:$0xf] }
  0x88   : > { %7751 = vmatpush.bf16.msrb.mxu1 %v15643_v20  ;;  %v15858_v20 = vld [vmem:[#allocation7 + $0x1b90] sm:$0xf]  ;;  %v12764_v44 = vld [vmem:[#allocation7 + $0x3a8] sm:$0xf0]  ;;  %v18093_v46 = vld [vmem:[#allocation7 + $0x7e4] sm:$0xf] }
  0x89   : > { %7764 = vmatpush.bf16.msrb.mxu2 %v16219_v25  ;;  %7777 = vmatpush.bf16.msrb.mxu3 %v16795_v26  ;;  %v15859_v24 = vor.u32 %v18732_v21, %v15858_v20  ;;  %v16435_v25 = vor.u32 %v18876_v23, %v16434_v22  ;;  %v15786_v26 = vld [vmem:[#allocation7 + $0x1b00] sm:$0xf]  ;;  %v13340_v47 = vld [vmem:[#allocation7 + $0x828] sm:$0xf0]  ;;  %v14564_v54 = vld [vmem:[#allocation7 + $0x11b8] sm:$0xf0] }
  0x8a   : > { %v15787_v28 = vor.u32 %v18714_v27, %v15786_v26  ;;  %v13343_v53 = vor.u32 %v18093_v46, %v13340_v47  ;;  %v17931_v55 = vld [vmem:[#allocation7 + $0x2d4] sm:$0xf]  ;;  %v18237_v5 = vld [vmem:[#allocation7 + $0xc64] sm:$0xf]  ;;  %v13196_v15 = vld [vmem:[#allocation7 + $0x708] sm:$0xf0] }
  0x8b   : > { %7739 = vmatpush.bf16.msrb.mxu0 %v14995_v29  ;;  %v16362_v29 = vld [vmem:[#allocation7 + $0x1f80] sm:$0xf]  ;;  %v18075_v60 = vld [vmem:[#allocation7 + $0x754] sm:$0xf]  ;;  %v18381_v7 = vld [vmem:[#allocation7 + $0x10e4] sm:$0xf] }
  0x8c   : > { %7752 = vmatpush.bf16.msrb.mxu1 %v15571_v32  ;;  %v16363_v31 = vor.u32 %v18858_v30, %v16362_v29  ;;  %v17967_v32 = vld [vmem:[#allocation7 + $0x3f4] sm:$0xf]  ;;  %v17913_v11 = vld [vmem:[#allocation7 + $0x244] sm:$0xf]  ;;  %v13844_v20 = vld [vmem:[#allocation7 + $0xc18] sm:$0xf0] }
  0x8d   : > { %7765 = vmatpush.bf16.msrb.mxu2 %v16147_v36  ;;  %7778 = vmatpush.bf16.msrb.mxu3 %v16723_v37  ;;  %v13412_v36 = vld [vmem:[#allocation7 + $0x8b8] sm:$0xf0]  ;;  %v18057_v14 = vld [vmem:[#allocation7 + $0x6c4] sm:$0xf]  ;;  %v18363_v23 = vld [vmem:[#allocation7 + $0x1054] sm:$0xf] }
  0x8e   : > { %v13415_v42 = vor.u32 %v18111_v35, %v13412_v36  ;;  %v13199_v22 = vor.u32 %v18057_v14, %v13196_v15  ;;  %v18039_v29 = vld [vmem:[#allocation7 + $0x634] sm:$0xf]  ;;  %v13124_v30 = vld [vmem:[#allocation7 + $0x678] sm:$0xf0]  ;;  %v18201_v36 = vld [vmem:[#allocation7 + $0xb44] sm:$0xf] }
  0x8f   : > { %7740 = vmatpush.bf16.msrb.mxu0 %v14923_v40  ;;  %v12839_v40 = vor.u32 %v17967_v32, %v12836_v33  ;;  %v12476_v47 = vld [vmem:[#allocation7 + $0x168] sm:$0xf0]  ;;  %vm11078_vm8 = vcmask 293888   ;;  %vm11080_vm9 = vcmask 367616   ;;  %vm11082_vm10 = vcmask 441344   ;;  %s20565_s29 = scalar_lea.vmem [#allocation16], %s12311_s7 }
  0x90   : > { %7753 = vmatpush.bf16.msrb.mxu1 %v15499_v43  ;;  %v17949_v43 = vld [vmem:[#allocation7 + $0x364] sm:$0xf]  ;;  %vm11084_vm11 = vcmask 515072   ;;  %vm11358_vm12 = vcmask 662528   ;;  %s19206_s7 = sshll.u32 %s19880_s25, 7  ;;  %s20826_s10 = sld [smem:[#allocation32_spill]] }
  0x91   : > { %7766 = vmatpush.bf16.msrb.mxu2 %v16075_v48  ;;  %7779 = vmatpush.bf16.msrb.mxu3 %v16651_v49  ;;  %v12767_v48 = vor.u32 %v17949_v43, %v12764_v44  ;;  %v18255_v49 = vld [vmem:[#allocation7 + $0xcf4] sm:$0xf]  ;;  %v14348_v43 = vld [vmem:[#allocation7 + $0x1008] sm:$0xf0]  ;;  %v17877_v44 = vld [vmem:[#allocation7 + $0x124] sm:$0xf] }
  0x93   : > { %7741 = vmatpush.bf16.msrb.mxu0 %v14851_v50  ;;  %v13988_v50 = vld [vmem:[#allocation7 + $0xd38] sm:$0xf0] }
  0x94   : > { %7754 = vmatpush.bf16.msrb.mxu1 %v15427_v51  ;;  %v18399_v51 = vld [vmem:[#allocation7 + $0x1174] sm:$0xf]  ;;  %v13991_v1 = vor.u32 %v18255_v49, %v13988_v50  ;;  %v13052_v49 = vld [vmem:[#allocation7 + $0x5e8] sm:$0xf0] }
  0x95   : > { %7767 = vmatpush.bf16.msrb.mxu2 %v16003_v61  ;;  %7780 = vmatpush.bf16.msrb.mxu3 %v16579_v63  ;;  %v13268_v61 = vld [vmem:[#allocation7 + $0x798] sm:$0xf0]  ;;  %v14567_v3 = vor.u32 %v18399_v51, %v14564_v54 }
  0x96   : > { %v13271_v9 = vor.u32 %v18075_v60, %v13268_v61  ;;  %s12153_s25 = scalar_lea.hbm %s20826_s10, %s19206_s7 }
  0x97   : > { %7742 = vmatpush.bf16.msrb.mxu0 %v14779_v56  ;;  %v12692_v56 = vld [vmem:[#allocation7 + $0x318] sm:$0xf0] }
  0x98   : > { %7755 = vmatpush.bf16.msrb.mxu1 %v15355_v57 }
  0x99   : > { %7768 = vmatpush.bf16.msrb.mxu2 %v15931_v10  ;;  %7781 = vmatpush.bf16.msrb.mxu3 %v16507_v13  ;;  %v14492_v10 = vld [vmem:[#allocation7 + $0x1128] sm:$0xf0] }
  0x9a   : > { %v12620_v13 = vld [vmem:[#allocation7 + $0x288] sm:$0xf0] }
  0x9b   : > { %7743 = vmatpush.bf16.msrb.mxu0 %v14707_v4  ;;  %v12695_v4 = vor.u32 %v17931_v55, %v12692_v56  ;;  %v12623_v18 = vor.u32 %v17913_v11, %v12620_v13  ;;  %v12479_v55 = vor.u32 %v17877_v44, %v12476_v47  ;;  %v13628_v11 = vld [vmem:[#allocation7 + $0xa68] sm:$0xf0]  ;;  %v18309_v13 = vld [vmem:[#allocation7 + $0xea4] sm:$0xf] }
  0x9c   : > { %7756 = vmatpush.bf16.msrb.mxu1 %v15283_v6  ;;  %v13916_v6 = vld [vmem:[#allocation7 + $0xca8] sm:$0xf0]  ;;  %v18129_v47 = vld [vmem:[#allocation7 + $0x904] sm:$0xf] }
  0x9d   : > { %7769 = vmatpush.bf16.msrb.mxu2 %v15859_v24  ;;  %7782 = vmatpush.bf16.msrb.mxu3 %v16435_v25  ;;  %v13919_v16 = vor.u32 %v18237_v5, %v13916_v6  ;;  %v14420_v24 = vld [vmem:[#allocation7 + $0x1098] sm:$0xf0]  ;;  %v17895_v25 = vld [vmem:[#allocation7 + $0x1b4] sm:$0xf] }
  0x9e   : > { %v14423_v35 = vor.u32 %v18363_v23, %v14420_v24  ;;  %v15140_v23 = vld [vmem:[#allocation7 + $0x1638] sm:$0xf0]  ;;  %v18687_v24 = vld [vmem:[#allocation7 + $0x1a74] sm:$0xf] }
  0x9f   : > { %7744 = vmatpush.bf16.msrb.mxu0 %v14635_v17  ;;  %v14495_v17 = vor.u32 %v18381_v7, %v14492_v10  ;;  %v18165_v10 = vld [vmem:[#allocation7 + $0xa24] sm:$0xf] }
  0xa0   : > { %7757 = vmatpush.bf16.msrb.mxu1 %v15211_v19  ;;  %v18219_v19 = vld [vmem:[#allocation7 + $0xbd4] sm:$0xf] }
  0xa1   : > { %7770 = vmatpush.bf16.msrb.mxu2 %v15787_v28  ;;  %7783 = vmatpush.bf16.msrb.mxu3 %v16363_v31  ;;  %v12548_v28 = vld [vmem:[#allocation7 + $0x1f8] sm:$0xf0]  ;;  %v13847_v33 = vor.u32 %v18219_v19, %v13844_v20  ;;  %v12332_v19 = vld [vmem:[#allocation7 + $0x48] sm:$0xf0] }
  0xa2   : > { %v12908_v20 = vld [vmem:[#allocation7 + $0x4c8] sm:$0xf0] }
  0xce   : > { %v20060_v34 = vpop.permute.xlu0 %654 }
  0xdb   : > { %v670_v12 = vpop.f32.mrf.mxu0  ;;  %v683_v38 = vpop.f32.mrf.mxu1 }
  0xdc   : > { %v671_v37 = vadd.f32 %v670_v12, %v20060_v34  ;;  %v684_v39 = vadd.f32 %v683_v38, %v20060_v34 }
  0xde   : > { %v20064_v41 = vpack.c.bf16 %v671_v37, %v671_v37  ;;  %v20066_v45 = vpack.c.bf16 %v684_v39, %v684_v39  ;;  %v13772_v37 = vld [vmem:[#allocation7 + $0xb88] sm:$0xf0]  ;;  %v12551_v39 = vor.u32 %v17895_v25, %v12548_v28  ;;  %v15716_v25 = vld [vmem:[#allocation7 + $0x1ab8] sm:$0xf0] }
  0xdf   : > { %v13775_v50 = vor.u32 %v18201_v36, %v13772_v37  ;;  %v13556_v28 = vld [vmem:[#allocation7 + $0x9d8] sm:$0xf0]  ;;  %v18525_v37 = vld [vmem:[#allocation7 + $0x1564] sm:$0xf] }
  0xe0   : > { %7693 = vmatmul.bf16.vlgmr.msra.gmra.mxu0 %v20064_v41  ;;  %7706 = vmatmul.bf16.vlgmr.msra.gmra.mxu1 %v20066_v45 }
  0xe1   : > { %7789 = vmatpush.bf16.msra.mxu0 %v12839_v40  ;;  %7802 = vmatpush.bf16.msra.mxu1 %v13415_v42  ;;  %v13127_v40 = vor.u32 %v18039_v29, %v13124_v30  ;;  %v18345_v42 = vld [vmem:[#allocation7 + $0xfc4] sm:$0xf] }
  0xe2   : > { %v696_v52 = vpop.f32.mrf.mxu2  ;;  %v14351_v51 = vor.u32 %v18345_v42, %v14348_v43  ;;  %v18669_v42 = vld [vmem:[#allocation7 + $0x19e4] sm:$0xf]  ;;  %v15644_v43 = vld [vmem:[#allocation7 + $0x1a28] sm:$0xf0] }
  0xe3   : > { %v697_v57 = vadd.f32 %v696_v52, %v20060_v34  ;;  %v709_v58 = vpop.f32.mrf.mxu3  ;;  %v672_v59 = vpop.f32.mrf.mxu0  ;;  %v18183_v52 = vld [vmem:[#allocation7 + $0xab4] sm:$0xf] }
  0xe4   : > { %v710_v62 = vadd.f32 %v709_v58, %v20060_v34  ;;  %v685_v63 = vpop.f32.mrf.mxu1  ;;  %v14276_v58 = vld [vmem:[#allocation7 + $0xf78] sm:$0xf0]  ;;  %v17859_v59 = vld [vmem:[#allocation7 + $0x94] sm:$0xf] }
  0xe5   : > { %v20072_v2 = vpack.c.bf16 %v697_v57, %v697_v57  ;;  %7790 = vmatpush.bf16.msra.mxu0 %v12767_v48  ;;  %7803 = vmatpush.bf16.msra.mxu1 %v13343_v53  ;;  %v18021_v48 = vld [vmem:[#allocation7 + $0x5a4] sm:$0xf]  ;;  %v13700_v53 = vld [vmem:[#allocation7 + $0xaf8] sm:$0xf0]  ;;  %v18327_v57 = vld [vmem:[#allocation7 + $0xf34] sm:$0xf] }
  0xe6   : > { %v20074_v8 = vpack.c.bf16 %v710_v62, %v710_v62  ;;  %v13055_v56 = vor.u32 %v18021_v48, %v13052_v49  ;;  %v12404_v62 = vld [vmem:[#allocation7 + $0xd8] sm:$0xf0]  ;;  %v18003_v63 = vld [vmem:[#allocation7 + $0x514] sm:$0xf]  ;;  %v13703_v5 = vor.u32 %v18183_v52, %v13700_v53  ;;  %v13484_v48 = vld [vmem:[#allocation7 + $0x948] sm:$0xf0] }
  0xe7   : > { %7719 = vmatmul.bf16.vlgmr.msra.gmra.mxu2 %v20072_v2  ;;  %v12407_v15 = vor.u32 %v17859_v59, %v12404_v62  ;;  %v18273_v49 = vld [vmem:[#allocation7 + $0xd84] sm:$0xf]  ;;  %v16292_v52 = vld [vmem:[#allocation7 + $0x1f38] sm:$0xf0] }
  0xe8   : > { %7732 = vmatmul.bf16.vlgmr.msra.gmra.mxu3 %v20074_v8  ;;  %7815 = vmatpush.bf16.msra.mxu2 %v13991_v1  ;;  %v12980_v1 = vld [vmem:[#allocation7 + $0x558] sm:$0xf0] }
  0xe9   : > { %7828 = vmatpush.bf16.msra.mxu3 %v14567_v3  ;;  %7791 = vmatpush.bf16.msra.mxu0 %v12695_v4  ;;  %v14996_v59 = vld [vmem:[#allocation7 + $0x1518] sm:$0xf0] }
  0xea   : > { %7804 = vmatpush.bf16.msra.mxu1 %v13271_v9  ;;  %v698_v21 = vpop.f32.mrf.mxu2  ;;  %v14279_v9 = vor.u32 %v18327_v57, %v14276_v58  ;;  %v18507_v57 = vld [vmem:[#allocation7 + $0x14d4] sm:$0xf]  ;;  %v13487_v58 = vor.u32 %v18129_v47, %v13484_v48  ;;  %v16004_v47 = vld [vmem:[#allocation7 + $0x1cf8] sm:$0xf0] }
  0xeb   : > { %v711_v26 = vpop.f32.mrf.mxu3  ;;  %v722_v27 = vpop.f32.mrf.mxu0  ;;  %v18543_v21 = vld [vmem:[#allocation7 + $0x15f4] sm:$0xf] }
  0xec   : > { %7816 = vmatpush.bf16.msra.mxu2 %v13919_v16  ;;  %v723_v31 = vadd.f32 %v722_v27, %v20060_v34  ;;  %v735_v32 = vpop.f32.mrf.mxu1  ;;  %v12983_v16 = vor.u32 %v18003_v63, %v12980_v1  ;;  %v18147_v27 = vld [vmem:[#allocation7 + $0x994] sm:$0xf] }
  0xed   : > { %7829 = vmatpush.bf16.msra.mxu3 %v14495_v17  ;;  %v736_v12 = vadd.f32 %v735_v32, %v20060_v34  ;;  %7792 = vmatpush.bf16.msra.mxu0 %v12623_v18  ;;  %v14204_v17 = vld [vmem:[#allocation7 + $0xee8] sm:$0xf0]  ;;  %v17841_v18 = vld [vmem:[#allocation7 + $0x4] sm:$0xf]  ;;  %v18291_v32 = vld [vmem:[#allocation7 + $0xe14] sm:$0xf] }
  0xee   : > { %v20080_v38 = vpack.c.bf16 %v723_v31, %v723_v31  ;;  %7805 = vmatpush.bf16.msra.mxu1 %v13199_v22  ;;  %v13631_v22 = vor.u32 %v18165_v10, %v13628_v11  ;;  %v14207_v26 = vor.u32 %v18309_v13, %v14204_v17  ;;  %v12335_v29 = vor.u32 %v17841_v18, %v12332_v19  ;;  %v16796_v10 = vld [vmem:[#allocation7 + $0x2328] sm:$0xf0]  ;;  %v18489_v11 = vld [vmem:[#allocation7 + $0x1444] sm:$0xf]  ;;  %v18795_v19 = vld [vmem:[#allocation7 + $0x1dd4] sm:$0xf] }
  0xef   : > { %v20082_v46 = vpack.c.bf16 %v736_v12, %v736_v12  ;;  %v15143_v12 = vor.u32 %v18543_v21, %v15140_v23  ;;  %v14924_v13 = vld [vmem:[#allocation7 + $0x1488] sm:$0xf0]  ;;  %v16724_v23 = vld [vmem:[#allocation7 + $0x2298] sm:$0xf0] }
  0xf0   : > { %7817 = vmatpush.bf16.msra.mxu2 %v13847_v33  ;;  %7745 = vmatmul.bf16.vlgmr.msrb.gmra.mxu0 %v20080_v38  ;;  %v14132_v33 = vld [vmem:[#allocation7 + $0xe58] sm:$0xf0] }
  0xf1   : > { %7830 = vmatpush.bf16.msra.mxu3 %v14423_v35  ;;  %7758 = vmatmul.bf16.vlgmr.msrb.gmra.mxu1 %v20082_v46  ;;  %v15719_v35 = vor.u32 %v18687_v24, %v15716_v25  ;;  %v14135_v44 = vor.u32 %v18291_v32, %v14132_v33  ;;  %v18471_v24 = vld [vmem:[#allocation7 + $0x13b4] sm:$0xf]  ;;  %v14852_v25 = vld [vmem:[#allocation7 + $0x13f8] sm:$0xf0] }
  0xf2   : > { %7793 = vmatpush.bf16.msra.mxu0 %v12551_v39  ;;  %7806 = vmatpush.bf16.msra.mxu1 %v13127_v40  ;;  %v748_v54 = vpop.f32.mrf.mxu2  ;;  %v13559_v39 = vor.u32 %v18147_v27, %v13556_v28  ;;  %v15068_v40 = vld [vmem:[#allocation7 + $0x15a8] sm:$0xf0]  ;;  %v15428_v27 = vld [vmem:[#allocation7 + $0x1878] sm:$0xf0]  ;;  %v14855_v32 = vor.u32 %v18471_v24, %v14852_v25  ;;  %v17959_v25 = vld [vmem:[#allocation7 + $0x3ac] sm:$0xf0] }
  0xf3   : > { %v749_v60 = vadd.f32 %v748_v54, %v20060_v34  ;;  %v761_v61 = vpop.f32.mrf.mxu3  ;;  %v724_v3 = vpop.f32.mrf.mxu0  ;;  %v15071_v53 = vor.u32 %v18525_v37, %v15068_v40  ;;  %v15647_v54 = vor.u32 %v18669_v42, %v15644_v43  ;;  %v14780_v37 = vld [vmem:[#allocation7 + $0x1368] sm:$0xf0] }
  0xf4   : > { %v762_v4 = vadd.f32 %v761_v61, %v20060_v34  ;;  %7818 = vmatpush.bf16.msra.mxu2 %v13775_v50  ;;  %v737_v6 = vpop.f32.mrf.mxu1  ;;  %v17985_v34 = vld [vmem:[#allocation7 + $0x484] sm:$0xf]  ;;  %v14060_v50 = vld [vmem:[#allocation7 + $0xdc8] sm:$0xf0]  ;;  %v15572_v61 = vld [vmem:[#allocation7 + $0x1998] sm:$0xf0] }
  0xf5   : > { %v20088_v7 = vpack.c.bf16 %v749_v60, %v749_v60  ;;  %7831 = vmatpush.bf16.msra.mxu3 %v14351_v51  ;;  %v12911_v30 = vor.u32 %v17985_v34, %v12908_v20  ;;  %v18831_v51 = vld [vmem:[#allocation7 + $0x1ef4] sm:$0xf]  ;;  %v14063_v62 = vor.u32 %v18273_v49, %v14060_v50  ;;  %v18813_v3 = vld [vmem:[#allocation7 + $0x1e64] sm:$0xf]  ;;  %v16148_v34 = vld [vmem:[#allocation7 + $0x1e18] sm:$0xf0]  ;;  %v14927_v20 = vor.u32 %v18489_v11, %v14924_v13 }
  0xf6   : > { %v20090_v14 = vpack.c.bf16 %v762_v4, %v762_v4  ;;  %7794 = vmatpush.bf16.msra.mxu0 %v12479_v55  ;;  %7807 = vmatpush.bf16.msra.mxu1 %v13055_v56  ;;  %v18975_v55 = vld [vmem:[#allocation7 + $0x2374] sm:$0xf]  ;;  %v16868_v56 = vld [vmem:[#allocation7 + $0x23b8] sm:$0xf0]  ;;  %v16295_v63 = vor.u32 %v18831_v51, %v16292_v52  ;;  %v16220_v4 = vld [vmem:[#allocation7 + $0x1ea8] sm:$0xf0]  ;;  %v16151_v28 = vor.u32 %v18795_v19, %v16148_v34 }
  0xf7   : > { %7771 = vmatmul.bf16.vlgmr.msrb.gmra.mxu2 %v20088_v7  ;;  %v18651_v60 = vld [vmem:[#allocation7 + $0x1954] sm:$0xf]  ;;  %v16871_v1 = vor.u32 %v18975_v55, %v16868_v56  ;;  %v16223_v17 = vor.u32 %v18813_v3, %v16220_v4  ;;  %v15356_v40 = vld [vmem:[#allocation7 + $0x17e8] sm:$0xf0]  ;;  %v16580_v51 = vld [vmem:[#allocation7 + $0x2178] sm:$0xf0] }
  0xf8   : > { %7784 = vmatmul.bf16.vlgmr.msrb.gmra.mxu3 %v20090_v14  ;;  %7819 = vmatpush.bf16.msra.mxu2 %v13703_v5  ;;  %v14999_v5 = vor.u32 %v18507_v57, %v14996_v59  ;;  %v15575_v6 = vor.u32 %v18651_v60, %v15572_v61  ;;  %v18903_v50 = vld [vmem:[#allocation7 + $0x2134] sm:$0xf]  ;;  %v15284_v55 = vld [vmem:[#allocation7 + $0x1758] sm:$0xf0]  ;;  %v15932_v59 = vld [vmem:[#allocation7 + $0x1c68] sm:$0xf0] }
  0xf9   : > { %7832 = vmatpush.bf16.msra.mxu3 %v14279_v9  ;;  %v18957_v9 = vld [vmem:[#allocation7 + $0x22e4] sm:$0xf]  ;;  %v18435_v52 = vld [vmem:[#allocation7 + $0x1294] sm:$0xf]  ;;  %v16583_v57 = vor.u32 %v18903_v50, %v16580_v51  ;;  %v14636_v3 = vld [vmem:[#allocation7 + $0x1248] sm:$0xf0] }
  0xfa   : > { %7795 = vmatpush.bf16.msra.mxu0 %v12407_v15  ;;  %7808 = vmatpush.bf16.msra.mxu1 %v12983_v16  ;;  %v750_v31 = vpop.f32.mrf.mxu2  ;;  %v18633_v15 = vld [vmem:[#allocation7 + $0x18c4] sm:$0xf]  ;;  %v15500_v16 = vld [vmem:[#allocation7 + $0x1908] sm:$0xf0]  ;;  %v16799_v18 = vor.u32 %v18957_v9, %v16796_v10  ;;  %v17977_v10 = vld [vmem:[#allocation7 + $0x43c] sm:$0xf0] }
  0xfb   : > { %v763_v36 = vpop.f32.mrf.mxu3  ;;  %v15503_v21 = vor.u32 %v18633_v15, %v15500_v16  ;;  %v16076_v31 = vld [vmem:[#allocation7 + $0x1d88] sm:$0xf0]  ;;  %v18885_v60 = vld [vmem:[#allocation7 + $0x20a4] sm:$0xf]  ;;  %v13418_v11 = vld [vmem:[#allocation7 + $0x878] sm:$0xf] }
  0xfc   : > { %7820 = vmatpush.bf16.msra.mxu2 %v13631_v22  ;;  %v18939_v22 = vld [vmem:[#allocation7 + $0x2254] sm:$0xf]  ;;  %v18453_v36 = vld [vmem:[#allocation7 + $0x1324] sm:$0xf]  ;;  %v18121_v13 = vld [vmem:[#allocation7 + $0x8bc] sm:$0xf0] }
  0xfd   : > { %7833 = vmatpush.bf16.msra.mxu3 %v14207_v26  ;;  %v18615_v26 = vld [vmem:[#allocation7 + $0x1834] sm:$0xf]  ;;  %v14783_v48 = vor.u32 %v18453_v36, %v14780_v37  ;;  %v18561_v4 = vld [vmem:[#allocation7 + $0x1684] sm:$0xf]  ;;  %v14570_v37 = vld [vmem:[#allocation7 + $0x1178] sm:$0xf] }
  0xfe   : > { %7796 = vmatpush.bf16.msra.mxu0 %v12335_v29  ;;  %7809 = vmatpush.bf16.msra.mxu1 %v12911_v30  ;;  %v16727_v29 = vor.u32 %v18939_v22, %v16724_v23  ;;  %v18777_v30 = vld [vmem:[#allocation7 + $0x1d44] sm:$0xf]  ;;  %v15431_v33 = vor.u32 %v18615_v26, %v15428_v27  ;;  %v18723_v16 = vld [vmem:[#allocation7 + $0x1b94] sm:$0xf]  ;;  %v13419_v22 = vor.u32 %v18121_v13, %v13418_v11  ;;  %v12770_v23 = vld [vmem:[#allocation7 + $0x368] sm:$0xf] }
  0xff   : > { %v16079_v42 = vor.u32 %v18777_v30, %v16076_v31  ;;  %v18867_v34 = vld [vmem:[#allocation7 + $0x2014] sm:$0xf]  ;;  %v13346_v26 = vld [vmem:[#allocation7 + $0x7e8] sm:$0xf]  ;;  %v18103_v27 = vld [vmem:[#allocation7 + $0x82c] sm:$0xf0] }
 0x100   : > { %7821 = vmatpush.bf16.msra.mxu2 %v13559_v39  ;;  %v18597_v39 = vld [vmem:[#allocation7 + $0x17a4] sm:$0xf]  ;;  %v15788_v30 = vld [vmem:[#allocation7 + $0x1b48] sm:$0xf0]  ;;  %v13347_v36 = vor.u32 %v18103_v27, %v13346_v26  ;;  %v13922_v51 = vld [vmem:[#allocation7 + $0xc68] sm:$0xf] }
 0x101   : > { %7834 = vmatpush.bf16.msra.mxu3 %v14135_v44  ;;  %7797 = vmatmul.bf16.vlgmr.msra.gmra.mxu0 %v20064_v41  ;;  %v18759_v44 = vld [vmem:[#allocation7 + $0x1cb4] sm:$0xf]  ;;  %v15359_v49 = vor.u32 %v18597_v39, %v15356_v40  ;;  %v18849_v31 = vld [vmem:[#allocation7 + $0x1f84] sm:$0xf]  ;;  %v18409_v39 = vld [vmem:[#allocation7 + $0x11bc] sm:$0xf0] }
 0x102   : > { %7841 = vmatpush.bf16.msrb.mxu0 %v15143_v12  ;;  %7854 = vmatpush.bf16.msrb.mxu1 %v15719_v35  ;;  %v18921_v12 = vld [vmem:[#allocation7 + $0x21c4] sm:$0xf]  ;;  %v16652_v35 = vld [vmem:[#allocation7 + $0x2208] sm:$0xf0]  ;;  %v16007_v56 = vor.u32 %v18759_v44, %v16004_v47  ;;  %v14571_v50 = vor.u32 %v18409_v39, %v14570_v37  ;;  %v13130_v13 = vld [vmem:[#allocation7 + $0x638] sm:$0xf] }
 0x103   : > { %7810 = vmatmul.bf16.vlgmr.msra.gmra.mxu1 %v20066_v45  ;;  %v16655_v43 = vor.u32 %v18921_v12, %v16652_v35  ;;  %v18265_v12 = vld [vmem:[#allocation7 + $0xd3c] sm:$0xf0]  ;;  %v12771_v35 = vor.u32 %v17959_v25, %v12770_v23  ;;  %v17887_v23 = vld [vmem:[#allocation7 + $0x16c] sm:$0xf0]  ;;  %v13058_v25 = vld [vmem:[#allocation7 + $0x5a8] sm:$0xf] }
 0x104   : > { %7822 = vmatpush.bf16.msra.mxu2 %v13487_v58  ;;  %v18741_v58 = vld [vmem:[#allocation7 + $0x1c24] sm:$0xf]  ;;  %v18031_v26 = vld [vmem:[#allocation7 + $0x5ec] sm:$0xf0]  ;;  %v12986_v37 = vld [vmem:[#allocation7 + $0x518] sm:$0xf] }
 0x105   : > { %7835 = vmatpush.bf16.msra.mxu3 %v14063_v62  ;;  %v15935_v9 = vor.u32 %v18741_v58, %v15932_v59  ;;  %v17923_v58 = vld [vmem:[#allocation7 + $0x28c] sm:$0xf0]  ;;  %v18013_v39 = vld [vmem:[#allocation7 + $0x55c] sm:$0xf0] }
 0x106   : > { %7842 = vmatpush.bf16.msrb.mxu0 %v15071_v53  ;;  %7855 = vmatpush.bf16.msrb.mxu1 %v15647_v54  ;;  %v14708_v53 = vld [vmem:[#allocation7 + $0x12d8] sm:$0xf0]  ;;  %v18579_v54 = vld [vmem:[#allocation7 + $0x1714] sm:$0xf] }
 0x107   : > { %7823 = vmatmul.bf16.vlgmr.msra.gmra.mxu2 %v20072_v2  ;;  %v14711_v61 = vor.u32 %v18435_v52, %v14708_v53  ;;  %v15287_v62 = vor.u32 %v18579_v54, %v15284_v55  ;;  %v18247_v52 = vld [vmem:[#allocation7 + $0xcac] sm:$0xf0]  ;;  %v14498_v54 = vld [vmem:[#allocation7 + $0x10e8] sm:$0xf] }
 0x108   : > { %7867 = vmatpush.bf16.msrb.mxu2 %v16295_v63  ;;  %7836 = vmatmul.bf16.vlgmr.msra.gmra.mxu3 %v20074_v8  ;;  %v16508_v63 = vld [vmem:[#allocation7 + $0x20e8] sm:$0xf0]  ;;  %v18391_v55 = vld [vmem:[#allocation7 + $0x112c] sm:$0xf0]  ;;  %v13923_v59 = vor.u32 %v18247_v52, %v13922_v51  ;;  %v12914_v52 = vld [vmem:[#allocation7 + $0x488] sm:$0xf] }
 0x109   : > { %7880 = vmatpush.bf16.msrb.mxu3 %v16871_v1  ;;  %v18417_v1 = vld [vmem:[#allocation7 + $0x1204] sm:$0xf]  ;;  %v16511_v15 = vor.u32 %v18885_v60, %v16508_v63  ;;  %v13202_v60 = vld [vmem:[#allocation7 + $0x6c8] sm:$0xf]  ;;  %v13850_v63 = vld [vmem:[#allocation7 + $0xbd8] sm:$0xf] }
 0x10a   : > { %7843 = vmatpush.bf16.msrb.mxu0 %v14999_v5  ;;  %7856 = vmatpush.bf16.msrb.mxu1 %v15575_v6  ;;  %v15212_v5 = vld [vmem:[#allocation7 + $0x16c8] sm:$0xf0]  ;;  %v12842_v6 = vld [vmem:[#allocation7 + $0x3f8] sm:$0xf]  ;;  %v17851_v51 = vld [vmem:[#allocation7 + $0x4c] sm:$0xf0] }
 0x10b   : > { %v15215_v19 = vor.u32 %v18561_v4, %v15212_v5  ;;  %v14426_v4 = vld [vmem:[#allocation7 + $0x1058] sm:$0xf]  ;;  %v18373_v5 = vld [vmem:[#allocation7 + $0x109c] sm:$0xf0] }
 0x10c   : > { %7868 = vmatpush.bf16.msrb.mxu2 %v16223_v17  ;;  %v15860_v17 = vld [vmem:[#allocation7 + $0x1bd8] sm:$0xf0] }
 0x10d   : > { %7881 = vmatpush.bf16.msrb.mxu3 %v16799_v18  ;;  %v14639_v18 = vor.u32 %v18417_v1, %v14636_v3  ;;  %v15863_v24 = vor.u32 %v18723_v16, %v15860_v17  ;;  %v18229_v1 = vld [vmem:[#allocation7 + $0xc1c] sm:$0xf0]  ;;  %v14427_v16 = vor.u32 %v18373_v5, %v14426_v4  ;;  %v13778_v17 = vld [vmem:[#allocation7 + $0xb48] sm:$0xf] }
 0x10e   : > { %7844 = vmatpush.bf16.msrb.mxu0 %v14927_v20  ;;  %7857 = vmatpush.bf16.msrb.mxu1 %v15503_v21  ;;  %v16436_v20 = vld [vmem:[#allocation7 + $0x2058] sm:$0xf0]  ;;  %v12843_v21 = vor.u32 %v17977_v10, %v12842_v6  ;;  %v17905_v10 = vld [vmem:[#allocation7 + $0x1fc] sm:$0xf0]  ;;  %v13851_v11 = vor.u32 %v18229_v1, %v13850_v63  ;;  %v14138_v63 = vld [vmem:[#allocation7 + $0xe18] sm:$0xf] }
 0x10f   : > { %v18301_v1 = vld [vmem:[#allocation7 + $0xe5c] sm:$0xf0]  ;;  %v15074_v5 = vld [vmem:[#allocation7 + $0x1568] sm:$0xf] }
 0x110   : > { %7869 = vmatpush.bf16.msrb.mxu2 %v16151_v28  ;;  %v16439_v28 = vor.u32 %v18867_v34, %v16436_v20  ;;  %v14354_v34 = vld [vmem:[#allocation7 + $0xfc8] sm:$0xf]  ;;  %v18355_v20 = vld [vmem:[#allocation7 + $0x100c] sm:$0xf0] }
 0x111   : > { %7882 = vmatpush.bf16.msrb.mxu3 %v16727_v29  ;;  %v18705_v29 = vld [vmem:[#allocation7 + $0x1b04] sm:$0xf]  ;;  %v14355_v27 = vor.u32 %v18355_v20, %v14354_v34  ;;  %v16298_v34 = vld [vmem:[#allocation7 + $0x1ef8] sm:$0xf]  ;;  %v18841_v20 = vld [vmem:[#allocation7 + $0x1f3c] sm:$0xf0] }
 0x112   : > { %7845 = vmatpush.bf16.msrb.mxu0 %v14855_v32  ;;  %7858 = vmatpush.bf16.msrb.mxu1 %v15431_v33  ;;  %v16364_v32 = vld [vmem:[#allocation7 + $0x1fc8] sm:$0xf0]  ;;  %v13994_v33 = vld [vmem:[#allocation7 + $0xcf8] sm:$0xf]  ;;  %v15791_v40 = vor.u32 %v18705_v29, %v15788_v30  ;;  %v18193_v29 = vld [vmem:[#allocation7 + $0xafc] sm:$0xf0] }
 0x113   : > { %v16367_v44 = vor.u32 %v18849_v31, %v16364_v32  ;;  %v13995_v47 = vor.u32 %v18265_v12, %v13994_v33  ;;  %v14282_v31 = vld [vmem:[#allocation7 + $0xf38] sm:$0xf]  ;;  %v18337_v32 = vld [vmem:[#allocation7 + $0xf7c] sm:$0xf0]  ;;  %v13059_v33 = vor.u32 %v18031_v26, %v13058_v25 }
 0x114   : > { %7870 = vmatpush.bf16.msrb.mxu2 %v16079_v42  ;;  %v12698_v42 = vld [vmem:[#allocation7 + $0x2d8] sm:$0xf] }
 0x115   : > { %7883 = vmatpush.bf16.msrb.mxu3 %v16655_v43  ;;  %v17941_v43 = vld [vmem:[#allocation7 + $0x31c] sm:$0xf0]  ;;  %v12410_v12 = vld [vmem:[#allocation7 + $0x98] sm:$0xf] }
 0x116   : > { %7846 = vmatpush.bf16.msrb.mxu0 %v14783_v48  ;;  %7859 = vmatpush.bf16.msrb.mxu1 %v15359_v49  ;;  %v13274_v48 = vld [vmem:[#allocation7 + $0x758] sm:$0xf]  ;;  %v18085_v49 = vld [vmem:[#allocation7 + $0x79c] sm:$0xf0]  ;;  %v12699_v53 = vor.u32 %v17941_v43, %v12698_v42  ;;  %v13634_v42 = vld [vmem:[#allocation7 + $0xa28] sm:$0xf] }
 0x117   : > { %v18175_v43 = vld [vmem:[#allocation7 + $0xa6c] sm:$0xf0]  ;;  %v15002_v26 = vld [vmem:[#allocation7 + $0x14d8] sm:$0xf] }
 0x118   : > { %7871 = vmatpush.bf16.msrb.mxu2 %v16007_v56  ;;  %v13275_v56 = vor.u32 %v18085_v49, %v13274_v48  ;;  %v18319_v48 = vld [vmem:[#allocation7 + $0xeec] sm:$0xf0]  ;;  %v12338_v49 = vld [vmem:[#allocation7 + $0x8] sm:$0xf] }
 0x119   : > { %7884 = vmatpush.bf16.msrb.mxu3 %v16583_v57  ;;  %v12626_v57 = vld [vmem:[#allocation7 + $0x248] sm:$0xf] }
 0x11a   : > { %7847 = vmatpush.bf16.msrb.mxu0 %v14711_v61  ;;  %7860 = vmatpush.bf16.msrb.mxu1 %v15287_v62  ;;  %v18067_v61 = vld [vmem:[#allocation7 + $0x70c] sm:$0xf0]  ;;  %v14499_v62 = vor.u32 %v18391_v55, %v14498_v54  ;;  %v12627_v3 = vor.u32 %v17923_v58, %v12626_v57  ;;  %v13635_v54 = vor.u32 %v18175_v43, %v13634_v42  ;;  %v15146_v55 = vld [vmem:[#allocation7 + $0x15f8] sm:$0xf] }
 0x11b   : > { %v13203_v6 = vor.u32 %v18067_v61, %v13202_v60  ;;  %v15722_v57 = vld [vmem:[#allocation7 + $0x1a78] sm:$0xf]  ;;  %v18157_v61 = vld [vmem:[#allocation7 + $0x9dc] sm:$0xf0]  ;;  %v18499_v42 = vld [vmem:[#allocation7 + $0x148c] sm:$0xf0] }
 0x11c   : > { %7872 = vmatpush.bf16.msrb.mxu2 %v15935_v9  ;;  %v12554_v9 = vld [vmem:[#allocation7 + $0x1b8] sm:$0xf] }
 0x11d   : > { %7885 = vmatpush.bf16.msrb.mxu3 %v16511_v15  ;;  %v18049_v15 = vld [vmem:[#allocation7 + $0x67c] sm:$0xf0]  ;;  %v13562_v60 = vld [vmem:[#allocation7 + $0x998] sm:$0xf] }
 0x11e   : > { %7848 = vmatpush.bf16.msrb.mxu0 %v14639_v18  ;;  %7861 = vmatpush.bf16.msrb.mxu1 %v15215_v19  ;;  %v18211_v18 = vld [vmem:[#allocation7 + $0xb8c] sm:$0xf0]  ;;  %v12555_v19 = vor.u32 %v17905_v10, %v12554_v9  ;;  %v13563_v9 = vor.u32 %v18157_v61, %v13562_v60  ;;  %v16082_v61 = vld [vmem:[#allocation7 + $0x1d48] sm:$0xf] }
 0x11f   : > { %v18535_v10 = vld [vmem:[#allocation7 + $0x15ac] sm:$0xf0] }
 0x120   : > { %7873 = vmatpush.bf16.msrb.mxu2 %v15863_v24  ;;  %v13779_v24 = vor.u32 %v18211_v18, %v13778_v17  ;;  %v18139_v17 = vld [vmem:[#allocation7 + $0x94c] sm:$0xf0]  ;;  %v14066_v18 = vld [vmem:[#allocation7 + $0xd88] sm:$0xf] }
 0x121   : > { %7886 = vmatpush.bf16.msrb.mxu3 %v16439_v28  ;;  %7849 = vmatmul.bf16.vlgmr.msrb.gmra.mxu0 %v20080_v38  ;;  %v13706_v28 = vld [vmem:[#allocation7 + $0xab8] sm:$0xf] }
 0x122   : > { %7893 = vmatpush.bf16.msra.mxu0 %v12843_v21  ;;  %7906 = vmatpush.bf16.msra.mxu1 %v13419_v22  ;;  %v13131_v21 = vor.u32 %v18049_v15, %v13130_v13  ;;  %v12482_v22 = vld [vmem:[#allocation7 + $0x128] sm:$0xf]  ;;  %v18679_v13 = vld [vmem:[#allocation7 + $0x1a2c] sm:$0xf0]  ;;  %v14139_v15 = vor.u32 %v18301_v1, %v14138_v63 }
 0x123   : > { %7862 = vmatmul.bf16.vlgmr.msrb.gmra.mxu1 %v20082_v46  ;;  %v12483_v30 = vor.u32 %v17887_v23, %v12482_v22  ;;  %v16874_v22 = vld [vmem:[#allocation7 + $0x2378] sm:$0xf]  ;;  %v18985_v23 = vld [vmem:[#allocation7 + $0x23bc] sm:$0xf0]  ;;  %v16658_v1 = vld [vmem:[#allocation7 + $0x21c8] sm:$0xf] }
 0x124   : > { %7874 = vmatpush.bf16.msrb.mxu2 %v15791_v40  ;;  %v14283_v40 = vor.u32 %v18337_v32, %v14282_v31  ;;  %v18661_v31 = vld [vmem:[#allocation7 + $0x199c] sm:$0xf0]  ;;  %v16875_v32 = vor.u32 %v18985_v23, %v16874_v22  ;;  %v15290_v23 = vld [vmem:[#allocation7 + $0x1718] sm:$0xf] }
 0x125   : > { %7887 = vmatpush.bf16.msrb.mxu3 %v16367_v44 }
 0x126   : > { %7894 = vmatpush.bf16.msra.mxu0 %v12771_v35  ;;  %7907 = vmatpush.bf16.msra.mxu1 %v13347_v36  ;;  %v17869_v35 = vld [vmem:[#allocation7 + $0xdc] sm:$0xf0]  ;;  %v13707_v36 = vor.u32 %v18193_v29, %v13706_v28  ;;  %v16299_v29 = vor.u32 %v18841_v20, %v16298_v34  ;;  %v14714_v20 = vld [vmem:[#allocation7 + $0x1298] sm:$0xf] }
 0x127   : > { %7875 = vmatmul.bf16.vlgmr.msrb.gmra.mxu2 %v20088_v7  ;;  %v12411_v44 = vor.u32 %v17869_v35, %v12410_v12  ;;  %v18823_v12 = vld [vmem:[#allocation7 + $0x1eac] sm:$0xf0] }
 0x128   : > { %7919 = vmatpush.bf16.msra.mxu2 %v13995_v47  ;;  %7888 = vmatmul.bf16.vlgmr.msrb.gmra.mxu3 %v20090_v14  ;;  %v14210_v47 = vld [vmem:[#allocation7 + $0xea8] sm:$0xf] }
 0x129   : > { %7932 = vmatpush.bf16.msra.mxu3 %v14571_v50  ;;  %v12987_v50 = vor.u32 %v18013_v39, %v12986_v37  ;;  %v14211_v58 = vor.u32 %v18319_v48, %v14210_v47  ;;  %v18967_v37 = vld [vmem:[#allocation7 + $0x232c] sm:$0xf0] }
 0x12a   : > { %7895 = vmatpush.bf16.msra.mxu0 %v12699_v53  ;;  %7908 = vmatpush.bf16.msra.mxu1 %v13275_v56  ;;  %v17995_v53 = vld [vmem:[#allocation7 + $0x4cc] sm:$0xf0]  ;;  %v18553_v56 = vld [vmem:[#allocation7 + $0x163c] sm:$0xf0] }
 0x12b   : > { %v15147_v4 = vor.u32 %v18553_v56, %v15146_v55  ;;  %v18643_v47 = vld [vmem:[#allocation7 + $0x190c] sm:$0xf0]  ;;  %v14858_v55 = vld [vmem:[#allocation7 + $0x13b8] sm:$0xf]  ;;  %v18481_v56 = vld [vmem:[#allocation7 + $0x13fc] sm:$0xf0] }
 0x12c   : > { %7920 = vmatpush.bf16.msra.mxu2 %v13923_v59  ;;  %v18697_v59 = vld [vmem:[#allocation7 + $0x1abc] sm:$0xf0]  ;;  %v14859_v63 = vor.u32 %v18481_v56, %v14858_v55  ;;  %v12772_v56 = vld [vmem:[#allocation7 + $0x3b0] sm:$0xf0] }
 0x12d   : > { %7933 = vmatpush.bf16.msra.mxu3 %v14499_v62  ;;  %v12339_v62 = vor.u32 %v17851_v51, %v12338_v49  ;;  %v16154_v49 = vld [vmem:[#allocation7 + $0x1dd8] sm:$0xf] }
 0x12e   : > { %7896 = vmatpush.bf16.msra.mxu0 %v12627_v3  ;;  %7909 = vmatpush.bf16.msra.mxu1 %v13203_v6  ;;  %v12915_v3 = vor.u32 %v17995_v53, %v12914_v52  ;;  %v15723_v6 = vor.u32 %v18697_v59, %v15722_v57  ;;  %v16730_v52 = vld [vmem:[#allocation7 + $0x2258] sm:$0xf]  ;;  %v18949_v53 = vld [vmem:[#allocation7 + $0x229c] sm:$0xf0] }
 0x12f   : > { %v18625_v59 = vld [vmem:[#allocation7 + $0x187c] sm:$0xf0]  ;;  %v16731_v60 = vor.u32 %v18949_v53, %v16730_v52  ;;  %v17950_v53 = vld [vmem:[#allocation7 + $0x36c] sm:$0xf] }
 0x130   : > { %7921 = vmatpush.bf16.msra.mxu2 %v13851_v11  ;;  %v15650_v11 = vld [vmem:[#allocation7 + $0x19e8] sm:$0xf] }
 0x131   : > { %7934 = vmatpush.bf16.msra.mxu3 %v14427_v16  ;;  %v13490_v16 = vld [vmem:[#allocation7 + $0x908] sm:$0xf] }
 0x132   : > { %7897 = vmatpush.bf16.msra.mxu0 %v12555_v19  ;;  %7910 = vmatpush.bf16.msra.mxu1 %v13131_v21  ;;  %v18283_v19 = vld [vmem:[#allocation7 + $0xdcc] sm:$0xf0]  ;;  %v15075_v21 = vor.u32 %v18535_v10, %v15074_v5  ;;  %v13491_v25 = vor.u32 %v18139_v17, %v13490_v16  ;;  %v14786_v5 = vld [vmem:[#allocation7 + $0x1328] sm:$0xf]  ;;  %v18769_v16 = vld [vmem:[#allocation7 + $0x1cfc] sm:$0xf0] }
 0x133   : > { %v14067_v28 = vor.u32 %v18283_v19, %v14066_v18  ;;  %v15362_v10 = vld [vmem:[#allocation7 + $0x17a8] sm:$0xf]  ;;  %v16586_v18 = vld [vmem:[#allocation7 + $0x2138] sm:$0xf]  ;;  %v18913_v19 = vld [vmem:[#allocation7 + $0x217c] sm:$0xf0] }
 0x134   : > { %7922 = vmatpush.bf16.msra.mxu2 %v13779_v24  ;;  %v15651_v24 = vor.u32 %v18679_v13, %v15650_v11  ;;  %v18607_v11 = vld [vmem:[#allocation7 + $0x17ec] sm:$0xf0] }
 0x135   : > { %7935 = vmatpush.bf16.msra.mxu3 %v14355_v27  ;;  %v18517_v27 = vld [vmem:[#allocation7 + $0x151c] sm:$0xf0]  ;;  %v15363_v34 = vor.u32 %v18607_v11, %v15362_v10  ;;  %v17932_v11 = vld [vmem:[#allocation7 + $0x2dc] sm:$0xf] }
 0x136   : > { %7898 = vmatpush.bf16.msra.mxu0 %v12483_v30  ;;  %7911 = vmatpush.bf16.msra.mxu1 %v13059_v33  ;;  %v15578_v30 = vld [vmem:[#allocation7 + $0x1958] sm:$0xf]  ;;  %v16226_v33 = vld [vmem:[#allocation7 + $0x1e68] sm:$0xf]  ;;  %v15003_v35 = vor.u32 %v18517_v27, %v15002_v26  ;;  %v18751_v27 = vld [vmem:[#allocation7 + $0x1c6c] sm:$0xf0] }
 0x137   : > { %v15579_v39 = vor.u32 %v18661_v31, %v15578_v30  ;;  %v16227_v43 = vor.u32 %v18823_v12, %v16226_v33  ;;  %v15938_v26 = vld [vmem:[#allocation7 + $0x1c28] sm:$0xf]  ;;  %v18895_v30 = vld [vmem:[#allocation7 + $0x20ec] sm:$0xf0] }
 0x138   : > { %7923 = vmatpush.bf16.msra.mxu2 %v13707_v36  ;;  %v16802_v36 = vld [vmem:[#allocation7 + $0x22e8] sm:$0xf]  ;;  %v18427_v33 = vld [vmem:[#allocation7 + $0x124c] sm:$0xf0] }
 0x139   : > { %7936 = vmatpush.bf16.msra.mxu3 %v14283_v40  ;;  %v14930_v40 = vld [vmem:[#allocation7 + $0x1448] sm:$0xf]  ;;  %v16803_v48 = vor.u32 %v18967_v37, %v16802_v36  ;;  %v15939_v36 = vor.u32 %v18751_v27, %v15938_v26  ;;  %v17968_v37 = vld [vmem:[#allocation7 + $0x3fc] sm:$0xf]  ;;  %v12628_v26 = vld [vmem:[#allocation7 + $0x290] sm:$0xf0] }
 0x13a   : > { %7899 = vmatpush.bf16.msra.mxu0 %v12411_v44  ;;  %7912 = vmatpush.bf16.msra.mxu1 %v12987_v50  ;;  %v15506_v44 = vld [vmem:[#allocation7 + $0x18c8] sm:$0xf]  ;;  %v18805_v50 = vld [vmem:[#allocation7 + $0x1e1c] sm:$0xf0]  ;;  %v14931_v51 = vor.u32 %v18499_v42, %v14930_v40  ;;  %v18112_v40 = vld [vmem:[#allocation7 + $0x87c] sm:$0xf] }
 0x13b   : > { %v16155_v57 = vor.u32 %v18805_v50, %v16154_v49  ;;  %v14642_v31 = vld [vmem:[#allocation7 + $0x1208] sm:$0xf]  ;;  %v16442_v49 = vld [vmem:[#allocation7 + $0x2018] sm:$0xf]  ;;  %v18877_v50 = vld [vmem:[#allocation7 + $0x205c] sm:$0xf0] }
 0x13c   : > { %7924 = vmatpush.bf16.msra.mxu2 %v13635_v54  ;;  %v15507_v54 = vor.u32 %v18643_v47, %v15506_v44  ;;  %v15218_v12 = vld [vmem:[#allocation7 + $0x1688] sm:$0xf]  ;;  %v15866_v44 = vld [vmem:[#allocation7 + $0x1b98] sm:$0xf]  ;;  %v18733_v47 = vld [vmem:[#allocation7 + $0x1bdc] sm:$0xf0] }
 0x13d   : > { %7937 = vmatpush.bf16.msra.mxu3 %v14211_v58  ;;  %v15434_v58 = vld [vmem:[#allocation7 + $0x1838] sm:$0xf]  ;;  %v15867_v55 = vor.u32 %v18733_v47, %v15866_v44  ;;  %v18040_v47 = vld [vmem:[#allocation7 + $0x63c] sm:$0xf] }
 0x13e   : > { %7900 = vmatpush.bf16.msra.mxu0 %v12339_v62  ;;  %7913 = vmatpush.bf16.msra.mxu1 %v12915_v3  ;;  %v18787_v62 = vld [vmem:[#allocation7 + $0x1d8c] sm:$0xf0] }
 0x13f   : > { %v18931_v3 = vld [vmem:[#allocation7 + $0x220c] sm:$0xf0] }
 0x140   : > { %7925 = vmatpush.bf16.msra.mxu2 %v13563_v9  ;;  %v16083_v9 = vor.u32 %v18787_v62, %v16082_v61  ;;  %v16659_v13 = vor.u32 %v18931_v3, %v16658_v1  ;;  %v18715_v61 = vld [vmem:[#allocation7 + $0x1b4c] sm:$0xf0]  ;;  %v16370_v62 = vld [vmem:[#allocation7 + $0x1f88] sm:$0xf]  ;;  %v18256_v1 = vld [vmem:[#allocation7 + $0xcfc] sm:$0xf] }
 0x141   : > { %7938 = vmatpush.bf16.msra.mxu3 %v14139_v15  ;;  %7901 = vmatmul.bf16.vlgmr.msra.gmra.mxu0 %v20064_v41  ;;  %v16010_v15 = vld [vmem:[#allocation7 + $0x1cb8] sm:$0xf]  ;;  %v13996_v3 = vld [vmem:[#allocation7 + $0xd40] sm:$0xf0] }
 0x142   : > { %7945 = vmatpush.bf16.msrb.mxu0 %v15147_v4  ;;  %7958 = vmatpush.bf16.msrb.mxu1 %v15723_v6  ;;  %v15435_v4 = vor.u32 %v18625_v59, %v15434_v58  ;;  %v18463_v6 = vld [vmem:[#allocation7 + $0x136c] sm:$0xf0]  ;;  %v16011_v22 = vor.u32 %v18769_v16, %v16010_v15  ;;  %v13348_v58 = vld [vmem:[#allocation7 + $0x830] sm:$0xf0]  ;;  %v16443_v59 = vor.u32 %v18877_v50, %v16442_v49  ;;  %v18202_v50 = vld [vmem:[#allocation7 + $0xb4c] sm:$0xf] }
 0x143   : > { %7914 = vmatmul.bf16.vlgmr.msra.gmra.mxu1 %v20066_v45  ;;  %v14787_v17 = vor.u32 %v18463_v6, %v14786_v5  ;;  %v18400_v5 = vld [vmem:[#allocation7 + $0x117c] sm:$0xf]  ;;  %v14572_v6 = vld [vmem:[#allocation7 + $0x11c0] sm:$0xf0]  ;;  %v13999_v16 = vor.u32 %v18256_v1, %v13996_v3 }
 0x144   : > { %7926 = vmatpush.bf16.msra.mxu2 %v13491_v25  ;;  %v16587_v25 = vor.u32 %v18913_v19, %v16586_v18  ;;  %v13276_v18 = vld [vmem:[#allocation7 + $0x7a0] sm:$0xf0]  ;;  %v14575_v19 = vor.u32 %v18400_v5, %v14572_v6  ;;  %v18328_v5 = vld [vmem:[#allocation7 + $0xf3c] sm:$0xf] }
 0x145   : > { %7939 = vmatpush.bf16.msra.mxu3 %v14067_v28  ;;  %v13708_v1 = vld [vmem:[#allocation7 + $0xb00] sm:$0xf0] }
 0x146   : > { %7946 = vmatpush.bf16.msrb.mxu0 %v15075_v21  ;;  %7959 = vmatpush.bf16.msrb.mxu1 %v15651_v24  ;;  %v18445_v21 = vld [vmem:[#allocation7 + $0x12dc] sm:$0xf0]  ;;  %v14284_v6 = vld [vmem:[#allocation7 + $0xf80] sm:$0xf0] }
 0x147   : > { %7927 = vmatmul.bf16.vlgmr.msra.gmra.mxu2 %v20072_v2  ;;  %v18589_v24 = vld [vmem:[#allocation7 + $0x175c] sm:$0xf0]  ;;  %v14715_v28 = vor.u32 %v18445_v21, %v14714_v20  ;;  %v13924_v20 = vld [vmem:[#allocation7 + $0xcb0] sm:$0xf0] }
 0x148   : > { %7971 = vmatpush.bf16.msrb.mxu2 %v16299_v29  ;;  %7940 = vmatmul.bf16.vlgmr.msra.gmra.mxu3 %v20074_v8  ;;  %v16514_v29 = vld [vmem:[#allocation7 + $0x20a8] sm:$0xf] }
 0x149   : > { %7984 = vmatpush.bf16.msrb.mxu3 %v16875_v32  ;;  %v15291_v32 = vor.u32 %v18589_v24, %v15290_v23  ;;  %v16515_v42 = vor.u32 %v18895_v30, %v16514_v29  ;;  %v14500_v23 = vld [vmem:[#allocation7 + $0x1130] sm:$0xf0] }
 0x14a   : > { %7947 = vmatpush.bf16.msrb.mxu0 %v15003_v35  ;;  %7960 = vmatpush.bf16.msrb.mxu1 %v15579_v39  ;;  %v18571_v35 = vld [vmem:[#allocation7 + $0x16cc] sm:$0xf0]  ;;  %v12844_v39 = vld [vmem:[#allocation7 + $0x440] sm:$0xf0]  ;;  %v13204_v29 = vld [vmem:[#allocation7 + $0x710] sm:$0xf0] }
 0x14b   : > { %v12847_v52 = vor.u32 %v17968_v37, %v12844_v39  ;;  %v14428_v37 = vld [vmem:[#allocation7 + $0x10a0] sm:$0xf0] }
 0x14c   : > { %7972 = vmatpush.bf16.msrb.mxu2 %v16227_v43  ;;  %v13420_v43 = vld [vmem:[#allocation7 + $0x8c0] sm:$0xf0] }
 0x14d   : > { %7985 = vmatpush.bf16.msrb.mxu3 %v16803_v48  ;;  %v14643_v48 = vor.u32 %v18427_v33, %v14642_v31  ;;  %v13852_v33 = vld [vmem:[#allocation7 + $0xc20] sm:$0xf0] }
 0x14e   : > { %7948 = vmatpush.bf16.msrb.mxu0 %v14931_v51  ;;  %7961 = vmatpush.bf16.msrb.mxu1 %v15507_v54  ;;  %v15219_v51 = vor.u32 %v18571_v35, %v15218_v12  ;;  %v13423_v54 = vor.u32 %v18112_v40, %v13420_v43  ;;  %v12556_v43 = vld [vmem:[#allocation7 + $0x200] sm:$0xf0] }
 0x150   : > { %7973 = vmatpush.bf16.msrb.mxu2 %v16155_v57  ;;  %v18094_v57 = vld [vmem:[#allocation7 + $0x7ec] sm:$0xf] }
 0x151   : > { %7986 = vmatpush.bf16.msrb.mxu3 %v16731_v60  ;;  %v15794_v60 = vld [vmem:[#allocation7 + $0x1b08] sm:$0xf] }
 0x152   : > { %7949 = vmatpush.bf16.msrb.mxu0 %v14859_v63  ;;  %7962 = vmatpush.bf16.msrb.mxu1 %v15435_v4  ;;  %v18859_v63 = vld [vmem:[#allocation7 + $0x1fcc] sm:$0xf0]  ;;  %v12775_v4 = vor.u32 %v17950_v53, %v12772_v56  ;;  %v15795_v10 = vor.u32 %v18715_v61, %v15794_v60  ;;  %v18346_v53 = vld [vmem:[#allocation7 + $0xfcc] sm:$0xf]  ;;  %v13060_v60 = vld [vmem:[#allocation7 + $0x5f0] sm:$0xf0] }
 0x153   : > { %v16371_v15 = vor.u32 %v18859_v63, %v16370_v62  ;;  %v17878_v56 = vld [vmem:[#allocation7 + $0x12c] sm:$0xf]  ;;  %v18184_v63 = vld [vmem:[#allocation7 + $0xabc] sm:$0xf] }
 0x154   : > { %7974 = vmatpush.bf16.msrb.mxu2 %v16083_v9  ;;  %v13351_v9 = vor.u32 %v18094_v57, %v13348_v58  ;;  %v12484_v57 = vld [vmem:[#allocation7 + $0x170] sm:$0xf0] }
 0x155   : > { %7987 = vmatpush.bf16.msrb.mxu3 %v16659_v13  ;;  %v12700_v13 = vld [vmem:[#allocation7 + $0x320] sm:$0xf0] }
 0x156   : > { %7950 = vmatpush.bf16.msrb.mxu0 %v14787_v17  ;;  %7963 = vmatpush.bf16.msrb.mxu1 %v15363_v34  ;;  %v18076_v17 = vld [vmem:[#allocation7 + $0x75c] sm:$0xf]  ;;  %v18238_v34 = vld [vmem:[#allocation7 + $0xc6c] sm:$0xf]  ;;  %v12703_v21 = vor.u32 %v17932_v11, %v12700_v13  ;;  %v12412_v11 = vld [vmem:[#allocation7 + $0xe0] sm:$0xf0]  ;;  %v13711_v13 = vor.u32 %v18184_v63, %v13708_v1 }
 0x157   : > { %v13279_v24 = vor.u32 %v18076_v17, %v13276_v18  ;;  %v13927_v27 = vor.u32 %v18238_v34, %v13924_v20  ;;  %v14287_v17 = vor.u32 %v18328_v5, %v14284_v6  ;;  %v18166_v18 = vld [vmem:[#allocation7 + $0xa2c] sm:$0xf]  ;;  %v14068_v63 = vld [vmem:[#allocation7 + $0xdd0] sm:$0xf0]  ;;  %v18832_v1 = vld [vmem:[#allocation7 + $0x1efc] sm:$0xf] }
 0x158   : > { %7975 = vmatpush.bf16.msrb.mxu2 %v16011_v22  ;;  %v18382_v22 = vld [vmem:[#allocation7 + $0x10ec] sm:$0xf]  ;;  %v18976_v6 = vld [vmem:[#allocation7 + $0x237c] sm:$0xf] }
 0x159   : > { %7988 = vmatpush.bf16.msrb.mxu3 %v16587_v25  ;;  %v17914_v25 = vld [vmem:[#allocation7 + $0x24c] sm:$0xf]  ;;  %v14503_v31 = vor.u32 %v18382_v22, %v14500_v23  ;;  %v14212_v22 = vld [vmem:[#allocation7 + $0xef0] sm:$0xf0] }
 0x15a   : > { %7951 = vmatpush.bf16.msrb.mxu0 %v14715_v28  ;;  %7964 = vmatpush.bf16.msrb.mxu1 %v15291_v32  ;;  %v18058_v28 = vld [vmem:[#allocation7 + $0x6cc] sm:$0xf]  ;;  %v18220_v32 = vld [vmem:[#allocation7 + $0xbdc] sm:$0xf]  ;;  %v12631_v35 = vor.u32 %v17914_v25, %v12628_v26 }
 0x15b   : > { %v13207_v40 = vor.u32 %v18058_v28, %v13204_v29  ;;  %v13855_v44 = vor.u32 %v18220_v32, %v13852_v33  ;;  %v17842_v23 = vld [vmem:[#allocation7 + $0xc] sm:$0xf]  ;;  %v12916_v29 = vld [vmem:[#allocation7 + $0x4d0] sm:$0xf0]  ;;  %v15148_v32 = vld [vmem:[#allocation7 + $0x1640] sm:$0xf0] }
 0x15c   : > { %7976 = vmatpush.bf16.msrb.mxu2 %v15939_v36  ;;  %v18364_v36 = vld [vmem:[#allocation7 + $0x105c] sm:$0xf]  ;;  %v17986_v28 = vld [vmem:[#allocation7 + $0x48c] sm:$0xf] }
 0x15d   : > { %7989 = vmatpush.bf16.msrb.mxu3 %v16515_v42  ;;  %v7694_v30 = vpop.f32.mrf.mxu0  ;;  %v7707_v12 = vpop.f32.mrf.mxu1  ;;  %v17896_v42 = vld [vmem:[#allocation7 + $0x1bc] sm:$0xf]  ;;  %v14431_v49 = vor.u32 %v18364_v36, %v14428_v37  ;;  %v15724_v37 = vld [vmem:[#allocation7 + $0x1ac0] sm:$0xf0] }
 0x15e   : > { %7952 = vmatpush.bf16.msrb.mxu0 %v14643_v48  ;;  %7965 = vmatpush.bf16.msrb.mxu1 %v15219_v51  ;;  %v7708_v39 = vadd.f32 %v7707_v12, %v7694_v30  ;;  %v13132_v48 = vld [vmem:[#allocation7 + $0x680] sm:$0xf0]  ;;  %v13780_v51 = vld [vmem:[#allocation7 + $0xb90] sm:$0xf0]  ;;  %v18688_v33 = vld [vmem:[#allocation7 + $0x1a7c] sm:$0xf] }
 0x15f   : > { %v13783_v58 = vor.u32 %v18202_v50, %v13780_v51  ;;  %v18526_v51 = vld [vmem:[#allocation7 + $0x156c] sm:$0xf] }
 0x160   : > { %7977 = vmatpush.bf16.msrb.mxu2 %v15867_v55  ;;  %v13135_v55 = vor.u32 %v18040_v47, %v13132_v48  ;;  %v14140_v47 = vld [vmem:[#allocation7 + $0xe60] sm:$0xf0] }
 0x161   : > { %7990 = vmatpush.bf16.msrb.mxu3 %v16443_v59  ;;  %7953 = vmatmul.bf16.vlgmr.msrb.gmra.mxu0 %v20080_v38  ;;  %v18022_v59 = vld [vmem:[#allocation7 + $0x5ac] sm:$0xf] }
 0x162   : > { %7997 = vmatpush.bf16.msra.mxu0 %v12847_v52  ;;  %8010 = vmatpush.bf16.msra.mxu1 %v13423_v54  ;;  %v12559_v52 = vor.u32 %v17896_v42, %v12556_v43  ;;  %v14356_v54 = vld [vmem:[#allocation7 + $0x1010] sm:$0xf0]  ;;  %v13564_v42 = vld [vmem:[#allocation7 + $0x9e0] sm:$0xf0] }
 0x163   : > { %7966 = vmatmul.bf16.vlgmr.msrb.gmra.mxu1 %v20082_v46  ;;  %v14359_v62 = vor.u32 %v18346_v53, %v14356_v54  ;;  %v15076_v54 = vld [vmem:[#allocation7 + $0x15b0] sm:$0xf0] }
 0x164   : > { %7978 = vmatpush.bf16.msrb.mxu2 %v15795_v10  ;;  %v17860_v10 = vld [vmem:[#allocation7 + $0x9c] sm:$0xf]  ;;  %v15079_v5 = vor.u32 %v18526_v51, %v15076_v54 }
 0x165   : > { %7991 = vmatpush.bf16.msrb.mxu3 %v16371_v15  ;;  %v7696_v61 = vpop.f32.mrf.mxu0  ;;  %v7709_v3 = vpop.f32.mrf.mxu1  ;;  %v18004_v15 = vld [vmem:[#allocation7 + $0x51c] sm:$0xf]  ;;  %v12415_v20 = vor.u32 %v17860_v10, %v12412_v11 }
 0x166   : > { %7998 = vmatpush.bf16.msra.mxu0 %v12775_v4  ;;  %8011 = vmatpush.bf16.msra.mxu1 %v13351_v9  ;;  %v12487_v4 = vor.u32 %v17878_v56, %v12484_v57  ;;  %v13063_v9 = vor.u32 %v18022_v59, %v13060_v60  ;;  %v15652_v56 = vld [vmem:[#allocation7 + $0x1a30] sm:$0xf0]  ;;  %v18130_v59 = vld [vmem:[#allocation7 + $0x90c] sm:$0xf]  ;;  %v16300_v3 = vld [vmem:[#allocation7 + $0x1f40] sm:$0xf0] }
 0x167   : > { %7979 = vmatmul.bf16.vlgmr.msrb.gmra.mxu2 %v20088_v7  ;;  %v13492_v60 = vld [vmem:[#allocation7 + $0x950] sm:$0xf0]  ;;  %v18274_v61 = vld [vmem:[#allocation7 + $0xd8c] sm:$0xf]  ;;  %v18616_v51 = vld [vmem:[#allocation7 + $0x183c] sm:$0xf] }
 0x168   : > { %8023 = vmatpush.bf16.msra.mxu2 %v13999_v16  ;;  %7992 = vmatmul.bf16.vlgmr.msrb.gmra.mxu3 %v20090_v14  ;;  %v12988_v16 = vld [vmem:[#allocation7 + $0x560] sm:$0xf0]  ;;  %v13495_v11 = vor.u32 %v18130_v59, %v13492_v60  ;;  %v18922_v59 = vld [vmem:[#allocation7 + $0x21cc] sm:$0xf]  ;;  %v16660_v60 = vld [vmem:[#allocation7 + $0x2210] sm:$0xf0] }
 0x169   : > { %8036 = vmatpush.bf16.msra.mxu3 %v14575_v19  ;;  %v13636_v19 = vld [vmem:[#allocation7 + $0xa70] sm:$0xf0]  ;;  %v12991_v26 = vor.u32 %v18004_v15, %v12988_v16  ;;  %v15004_v15 = vld [vmem:[#allocation7 + $0x1520] sm:$0xf0] }
 0x16a   : > { %7999 = vmatpush.bf16.msra.mxu0 %v12703_v21  ;;  %8012 = vmatpush.bf16.msra.mxu1 %v13279_v24  ;;  %v7720_v34 = vpop.f32.mrf.mxu2  ;;  %v18310_v21 = vld [vmem:[#allocation7 + $0xeac] sm:$0xf]  ;;  %v13639_v30 = vor.u32 %v18166_v18, %v13636_v19  ;;  %v16303_v18 = vor.u32 %v18832_v1, %v16300_v3  ;;  %v18652_v19 = vld [vmem:[#allocation7 + $0x195c] sm:$0xf]  ;;  %v14788_v1 = vld [vmem:[#allocation7 + $0x1370] sm:$0xf0] }
 0x16b   : > { %v7721_v24 = vadd.f32 %v7720_v34, %v7708_v39  ;;  %v7733_v25 = vpop.f32.mrf.mxu3  ;;  %v14215_v36 = vor.u32 %v18310_v21, %v14212_v22  ;;  %v15580_v34 = vld [vmem:[#allocation7 + $0x19a0] sm:$0xf0]  ;;  %v18814_v22 = vld [vmem:[#allocation7 + $0x1e6c] sm:$0xf] }
 0x16c   : > { %8024 = vmatpush.bf16.msra.mxu2 %v13927_v27  ;;  %v12340_v27 = vld [vmem:[#allocation7 + $0x50] sm:$0xf0] }
 0x16d   : > { %8037 = vmatpush.bf16.msra.mxu3 %v14503_v31  ;;  %v18544_v31 = vld [vmem:[#allocation7 + $0x15fc] sm:$0xf]  ;;  %v7734_v12 = vadd.f32 %v7733_v25, %v7721_v24  ;;  %v12343_v39 = vor.u32 %v17842_v23, %v12340_v27  ;;  %v16228_v23 = vld [vmem:[#allocation7 + $0x1eb0] sm:$0xf0]  ;;  %v18958_v25 = vld [vmem:[#allocation7 + $0x22ec] sm:$0xf]  ;;  %v15583_v27 = vor.u32 %v18652_v19, %v15580_v34 }
 0x16e   : > { %8000 = vmatpush.bf16.msra.mxu0 %v12631_v35  ;;  %8013 = vmatpush.bf16.msra.mxu1 %v13207_v40  ;;  %v7746_v35 = vpop.f32.mrf.mxu0  ;;  %v18148_v40 = vld [vmem:[#allocation7 + $0x99c] sm:$0xf]  ;;  %v7759_v43 = vpop.f32.mrf.mxu1  ;;  %v15151_v50 = vor.u32 %v18544_v31, %v15148_v32  ;;  %v18634_v31 = vld [vmem:[#allocation7 + $0x18cc] sm:$0xf]  ;;  %v15508_v32 = vld [vmem:[#allocation7 + $0x1910] sm:$0xf0] }
 0x16f   : > { %v7747_v48 = vadd.f32 %v7746_v35, %v7734_v12  ;;  %v13567_v53 = vor.u32 %v18148_v40, %v13564_v42  ;;  %v18796_v35 = vld [vmem:[#allocation7 + $0x1ddc] sm:$0xf]  ;;  %v14716_v34 = vld [vmem:[#allocation7 + $0x12e0] sm:$0xf0] }
 0x170   : > { %8025 = vmatpush.bf16.msra.mxu2 %v13855_v44  ;;  %v18292_v44 = vld [vmem:[#allocation7 + $0xe1c] sm:$0xf] }
 0x171   : > { %8038 = vmatpush.bf16.msra.mxu3 %v14431_v49  ;;  %v12919_v49 = vor.u32 %v17986_v28, %v12916_v29  ;;  %v7760_v57 = vadd.f32 %v7759_v43, %v7747_v48  ;;  %v18490_v28 = vld [vmem:[#allocation7 + $0x144c] sm:$0xf]  ;;  %v14932_v29 = vld [vmem:[#allocation7 + $0x1490] sm:$0xf0]  ;;  %v18940_v43 = vld [vmem:[#allocation7 + $0x225c] sm:$0xf] }
 0x172   : > { %8001 = vmatpush.bf16.msra.mxu0 %v12559_v52  ;;  %8014 = vmatpush.bf16.msra.mxu1 %v13135_v55  ;;  %v15727_v52 = vor.u32 %v18688_v33, %v15724_v37  ;;  %v18670_v55 = vld [vmem:[#allocation7 + $0x19ec] sm:$0xf]  ;;  %v14935_v42 = vor.u32 %v18490_v28, %v14932_v29  ;;  %v14860_v48 = vld [vmem:[#allocation7 + $0x1400] sm:$0xf0]  ;;  %v18436_v19 = vld [vmem:[#allocation7 + $0x129c] sm:$0xf] }
 0x173   : > { %v15655_v10 = vor.u32 %v18670_v55, %v15652_v56  ;;  %v18778_v55 = vld [vmem:[#allocation7 + $0x1d4c] sm:$0xf]  ;;  %v16084_v56 = vld [vmem:[#allocation7 + $0x1d90] sm:$0xf0]  ;;  %v14719_v28 = vor.u32 %v18436_v19, %v14716_v34  ;;  %v17942_v19 = vld [vmem:[#allocation7 + $0x324] sm:$0xf0] }
 0x174   : > { %8026 = vmatpush.bf16.msra.mxu2 %v13783_v58  ;;  %v14143_v58 = vor.u32 %v18292_v44, %v14140_v47  ;;  %v15511_v44 = vor.u32 %v18634_v31, %v15508_v32  ;;  %v18472_v47 = vld [vmem:[#allocation7 + $0x13bc] sm:$0xf]  ;;  %v16087_v3 = vor.u32 %v18778_v55, %v16084_v56  ;;  %v18886_v29 = vld [vmem:[#allocation7 + $0x20ac] sm:$0xf] }
 0x175   : > { %8039 = vmatpush.bf16.msra.mxu3 %v14359_v62  ;;  %v7722_v62 = vpop.f32.mrf.mxu2  ;;  %v18418_v31 = vld [vmem:[#allocation7 + $0x120c] sm:$0xf] }
 0x176   : > { %8002 = vmatpush.bf16.msra.mxu0 %v12487_v4  ;;  %8015 = vmatpush.bf16.msra.mxu1 %v13063_v9  ;;  %v7735_v4 = vpop.f32.mrf.mxu3  ;;  %v16876_v9 = vld [vmem:[#allocation7 + $0x23c0] sm:$0xf0]  ;;  %v7748_v16 = vpop.f32.mrf.mxu0 }
 0x177   : > { %v16879_v21 = vor.u32 %v18976_v6, %v16876_v9  ;;  %v18598_v4 = vld [vmem:[#allocation7 + $0x17ac] sm:$0xf]  ;;  %v16663_v9 = vor.u32 %v18922_v59, %v16660_v60  ;;  %v18904_v16 = vld [vmem:[#allocation7 + $0x213c] sm:$0xf]  ;;  %v17960_v60 = vld [vmem:[#allocation7 + $0x3b4] sm:$0xf0] }
 0x178   : > { %8027 = vmatpush.bf16.msra.mxu2 %v13711_v13  ;;  %v18508_v13 = vld [vmem:[#allocation7 + $0x14dc] sm:$0xf] }
 0x179   : > { %8040 = vmatpush.bf16.msra.mxu3 %v14287_v17  ;;  %v14071_v17 = vor.u32 %v18274_v61, %v14068_v63  ;;  %v15007_v24 = vor.u32 %v18508_v13, %v15004_v15  ;;  %v18454_v63 = vld [vmem:[#allocation7 + $0x132c] sm:$0xf] }
 0x17a   : > { %8003 = vmatpush.bf16.msra.mxu0 %v12415_v20  ;;  %8016 = vmatpush.bf16.msra.mxu1 %v12991_v26  ;;  %v7761_v20 = vpop.f32.mrf.mxu1  ;;  %v16804_v26 = vld [vmem:[#allocation7 + $0x2330] sm:$0xf0]  ;;  %v14791_v15 = vor.u32 %v18454_v63, %v14788_v1  ;;  %v18104_v63 = vld [vmem:[#allocation7 + $0x834] sm:$0xf0] }
 0x17b   : > { %v16807_v12 = vor.u32 %v18958_v25, %v16804_v26  ;;  %v18742_v25 = vld [vmem:[#allocation7 + $0x1c2c] sm:$0xf]  ;;  %v15940_v26 = vld [vmem:[#allocation7 + $0x1c70] sm:$0xf0] }
 0x17c   : > { %8028 = vmatpush.bf16.msra.mxu2 %v13639_v30  ;;  %v16231_v30 = vor.u32 %v18814_v22, %v16228_v23  ;;  %v15292_v22 = vld [vmem:[#allocation7 + $0x1760] sm:$0xf0] }
 0x17d   : > { %8041 = vmatpush.bf16.msra.mxu3 %v14215_v36  ;;  %v7772_v33 = vpop.f32.mrf.mxu2  ;;  %v16156_v36 = vld [vmem:[#allocation7 + $0x1e20] sm:$0xf0] }
 0x17e   : > { %8004 = vmatpush.bf16.msra.mxu0 %v12343_v39  ;;  %8017 = vmatpush.bf16.msra.mxu1 %v12919_v49  ;;  %v7773_v37 = vadd.f32 %v7772_v33, %v7760_v57  ;;  %v7785_v40 = vpop.f32.mrf.mxu3  ;;  %v16732_v39 = vld [vmem:[#allocation7 + $0x22a0] sm:$0xf0]  ;;  %v14644_v33 = vld [vmem:[#allocation7 + $0x1250] sm:$0xf0] }
 0x17f   : > { %v16735_v54 = vor.u32 %v18940_v43, %v16732_v39  ;;  %v18122_v39 = vld [vmem:[#allocation7 + $0x8c4] sm:$0xf0] }
 0x180   : > { %8029 = vmatpush.bf16.msra.mxu2 %v13567_v53  ;;  %v20114_v49 = vadd.f32 %v7785_v40, %v7773_v37  ;;  %v7798_v53 = vpop.f32.mrf.mxu0  ;;  %v12850_v37 = vld [vmem:[#allocation7 + $0x400] sm:$0xf]  ;;  %v17978_v40 = vld [vmem:[#allocation7 + $0x444] sm:$0xf0] }
 0x181   : > { %8042 = vmatpush.bf16.msra.mxu3 %v14143_v58  ;;  %8005 = vmatmul.bf16.vlgmr.msra.gmra.mxu0 %v20064_v41  ;;  %v14863_v58 = vor.u32 %v18472_v47, %v14860_v48  ;;  %v15868_v47 = vld [vmem:[#allocation7 + $0x1be0] sm:$0xf0]  ;;  %v12851_v56 = vor.u32 %v17978_v40, %v12850_v37  ;;  %v13858_v40 = vld [vmem:[#allocation7 + $0xbe0] sm:$0xf] }
 0x182   : > { %8049 = vmatpush.bf16.msrb.mxu0 %v15151_v50  ;;  %8062 = vmatpush.bf16.msrb.mxu1 %v15727_v52  ;;  %v16159_v50 = vor.u32 %v18796_v35, %v16156_v36  ;;  %v15436_v52 = vld [vmem:[#allocation7 + $0x1880] sm:$0xf0]  ;;  %v7811_v57 = vpop.f32.mrf.mxu1  ;;  %v15220_v35 = vld [vmem:[#allocation7 + $0x16d0] sm:$0xf0]  ;;  %v15943_v36 = vor.u32 %v18742_v25, %v15940_v26  ;;  %v13930_v26 = vld [vmem:[#allocation7 + $0xc70] sm:$0xf] }
 0x183   : > { %8018 = vmatmul.bf16.vlgmr.msra.gmra.mxu1 %v20066_v45  ;;  %v7812_v61 = vadd.f32 %v7811_v57, %v7798_v53  ;;  %v15439_v62 = vor.u32 %v18616_v51, %v15436_v52  ;;  %v14647_v51 = vor.u32 %v18418_v31, %v14644_v33  ;;  %v18868_v52 = vld [vmem:[#allocation7 + $0x201c] sm:$0xf]  ;;  %v16444_v53 = vld [vmem:[#allocation7 + $0x2060] sm:$0xf0]  ;;  %v12778_v57 = vld [vmem:[#allocation7 + $0x370] sm:$0xf] }
 0x184   : > { %8030 = vmatpush.bf16.msra.mxu2 %v13495_v11  ;;  %v16012_v11 = vld [vmem:[#allocation7 + $0x1d00] sm:$0xf0]  ;;  %v17924_v33 = vld [vmem:[#allocation7 + $0x294] sm:$0xf0] }
 0x185   : > { %8043 = vmatpush.bf16.msra.mxu3 %v14071_v17  ;;  %v7774_v6 = vpop.f32.mrf.mxu2  ;;  %v16588_v17 = vld [vmem:[#allocation7 + $0x2180] sm:$0xf0] }
 0x186   : > { %8050 = vmatpush.bf16.msrb.mxu0 %v15079_v5  ;;  %8063 = vmatpush.bf16.msrb.mxu1 %v15655_v10  ;;  %v15364_v5 = vld [vmem:[#allocation7 + $0x17f0] sm:$0xf0]  ;;  %v18760_v10 = vld [vmem:[#allocation7 + $0x1cbc] sm:$0xf]  ;;  %v7787_v13 = vpop.f32.mrf.mxu3  ;;  %v18850_v6 = vld [vmem:[#allocation7 + $0x1f8c] sm:$0xf] }
 0x187   : > { %8031 = vmatmul.bf16.vlgmr.msra.gmra.mxu2 %v20072_v2  ;;  %v16015_v20 = vor.u32 %v18760_v10, %v16012_v11  ;;  %v18266_v10 = vld [vmem:[#allocation7 + $0xd44] sm:$0xf0]  ;;  %v12779_v11 = vor.u32 %v17960_v60, %v12778_v57  ;;  %v14578_v13 = vld [vmem:[#allocation7 + $0x1180] sm:$0xf]  ;;  %v18212_v57 = vld [vmem:[#allocation7 + $0xb94] sm:$0xf0] }
 0x188   : > { %8075 = vmatpush.bf16.msrb.mxu2 %v16303_v18  ;;  %8044 = vmatmul.bf16.vlgmr.msra.gmra.mxu3 %v20074_v8  ;;  %v15367_v18 = vor.u32 %v18598_v4, %v15364_v5  ;;  %v7800_v23 = vpop.f32.mrf.mxu0  ;;  %v18706_v4 = vld [vmem:[#allocation7 + $0x1b0c] sm:$0xf]  ;;  %v15796_v5 = vld [vmem:[#allocation7 + $0x1b50] sm:$0xf0] }
 0x189   : > { %8088 = vmatpush.bf16.msrb.mxu3 %v16879_v21  ;;  %v18580_v21 = vld [vmem:[#allocation7 + $0x171c] sm:$0xf] }
 0x18a   : > { %8051 = vmatpush.bf16.msrb.mxu0 %v15007_v24  ;;  %8064 = vmatpush.bf16.msrb.mxu1 %v15583_v27  ;;  %v16591_v24 = vor.u32 %v18904_v16, %v16588_v17  ;;  %v7813_v27 = vpop.f32.mrf.mxu1  ;;  %v15295_v32 = vor.u32 %v18580_v21, %v15292_v22  ;;  %v15799_v17 = vor.u32 %v18706_v4, %v15796_v5  ;;  %v13282_v21 = vld [vmem:[#allocation7 + $0x760] sm:$0xf]  ;;  %v18086_v22 = vld [vmem:[#allocation7 + $0x7a4] sm:$0xf0]  ;;  %v12490_v4 = vld [vmem:[#allocation7 + $0x130] sm:$0xf] }
 0x18b   : > { %v18248_v27 = vld [vmem:[#allocation7 + $0xcb4] sm:$0xf0]  ;;  %v13283_v31 = vor.u32 %v18086_v22, %v13282_v21  ;;  %v12994_v21 = vld [vmem:[#allocation7 + $0x520] sm:$0xf]  ;;  %v18014_v22 = vld [vmem:[#allocation7 + $0x564] sm:$0xf0] }
 0x18c   : > { %8076 = vmatpush.bf16.msrb.mxu2 %v16231_v30  ;;  %v16516_v30 = vld [vmem:[#allocation7 + $0x20f0] sm:$0xf0]  ;;  %v17888_v5 = vld [vmem:[#allocation7 + $0x174] sm:$0xf0] }
 0x18d   : > { %8089 = vmatpush.bf16.msrb.mxu3 %v16807_v12  ;;  %v18562_v12 = vld [vmem:[#allocation7 + $0x168c] sm:$0xf]  ;;  %v16519_v43 = vor.u32 %v18886_v29, %v16516_v30  ;;  %v7824_v48 = vpop.f32.mrf.mxu2  ;;  %v14506_v29 = vld [vmem:[#allocation7 + $0x10f0] sm:$0xf]  ;;  %v18392_v30 = vld [vmem:[#allocation7 + $0x1134] sm:$0xf0] }
 0x18e   : > { %8052 = vmatpush.bf16.msrb.mxu0 %v14935_v42  ;;  %8065 = vmatpush.bf16.msrb.mxu1 %v15511_v44  ;;  %v13426_v42 = vld [vmem:[#allocation7 + $0x880] sm:$0xf]  ;;  %v18724_v44 = vld [vmem:[#allocation7 + $0x1b9c] sm:$0xf]  ;;  %v15223_v55 = vor.u32 %v18562_v12, %v15220_v35  ;;  %v13931_v12 = vor.u32 %v18248_v27, %v13930_v26  ;;  %v13210_v35 = vld [vmem:[#allocation7 + $0x6d0] sm:$0xf]  ;;  %v14507_v37 = vor.u32 %v18392_v30, %v14506_v29 }
 0x18f   : > { %v15871_v59 = vor.u32 %v18724_v44, %v15868_v47  ;;  %v18374_v44 = vld [vmem:[#allocation7 + $0x10a4] sm:$0xf0]  ;;  %v18176_v26 = vld [vmem:[#allocation7 + $0xa74] sm:$0xf0]  ;;  %v14218_v29 = vld [vmem:[#allocation7 + $0xeb0] sm:$0xf] }
 0x190   : > { %8077 = vmatpush.bf16.msrb.mxu2 %v16159_v50  ;;  %v7837_v50 = vpop.f32.mrf.mxu3  ;;  %v18320_v30 = vld [vmem:[#allocation7 + $0xef4] sm:$0xf0] }
 0x191   : > { %8090 = vmatpush.bf16.msrb.mxu3 %v16735_v54  ;;  %v7825_v54 = vadd.f32 %v7824_v48, %v7812_v61  ;;  %v14002_v61 = vld [vmem:[#allocation7 + $0xd00] sm:$0xf] }
 0x192   : > { %8053 = vmatpush.bf16.msrb.mxu0 %v14863_v58  ;;  %8066 = vmatpush.bf16.msrb.mxu1 %v15439_v62  ;;  %v13427_v58 = vor.u32 %v18122_v39, %v13426_v42  ;;  %v13354_v62 = vld [vmem:[#allocation7 + $0x7f0] sm:$0xf]  ;;  %v18230_v42 = vld [vmem:[#allocation7 + $0xc24] sm:$0xf0]  ;;  %v14434_v39 = vld [vmem:[#allocation7 + $0x1060] sm:$0xf] }
 0x193   : > { %v20116_v1 = vadd.f32 %v7837_v50, %v7825_v54  ;;  %v13355_v16 = vor.u32 %v18104_v63, %v13354_v62  ;;  %v12562_v48 = vld [vmem:[#allocation7 + $0x1c0] sm:$0xf]  ;;  %v17906_v50 = vld [vmem:[#allocation7 + $0x204] sm:$0xf0]  ;;  %v14362_v62 = vld [vmem:[#allocation7 + $0xfd0] sm:$0xf] }
 0x194   : > { %8078 = vmatpush.bf16.msrb.mxu2 %v16087_v3  ;;  %v16447_v3 = vor.u32 %v18868_v52, %v16444_v53  ;;  %v13138_v52 = vld [vmem:[#allocation7 + $0x640] sm:$0xf]  ;;  %v18050_v53 = vld [vmem:[#allocation7 + $0x684] sm:$0xf0]  ;;  %v12563_v60 = vor.u32 %v17906_v50, %v12562_v48  ;;  %v18356_v63 = vld [vmem:[#allocation7 + $0x1014] sm:$0xf0] }
 0x195   : > { %8091 = vmatpush.bf16.msrb.mxu3 %v16663_v9  ;;  %v16372_v9 = vld [vmem:[#allocation7 + $0x1fd0] sm:$0xf0]  ;;  %v7826_v23 = vpop.f32.mrf.mxu2  ;;  %v18158_v48 = vld [vmem:[#allocation7 + $0x9e4] sm:$0xf0] }
 0x196   : > { %8054 = vmatpush.bf16.msrb.mxu0 %v14791_v15  ;;  %8067 = vmatpush.bf16.msrb.mxu1 %v15367_v18  ;;  %v18410_v15 = vld [vmem:[#allocation7 + $0x11c4] sm:$0xf0]  ;;  %v12706_v18 = vld [vmem:[#allocation7 + $0x2e0] sm:$0xf]  ;;  %v16375_v34 = vor.u32 %v18850_v6, %v16372_v9 }
 0x197   : > { %v14579_v25 = vor.u32 %v18410_v15, %v14578_v13  ;;  %v13714_v13 = vld [vmem:[#allocation7 + $0xac0] sm:$0xf]  ;;  %v18194_v15 = vld [vmem:[#allocation7 + $0xb04] sm:$0xf0] }
 0x198   : > { %8079 = vmatpush.bf16.msrb.mxu2 %v16015_v20  ;;  %v14003_v20 = vor.u32 %v18266_v10, %v14002_v61  ;;  %v13066_v61 = vld [vmem:[#allocation7 + $0x5b0] sm:$0xf]  ;;  %v18032_v10 = vld [vmem:[#allocation7 + $0x5f4] sm:$0xf0] }
 0x199   : > { %8092 = vmatpush.bf16.msrb.mxu3 %v16591_v24  ;;  %v7839_v24 = vpop.f32.mrf.mxu3 }
 0x19a   : > { %8055 = vmatpush.bf16.msrb.mxu0 %v14719_v28  ;;  %8068 = vmatpush.bf16.msrb.mxu1 %v15295_v32  ;;  %v12707_v28 = vor.u32 %v17942_v19, %v12706_v18  ;;  %v12634_v32 = vld [vmem:[#allocation7 + $0x250] sm:$0xf]  ;;  %v13067_v18 = vor.u32 %v18032_v10, %v13066_v61  ;;  %v12418_v19 = vld [vmem:[#allocation7 + $0xa0] sm:$0xf]  ;;  %v18284_v61 = vld [vmem:[#allocation7 + $0xdd4] sm:$0xf0] }
 0x19b   : > { %v16306_v10 = vld [vmem:[#allocation7 + $0x1f00] sm:$0xf] }
 0x19c   : > { %8080 = vmatpush.bf16.msrb.mxu2 %v15943_v36  ;;  %v18068_v36 = vld [vmem:[#allocation7 + $0x714] sm:$0xf0] }
 0x19d   : > { %8093 = vmatpush.bf16.msrb.mxu3 %v16519_v43  ;;  %v12635_v43 = vor.u32 %v17924_v33, %v12634_v32  ;;  %v13211_v47 = vor.u32 %v18068_v36, %v13210_v35  ;;  %v12995_v32 = vor.u32 %v18014_v22, %v12994_v21  ;;  %v17852_v33 = vld [vmem:[#allocation7 + $0x54] sm:$0xf0]  ;;  %v15586_v22 = vld [vmem:[#allocation7 + $0x1960] sm:$0xf] }
 0x19e   : > { %8056 = vmatpush.bf16.msrb.mxu0 %v14647_v51  ;;  %8069 = vmatpush.bf16.msrb.mxu1 %v15223_v55  ;;  %v13859_v51 = vor.u32 %v18230_v42, %v13858_v40  ;;  %v7850_v54 = vpop.f32.mrf.mxu0  ;;  %v14435_v55 = vor.u32 %v18374_v44, %v14434_v39  ;;  %v17996_v35 = vld [vmem:[#allocation7 + $0x4d4] sm:$0xf0]  ;;  %v18554_v40 = vld [vmem:[#allocation7 + $0x1644] sm:$0xf0]  ;;  %v15730_v42 = vld [vmem:[#allocation7 + $0x1a80] sm:$0xf]  ;;  %v14219_v39 = vor.u32 %v18320_v30, %v14218_v29 }
 0x19f   : > { %v18698_v44 = vld [vmem:[#allocation7 + $0x1ac4] sm:$0xf0]  ;;  %v16810_v29 = vld [vmem:[#allocation7 + $0x22f0] sm:$0xf]  ;;  %v18968_v30 = vld [vmem:[#allocation7 + $0x2334] sm:$0xf0] }
 0x1a0   : > { %8081 = vmatpush.bf16.msrb.mxu2 %v15871_v59  ;;  %v7863_v59 = vpop.f32.mrf.mxu1 }
 0x1a1   : > { %8094 = vmatpush.bf16.msrb.mxu3 %v16447_v3  ;;  %8057 = vmatmul.bf16.vlgmr.msrb.gmra.mxu0 %v20080_v38  ;;  %v13139_v3 = vor.u32 %v18050_v53, %v13138_v52  ;;  %v14146_v53 = vld [vmem:[#allocation7 + $0xe20] sm:$0xf] }
 0x1a2   : > { %8101 = vmatpush.bf16.msra.mxu0 %v12851_v56  ;;  %8114 = vmatpush.bf16.msra.mxu1 %v13427_v58  ;;  %v13786_v56 = vld [vmem:[#allocation7 + $0xb50] sm:$0xf]  ;;  %v7851_v58 = vadd.f32 %v7850_v54, %v20116_v1  ;;  %v12491_v1 = vor.u32 %v17888_v5, %v12490_v4  ;;  %v18302_v54 = vld [vmem:[#allocation7 + $0xe64] sm:$0xf0] }
 0x1a3   : > { %8070 = vmatmul.bf16.vlgmr.msrb.gmra.mxu1 %v20082_v46  ;;  %v13787_v9 = vor.u32 %v18212_v57, %v13786_v56  ;;  %v15082_v57 = vld [vmem:[#allocation7 + $0x1570] sm:$0xf]  ;;  %v14147_v4 = vor.u32 %v18302_v54, %v14146_v53  ;;  %v18626_v53 = vld [vmem:[#allocation7 + $0x1884] sm:$0xf0] }
 0x1a4   : > { %8082 = vmatpush.bf16.msrb.mxu2 %v15799_v17  ;;  %v7864_v6 = vadd.f32 %v7863_v59, %v7851_v58  ;;  %v18338_v17 = vld [vmem:[#allocation7 + $0xf84] sm:$0xf0]  ;;  %v15731_v59 = vor.u32 %v18698_v44, %v15730_v42  ;;  %v13498_v5 = vld [vmem:[#allocation7 + $0x910] sm:$0xf] }
 0x1a5   : > { %8095 = vmatpush.bf16.msrb.mxu3 %v16375_v34  ;;  %v17870_v34 = vld [vmem:[#allocation7 + $0xe4] sm:$0xf0] }
 0x1a6   : > { %8102 = vmatpush.bf16.msra.mxu0 %v12779_v11  ;;  %8115 = vmatpush.bf16.msra.mxu1 %v13355_v16  ;;  %v14363_v11 = vor.u32 %v18356_v63, %v14362_v62  ;;  %v14290_v16 = vld [vmem:[#allocation7 + $0xf40] sm:$0xf]  ;;  %v7852_v23 = vpop.f32.mrf.mxu0  ;;  %v18536_v62 = vld [vmem:[#allocation7 + $0x15b4] sm:$0xf0]  ;;  %v15658_v63 = vld [vmem:[#allocation7 + $0x19f0] sm:$0xf] }
 0x1a7   : > { %8083 = vmatmul.bf16.vlgmr.msrb.gmra.mxu2 %v20088_v7  ;;  %v14291_v24 = vor.u32 %v18338_v17, %v14290_v16  ;;  %v18662_v23 = vld [vmem:[#allocation7 + $0x19a4] sm:$0xf0] }
 0x1a8   : > { %8127 = vmatpush.bf16.msra.mxu2 %v14003_v20  ;;  %8096 = vmatmul.bf16.vlgmr.msrb.gmra.mxu3 %v20090_v14  ;;  %v13715_v20 = vor.u32 %v18194_v15, %v13714_v13  ;;  %v7865_v27 = vpop.f32.mrf.mxu1  ;;  %v15083_v13 = vor.u32 %v18536_v62, %v15082_v57  ;;  %v16882_v15 = vld [vmem:[#allocation7 + $0x2380] sm:$0xf]  ;;  %v18806_v42 = vld [vmem:[#allocation7 + $0x1e24] sm:$0xf0]  ;;  %v18788_v57 = vld [vmem:[#allocation7 + $0x1d94] sm:$0xf0] }
 0x1a9   : > { %8140 = vmatpush.bf16.msra.mxu3 %v14579_v25  ;;  %v13642_v25 = vld [vmem:[#allocation7 + $0xa30] sm:$0xf]  ;;  %v18824_v27 = vld [vmem:[#allocation7 + $0x1eb4] sm:$0xf0]  ;;  %v18950_v44 = vld [vmem:[#allocation7 + $0x22a4] sm:$0xf0] }
 0x1aa   : > { %8103 = vmatpush.bf16.msra.mxu0 %v12707_v28  ;;  %8116 = vmatpush.bf16.msra.mxu1 %v13283_v31  ;;  %v12419_v28 = vor.u32 %v17870_v34, %v12418_v19  ;;  %v12346_v31 = vld [vmem:[#allocation7 + $0x10] sm:$0xf]  ;;  %v13643_v36 = vor.u32 %v18176_v26, %v13642_v25  ;;  %v18518_v19 = vld [vmem:[#allocation7 + $0x1524] sm:$0xf0] }
 0x1ab   : > { %v12347_v52 = vor.u32 %v17852_v33, %v12346_v31  ;;  %v16234_v26 = vld [vmem:[#allocation7 + $0x1e70] sm:$0xf]  ;;  %v15587_v31 = vor.u32 %v18662_v23, %v15586_v22  ;;  %v18500_v33 = vld [vmem:[#allocation7 + $0x1494] sm:$0xf0]  ;;  %v18590_v22 = vld [vmem:[#allocation7 + $0x1764] sm:$0xf0] }
 0x1ac   : > { %8128 = vmatpush.bf16.msra.mxu2 %v13931_v12  ;;  %v12922_v12 = vld [vmem:[#allocation7 + $0x490] sm:$0xf] }
 0x1ad   : > { %8141 = vmatpush.bf16.msra.mxu3 %v14507_v37  ;;  %v15154_v37 = vld [vmem:[#allocation7 + $0x1600] sm:$0xf]  ;;  %v16666_v62 = vld [vmem:[#allocation7 + $0x21d0] sm:$0xf] }
 0x1ae   : > { %8104 = vmatpush.bf16.msra.mxu0 %v12635_v43  ;;  %8117 = vmatpush.bf16.msra.mxu1 %v13211_v47  ;;  %v7876_v43 = vpop.f32.mrf.mxu2  ;;  %v13570_v47 = vld [vmem:[#allocation7 + $0x9a0] sm:$0xf]  ;;  %v15155_v56 = vor.u32 %v18554_v40, %v15154_v37  ;;  %v16811_v37 = vor.u32 %v18968_v30, %v16810_v29  ;;  %v16522_v29 = vld [vmem:[#allocation7 + $0x20b0] sm:$0xf]  ;;  %v18896_v30 = vld [vmem:[#allocation7 + $0x20f4] sm:$0xf0] }
 0x1af   : > { %v7877_v50 = vadd.f32 %v7876_v43, %v7864_v6  ;;  %v18140_v6 = vld [vmem:[#allocation7 + $0x954] sm:$0xf0]  ;;  %v16162_v40 = vld [vmem:[#allocation7 + $0x1de0] sm:$0xf] }
 0x1b0   : > { %8129 = vmatpush.bf16.msra.mxu2 %v13859_v51  ;;  %v7889_v51 = vpop.f32.mrf.mxu3  ;;  %v13499_v17 = vor.u32 %v18140_v6, %v13498_v5  ;;  %v14794_v5 = vld [vmem:[#allocation7 + $0x1330] sm:$0xf]  ;;  %v18464_v6 = vld [vmem:[#allocation7 + $0x1374] sm:$0xf0] }
 0x1b1   : > { %8142 = vmatpush.bf16.msra.mxu3 %v14435_v55  ;;  %v12923_v55 = vor.u32 %v17996_v35, %v12922_v12  ;;  %v20123_v58 = vadd.f32 %v7889_v51, %v7877_v50  ;;  %v16235_v12 = vor.u32 %v18824_v27, %v16234_v26  ;;  %v15514_v35 = vld [vmem:[#allocation7 + $0x18d0] sm:$0xf]  ;;  %v18482_v50 = vld [vmem:[#allocation7 + $0x1404] sm:$0xf0]  ;;  %v16163_v51 = vor.u32 %v18806_v42, %v16162_v40  ;;  %v18752_v26 = vld [vmem:[#allocation7 + $0x1c74] sm:$0xf0] }
 0x1b2   : > { %8105 = vmatpush.bf16.msra.mxu0 %v12563_v60  ;;  %8118 = vmatpush.bf16.msra.mxu1 %v13139_v3  ;;  %v13571_v60 = vor.u32 %v18158_v48, %v13570_v47  ;;  %v18680_v3 = vld [vmem:[#allocation7 + $0x1a34] sm:$0xf0]  ;;  %v14866_v48 = vld [vmem:[#allocation7 + $0x13c0] sm:$0xf]  ;;  %v12852_v40 = vld [vmem:[#allocation7 + $0x448] sm:$0xf0] }
 0x1b3   : > { %v15659_v16 = vor.u32 %v18680_v3, %v15658_v63  ;;  %v18932_v63 = vld [vmem:[#allocation7 + $0x2214] sm:$0xf0]  ;;  %v18113_v42 = vld [vmem:[#allocation7 + $0x884] sm:$0xf] }
 0x1b4   : > { %8130 = vmatpush.bf16.msra.mxu2 %v13787_v9  ;;  %v14074_v9 = vld [vmem:[#allocation7 + $0xd90] sm:$0xf] }
 0x1b5   : > { %8143 = vmatpush.bf16.msra.mxu3 %v14363_v11  ;;  %v18842_v11 = vld [vmem:[#allocation7 + $0x1f44] sm:$0xf0] }
 0x1b6   : > { %8106 = vmatpush.bf16.msra.mxu0 %v12491_v1  ;;  %8119 = vmatpush.bf16.msra.mxu1 %v13067_v18  ;;  %v18986_v1 = vld [vmem:[#allocation7 + $0x23c4] sm:$0xf0]  ;;  %v15010_v18 = vld [vmem:[#allocation7 + $0x14e0] sm:$0xf]  ;;  %v7878_v34 = vpop.f32.mrf.mxu2  ;;  %v16307_v21 = vor.u32 %v18842_v11, %v16306_v10  ;;  %v18608_v10 = vld [vmem:[#allocation7 + $0x17f4] sm:$0xf0]  ;;  %v16667_v11 = vor.u32 %v18932_v63, %v16666_v62 }
 0x1b7   : > { %v16883_v25 = vor.u32 %v18986_v1, %v16882_v15  ;;  %v18770_v15 = vld [vmem:[#allocation7 + $0x1d04] sm:$0xf0]  ;;  %v14795_v1 = vor.u32 %v18464_v6, %v14794_v5  ;;  %v12780_v63 = vld [vmem:[#allocation7 + $0x3b8] sm:$0xf0] }
 0x1b8   : > { %8131 = vmatpush.bf16.msra.mxu2 %v13715_v20  ;;  %v14075_v20 = vor.u32 %v18284_v61, %v14074_v9  ;;  %v15370_v61 = vld [vmem:[#allocation7 + $0x17b0] sm:$0xf]  ;;  %v18446_v34 = vld [vmem:[#allocation7 + $0x12e4] sm:$0xf0]  ;;  %v13356_v5 = vld [vmem:[#allocation7 + $0x838] sm:$0xf0] }
 0x1b9   : > { %8144 = vmatpush.bf16.msra.mxu3 %v14291_v24  ;;  %v7891_v24 = vpop.f32.mrf.mxu3 }
 0x1ba   : > { %8107 = vmatpush.bf16.msra.mxu0 %v12419_v28  ;;  %8120 = vmatpush.bf16.msra.mxu1 %v12995_v32  ;;  %v15011_v28 = vor.u32 %v18518_v19, %v15010_v18  ;;  %v14938_v32 = vld [vmem:[#allocation7 + $0x1450] sm:$0xf]  ;;  %v15371_v18 = vor.u32 %v18608_v10, %v15370_v61  ;;  %v14722_v19 = vld [vmem:[#allocation7 + $0x12a0] sm:$0xf]  ;;  %v18860_v10 = vld [vmem:[#allocation7 + $0x1fd4] sm:$0xf0] }
 0x1bb   : > { %v14939_v43 = vor.u32 %v18500_v33, %v14938_v32  ;;  %v18428_v33 = vld [vmem:[#allocation7 + $0x1254] sm:$0xf0]  ;;  %v16378_v61 = vld [vmem:[#allocation7 + $0x1f90] sm:$0xf] }
 0x1bc   : > { %8132 = vmatpush.bf16.msra.mxu2 %v13643_v36  ;;  %v18644_v36 = vld [vmem:[#allocation7 + $0x1914] sm:$0xf0] }
 0x1bd   : > { %8145 = vmatpush.bf16.msra.mxu3 %v14219_v39  ;;  %v16738_v39 = vld [vmem:[#allocation7 + $0x2260] sm:$0xf]  ;;  %v15515_v47 = vor.u32 %v18644_v36, %v15514_v35  ;;  %v18572_v35 = vld [vmem:[#allocation7 + $0x16d4] sm:$0xf0] }
 0x1be   : > { %8108 = vmatpush.bf16.msra.mxu0 %v12347_v52  ;;  %8121 = vmatpush.bf16.msra.mxu1 %v12923_v55  ;;  %v15442_v52 = vld [vmem:[#allocation7 + $0x1840] sm:$0xf]  ;;  %v7902_v54 = vpop.f32.mrf.mxu0  ;;  %v16739_v55 = vor.u32 %v18950_v44, %v16738_v39  ;;  %v16523_v39 = vor.u32 %v18896_v30, %v16522_v29  ;;  %v13428_v44 = vld [vmem:[#allocation7 + $0x8c8] sm:$0xf0]  ;;  %v18383_v30 = vld [vmem:[#allocation7 + $0x10f4] sm:$0xf] }
 0x1c0   : > { %8133 = vmatpush.bf16.msra.mxu2 %v13571_v60  ;;  %v14867_v60 = vor.u32 %v18482_v50, %v14866_v48  ;;  %v18734_v48 = vld [vmem:[#allocation7 + $0x1be4] sm:$0xf0] }
 0x1c1   : > { %8146 = vmatpush.bf16.msra.mxu3 %v14147_v4  ;;  %8109 = vmatmul.bf16.vlgmr.msra.gmra.mxu0 %v20064_v41  ;;  %v15443_v4 = vor.u32 %v18626_v53, %v15442_v52  ;;  %v16450_v53 = vld [vmem:[#allocation7 + $0x2020] sm:$0xf] }
 0x1c2   : > { %8153 = vmatpush.bf16.msrb.mxu0 %v15155_v56  ;;  %8166 = vmatpush.bf16.msrb.mxu1 %v15731_v59  ;;  %v16090_v56 = vld [vmem:[#allocation7 + $0x1d50] sm:$0xf]  ;;  %v7915_v59 = vpop.f32.mrf.mxu1 }
 0x1c3   : > { %8122 = vmatmul.bf16.vlgmr.msra.gmra.mxu1 %v20066_v45  ;;  %v7916_v3 = vadd.f32 %v7915_v59, %v7902_v54  ;;  %v16091_v9 = vor.u32 %v18788_v57, %v16090_v56  ;;  %v18878_v54 = vld [vmem:[#allocation7 + $0x2064] sm:$0xf0]  ;;  %v17951_v57 = vld [vmem:[#allocation7 + $0x374] sm:$0xf] }
 0x1c4   : > { %8134 = vmatpush.bf16.msra.mxu2 %v13499_v17  ;;  %v18914_v17 = vld [vmem:[#allocation7 + $0x2184] sm:$0xf0]  ;;  %v16451_v6 = vor.u32 %v18878_v54, %v16450_v53  ;;  %v18041_v53 = vld [vmem:[#allocation7 + $0x644] sm:$0xf]  ;;  %v13140_v54 = vld [vmem:[#allocation7 + $0x688] sm:$0xf0] }
 0x1c5   : > { %8147 = vmatpush.bf16.msra.mxu3 %v14075_v20 }
 0x1c6   : > { %8154 = vmatpush.bf16.msrb.mxu0 %v15083_v13  ;;  %8167 = vmatpush.bf16.msrb.mxu1 %v15659_v16  ;;  %v16018_v13 = vld [vmem:[#allocation7 + $0x1cc0] sm:$0xf]  ;;  %v7904_v23 = vpop.f32.mrf.mxu0 }
 0x1c7   : > { %8135 = vmatmul.bf16.vlgmr.msra.gmra.mxu2 %v20072_v2  ;;  %v16594_v16 = vld [vmem:[#allocation7 + $0x2140] sm:$0xf]  ;;  %v16019_v20 = vor.u32 %v18770_v15, %v16018_v13  ;;  %v14004_v13 = vld [vmem:[#allocation7 + $0xd48] sm:$0xf0]  ;;  %v12783_v15 = vor.u32 %v17951_v57, %v12780_v63  ;;  %v18077_v23 = vld [vmem:[#allocation7 + $0x764] sm:$0xf] }
 0x1c8   : > { %8179 = vmatpush.bf16.msrb.mxu2 %v16307_v21  ;;  %8148 = vmatmul.bf16.vlgmr.msra.gmra.mxu3 %v20074_v8  ;;  %v15298_v21 = vld [vmem:[#allocation7 + $0x1720] sm:$0xf]  ;;  %v16595_v24 = vor.u32 %v18914_v17, %v16594_v16  ;;  %v14580_v16 = vld [vmem:[#allocation7 + $0x11c8] sm:$0xf0]  ;;  %v18203_v57 = vld [vmem:[#allocation7 + $0xb54] sm:$0xf] }
 0x1c9   : > { %8192 = vmatpush.bf16.msrb.mxu3 %v16883_v25  ;;  %v15946_v25 = vld [vmem:[#allocation7 + $0x1c30] sm:$0xf]  ;;  %v15299_v32 = vor.u32 %v18590_v22, %v15298_v21  ;;  %v16379_v21 = vor.u32 %v18860_v10, %v16378_v61  ;;  %v12492_v61 = vld [vmem:[#allocation7 + $0x178] sm:$0xf0] }
 0x1ca   : > { %8155 = vmatpush.bf16.msrb.mxu0 %v15011_v28  ;;  %8168 = vmatpush.bf16.msrb.mxu1 %v15587_v31  ;;  %v7917_v27 = vpop.f32.mrf.mxu1  ;;  %v14723_v28 = vor.u32 %v18446_v34, %v14722_v19  ;;  %v14650_v31 = vld [vmem:[#allocation7 + $0x1210] sm:$0xf]  ;;  %v15947_v36 = vor.u32 %v18752_v26, %v15946_v25  ;;  %v17933_v19 = vld [vmem:[#allocation7 + $0x2e4] sm:$0xf]  ;;  %v12708_v34 = vld [vmem:[#allocation7 + $0x328] sm:$0xf0] }
 0x1cb   : > { %v14651_v52 = vor.u32 %v18428_v33, %v14650_v31  ;;  %v18239_v27 = vld [vmem:[#allocation7 + $0xc74] sm:$0xf]  ;;  %v12711_v29 = vor.u32 %v17933_v19, %v12708_v34  ;;  %v14508_v31 = vld [vmem:[#allocation7 + $0x1138] sm:$0xf0]  ;;  %v14292_v19 = vld [vmem:[#allocation7 + $0xf88] sm:$0xf0] }
 0x1cc   : > { %8180 = vmatpush.bf16.msrb.mxu2 %v16235_v12  ;;  %v15226_v12 = vld [vmem:[#allocation7 + $0x1690] sm:$0xf]  ;;  %v17915_v33 = vld [vmem:[#allocation7 + $0x254] sm:$0xf] }
 0x1cd   : > { %8193 = vmatpush.bf16.msrb.mxu3 %v16811_v37  ;;  %v17969_v37 = vld [vmem:[#allocation7 + $0x404] sm:$0xf] }
 0x1ce   : > { %8156 = vmatpush.bf16.msrb.mxu0 %v14939_v43  ;;  %8169 = vmatpush.bf16.msrb.mxu1 %v15515_v47  ;;  %v7928_v43 = vpop.f32.mrf.mxu2  ;;  %v15874_v47 = vld [vmem:[#allocation7 + $0x1ba0] sm:$0xf]  ;;  %v12855_v56 = vor.u32 %v17969_v37, %v12852_v40  ;;  %v13212_v37 = vld [vmem:[#allocation7 + $0x718] sm:$0xf0]  ;;  %v14511_v40 = vor.u32 %v18383_v30, %v14508_v31  ;;  %v18311_v31 = vld [vmem:[#allocation7 + $0xeb4] sm:$0xf] }
 0x1cf   : > { %v7929_v50 = vadd.f32 %v7928_v43, %v7916_v3  ;;  %v15875_v62 = vor.u32 %v18734_v48, %v15874_v47  ;;  %v15802_v3 = vld [vmem:[#allocation7 + $0x1b10] sm:$0xf]  ;;  %v13860_v43 = vld [vmem:[#allocation7 + $0xc28] sm:$0xf0] }
 0x1d0   : > { %8181 = vmatpush.bf16.msrb.mxu2 %v16163_v51  ;;  %v7941_v51 = vpop.f32.mrf.mxu3  ;;  %v14436_v47 = vld [vmem:[#allocation7 + $0x10a8] sm:$0xf0] }
 0x1d1   : > { %8194 = vmatpush.bf16.msrb.mxu3 %v16739_v55  ;;  %v15227_v55 = vor.u32 %v18572_v35, %v15226_v12  ;;  %v20129_v59 = vadd.f32 %v7941_v51, %v7929_v50  ;;  %v12636_v12 = vld [vmem:[#allocation7 + $0x298] sm:$0xf0]  ;;  %v17897_v50 = vld [vmem:[#allocation7 + $0x1c4] sm:$0xf]  ;;  %v12564_v51 = vld [vmem:[#allocation7 + $0x208] sm:$0xf0] }
 0x1d2   : > { %8157 = vmatpush.bf16.msrb.mxu0 %v14867_v60  ;;  %8170 = vmatpush.bf16.msrb.mxu1 %v15443_v4  ;;  %v13431_v60 = vor.u32 %v18113_v42, %v13428_v44  ;;  %v18095_v4 = vld [vmem:[#allocation7 + $0x7f4] sm:$0xf]  ;;  %v18221_v42 = vld [vmem:[#allocation7 + $0xbe4] sm:$0xf] }
 0x1d3   : > { %v13359_v17 = vor.u32 %v18095_v4, %v13356_v5  ;;  %v18365_v44 = vld [vmem:[#allocation7 + $0x1064] sm:$0xf]  ;;  %v12567_v4 = vor.u32 %v17897_v50, %v12564_v51  ;;  %v18347_v5 = vld [vmem:[#allocation7 + $0xfd4] sm:$0xf]  ;;  %v13572_v51 = vld [vmem:[#allocation7 + $0x9e8] sm:$0xf0] }
 0x1d4   : > { %8182 = vmatpush.bf16.msrb.mxu2 %v16091_v9  ;;  %v18716_v9 = vld [vmem:[#allocation7 + $0x1b54] sm:$0xf0]  ;;  %v18149_v50 = vld [vmem:[#allocation7 + $0x9a4] sm:$0xf] }
 0x1d5   : > { %8195 = vmatpush.bf16.msrb.mxu3 %v16667_v11  ;;  %v18257_v11 = vld [vmem:[#allocation7 + $0xd04] sm:$0xf] }
 0x1d6   : > { %8158 = vmatpush.bf16.msrb.mxu0 %v14795_v1  ;;  %8171 = vmatpush.bf16.msrb.mxu1 %v15371_v18  ;;  %v18401_v1 = vld [vmem:[#allocation7 + $0x1184] sm:$0xf]  ;;  %v15803_v18 = vor.u32 %v18716_v9, %v15802_v3  ;;  %v14007_v22 = vor.u32 %v18257_v11, %v14004_v13  ;;  %v13143_v3 = vor.u32 %v18041_v53, %v13140_v54  ;;  %v17879_v9 = vld [vmem:[#allocation7 + $0x134] sm:$0xf] }
 0x1d7   : > { %v14583_v26 = vor.u32 %v18401_v1, %v14580_v16  ;;  %v18023_v13 = vld [vmem:[#allocation7 + $0x5b4] sm:$0xf]  ;;  %v18185_v16 = vld [vmem:[#allocation7 + $0xac4] sm:$0xf] }
 0x1d8   : > { %8183 = vmatpush.bf16.msrb.mxu2 %v16019_v20  ;;  %v7930_v20 = vpop.f32.mrf.mxu2  ;;  %v7943_v25 = vpop.f32.mrf.mxu3 }
 0x1d9   : > { %8196 = vmatpush.bf16.msrb.mxu3 %v16595_v24  ;;  %v13284_v24 = vld [vmem:[#allocation7 + $0x7a8] sm:$0xf0]  ;;  %v17861_v20 = vld [vmem:[#allocation7 + $0xa4] sm:$0xf] }
 0x1da   : > { %8159 = vmatpush.bf16.msrb.mxu0 %v14723_v28  ;;  %8172 = vmatpush.bf16.msrb.mxu1 %v15299_v32  ;;  %v13932_v28 = vld [vmem:[#allocation7 + $0xcb8] sm:$0xf0]  ;;  %v13287_v32 = vor.u32 %v18077_v23, %v13284_v24  ;;  %v18005_v23 = vld [vmem:[#allocation7 + $0x524] sm:$0xf]  ;;  %v12996_v24 = vld [vmem:[#allocation7 + $0x568] sm:$0xf0] }
 0x1db   : > { %v13935_v35 = vor.u32 %v18239_v27, %v13932_v28  ;;  %v18167_v27 = vld [vmem:[#allocation7 + $0xa34] sm:$0xf]  ;;  %v13644_v28 = vld [vmem:[#allocation7 + $0xa78] sm:$0xf0] }
 0x1dc   : > { %8184 = vmatpush.bf16.msrb.mxu2 %v15947_v36  ;;  %v18059_v36 = vld [vmem:[#allocation7 + $0x6d4] sm:$0xf] }
 0x1dd   : > { %8197 = vmatpush.bf16.msrb.mxu3 %v16523_v39  ;;  %v12639_v39 = vor.u32 %v17915_v33, %v12636_v12  ;;  %v13215_v48 = vor.u32 %v18059_v36, %v13212_v37  ;;  %v17843_v33 = vld [vmem:[#allocation7 + $0x14] sm:$0xf]  ;;  %v12999_v12 = vor.u32 %v18005_v23, %v12996_v24  ;;  %v12924_v37 = vld [vmem:[#allocation7 + $0x4d8] sm:$0xf0] }
 0x1de   : > { %8160 = vmatpush.bf16.msrb.mxu0 %v14651_v52  ;;  %8173 = vmatpush.bf16.msrb.mxu1 %v15227_v55  ;;  %v13863_v52 = vor.u32 %v18221_v42, %v13860_v43  ;;  %v7954_v55 = vpop.f32.mrf.mxu0  ;;  %v17987_v36 = vld [vmem:[#allocation7 + $0x494] sm:$0xf]  ;;  %v18545_v42 = vld [vmem:[#allocation7 + $0x1604] sm:$0xf]  ;;  %v15156_v43 = vld [vmem:[#allocation7 + $0x1648] sm:$0xf0] }
 0x1e0   : > { %8185 = vmatpush.bf16.msrb.mxu2 %v15875_v62  ;;  %v7955_v62 = vadd.f32 %v7954_v55, %v20129_v59  ;;  %v7967_v63 = vpop.f32.mrf.mxu1  ;;  %v12495_v59 = vor.u32 %v17879_v9, %v12492_v61  ;;  %v18293_v55 = vld [vmem:[#allocation7 + $0xe24] sm:$0xf]  ;;  %v15660_v9 = vld [vmem:[#allocation7 + $0x1a38] sm:$0xf0] }
 0x1e1   : > { %8198 = vmatpush.bf16.msrb.mxu3 %v16451_v6  ;;  %8161 = vmatmul.bf16.vlgmr.msrb.gmra.mxu0 %v20080_v38  ;;  %v14364_v6 = vld [vmem:[#allocation7 + $0x1018] sm:$0xf0] }
 0x1e2   : > { %8205 = vmatpush.bf16.msra.mxu0 %v12855_v56  ;;  %8218 = vmatpush.bf16.msra.mxu1 %v13431_v60  ;;  %v14439_v56 = vor.u32 %v18365_v44, %v14436_v47  ;;  %v13788_v60 = vld [vmem:[#allocation7 + $0xb98] sm:$0xf0]  ;;  %v7968_v10 = vadd.f32 %v7967_v63, %v7955_v62  ;;  %v14367_v1 = vor.u32 %v18347_v5, %v14364_v6  ;;  %v18527_v62 = vld [vmem:[#allocation7 + $0x1574] sm:$0xf] }
 0x1e3   : > { %8174 = vmatmul.bf16.vlgmr.msrb.gmra.mxu1 %v20082_v46  ;;  %v13791_v11 = vor.u32 %v18203_v57, %v13788_v60  ;;  %v12927_v57 = vor.u32 %v17987_v36, %v12924_v37  ;;  %v15159_v60 = vor.u32 %v18545_v42, %v15156_v43  ;;  %v13575_v5 = vor.u32 %v18149_v50, %v13572_v51  ;;  %v15084_v6 = vld [vmem:[#allocation7 + $0x15b8] sm:$0xf0]  ;;  %v18491_v36 = vld [vmem:[#allocation7 + $0x1454] sm:$0xf]  ;;  %v18941_v50 = vld [vmem:[#allocation7 + $0x2264] sm:$0xf] }
 0x1e4   : > { %8186 = vmatpush.bf16.msrb.mxu2 %v15803_v18  ;;  %v18329_v18 = vld [vmem:[#allocation7 + $0xf44] sm:$0xf]  ;;  %v14940_v37 = vld [vmem:[#allocation7 + $0x1498] sm:$0xf0]  ;;  %v18635_v42 = vld [vmem:[#allocation7 + $0x18d4] sm:$0xf] }
 0x1e5   : > { %8199 = vmatpush.bf16.msrb.mxu3 %v16379_v21  ;;  %v12420_v21 = vld [vmem:[#allocation7 + $0xe8] sm:$0xf0]  ;;  %v15516_v43 = vld [vmem:[#allocation7 + $0x1918] sm:$0xf0] }
 0x1e6   : > { %8206 = vmatpush.bf16.msra.mxu0 %v12783_v15  ;;  %8219 = vmatpush.bf16.msra.mxu1 %v13359_v17  ;;  %v13068_v15 = vld [vmem:[#allocation7 + $0x5f8] sm:$0xf0]  ;;  %v13716_v17 = vld [vmem:[#allocation7 + $0xb08] sm:$0xf0]  ;;  %v7956_v25 = vpop.f32.mrf.mxu0  ;;  %v12423_v30 = vor.u32 %v17861_v20, %v12420_v21  ;;  %v18509_v21 = vld [vmem:[#allocation7 + $0x14e4] sm:$0xf] }
 0x1e7   : > { %8187 = vmatmul.bf16.vlgmr.msrb.gmra.mxu2 %v20088_v7  ;;  %v13071_v34 = vor.u32 %v18023_v13, %v13068_v15  ;;  %v18275_v13 = vld [vmem:[#allocation7 + $0xd94] sm:$0xf]  ;;  %v16740_v51 = vld [vmem:[#allocation7 + $0x22a8] sm:$0xf0] }
 0x1e8   : > { %8231 = vmatpush.bf16.msra.mxu2 %v14007_v22  ;;  %8200 = vmatmul.bf16.vlgmr.msrb.gmra.mxu3 %v20090_v14  ;;  %v13719_v22 = vor.u32 %v18185_v16, %v13716_v17  ;;  %v18833_v16 = vld [vmem:[#allocation7 + $0x1f04] sm:$0xf]  ;;  %v16308_v17 = vld [vmem:[#allocation7 + $0x1f48] sm:$0xf0] }
 0x1e9   : > { %8244 = vmatpush.bf16.msra.mxu3 %v14583_v26  ;;  %v14295_v26 = vor.u32 %v18329_v18, %v14292_v19  ;;  %v18977_v18 = vld [vmem:[#allocation7 + $0x2384] sm:$0xf]  ;;  %v16884_v19 = vld [vmem:[#allocation7 + $0x23c8] sm:$0xf0]  ;;  %v16311_v25 = vor.u32 %v18833_v16, %v16308_v17  ;;  %v18599_v17 = vld [vmem:[#allocation7 + $0x17b4] sm:$0xf] }
 0x1ea   : > { %8207 = vmatpush.bf16.msra.mxu0 %v12711_v29  ;;  %8220 = vmatpush.bf16.msra.mxu1 %v13287_v32  ;;  %v7969_v29 = vpop.f32.mrf.mxu1  ;;  %v14220_v32 = vld [vmem:[#allocation7 + $0xef8] sm:$0xf0]  ;;  %v7980_v44 = vpop.f32.mrf.mxu2 }
 0x1eb   : > { %v14223_v47 = vor.u32 %v18311_v31, %v14220_v32  ;;  %v7993_v53 = vpop.f32.mrf.mxu3  ;;  %v16887_v29 = vor.u32 %v18977_v18, %v16884_v19  ;;  %v16236_v31 = vld [vmem:[#allocation7 + $0x1eb8] sm:$0xf0]  ;;  %v18761_v19 = vld [vmem:[#allocation7 + $0x1cc4] sm:$0xf] }
 0x1ec   : > { %8232 = vmatpush.bf16.msra.mxu2 %v13935_v35  ;;  %v12348_v35 = vld [vmem:[#allocation7 + $0x58] sm:$0xf0] }
 0x1ed   : > { %8245 = vmatpush.bf16.msra.mxu3 %v14511_v40  ;;  %v13647_v40 = vor.u32 %v18167_v27, %v13644_v28  ;;  %v12351_v54 = vor.u32 %v17843_v33, %v12348_v35  ;;  %v15588_v27 = vld [vmem:[#allocation7 + $0x19a8] sm:$0xf0]  ;;  %v18959_v33 = vld [vmem:[#allocation7 + $0x22f4] sm:$0xf] }
 0x1ee   : > { %8208 = vmatpush.bf16.msra.mxu0 %v12639_v39  ;;  %8221 = vmatpush.bf16.msra.mxu1 %v13215_v48  ;;  %v18689_v39 = vld [vmem:[#allocation7 + $0x1a84] sm:$0xf]  ;;  %v15732_v48 = vld [vmem:[#allocation7 + $0x1ac8] sm:$0xf0] }
 0x1f0   : > { %8233 = vmatpush.bf16.msra.mxu2 %v13863_v52  ;;  %v7981_v52 = vadd.f32 %v7980_v44, %v7968_v10  ;;  %v18131_v10 = vld [vmem:[#allocation7 + $0x914] sm:$0xf]  ;;  %v18797_v44 = vld [vmem:[#allocation7 + $0x1de4] sm:$0xf] }
 0x1f1   : > { %8246 = vmatpush.bf16.msra.mxu3 %v14439_v56  ;;  %v14148_v56 = vld [vmem:[#allocation7 + $0xe68] sm:$0xf0] }
 0x1f2   : > { %8209 = vmatpush.bf16.msra.mxu0 %v12567_v4  ;;  %8222 = vmatpush.bf16.msra.mxu1 %v13143_v3  ;;  %v20136_v63 = vadd.f32 %v7993_v53, %v7981_v52  ;;  %v15735_v4 = vor.u32 %v18689_v39, %v15732_v48  ;;  %v18671_v3 = vld [vmem:[#allocation7 + $0x19f4] sm:$0xf]  ;;  %v14151_v61 = vor.u32 %v18293_v55, %v14148_v56  ;;  %v7982_v23 = vpop.f32.mrf.mxu2  ;;  %v18473_v53 = vld [vmem:[#allocation7 + $0x13c4] sm:$0xf] }
 0x1f3   : > { %v7995_v28 = vpop.f32.mrf.mxu3  ;;  %v14943_v48 = vor.u32 %v18491_v36, %v14940_v37  ;;  %v15519_v52 = vor.u32 %v18635_v42, %v15516_v43  ;;  %v18617_v56 = vld [vmem:[#allocation7 + $0x1844] sm:$0xf]  ;;  %v16524_v36 = vld [vmem:[#allocation7 + $0x20f8] sm:$0xf0]  ;;  %v18419_v37 = vld [vmem:[#allocation7 + $0x1214] sm:$0xf] }
 0x1f4   : > { %8234 = vmatpush.bf16.msra.mxu2 %v13791_v11  ;;  %v13500_v11 = vld [vmem:[#allocation7 + $0x958] sm:$0xf0]  ;;  %v9557_v15 = vpack.c.bf16 %v20136_v63, %v20114_v49  ;;  %v15300_v28 = vld [vmem:[#allocation7 + $0x1768] sm:$0xf0]  ;;  %v18563_v43 = vld [vmem:[#allocation7 + $0x1694] sm:$0xf] }
 0x1f5   : > { %8247 = vmatpush.bf16.msra.mxu3 %v14367_v1  ;;  %v14076_v1 = vld [vmem:[#allocation7 + $0xdd8] sm:$0xf0]  ;;  %v13503_v20 = vor.u32 %v18131_v10, %v13500_v11  ;;  %v17136_v49 = vld [vmem:[#allocation10 + $0x188] sm:$0xf]  ;;  %v19045_v63 = vld [vmem:[#allocation10 + $0x1a0] sm:$0xf0] }
 0x1f6   : > { %8210 = vmatpush.bf16.msra.mxu0 %v12495_v59  ;;  %8223 = vmatpush.bf16.msra.mxu1 %v13071_v34  ;;  %v15087_v59 = vor.u32 %v18527_v62, %v15084_v6  ;;  %v15663_v34 = vor.u32 %v18671_v3, %v15660_v9  ;;  %v14079_v24 = vor.u32 %v18275_v13, %v14076_v1  ;;  %v18923_v9 = vld [vmem:[#allocation7 + $0x21d4] sm:$0xf]  ;;  %v14796_v1 = vld [vmem:[#allocation7 + $0x1378] sm:$0xf0] }
 0x1f7   : > { %v16743_v62 = vor.u32 %v18941_v50, %v16740_v51  ;;  %v18455_v13 = vld [vmem:[#allocation7 + $0x1334] sm:$0xf]  ;;  %v14652_v42 = vld [vmem:[#allocation7 + $0x1258] sm:$0xf0]  ;;  %v13434_v50 = vld [vmem:[#allocation7 + $0x888] sm:$0xf] }
 0x1f8   : > { %8235 = vmatpush.bf16.msra.mxu2 %v13719_v22  ;;  %v15012_v22 = vld [vmem:[#allocation7 + $0x1528] sm:$0xf0] }
 0x1f9   : > { %8248 = vmatpush.bf16.msra.mxu3 %v14295_v26  ;;  %v18653_v26 = vld [vmem:[#allocation7 + $0x1964] sm:$0xf]  ;;  %v15015_v32 = vor.u32 %v18509_v21, %v15012_v22  ;;  %v16596_v22 = vld [vmem:[#allocation7 + $0x2188] sm:$0xf0] }
 0x1fa   : > { %8211 = vmatpush.bf16.msra.mxu0 %v12423_v30  ;;  %8224 = vmatpush.bf16.msra.mxu1 %v12999_v12  ;;  %v18815_v30 = vld [vmem:[#allocation7 + $0x1e74] sm:$0xf]  ;;  %v16812_v12 = vld [vmem:[#allocation7 + $0x2338] sm:$0xf0]  ;;  %v15591_v35 = vor.u32 %v18653_v26, %v15588_v27  ;;  %v18905_v21 = vld [vmem:[#allocation7 + $0x2144] sm:$0xf] }
 0x1fb   : > { %v16815_v39 = vor.u32 %v18959_v33, %v16812_v12  ;;  %v18581_v27 = vld [vmem:[#allocation7 + $0x1724] sm:$0xf] }
 0x1fc   : > { %8236 = vmatpush.bf16.msra.mxu2 %v13647_v40  ;;  %v16239_v40 = vor.u32 %v18815_v30, %v16236_v31  ;;  %v16599_v30 = vor.u32 %v18905_v21, %v16596_v22  ;;  %v18743_v31 = vld [vmem:[#allocation7 + $0x1c34] sm:$0xf]  ;;  %v14586_v22 = vld [vmem:[#allocation7 + $0x1188] sm:$0xf] }
 0x1fd   : > { %8249 = vmatpush.bf16.msra.mxu3 %v14223_v47  ;;  %v16164_v47 = vld [vmem:[#allocation7 + $0x1e28] sm:$0xf0] }
 0x1fe   : > { %8212 = vmatpush.bf16.msra.mxu0 %v12351_v54  ;;  %8225 = vmatpush.bf16.msra.mxu1 %v12927_v57  ;;  %v14868_v54 = vld [vmem:[#allocation7 + $0x1408] sm:$0xf0]  ;;  %v16167_v55 = vor.u32 %v18797_v44, %v16164_v47  ;;  %v12858_v47 = vld [vmem:[#allocation7 + $0x408] sm:$0xf] }
 0x1ff   : > { %v15444_v57 = vld [vmem:[#allocation7 + $0x1888] sm:$0xf0]  ;;  %v14871_v3 = vor.u32 %v18473_v53, %v14868_v54  ;;  %v18123_v53 = vld [vmem:[#allocation7 + $0x8cc] sm:$0xf0]  ;;  %v18725_v54 = vld [vmem:[#allocation7 + $0x1ba4] sm:$0xf] }
 0x200   : > { %8237 = vmatpush.bf16.msra.mxu2 %v13575_v5  ;;  %v16092_v5 = vld [vmem:[#allocation7 + $0x1d98] sm:$0xf0]  ;;  %v8019_v6 = vpop.f32.mrf.mxu1  ;;  %v15447_v11 = vor.u32 %v18617_v56, %v15444_v57 }
 0x201   : > { %8250 = vmatpush.bf16.msra.mxu3 %v14151_v61  ;;  %8213 = vmatmul.bf16.vlgmr.msra.gmra.mxu0 %v20064_v41  ;;  %v16668_v61 = vld [vmem:[#allocation7 + $0x2218] sm:$0xf0] }
 0x202   : > { %8257 = vmatpush.bf16.msrb.mxu0 %v15159_v60  ;;  %8270 = vmatpush.bf16.msrb.mxu1 %v15735_v4  ;;  %v8006_v60 = vpop.f32.mrf.mxu0  ;;  %v18779_v4 = vld [vmem:[#allocation7 + $0x1d54] sm:$0xf]  ;;  %v16671_v18 = vor.u32 %v18923_v9, %v16668_v61  ;;  %v13435_v61 = vor.u32 %v18123_v53, %v13434_v50  ;;  %v18069_v50 = vld [vmem:[#allocation7 + $0x71c] sm:$0xf0]  ;;  %v18231_v53 = vld [vmem:[#allocation7 + $0xc2c] sm:$0xf0] }
 0x203   : > { %8226 = vmatmul.bf16.vlgmr.msra.gmra.mxu1 %v20066_v45  ;;  %v8020_v10 = vadd.f32 %v8019_v6, %v8006_v60  ;;  %v16095_v16 = vor.u32 %v18779_v4, %v16092_v5  ;;  %v14655_v60 = vor.u32 %v18419_v37, %v14652_v42  ;;  %v16452_v4 = vld [vmem:[#allocation7 + $0x2068] sm:$0xf0]  ;;  %v18393_v42 = vld [vmem:[#allocation7 + $0x113c] sm:$0xf0] }
 0x204   : > { %8238 = vmatpush.bf16.msra.mxu2 %v13503_v20  ;;  %v14799_v20 = vor.u32 %v18455_v13, %v14796_v1  ;;  %v17961_v13 = vld [vmem:[#allocation7 + $0x3bc] sm:$0xf0]  ;;  %v13362_v1 = vld [vmem:[#allocation7 + $0x7f8] sm:$0xf] }
 0x205   : > { %8251 = vmatpush.bf16.msra.mxu3 %v14079_v24  ;;  %v18437_v24 = vld [vmem:[#allocation7 + $0x12a4] sm:$0xf] }
 0x206   : > { %8258 = vmatpush.bf16.msrb.mxu0 %v15087_v59  ;;  %8271 = vmatpush.bf16.msrb.mxu1 %v15663_v34  ;;  %v15372_v59 = vld [vmem:[#allocation7 + $0x17f8] sm:$0xf0]  ;;  %v16020_v34 = vld [vmem:[#allocation7 + $0x1d08] sm:$0xf0] }
 0x207   : > { %8239 = vmatmul.bf16.vlgmr.msra.gmra.mxu2 %v20072_v2  ;;  %v15375_v23 = vor.u32 %v18599_v17, %v15372_v59  ;;  %v16023_v26 = vor.u32 %v18761_v19, %v16020_v34  ;;  %v15804_v59 = vld [vmem:[#allocation7 + $0x1b58] sm:$0xf0]  ;;  %v14010_v34 = vld [vmem:[#allocation7 + $0xd08] sm:$0xf] }
 0x208   : > { %8283 = vmatpush.bf16.msrb.mxu2 %v16311_v25  ;;  %8252 = vmatmul.bf16.vlgmr.msra.gmra.mxu3 %v20074_v8  ;;  %v14724_v25 = vld [vmem:[#allocation7 + $0x12e8] sm:$0xf0]  ;;  %v8021_v33 = vpop.f32.mrf.mxu1  ;;  %v16380_v19 = vld [vmem:[#allocation7 + $0x1fd8] sm:$0xf0] }
 0x209   : > { %8296 = vmatpush.bf16.msrb.mxu3 %v16887_v29  ;;  %v14727_v12 = vor.u32 %v18437_v24, %v14724_v25 }
 0x20a   : > { %8259 = vmatpush.bf16.msrb.mxu0 %v15015_v32  ;;  %8272 = vmatpush.bf16.msrb.mxu1 %v15591_v35  ;;  %v8008_v29 = vpop.f32.mrf.mxu0  ;;  %v15948_v32 = vld [vmem:[#allocation7 + $0x1c78] sm:$0xf0]  ;;  %v18887_v35 = vld [vmem:[#allocation7 + $0x20b4] sm:$0xf]  ;;  %v8032_v51 = vpop.f32.mrf.mxu2 }
 0x20b   : > { %v15951_v44 = vor.u32 %v18743_v31, %v15948_v32  ;;  %v8033_v56 = vadd.f32 %v8032_v51, %v8020_v10  ;;  %v8045_v57 = vpop.f32.mrf.mxu3  ;;  %v18707_v10 = vld [vmem:[#allocation7 + $0x1b14] sm:$0xf]  ;;  %v13290_v31 = vld [vmem:[#allocation7 + $0x768] sm:$0xf]  ;;  %v18087_v32 = vld [vmem:[#allocation7 + $0x7ac] sm:$0xf0] }
 0x20c   : > { %8284 = vmatpush.bf16.msrb.mxu2 %v16239_v40  ;;  %v15303_v40 = vor.u32 %v18581_v27, %v15300_v28  ;;  %v15807_v25 = vor.u32 %v18707_v10, %v15804_v59  ;;  %v17943_v27 = vld [vmem:[#allocation7 + $0x32c] sm:$0xf0]  ;;  %v14370_v10 = vld [vmem:[#allocation7 + $0xfd8] sm:$0xf]  ;;  %v18357_v59 = vld [vmem:[#allocation7 + $0x101c] sm:$0xf0] }
 0x20d   : > { %8297 = vmatpush.bf16.msrb.mxu3 %v16815_v39  ;;  %v15228_v39 = vld [vmem:[#allocation7 + $0x16d8] sm:$0xf0]  ;;  %v20144_v9 = vadd.f32 %v8045_v57, %v8033_v56  ;;  %v18375_v56 = vld [vmem:[#allocation7 + $0x10ac] sm:$0xf0] }
 0x20e   : > { %8260 = vmatpush.bf16.msrb.mxu0 %v14943_v48  ;;  %8273 = vmatpush.bf16.msrb.mxu1 %v15519_v52  ;;  %v17979_v48 = vld [vmem:[#allocation7 + $0x44c] sm:$0xf0]  ;;  %v16527_v52 = vor.u32 %v18887_v35, %v16524_v36  ;;  %v15231_v5 = vor.u32 %v18563_v43, %v15228_v39  ;;  %v13938_v35 = vld [vmem:[#allocation7 + $0xc78] sm:$0xf]  ;;  %v18249_v36 = vld [vmem:[#allocation7 + $0xcbc] sm:$0xf0]  ;;  %v13291_v43 = vor.u32 %v18087_v32, %v13290_v31 }
 0x20f   : > { %v12859_v6 = vor.u32 %v17979_v48, %v12858_v47  ;;  %v12642_v39 = vld [vmem:[#allocation7 + $0x258] sm:$0xf]  ;;  %v13939_v47 = vor.u32 %v18249_v36, %v13938_v35  ;;  %v17871_v31 = vld [vmem:[#allocation7 + $0xec] sm:$0xf0] }
 0x210   : > { %8285 = vmatpush.bf16.msrb.mxu2 %v16167_v55  ;;  %v15876_v55 = vld [vmem:[#allocation7 + $0x1be8] sm:$0xf0]  ;;  %v13218_v48 = vld [vmem:[#allocation7 + $0x6d8] sm:$0xf] }
 0x211   : > { %8298 = vmatpush.bf16.msrb.mxu3 %v16743_v62  ;;  %v18869_v62 = vld [vmem:[#allocation7 + $0x2024] sm:$0xf]  ;;  %v13219_v57 = vor.u32 %v18069_v50, %v13218_v48  ;;  %v17853_v50 = vld [vmem:[#allocation7 + $0x5c] sm:$0xf0] }
 0x212   : > { %8261 = vmatpush.bf16.msrb.mxu0 %v14871_v3  ;;  %8274 = vmatpush.bf16.msrb.mxu1 %v15447_v11  ;;  %v12786_v3 = vld [vmem:[#allocation7 + $0x378] sm:$0xf]  ;;  %v15879_v11 = vor.u32 %v18725_v54, %v15876_v55  ;;  %v16455_v17 = vor.u32 %v18869_v62, %v16452_v4  ;;  %v8034_v28 = vpop.f32.mrf.mxu2  ;;  %v14442_v55 = vld [vmem:[#allocation7 + $0x1068] sm:$0xf]  ;;  %v17907_v62 = vld [vmem:[#allocation7 + $0x20c] sm:$0xf0] }
 0x213   : > { %v12787_v21 = vor.u32 %v17961_v13, %v12786_v3  ;;  %v8047_v33 = vpop.f32.mrf.mxu3  ;;  %v18213_v13 = vld [vmem:[#allocation7 + $0xb9c] sm:$0xf0]  ;;  %v18339_v28 = vld [vmem:[#allocation7 + $0xf8c] sm:$0xf0] }
 0x214   : > { %8286 = vmatpush.bf16.msrb.mxu2 %v16095_v16  ;;  %v18105_v16 = vld [vmem:[#allocation7 + $0x83c] sm:$0xf0]  ;;  %v13002_v33 = vld [vmem:[#allocation7 + $0x528] sm:$0xf] }
 0x215   : > { %8299 = vmatpush.bf16.msrb.mxu3 %v16671_v18  ;;  %v18851_v18 = vld [vmem:[#allocation7 + $0x1f94] sm:$0xf]  ;;  %v13363_v24 = vor.u32 %v18105_v16, %v13362_v1 }
 0x216   : > { %8262 = vmatpush.bf16.msrb.mxu0 %v14799_v20  ;;  %8275 = vmatpush.bf16.msrb.mxu1 %v15375_v23  ;;  %v18267_v20 = vld [vmem:[#allocation7 + $0xd4c] sm:$0xf0]  ;;  %v16383_v29 = vor.u32 %v18851_v18, %v16380_v19  ;;  %v12498_v19 = vld [vmem:[#allocation7 + $0x138] sm:$0xf] }
 0x217   : > { %v18411_v23 = vld [vmem:[#allocation7 + $0x11cc] sm:$0xf0] }
 0x218   : > { %8287 = vmatpush.bf16.msrb.mxu2 %v16023_v26  ;;  %v12714_v26 = vld [vmem:[#allocation7 + $0x2e8] sm:$0xf] }
 0x219   : > { %8300 = vmatpush.bf16.msrb.mxu3 %v16599_v30  ;;  %v14011_v30 = vor.u32 %v18267_v20, %v14010_v34  ;;  %v12715_v37 = vor.u32 %v17943_v27, %v12714_v26  ;;  %v17889_v34 = vld [vmem:[#allocation7 + $0x17c] sm:$0xf0]  ;;  %v18195_v26 = vld [vmem:[#allocation7 + $0xb0c] sm:$0xf0]  ;;  %v14298_v27 = vld [vmem:[#allocation7 + $0xf48] sm:$0xf] }
 0x21a   : > { %8263 = vmatpush.bf16.msrb.mxu0 %v14727_v12  ;;  %8276 = vmatpush.bf16.msrb.mxu1 %v15303_v40  ;;  %v14587_v12 = vor.u32 %v18411_v23, %v14586_v22  ;;  %v14514_v40 = vld [vmem:[#allocation7 + $0x10f8] sm:$0xf]  ;;  %v18033_v23 = vld [vmem:[#allocation7 + $0x5fc] sm:$0xf0]  ;;  %v14299_v36 = vor.u32 %v18339_v28, %v14298_v27  ;;  %v18843_v27 = vld [vmem:[#allocation7 + $0x1f4c] sm:$0xf0] }
 0x21b   : > { %v14515_v51 = vor.u32 %v18393_v42, %v14514_v40  ;;  %v13074_v22 = vld [vmem:[#allocation7 + $0x5b8] sm:$0xf]  ;;  %v18177_v40 = vld [vmem:[#allocation7 + $0xa7c] sm:$0xf0] }
 0x21c   : > { %8288 = vmatpush.bf16.msrb.mxu2 %v15951_v44  ;;  %v17925_v44 = vld [vmem:[#allocation7 + $0x29c] sm:$0xf0] }
 0x21d   : > { %8301 = vmatpush.bf16.msrb.mxu3 %v16527_v52  ;;  %v13866_v52 = vld [vmem:[#allocation7 + $0xbe8] sm:$0xf]  ;;  %v12643_v54 = vor.u32 %v17925_v44, %v12642_v39  ;;  %v14226_v39 = vld [vmem:[#allocation7 + $0xeb8] sm:$0xf]  ;;  %v18321_v44 = vld [vmem:[#allocation7 + $0xefc] sm:$0xf0] }
 0x21e   : > { %8264 = vmatpush.bf16.msrb.mxu0 %v14655_v60  ;;  %8277 = vmatpush.bf16.msrb.mxu1 %v15231_v5  ;;  %v12570_v60 = vld [vmem:[#allocation7 + $0x1c8] sm:$0xf]  ;;  %v13867_v4 = vor.u32 %v18231_v53, %v13866_v52  ;;  %v8058_v3 = vpop.f32.mrf.mxu0  ;;  %v17997_v52 = vld [vmem:[#allocation7 + $0x4dc] sm:$0xf0] }
 0x21f   : > { %v13146_v5 = vld [vmem:[#allocation7 + $0x648] sm:$0xf]  ;;  %v8059_v1 = vadd.f32 %v8058_v3, %v20144_v9  ;;  %v12499_v9 = vor.u32 %v17889_v34, %v12498_v19  ;;  %v18537_v19 = vld [vmem:[#allocation7 + $0x15bc] sm:$0xf0]  ;;  %v15666_v34 = vld [vmem:[#allocation7 + $0x19f8] sm:$0xf] }
 0x220   : > { %8289 = vmatpush.bf16.msrb.mxu2 %v15879_v11  ;;  %v13794_v11 = vld [vmem:[#allocation7 + $0xb58] sm:$0xf]  ;;  %v8071_v16 = vpop.f32.mrf.mxu1 }
 0x221   : > { %8302 = vmatpush.bf16.msrb.mxu3 %v16455_v17  ;;  %8265 = vmatmul.bf16.vlgmr.msrb.gmra.mxu0 %v20080_v38  ;;  %v12571_v17 = vor.u32 %v17907_v62, %v12570_v60  ;;  %v8072_v20 = vadd.f32 %v8071_v16, %v8059_v1  ;;  %v14227_v60 = vor.u32 %v18321_v44, %v14226_v39  ;;  %v18699_v62 = vld [vmem:[#allocation7 + $0x1acc] sm:$0xf0]  ;;  %v16242_v44 = vld [vmem:[#allocation7 + $0x1e78] sm:$0xf] }
 0x222   : > { %8309 = vmatpush.bf16.msra.mxu0 %v12859_v6  ;;  %8322 = vmatpush.bf16.msra.mxu1 %v13435_v61  ;;  %v18051_v6 = vld [vmem:[#allocation7 + $0x68c] sm:$0xf0]  ;;  %v14443_v61 = vor.u32 %v18375_v56, %v14442_v55  ;;  %v15738_v56 = vld [vmem:[#allocation7 + $0x1a88] sm:$0xf] }
 0x223   : > { %8278 = vmatmul.bf16.vlgmr.msrb.gmra.mxu1 %v20082_v46  ;;  %v13147_v18 = vor.u32 %v18051_v6, %v13146_v5  ;;  %v18555_v55 = vld [vmem:[#allocation7 + $0x164c] sm:$0xf0] }
 0x224   : > { %8290 = vmatpush.bf16.msrb.mxu2 %v15807_v25  ;;  %v13722_v25 = vld [vmem:[#allocation7 + $0xac8] sm:$0xf]  ;;  %v18159_v5 = vld [vmem:[#allocation7 + $0x9ec] sm:$0xf0] }
 0x225   : > { %8303 = vmatpush.bf16.msrb.mxu3 %v16383_v29  ;;  %v13075_v29 = vor.u32 %v18033_v23, %v13074_v22  ;;  %v13723_v32 = vor.u32 %v18195_v26, %v13722_v25  ;;  %v18141_v23 = vld [vmem:[#allocation7 + $0x95c] sm:$0xf0] }
 0x226   : > { %8310 = vmatpush.bf16.msra.mxu0 %v12787_v21  ;;  %8323 = vmatpush.bf16.msra.mxu1 %v13363_v24  ;;  %v13795_v21 = vor.u32 %v18213_v13, %v13794_v11  ;;  %v14371_v24 = vor.u32 %v18357_v59, %v14370_v10  ;;  %v8060_v35 = vpop.f32.mrf.mxu0  ;;  %v14154_v11 = vld [vmem:[#allocation7 + $0xe28] sm:$0xf]  ;;  %v18303_v13 = vld [vmem:[#allocation7 + $0xe6c] sm:$0xf0]  ;;  %v15739_v59 = vor.u32 %v18699_v62, %v15738_v56  ;;  %v18285_v26 = vld [vmem:[#allocation7 + $0xddc] sm:$0xf0] }
 0x227   : > { %8291 = vmatmul.bf16.vlgmr.msrb.gmra.mxu2 %v20088_v7  ;;  %v14155_v22 = vor.u32 %v18303_v13, %v14154_v11  ;;  %v15522_v56 = vld [vmem:[#allocation7 + $0x18d8] sm:$0xf]  ;;  %v16170_v62 = vld [vmem:[#allocation7 + $0x1de8] sm:$0xf]  ;;  %v18483_v13 = vld [vmem:[#allocation7 + $0x140c] sm:$0xf0] }
 0x228   : > { %8335 = vmatpush.bf16.msra.mxu2 %v14011_v30  ;;  %8304 = vmatmul.bf16.vlgmr.msrb.gmra.mxu3 %v20090_v14  ;;  %v12426_v30 = vld [vmem:[#allocation7 + $0xa8] sm:$0xf]  ;;  %v8073_v42 = vpop.f32.mrf.mxu1 }
 0x229   : > { %8348 = vmatpush.bf16.msra.mxu3 %v14587_v12  ;;  %v18015_v12 = vld [vmem:[#allocation7 + $0x56c] sm:$0xf0]  ;;  %v14874_v11 = vld [vmem:[#allocation7 + $0x13c8] sm:$0xf] }
 0x22a   : > { %8311 = vmatpush.bf16.msra.mxu0 %v12715_v37  ;;  %8324 = vmatpush.bf16.msra.mxu1 %v13291_v43  ;;  %v13650_v37 = vld [vmem:[#allocation7 + $0xa38] sm:$0xf]  ;;  %v12427_v43 = vor.u32 %v17871_v31, %v12426_v30  ;;  %v13003_v48 = vor.u32 %v18015_v12, %v13002_v33  ;;  %v18987_v30 = vld [vmem:[#allocation7 + $0x23cc] sm:$0xf0]  ;;  %v15018_v33 = vld [vmem:[#allocation7 + $0x14e8] sm:$0xf] }
 0x22b   : > { %v13651_v53 = vor.u32 %v18177_v40, %v13650_v37  ;;  %v8097_v3 = vpop.f32.mrf.mxu3  ;;  %v18519_v12 = vld [vmem:[#allocation7 + $0x152c] sm:$0xf0]  ;;  %v15594_v40 = vld [vmem:[#allocation7 + $0x1968] sm:$0xf] }
 0x22c   : > { %8336 = vmatpush.bf16.msra.mxu2 %v13939_v47  ;;  %v12354_v47 = vld [vmem:[#allocation7 + $0x18] sm:$0xf]  ;;  %v18663_v42 = vld [vmem:[#allocation7 + $0x19ac] sm:$0xf0] }
 0x22d   : > { %8349 = vmatpush.bf16.msra.mxu3 %v14515_v51  ;;  %v12930_v51 = vld [vmem:[#allocation7 + $0x498] sm:$0xf] }
 0x22e   : > { %8312 = vmatpush.bf16.msra.mxu0 %v12643_v54  ;;  %8325 = vmatpush.bf16.msra.mxu1 %v13219_v57  ;;  %v15162_v54 = vld [vmem:[#allocation7 + $0x1608] sm:$0xf]  ;;  %v8084_v57 = vpop.f32.mrf.mxu2  ;;  %v12931_v1 = vor.u32 %v17997_v52, %v12930_v51  ;;  %v18969_v51 = vld [vmem:[#allocation7 + $0x233c] sm:$0xf0]  ;;  %v15595_v52 = vor.u32 %v18663_v42, %v15594_v40  ;;  %v18447_v42 = vld [vmem:[#allocation7 + $0x12ec] sm:$0xf0] }
 0x22f   : > { %v8085_v6 = vadd.f32 %v8084_v57, %v8072_v20  ;;  %v15163_v16 = vor.u32 %v18555_v55, %v15162_v54  ;;  %v13506_v20 = vld [vmem:[#allocation7 + $0x918] sm:$0xf]  ;;  %v18501_v54 = vld [vmem:[#allocation7 + $0x149c] sm:$0xf0]  ;;  %v14730_v40 = vld [vmem:[#allocation7 + $0x12a8] sm:$0xf] }
 0x230   : > { %8337 = vmatpush.bf16.msra.mxu2 %v13867_v4  ;;  %v13578_v4 = vld [vmem:[#allocation7 + $0x9a8] sm:$0xf]  ;;  %v18645_v57 = vld [vmem:[#allocation7 + $0x191c] sm:$0xf0] }
 0x231   : > { %8350 = vmatpush.bf16.msra.mxu3 %v14443_v61  ;;  %v12355_v61 = vor.u32 %v17853_v50, %v12354_v47  ;;  %v20151_v10 = vadd.f32 %v8097_v3, %v8085_v6  ;;  %v18825_v47 = vld [vmem:[#allocation7 + $0x1ebc] sm:$0xf0]  ;;  %v16818_v50 = vld [vmem:[#allocation7 + $0x22f8] sm:$0xf]  ;;  %v16746_v6 = vld [vmem:[#allocation7 + $0x2268] sm:$0xf] }
 0x232   : > { %8313 = vmatpush.bf16.msra.mxu0 %v12571_v17  ;;  %8326 = vmatpush.bf16.msra.mxu1 %v13147_v18  ;;  %v15090_v17 = vld [vmem:[#allocation7 + $0x1578] sm:$0xf]  ;;  %v13579_v18 = vor.u32 %v18159_v5, %v13578_v4  ;;  %v16243_v55 = vor.u32 %v18825_v47, %v16242_v44  ;;  %v18807_v4 = vld [vmem:[#allocation7 + $0x1e2c] sm:$0xf0] }
 0x233   : > { %v9558_v25 = vpack.c.bf16 %v20151_v10, %v20123_v58  ;;  %v15091_v28 = vor.u32 %v18537_v19, %v15090_v17  ;;  %v18951_v3 = vld [vmem:[#allocation7 + $0x22ac] sm:$0xf0]  ;;  %v16098_v19 = vld [vmem:[#allocation7 + $0x1d58] sm:$0xf]  ;;  %v17090_v58 = vld [vmem:[#allocation10 + $0x13c] sm:$0xf0] }
 0x234   : > { %8338 = vmatpush.bf16.msra.mxu2 %v13795_v21  ;;  %v18681_v21 = vld [vmem:[#allocation7 + $0x1a3c] sm:$0xf0]  ;;  %v18627_v17 = vld [vmem:[#allocation7 + $0x188c] sm:$0xf0] }
 0x235   : > { %8351 = vmatpush.bf16.msra.mxu3 %v14371_v24  ;;  %v14082_v24 = vld [vmem:[#allocation7 + $0xd98] sm:$0xf]  ;;  %v15667_v31 = vor.u32 %v18681_v21, %v15666_v34  ;;  %v18789_v34 = vld [vmem:[#allocation7 + $0x1d9c] sm:$0xf0]  ;;  %v18591_v44 = vld [vmem:[#allocation7 + $0x176c] sm:$0xf0] }
 0x236   : > { %8314 = vmatpush.bf16.msra.mxu0 %v12499_v9  ;;  %8327 = vmatpush.bf16.msra.mxu1 %v13075_v29  ;;  %v16314_v9 = vld [vmem:[#allocation7 + $0x1f08] sm:$0xf]  ;;  %v8086_v35 = vpop.f32.mrf.mxu2 }
 0x237   : > { %v16890_v29 = vld [vmem:[#allocation7 + $0x2388] sm:$0xf]  ;;  %v16315_v37 = vor.u32 %v18843_v27, %v16314_v9  ;;  %v14802_v9 = vld [vmem:[#allocation7 + $0x1338] sm:$0xf]  ;;  %v18465_v27 = vld [vmem:[#allocation7 + $0x137c] sm:$0xf0] }
 0x238   : > { %8339 = vmatpush.bf16.msra.mxu2 %v13723_v32  ;;  %v13507_v32 = vor.u32 %v18141_v23, %v13506_v20  ;;  %v16891_v39 = vor.u32 %v18987_v30, %v16890_v29  ;;  %v16674_v20 = vld [vmem:[#allocation7 + $0x21d8] sm:$0xf]  ;;  %v18933_v23 = vld [vmem:[#allocation7 + $0x221c] sm:$0xf0]  ;;  %v16602_v35 = vld [vmem:[#allocation7 + $0x2148] sm:$0xf] }
 0x239   : > { %8352 = vmatpush.bf16.msra.mxu3 %v14299_v36  ;;  %v14083_v36 = vor.u32 %v18285_v26, %v14082_v24  ;;  %v15378_v29 = vld [vmem:[#allocation7 + $0x17b8] sm:$0xf]  ;;  %v18609_v30 = vld [vmem:[#allocation7 + $0x17fc] sm:$0xf0] }
 0x23a   : > { %8315 = vmatpush.bf16.msra.mxu0 %v12427_v43  ;;  %8328 = vmatpush.bf16.msra.mxu1 %v13003_v48  ;;  %v8099_v43 = vpop.f32.mrf.mxu3  ;;  %v15019_v48 = vor.u32 %v18519_v12, %v15018_v33  ;;  %v18771_v33 = vld [vmem:[#allocation7 + $0x1d0c] sm:$0xf0]  ;;  %v14803_v12 = vor.u32 %v18465_v27, %v14802_v9 }
 0x23c   : > { %8340 = vmatpush.bf16.msra.mxu2 %v13651_v53  ;;  %v14946_v53 = vld [vmem:[#allocation7 + $0x1458] sm:$0xf] }
 0x23d   : > { %8353 = vmatpush.bf16.msra.mxu3 %v14227_v60  ;;  %v16819_v60 = vor.u32 %v18969_v51, %v16818_v50  ;;  %v14947_v5 = vor.u32 %v18501_v54, %v14946_v53  ;;  %v15954_v50 = vld [vmem:[#allocation7 + $0x1c38] sm:$0xf]  ;;  %v18753_v51 = vld [vmem:[#allocation7 + $0x1c7c] sm:$0xf0]  ;;  %v14731_v53 = vor.u32 %v18447_v42, %v14730_v40  ;;  %v18402_v40 = vld [vmem:[#allocation7 + $0x118c] sm:$0xf] }
 0x23e   : > { %8316 = vmatpush.bf16.msra.mxu0 %v12355_v61  ;;  %8329 = vmatpush.bf16.msra.mxu1 %v12931_v1  ;;  %v15523_v61 = vor.u32 %v18645_v57, %v15522_v56  ;;  %v16171_v1 = vor.u32 %v18807_v4, %v16170_v62  ;;  %v16530_v54 = vld [vmem:[#allocation7 + $0x20b8] sm:$0xf]  ;;  %v18573_v4 = vld [vmem:[#allocation7 + $0x16dc] sm:$0xf0]  ;;  %v14588_v42 = vld [vmem:[#allocation7 + $0x11d0] sm:$0xf0] }
 0x23f   : > { %v14658_v56 = vld [vmem:[#allocation7 + $0x1218] sm:$0xf] }
 0x240   : > { %8341 = vmatpush.bf16.msra.mxu2 %v13579_v18  ;;  %v16747_v18 = vor.u32 %v18951_v3, %v16746_v6  ;;  %v8123_v21 = vpop.f32.mrf.mxu1  ;;  %v15234_v62 = vld [vmem:[#allocation7 + $0x1698] sm:$0xf]  ;;  %v17970_v6 = vld [vmem:[#allocation7 + $0x40c] sm:$0xf]  ;;  %v12860_v3 = vld [vmem:[#allocation7 + $0x450] sm:$0xf0] }
 0x241   : > { %8354 = vmatpush.bf16.msra.mxu3 %v14155_v22  ;;  %8317 = vmatmul.bf16.vlgmr.msra.gmra.mxu0 %v20064_v41  ;;  %v14875_v22 = vor.u32 %v18483_v13, %v14874_v11 }
 0x242   : > { %8361 = vmatpush.bf16.msrb.mxu0 %v15163_v16  ;;  %8374 = vmatpush.bf16.msrb.mxu1 %v15739_v59  ;;  %v15450_v16 = vld [vmem:[#allocation7 + $0x1848] sm:$0xf]  ;;  %v8110_v59 = vpop.f32.mrf.mxu0 }
 0x243   : > { %8330 = vmatmul.bf16.vlgmr.msra.gmra.mxu1 %v20066_v45  ;;  %v8124_v24 = vadd.f32 %v8123_v21, %v8110_v59  ;;  %v15451_v26 = vor.u32 %v18627_v17, %v15450_v16  ;;  %v15882_v16 = vld [vmem:[#allocation7 + $0x1ba8] sm:$0xf]  ;;  %v18735_v17 = vld [vmem:[#allocation7 + $0x1bec] sm:$0xf0] }
 0x244   : > { %8342 = vmatpush.bf16.msra.mxu2 %v13507_v32  ;;  %v16026_v32 = vld [vmem:[#allocation7 + $0x1cc8] sm:$0xf]  ;;  %v18879_v21 = vld [vmem:[#allocation7 + $0x206c] sm:$0xf0]  ;;  %v15883_v27 = vor.u32 %v18735_v17, %v15882_v16  ;;  %v18222_v16 = vld [vmem:[#allocation7 + $0xbec] sm:$0xf] }
 0x245   : > { %8355 = vmatpush.bf16.msra.mxu3 %v14083_v36  ;;  %v18915_v36 = vld [vmem:[#allocation7 + $0x218c] sm:$0xf0]  ;;  %v16027_v43 = vor.u32 %v18771_v33, %v16026_v32  ;;  %v18717_v32 = vld [vmem:[#allocation7 + $0x1b5c] sm:$0xf0]  ;;  %v16386_v33 = vld [vmem:[#allocation7 + $0x1f98] sm:$0xf] }
 0x246   : > { %8362 = vmatpush.bf16.msrb.mxu0 %v15091_v28  ;;  %8375 = vmatpush.bf16.msrb.mxu1 %v15667_v31  ;;  %v16099_v28 = vor.u32 %v18789_v34, %v16098_v19  ;;  %v16675_v31 = vor.u32 %v18933_v23, %v16674_v20  ;;  %v16458_v34 = vld [vmem:[#allocation7 + $0x2028] sm:$0xf]  ;;  %v12863_v20 = vor.u32 %v17970_v6, %v12860_v3  ;;  %v17952_v23 = vld [vmem:[#allocation7 + $0x37c] sm:$0xf]  ;;  %v12644_v3 = vld [vmem:[#allocation7 + $0x2a0] sm:$0xf0] }
 0x247   : > { %8343 = vmatmul.bf16.vlgmr.msra.gmra.mxu2 %v20072_v2  ;;  %v17916_v6 = vld [vmem:[#allocation7 + $0x25c] sm:$0xf]  ;;  %v13868_v17 = vld [vmem:[#allocation7 + $0xc30] sm:$0xf0] }
 0x248   : > { %8387 = vmatpush.bf16.msrb.mxu2 %v16315_v37  ;;  %8356 = vmatmul.bf16.vlgmr.msra.gmra.mxu3 %v20074_v8  ;;  %v15379_v37 = vor.u32 %v18609_v30, %v15378_v29  ;;  %v18096_v29 = vld [vmem:[#allocation7 + $0x7fc] sm:$0xf]  ;;  %v13364_v30 = vld [vmem:[#allocation7 + $0x840] sm:$0xf0] }
 0x249   : > { %8400 = vmatpush.bf16.msrb.mxu3 %v16891_v39  ;;  %v15306_v39 = vld [vmem:[#allocation7 + $0x1728] sm:$0xf] }
 0x24a   : > { %8363 = vmatpush.bf16.msrb.mxu0 %v15019_v48  ;;  %8376 = vmatpush.bf16.msrb.mxu1 %v15595_v52  ;;  %v8112_v47 = vpop.f32.mrf.mxu0  ;;  %v16603_v48 = vor.u32 %v18915_v36, %v16602_v35  ;;  %v8125_v52 = vpop.f32.mrf.mxu1  ;;  %v15307_v57 = vor.u32 %v18591_v44, %v15306_v39  ;;  %v18258_v35 = vld [vmem:[#allocation7 + $0xd0c] sm:$0xf]  ;;  %v14012_v36 = vld [vmem:[#allocation7 + $0xd50] sm:$0xf0] }
 0x24b   : > { %v8136_v11 = vpop.f32.mrf.mxu2  ;;  %v17934_v44 = vld [vmem:[#allocation7 + $0x2ec] sm:$0xf]  ;;  %v12716_v47 = vld [vmem:[#allocation7 + $0x330] sm:$0xf0] }
 0x24c   : > { %8388 = vmatpush.bf16.msrb.mxu2 %v16243_v55  ;;  %v18897_v55 = vld [vmem:[#allocation7 + $0x20fc] sm:$0xf0]  ;;  %v8137_v59 = vadd.f32 %v8136_v11, %v8124_v24  ;;  %v15810_v24 = vld [vmem:[#allocation7 + $0x1b18] sm:$0xf]  ;;  %v18078_v52 = vld [vmem:[#allocation7 + $0x76c] sm:$0xf] }
 0x24d   : > { %8401 = vmatpush.bf16.msrb.mxu3 %v16819_v60  ;;  %v18429_v60 = vld [vmem:[#allocation7 + $0x125c] sm:$0xf0]  ;;  %v16531_v13 = vor.u32 %v18897_v55, %v16530_v54  ;;  %v15811_v39 = vor.u32 %v18717_v32, %v15810_v24  ;;  %v14591_v55 = vor.u32 %v18402_v40, %v14588_v42  ;;  %v18060_v11 = vld [vmem:[#allocation7 + $0x6dc] sm:$0xf] }
 0x24e   : > { %8364 = vmatpush.bf16.msrb.mxu0 %v14947_v5  ;;  %8377 = vmatpush.bf16.msrb.mxu1 %v15523_v61  ;;  %v15955_v5 = vor.u32 %v18753_v51, %v15954_v50  ;;  %v18114_v61 = vld [vmem:[#allocation7 + $0x88c] sm:$0xf]  ;;  %v14659_v19 = vor.u32 %v18429_v60, %v14658_v56  ;;  %v14015_v51 = vor.u32 %v18258_v35, %v14012_v36  ;;  %v18240_v56 = vld [vmem:[#allocation7 + $0xc7c] sm:$0xf] }
 0x24f   : > { %v12719_v60 = vor.u32 %v17934_v44, %v12716_v47  ;;  %v17880_v36 = vld [vmem:[#allocation7 + $0x13c] sm:$0xf]  ;;  %v18186_v47 = vld [vmem:[#allocation7 + $0xacc] sm:$0xf] }
 0x250   : > { %8389 = vmatpush.bf16.msrb.mxu2 %v16171_v1  ;;  %v13436_v1 = vld [vmem:[#allocation7 + $0x8d0] sm:$0xf0] }
 0x251   : > { %8402 = vmatpush.bf16.msrb.mxu3 %v16747_v18  ;;  %v8149_v18 = vpop.f32.mrf.mxu3  ;;  %v13439_v9 = vor.u32 %v18114_v61, %v13436_v1 }
 0x252   : > { %8365 = vmatpush.bf16.msrb.mxu0 %v14875_v22  ;;  %8378 = vmatpush.bf16.msrb.mxu1 %v15451_v26  ;;  %v15235_v22 = vor.u32 %v18573_v4, %v15234_v62  ;;  %v20159_v26 = vadd.f32 %v8149_v18, %v8137_v59  ;;  %v18384_v62 = vld [vmem:[#allocation7 + $0x10fc] sm:$0xf]  ;;  %v14516_v4 = vld [vmem:[#allocation7 + $0x1140] sm:$0xf0]  ;;  %v12647_v59 = vor.u32 %v17916_v6, %v12644_v3  ;;  %v18366_v18 = vld [vmem:[#allocation7 + $0x106c] sm:$0xf] }
 0x253   : > { %v14519_v1 = vor.u32 %v18384_v62, %v14516_v4  ;;  %v18168_v4 = vld [vmem:[#allocation7 + $0xa3c] sm:$0xf] }
 0x254   : > { %8390 = vmatpush.bf16.msrb.mxu2 %v16099_v28  ;;  %v12788_v28 = vld [vmem:[#allocation7 + $0x3c0] sm:$0xf0] }
 0x255   : > { %8403 = vmatpush.bf16.msrb.mxu3 %v16675_v31  ;;  %v16459_v31 = vor.u32 %v18879_v21, %v16458_v34  ;;  %v17898_v21 = vld [vmem:[#allocation7 + $0x1cc] sm:$0xf] }
 0x256   : > { %8366 = vmatpush.bf16.msrb.mxu0 %v14803_v12  ;;  %8379 = vmatpush.bf16.msrb.mxu1 %v15379_v37  ;;  %v18861_v12 = vld [vmem:[#allocation7 + $0x1fdc] sm:$0xf0]  ;;  %v12791_v37 = vor.u32 %v17952_v23, %v12788_v28  ;;  %v18042_v23 = vld [vmem:[#allocation7 + $0x64c] sm:$0xf] }
 0x257   : > { %v16387_v50 = vor.u32 %v18861_v12, %v16386_v33  ;;  %v18348_v33 = vld [vmem:[#allocation7 + $0xfdc] sm:$0xf]  ;;  %v14372_v12 = vld [vmem:[#allocation7 + $0x1020] sm:$0xf0] }
 0x258   : > { %8391 = vmatpush.bf16.msrb.mxu2 %v16027_v43  ;;  %v13367_v43 = vor.u32 %v18096_v29, %v13364_v30  ;;  %v18204_v29 = vld [vmem:[#allocation7 + $0xb5c] sm:$0xf]  ;;  %v13796_v30 = vld [vmem:[#allocation7 + $0xba0] sm:$0xf0]  ;;  %v14375_v44 = vor.u32 %v18348_v33, %v14372_v12 }
 0x259   : > { %8404 = vmatpush.bf16.msrb.mxu3 %v16603_v48  ;;  %v8138_v48 = vpop.f32.mrf.mxu2  ;;  %v8151_v54 = vpop.f32.mrf.mxu3  ;;  %v13799_v42 = vor.u32 %v18204_v29, %v13796_v30  ;;  %v18528_v12 = vld [vmem:[#allocation7 + $0x157c] sm:$0xf] }
 0x25a   : > { %8367 = vmatpush.bf16.msrb.mxu0 %v14731_v53  ;;  %8380 = vmatpush.bf16.msrb.mxu1 %v15307_v57  ;;  %v13292_v53 = vld [vmem:[#allocation7 + $0x7b0] sm:$0xf0]  ;;  %v13940_v57 = vld [vmem:[#allocation7 + $0xcc0] sm:$0xf0] }
 0x25b   : > { %v13943_v61 = vor.u32 %v18240_v56, %v13940_v57  ;;  %v13724_v48 = vld [vmem:[#allocation7 + $0xb10] sm:$0xf0]  ;;  %v18006_v56 = vld [vmem:[#allocation7 + $0x52c] sm:$0xf] }
 0x25c   : > { %8392 = vmatpush.bf16.msrb.mxu2 %v15955_v5  ;;  %v13295_v5 = vor.u32 %v18078_v52, %v13292_v53  ;;  %v17862_v53 = vld [vmem:[#allocation7 + $0xac] sm:$0xf]  ;;  %v12428_v54 = vld [vmem:[#allocation7 + $0xf0] sm:$0xf0] }
 0x25d   : > { %8405 = vmatpush.bf16.msrb.mxu3 %v16531_v13  ;;  %v13220_v13 = vld [vmem:[#allocation7 + $0x720] sm:$0xf0]  ;;  %v13004_v57 = vld [vmem:[#allocation7 + $0x570] sm:$0xf0]  ;;  %v12431_v3 = vor.u32 %v17862_v53, %v12428_v54  ;;  %v18978_v53 = vld [vmem:[#allocation7 + $0x238c] sm:$0xf] }
 0x25e   : > { %8368 = vmatpush.bf16.msrb.mxu0 %v14659_v19  ;;  %8381 = vmatpush.bf16.msrb.mxu1 %v15235_v22  ;;  %v14444_v19 = vld [vmem:[#allocation7 + $0x10b0] sm:$0xf0]  ;;  %v13223_v34 = vor.u32 %v18060_v11, %v13220_v13  ;;  %v14228_v11 = vld [vmem:[#allocation7 + $0xf00] sm:$0xf0]  ;;  %v17844_v13 = vld [vmem:[#allocation7 + $0x1c] sm:$0xf] }
 0x25f   : > { %v12572_v22 = vld [vmem:[#allocation7 + $0x210] sm:$0xf0]  ;;  %v14447_v28 = vor.u32 %v18366_v18, %v14444_v19  ;;  %v18546_v19 = vld [vmem:[#allocation7 + $0x160c] sm:$0xf] }
 0x260   : > { %8393 = vmatpush.bf16.msrb.mxu2 %v15883_v27  ;;  %v8162_v27 = vpop.f32.mrf.mxu0  ;;  %v8175_v24 = vpop.f32.mrf.mxu1  ;;  %v12575_v32 = vor.u32 %v17898_v21, %v12572_v22  ;;  %v18690_v21 = vld [vmem:[#allocation7 + $0x1a8c] sm:$0xf]  ;;  %v16892_v54 = vld [vmem:[#allocation7 + $0x23d0] sm:$0xf0] }
 0x261   : > { %8406 = vmatpush.bf16.msrb.mxu3 %v16459_v31  ;;  %8369 = vmatmul.bf16.vlgmr.msrb.gmra.mxu0 %v20080_v38  ;;  %v8163_v31 = vadd.f32 %v8162_v27, %v20159_v26  ;;  %v13580_v27 = vld [vmem:[#allocation7 + $0x9f0] sm:$0xf0] }
 0x262   : > { %8413 = vmatpush.bf16.msra.mxu0 %v12863_v20  ;;  %8426 = vmatpush.bf16.msra.mxu1 %v13439_v9  ;;  %v13871_v20 = vor.u32 %v18222_v16, %v13868_v17  ;;  %v13148_v9 = vld [vmem:[#allocation7 + $0x690] sm:$0xf0]  ;;  %v12356_v16 = vld [vmem:[#allocation7 + $0x60] sm:$0xf0]  ;;  %v17988_v17 = vld [vmem:[#allocation7 + $0x49c] sm:$0xf] }
 0x263   : > { %8382 = vmatmul.bf16.vlgmr.msrb.gmra.mxu1 %v20082_v46  ;;  %v13151_v35 = vor.u32 %v18042_v23, %v13148_v9  ;;  %v8176_v40 = vadd.f32 %v8175_v24, %v8163_v31  ;;  %v15740_v23 = vld [vmem:[#allocation7 + $0x1ad0] sm:$0xf0]  ;;  %v18150_v9 = vld [vmem:[#allocation7 + $0x9ac] sm:$0xf]  ;;  %v12359_v30 = vor.u32 %v17844_v13, %v12356_v16  ;;  %v18816_v13 = vld [vmem:[#allocation7 + $0x1e7c] sm:$0xf] }
 0x264   : > { %8394 = vmatpush.bf16.msrb.mxu2 %v15811_v39  ;;  %v13076_v39 = vld [vmem:[#allocation7 + $0x600] sm:$0xf0]  ;;  %v18294_v31 = vld [vmem:[#allocation7 + $0xe2c] sm:$0xf]  ;;  %v14156_v24 = vld [vmem:[#allocation7 + $0xe70] sm:$0xf0] }
 0x265   : > { %8407 = vmatpush.bf16.msrb.mxu3 %v16387_v50  ;;  %v18330_v50 = vld [vmem:[#allocation7 + $0xf4c] sm:$0xf] }
 0x266   : > { %8414 = vmatpush.bf16.msra.mxu0 %v12791_v37  ;;  %8427 = vmatpush.bf16.msra.mxu1 %v13367_v43  ;;  %v12500_v37 = vld [vmem:[#allocation7 + $0x180] sm:$0xf0]  ;;  %v18024_v43 = vld [vmem:[#allocation7 + $0x5bc] sm:$0xf] }
 0x267   : > { %8395 = vmatmul.bf16.vlgmr.msrb.gmra.mxu2 %v20088_v7  ;;  %v12503_v26 = vor.u32 %v17880_v36, %v12500_v37  ;;  %v13079_v52 = vor.u32 %v18024_v43, %v13076_v39  ;;  %v15743_v36 = vor.u32 %v18690_v21, %v15740_v23  ;;  %v13583_v37 = vor.u32 %v18150_v9, %v13580_v27  ;;  %v18672_v43 = vld [vmem:[#allocation7 + $0x19fc] sm:$0xf]  ;;  %v15668_v39 = vld [vmem:[#allocation7 + $0x1a40] sm:$0xf0]  ;;  %v18798_v9 = vld [vmem:[#allocation7 + $0x1dec] sm:$0xf] }
 0x268   : > { %8439 = vmatpush.bf16.msra.mxu2 %v14015_v51  ;;  %8408 = vmatmul.bf16.vlgmr.msrb.gmra.mxu3 %v20090_v14  ;;  %v14300_v51 = vld [vmem:[#allocation7 + $0xf90] sm:$0xf0]  ;;  %v8177_v6 = vpop.f32.mrf.mxu1 }
 0x269   : > { %8452 = vmatpush.bf16.msra.mxu3 %v14591_v55  ;;  %v13727_v55 = vor.u32 %v18186_v47, %v13724_v48  ;;  %v14303_v62 = vor.u32 %v18330_v50, %v14300_v51  ;;  %v13508_v47 = vld [vmem:[#allocation7 + $0x960] sm:$0xf0]  ;;  %v18276_v48 = vld [vmem:[#allocation7 + $0xd9c] sm:$0xf]  ;;  %v18834_v50 = vld [vmem:[#allocation7 + $0x1f0c] sm:$0xf] }
 0x26a   : > { %8415 = vmatpush.bf16.msra.mxu0 %v12719_v60  ;;  %8428 = vmatpush.bf16.msra.mxu1 %v13295_v5  ;;  %v8164_v60 = vpop.f32.mrf.mxu0  ;;  %v13652_v5 = vld [vmem:[#allocation7 + $0xa80] sm:$0xf0]  ;;  %v8188_v22 = vpop.f32.mrf.mxu2  ;;  %v16316_v51 = vld [vmem:[#allocation7 + $0x1f50] sm:$0xf0]  ;;  %v18654_v6 = vld [vmem:[#allocation7 + $0x196c] sm:$0xf] }
 0x26b   : > { %v13655_v18 = vor.u32 %v18168_v4, %v13652_v5  ;;  %v8201_v29 = vpop.f32.mrf.mxu3  ;;  %v15020_v60 = vld [vmem:[#allocation7 + $0x1530] sm:$0xf0]  ;;  %v16319_v5 = vor.u32 %v18834_v50, %v16316_v51  ;;  %v18456_v51 = vld [vmem:[#allocation7 + $0x133c] sm:$0xf] }
 0x26c   : > { %8440 = vmatpush.bf16.msra.mxu2 %v13943_v61  ;;  %v18312_v61 = vld [vmem:[#allocation7 + $0xebc] sm:$0xf]  ;;  %v16172_v27 = vld [vmem:[#allocation7 + $0x1e30] sm:$0xf0] }
 0x26d   : > { %8453 = vmatpush.bf16.msra.mxu3 %v14519_v1  ;;  %v13007_v1 = vor.u32 %v18006_v56, %v13004_v57  ;;  %v18510_v57 = vld [vmem:[#allocation7 + $0x14ec] sm:$0xf] }
 0x26e   : > { %8416 = vmatpush.bf16.msra.mxu0 %v12647_v59  ;;  %8429 = vmatpush.bf16.msra.mxu1 %v13223_v34  ;;  %v12932_v59 = vld [vmem:[#allocation7 + $0x4e0] sm:$0xf0]  ;;  %v15164_v34 = vld [vmem:[#allocation7 + $0x1650] sm:$0xf0]  ;;  %v15023_v16 = vor.u32 %v18510_v57, %v15020_v60  ;;  %v18762_v57 = vld [vmem:[#allocation7 + $0x1ccc] sm:$0xf] }
 0x26f   : > { %v15167_v33 = vor.u32 %v18546_v19, %v15164_v34  ;;  %v18492_v19 = vld [vmem:[#allocation7 + $0x145c] sm:$0xf]  ;;  %v14948_v34 = vld [vmem:[#allocation7 + $0x14a0] sm:$0xf0]  ;;  %v16028_v60 = vld [vmem:[#allocation7 + $0x1d10] sm:$0xf0] }
 0x270   : > { %8441 = vmatpush.bf16.msra.mxu2 %v13871_v20  ;;  %v14231_v20 = vor.u32 %v18312_v61, %v14228_v11  ;;  %v16895_v11 = vor.u32 %v18978_v53, %v16892_v54  ;;  %v18600_v54 = vld [vmem:[#allocation7 + $0x17bc] sm:$0xf] }
 0x271   : > { %8454 = vmatpush.bf16.msra.mxu3 %v14447_v28  ;;  %v8189_v28 = vadd.f32 %v8188_v22, %v8176_v40  ;;  %v18132_v40 = vld [vmem:[#allocation7 + $0x91c] sm:$0xf] }
 0x272   : > { %8417 = vmatpush.bf16.msra.mxu0 %v12575_v32  ;;  %8430 = vmatpush.bf16.msra.mxu1 %v13151_v35  ;;  %v12935_v32 = vor.u32 %v17988_v17, %v12932_v59  ;;  %v13511_v56 = vor.u32 %v18132_v40, %v13508_v47  ;;  %v18960_v17 = vld [vmem:[#allocation7 + $0x22fc] sm:$0xf]  ;;  %v16820_v59 = vld [vmem:[#allocation7 + $0x2340] sm:$0xf0] }
 0x273   : > { %v20166_v35 = vadd.f32 %v8201_v29, %v8189_v28  ;;  %v8203_v61 = vpop.f32.mrf.mxu3  ;;  %v18636_v22 = vld [vmem:[#allocation7 + $0x18dc] sm:$0xf]  ;;  %v16823_v23 = vor.u32 %v18960_v17, %v16820_v59  ;;  %v14951_v28 = vor.u32 %v18492_v19, %v14948_v34  ;;  %v18942_v29 = vld [vmem:[#allocation7 + $0x226c] sm:$0xf] }
 0x274   : > { %8442 = vmatpush.bf16.msra.mxu2 %v13799_v42  ;;  %v15092_v42 = vld [vmem:[#allocation7 + $0x15c0] sm:$0xf0]  ;;  %v18924_v47 = vld [vmem:[#allocation7 + $0x21dc] sm:$0xf]  ;;  %v14732_v61 = vld [vmem:[#allocation7 + $0x12f0] sm:$0xf0] }
 0x275   : > { %8455 = vmatpush.bf16.msra.mxu3 %v14375_v44  ;;  %v14159_v44 = vor.u32 %v18294_v31, %v14156_v24  ;;  %v18474_v24 = vld [vmem:[#allocation7 + $0x13cc] sm:$0xf]  ;;  %v18744_v59 = vld [vmem:[#allocation7 + $0x1c3c] sm:$0xf] }
 0x276   : > { %8418 = vmatpush.bf16.msra.mxu0 %v12503_v26  ;;  %8431 = vmatpush.bf16.msra.mxu1 %v13079_v52  ;;  %v14084_v26 = vld [vmem:[#allocation7 + $0xde0] sm:$0xf0]  ;;  %v15095_v52 = vor.u32 %v18528_v12, %v15092_v42  ;;  %v18618_v12 = vld [vmem:[#allocation7 + $0x184c] sm:$0xf] }
 0x277   : > { %v14087_v4 = vor.u32 %v18276_v48, %v14084_v26  ;;  %v16676_v48 = vld [vmem:[#allocation7 + $0x2220] sm:$0xf0] }
 0x278   : > { %8443 = vmatpush.bf16.msra.mxu2 %v13727_v55  ;;  %v15671_v55 = vor.u32 %v18672_v43, %v15668_v39  ;;  %v18780_v43 = vld [vmem:[#allocation7 + $0x1d5c] sm:$0xf]  ;;  %v16100_v39 = vld [vmem:[#allocation7 + $0x1da0] sm:$0xf0] }
 0x279   : > { %8456 = vmatpush.bf16.msra.mxu3 %v14303_v62  ;;  %v8190_v62 = vpop.f32.mrf.mxu2  ;;  %v16103_v53 = vor.u32 %v18780_v43, %v16100_v39 }
 0x27a   : > { %8419 = vmatpush.bf16.msra.mxu0 %v12431_v3  ;;  %8432 = vmatpush.bf16.msra.mxu1 %v13007_v1  ;;  %v15596_v3 = vld [vmem:[#allocation7 + $0x19b0] sm:$0xf0]  ;;  %v16244_v1 = vld [vmem:[#allocation7 + $0x1ec0] sm:$0xf0] }
 0x27b   : > { %v16247_v21 = vor.u32 %v18816_v13, %v16244_v1  ;;  %v18582_v13 = vld [vmem:[#allocation7 + $0x172c] sm:$0xf]  ;;  %v15308_v1 = vld [vmem:[#allocation7 + $0x1770] sm:$0xf0] }
 0x27c   : > { %8444 = vmatpush.bf16.msra.mxu2 %v13655_v18  ;;  %v15599_v18 = vor.u32 %v18654_v6, %v15596_v3  ;;  %v18438_v3 = vld [vmem:[#allocation7 + $0x12ac] sm:$0xf] }
 0x27d   : > { %8457 = vmatpush.bf16.msra.mxu3 %v14231_v20  ;;  %v15524_v20 = vld [vmem:[#allocation7 + $0x1920] sm:$0xf0]  ;;  %v14735_v34 = vor.u32 %v18438_v3, %v14732_v61  ;;  %v14594_v61 = vld [vmem:[#allocation7 + $0x1190] sm:$0xf] }
 0x27e   : > { %8420 = vmatpush.bf16.msra.mxu0 %v12359_v30  ;;  %8433 = vmatpush.bf16.msra.mxu1 %v12935_v32  ;;  %v16748_v30 = vld [vmem:[#allocation7 + $0x22b0] sm:$0xf0]  ;;  %v15527_v31 = vor.u32 %v18636_v22, %v15524_v20  ;;  %v16532_v22 = vld [vmem:[#allocation7 + $0x2100] sm:$0xf0]  ;;  %v18420_v20 = vld [vmem:[#allocation7 + $0x121c] sm:$0xf] }
 0x27f   : > { %v14876_v32 = vld [vmem:[#allocation7 + $0x1410] sm:$0xf0]  ;;  %v16751_v42 = vor.u32 %v18942_v29, %v16748_v30  ;;  %v12866_v30 = vld [vmem:[#allocation7 + $0x410] sm:$0xf] }
 0x280   : > { %8445 = vmatpush.bf16.msra.mxu2 %v13583_v37  ;;  %v8214_v37 = vpop.f32.mrf.mxu0  ;;  %v14879_v40 = vor.u32 %v18474_v24, %v14876_v32  ;;  %v13442_v24 = vld [vmem:[#allocation7 + $0x890] sm:$0xf] }
 0x281   : > { %8458 = vmatpush.bf16.msra.mxu3 %v14159_v44  ;;  %8421 = vmatmul.bf16.vlgmr.msra.gmra.mxu0 %v20064_v41  ;;  %v8227_v44 = vpop.f32.mrf.mxu1 }
 0x282   : > { %8465 = vmatpush.bf16.msrb.mxu0 %v15167_v33  ;;  %8478 = vmatpush.bf16.msrb.mxu1 %v15743_v36  ;;  %v16175_v33 = vor.u32 %v18798_v9, %v16172_v27  ;;  %v15452_v36 = vld [vmem:[#allocation7 + $0x1890] sm:$0xf0]  ;;  %v8228_v26 = vadd.f32 %v8227_v44, %v8214_v37  ;;  %v14660_v9 = vld [vmem:[#allocation7 + $0x1260] sm:$0xf0]  ;;  %v18564_v27 = vld [vmem:[#allocation7 + $0x169c] sm:$0xf] }
 0x283   : > { %8434 = vmatmul.bf16.vlgmr.msra.gmra.mxu1 %v20066_v45  ;;  %v15455_v50 = vor.u32 %v18618_v12, %v15452_v36  ;;  %v18124_v12 = vld [vmem:[#allocation7 + $0x8d4] sm:$0xf0]  ;;  %v18726_v36 = vld [vmem:[#allocation7 + $0x1bac] sm:$0xf]  ;;  %v15884_v37 = vld [vmem:[#allocation7 + $0x1bf0] sm:$0xf0]  ;;  %v14663_v39 = vor.u32 %v18420_v20, %v14660_v9 }
 0x284   : > { %8446 = vmatpush.bf16.msra.mxu2 %v13511_v56  ;;  %v16679_v56 = vor.u32 %v18924_v47, %v16676_v48  ;;  %v18870_v44 = vld [vmem:[#allocation7 + $0x202c] sm:$0xf]  ;;  %v18250_v9 = vld [vmem:[#allocation7 + $0xcc4] sm:$0xf0] }
 0x285   : > { %8459 = vmatpush.bf16.msra.mxu3 %v14087_v4  ;;  %v18906_v4 = vld [vmem:[#allocation7 + $0x214c] sm:$0xf] }
 0x286   : > { %8466 = vmatpush.bf16.msrb.mxu0 %v15095_v52  ;;  %8479 = vmatpush.bf16.msrb.mxu1 %v15671_v55  ;;  %v14804_v52 = vld [vmem:[#allocation7 + $0x1380] sm:$0xf0] }
 0x287   : > { %8447 = vmatmul.bf16.vlgmr.msra.gmra.mxu2 %v20072_v2  ;;  %v15380_v55 = vld [vmem:[#allocation7 + $0x1800] sm:$0xf0]  ;;  %v14807_v62 = vor.u32 %v18456_v51, %v14804_v52  ;;  %v13443_v52 = vor.u32 %v18124_v12, %v13442_v24  ;;  %v17926_v24 = vld [vmem:[#allocation7 + $0x2a4] sm:$0xf0] }
 0x288   : > { %8491 = vmatpush.bf16.msrb.mxu2 %v16319_v5  ;;  %8460 = vmatmul.bf16.vlgmr.msra.gmra.mxu3 %v20074_v8  ;;  %v16604_v5 = vld [vmem:[#allocation7 + $0x2190] sm:$0xf0]  ;;  %v15383_v6 = vor.u32 %v18600_v54, %v15380_v55  ;;  %v17962_v54 = vld [vmem:[#allocation7 + $0x3c4] sm:$0xf0]  ;;  %v13370_v55 = vld [vmem:[#allocation7 + $0x800] sm:$0xf] }
 0x289   : > { %8504 = vmatpush.bf16.msrb.mxu3 %v16895_v11  ;;  %v16031_v11 = vor.u32 %v18762_v57, %v16028_v60  ;;  %v16607_v17 = vor.u32 %v18906_v4, %v16604_v5  ;;  %v8229_v19 = vpop.f32.mrf.mxu1  ;;  %v15812_v60 = vld [vmem:[#allocation7 + $0x1b60] sm:$0xf0]  ;;  %v14018_v5 = vld [vmem:[#allocation7 + $0xd10] sm:$0xf]  ;;  %v18070_v12 = vld [vmem:[#allocation7 + $0x724] sm:$0xf0] }
 0x28a   : > { %8467 = vmatpush.bf16.msrb.mxu0 %v15023_v16  ;;  %8480 = vmatpush.bf16.msrb.mxu1 %v15599_v18  ;;  %v8216_v16 = vpop.f32.mrf.mxu0  ;;  %v15956_v18 = vld [vmem:[#allocation7 + $0x1c80] sm:$0xf0]  ;;  %v8240_v32 = vpop.f32.mrf.mxu2 }
 0x28b   : > { %v15959_v29 = vor.u32 %v18744_v59, %v15956_v18  ;;  %v8253_v43 = vpop.f32.mrf.mxu3  ;;  %v16388_v4 = vld [vmem:[#allocation7 + $0x1fe0] sm:$0xf0]  ;;  %v12722_v16 = vld [vmem:[#allocation7 + $0x2f0] sm:$0xf] }
 0x28c   : > { %8492 = vmatpush.bf16.msrb.mxu2 %v16247_v21  ;;  %v18888_v21 = vld [vmem:[#allocation7 + $0x20bc] sm:$0xf] }
 0x28d   : > { %8505 = vmatpush.bf16.msrb.mxu3 %v16823_v23  ;;  %v15311_v23 = vor.u32 %v18582_v13, %v15308_v1 }
 0x28e   : > { %8468 = vmatpush.bf16.msrb.mxu0 %v14951_v28  ;;  %8481 = vmatpush.bf16.msrb.mxu1 %v15527_v31  ;;  %v15236_v28 = vld [vmem:[#allocation7 + $0x16e0] sm:$0xf0]  ;;  %v17980_v31 = vld [vmem:[#allocation7 + $0x454] sm:$0xf0] }
 0x28f   : > { %v15239_v47 = vor.u32 %v18564_v27, %v15236_v28  ;;  %v12867_v48 = vor.u32 %v17980_v31, %v12866_v30  ;;  %v14522_v28 = vld [vmem:[#allocation7 + $0x1100] sm:$0xf] }
 0x290   : > { %8493 = vmatpush.bf16.msrb.mxu2 %v16175_v33  ;;  %v16535_v33 = vor.u32 %v18888_v21, %v16532_v22  ;;  %v18088_v21 = vld [vmem:[#allocation7 + $0x7b4] sm:$0xf0]  ;;  %v12650_v31 = vld [vmem:[#allocation7 + $0x260] sm:$0xf] }
 0x291   : > { %8506 = vmatpush.bf16.msrb.mxu3 %v16751_v42  ;;  %v8241_v42 = vadd.f32 %v8240_v32, %v8228_v26  ;;  %v18708_v26 = vld [vmem:[#allocation7 + $0x1b1c] sm:$0xf] }
 0x292   : > { %8469 = vmatpush.bf16.msrb.mxu0 %v14879_v40  ;;  %8482 = vmatpush.bf16.msrb.mxu1 %v15455_v50  ;;  %v16460_v40 = vld [vmem:[#allocation7 + $0x2070] sm:$0xf0]  ;;  %v12794_v50 = vld [vmem:[#allocation7 + $0x380] sm:$0xf]  ;;  %v15815_v1 = vor.u32 %v18708_v26, %v15812_v60  ;;  %v8242_v59 = vpop.f32.mrf.mxu2 }
 0x293   : > { %v20172_v51 = vadd.f32 %v8253_v43, %v8241_v42  ;;  %v16463_v57 = vor.u32 %v18870_v44, %v16460_v40  ;;  %v12795_v3 = vor.u32 %v17962_v54, %v12794_v50  ;;  %v8255_v22 = vpop.f32.mrf.mxu3  ;;  %v18232_v42 = vld [vmem:[#allocation7 + $0xc34] sm:$0xf0]  ;;  %v12651_v43 = vor.u32 %v17926_v24, %v12650_v31  ;;  %v13730_v59 = vld [vmem:[#allocation7 + $0xad0] sm:$0xf]  ;;  %v18178_v31 = vld [vmem:[#allocation7 + $0xa84] sm:$0xf0] }
 0x294   : > { %8494 = vmatpush.bf16.msrb.mxu2 %v16103_v53  ;;  %v15887_v53 = vor.u32 %v18726_v36, %v15884_v37  ;;  %v13874_v37 = vld [vmem:[#allocation7 + $0xbf0] sm:$0xf]  ;;  %v18376_v44 = vld [vmem:[#allocation7 + $0x10b4] sm:$0xf0] }
 0x295   : > { %8507 = vmatpush.bf16.msrb.mxu3 %v16679_v56  ;;  %v18106_v56 = vld [vmem:[#allocation7 + $0x844] sm:$0xf0]  ;;  %v13875_v50 = vor.u32 %v18232_v42, %v13874_v37  ;;  %v12434_v22 = vld [vmem:[#allocation7 + $0xb0] sm:$0xf] }
 0x296   : > { %8470 = vmatpush.bf16.msrb.mxu0 %v14807_v62  ;;  %8483 = vmatpush.bf16.msrb.mxu1 %v15383_v6  ;;  %v18852_v62 = vld [vmem:[#allocation7 + $0x1f9c] sm:$0xf]  ;;  %v18268_v6 = vld [vmem:[#allocation7 + $0xd54] sm:$0xf0]  ;;  %v13371_v13 = vor.u32 %v18106_v56, %v13370_v55  ;;  %v13802_v56 = vld [vmem:[#allocation7 + $0xb60] sm:$0xf] }
 0x297   : > { %v16391_v18 = vor.u32 %v18852_v62, %v16388_v4  ;;  %v14019_v19 = vor.u32 %v18268_v6, %v14018_v5  ;;  %v14378_v4 = vld [vmem:[#allocation7 + $0xfe0] sm:$0xf]  ;;  %v18358_v5 = vld [vmem:[#allocation7 + $0x1024] sm:$0xf0] }
 0x298   : > { %8495 = vmatpush.bf16.msrb.mxu2 %v16031_v11  ;;  %v18412_v11 = vld [vmem:[#allocation7 + $0x11d4] sm:$0xf0]  ;;  %v17854_v42 = vld [vmem:[#allocation7 + $0x64] sm:$0xf0] }
 0x299   : > { %8508 = vmatpush.bf16.msrb.mxu3 %v16607_v17  ;;  %v17944_v17 = vld [vmem:[#allocation7 + $0x334] sm:$0xf0]  ;;  %v14595_v20 = vor.u32 %v18412_v11, %v14594_v61  ;;  %v17890_v61 = vld [vmem:[#allocation7 + $0x184] sm:$0xf0] }
 0x29a   : > { %8471 = vmatpush.bf16.msrb.mxu0 %v14735_v34  ;;  %8484 = vmatpush.bf16.msrb.mxu1 %v15311_v23  ;;  %v13298_v34 = vld [vmem:[#allocation7 + $0x770] sm:$0xf]  ;;  %v13946_v23 = vld [vmem:[#allocation7 + $0xc80] sm:$0xf]  ;;  %v12723_v27 = vor.u32 %v17944_v17, %v12722_v16  ;;  %v18034_v16 = vld [vmem:[#allocation7 + $0x604] sm:$0xf0]  ;;  %v14379_v17 = vor.u32 %v18358_v5, %v14378_v4 }
 0x29b   : > { %v13299_v30 = vor.u32 %v18088_v21, %v13298_v34  ;;  %v13947_v32 = vor.u32 %v18250_v9, %v13946_v23  ;;  %v18340_v34 = vld [vmem:[#allocation7 + $0xf94] sm:$0xf0]  ;;  %v13010_v9 = vld [vmem:[#allocation7 + $0x530] sm:$0xf] }
 0x29c   : > { %8496 = vmatpush.bf16.msrb.mxu2 %v15959_v29  ;;  %v18394_v29 = vld [vmem:[#allocation7 + $0x1144] sm:$0xf0] }
 0x29d   : > { %8509 = vmatpush.bf16.msrb.mxu3 %v16535_v33  ;;  %v13226_v33 = vld [vmem:[#allocation7 + $0x6e0] sm:$0xf]  ;;  %v14523_v36 = vor.u32 %v18394_v29, %v14522_v28 }
 0x29e   : > { %8472 = vmatpush.bf16.msrb.mxu0 %v14663_v39  ;;  %8485 = vmatpush.bf16.msrb.mxu1 %v15239_v47  ;;  %v14450_v39 = vld [vmem:[#allocation7 + $0x1070] sm:$0xf]  ;;  %v13227_v40 = vor.u32 %v18070_v12, %v13226_v33  ;;  %v8266_v54 = vpop.f32.mrf.mxu0  ;;  %v14234_v33 = vld [vmem:[#allocation7 + $0xec0] sm:$0xf]  ;;  %v18322_v12 = vld [vmem:[#allocation7 + $0xf04] sm:$0xf0] }
 0x29f   : > { %v12578_v47 = vld [vmem:[#allocation7 + $0x1d0] sm:$0xf]  ;;  %v14451_v55 = vor.u32 %v18376_v44, %v14450_v39  ;;  %v8267_v26 = vadd.f32 %v8266_v54, %v20172_v51  ;;  %v17998_v39 = vld [vmem:[#allocation7 + $0x4e4] sm:$0xf0] }
 0x2a0   : > { %8497 = vmatpush.bf16.msrb.mxu2 %v15887_v53  ;;  %v18052_v53 = vld [vmem:[#allocation7 + $0x694] sm:$0xf0]  ;;  %v8279_v60 = vpop.f32.mrf.mxu1  ;;  %v13586_v54 = vld [vmem:[#allocation7 + $0x9b0] sm:$0xf] }
 0x2a1   : > { %8510 = vmatpush.bf16.msrb.mxu3 %v16463_v57  ;;  %8473 = vmatmul.bf16.vlgmr.msrb.gmra.mxu0 %v20080_v38  ;;  %v18214_v57 = vld [vmem:[#allocation7 + $0xba4] sm:$0xf0]  ;;  %v8280_v11 = vadd.f32 %v8279_v60, %v8267_v26  ;;  %v14162_v60 = vld [vmem:[#allocation7 + $0xe30] sm:$0xf] }
 0x2a2   : > { %8517 = vmatpush.bf16.msra.mxu0 %v12867_v48  ;;  %8530 = vmatpush.bf16.msra.mxu1 %v13443_v52  ;;  %v17908_v48 = vld [vmem:[#allocation7 + $0x214] sm:$0xf0]  ;;  %v13154_v52 = vld [vmem:[#allocation7 + $0x650] sm:$0xf] }
 0x2a3   : > { %8486 = vmatmul.bf16.vlgmr.msrb.gmra.mxu1 %v20082_v46  ;;  %v12579_v62 = vor.u32 %v17908_v48, %v12578_v47  ;;  %v13155_v6 = vor.u32 %v18052_v53, %v13154_v52  ;;  %v18556_v47 = vld [vmem:[#allocation7 + $0x1654] sm:$0xf0]  ;;  %v15746_v48 = vld [vmem:[#allocation7 + $0x1a90] sm:$0xf]  ;;  %v14235_v52 = vor.u32 %v18322_v12, %v14234_v33 }
 0x2a4   : > { %8498 = vmatpush.bf16.msrb.mxu2 %v15815_v1  ;;  %v13082_v1 = vld [vmem:[#allocation7 + $0x5c0] sm:$0xf]  ;;  %v18700_v53 = vld [vmem:[#allocation7 + $0x1ad4] sm:$0xf0] }
 0x2a5   : > { %8511 = vmatpush.bf16.msrb.mxu3 %v16391_v18  ;;  %v18196_v18 = vld [vmem:[#allocation7 + $0xb14] sm:$0xf0]  ;;  %v13083_v21 = vor.u32 %v18034_v16, %v13082_v1  ;;  %v18538_v1 = vld [vmem:[#allocation7 + $0x15c4] sm:$0xf0]  ;;  %v15674_v16 = vld [vmem:[#allocation7 + $0x1a00] sm:$0xf] }
 0x2a6   : > { %8518 = vmatpush.bf16.msra.mxu0 %v12795_v3  ;;  %8531 = vmatpush.bf16.msra.mxu1 %v13371_v13  ;;  %v12506_v3 = vld [vmem:[#allocation7 + $0x140] sm:$0xf]  ;;  %v13803_v13 = vor.u32 %v18214_v57, %v13802_v56  ;;  %v13731_v23 = vor.u32 %v18196_v18, %v13730_v59  ;;  %v8268_v28 = vpop.f32.mrf.mxu0  ;;  %v18142_v18 = vld [vmem:[#allocation7 + $0x964] sm:$0xf0]  ;;  %v18664_v33 = vld [vmem:[#allocation7 + $0x19b4] sm:$0xf0] }
 0x2a7   : > { %8499 = vmatmul.bf16.vlgmr.msrb.gmra.mxu2 %v20088_v7  ;;  %v12507_v51 = vor.u32 %v17890_v61, %v12506_v3  ;;  %v15747_v61 = vor.u32 %v18700_v53, %v15746_v48  ;;  %v15026_v28 = vld [vmem:[#allocation7 + $0x14f0] sm:$0xf]  ;;  %v18502_v48 = vld [vmem:[#allocation7 + $0x14a4] sm:$0xf0] }
 0x2a8   : > { %8543 = vmatpush.bf16.msra.mxu2 %v14019_v19  ;;  %8512 = vmatmul.bf16.vlgmr.msrb.gmra.mxu3 %v20090_v14  ;;  %v14306_v19 = vld [vmem:[#allocation7 + $0xf50] sm:$0xf]  ;;  %v8281_v24 = vpop.f32.mrf.mxu1  ;;  %v18646_v53 = vld [vmem:[#allocation7 + $0x1924] sm:$0xf0] }
 0x2a9   : > { %8556 = vmatpush.bf16.msra.mxu3 %v14595_v20  ;;  %v17872_v20 = vld [vmem:[#allocation7 + $0xf4] sm:$0xf0]  ;;  %v14307_v29 = vor.u32 %v18340_v34, %v14306_v19  ;;  %v18286_v19 = vld [vmem:[#allocation7 + $0xde4] sm:$0xf0]  ;;  %v16322_v34 = vld [vmem:[#allocation7 + $0x1f10] sm:$0xf] }
 0x2aa   : > { %8519 = vmatpush.bf16.msra.mxu0 %v12723_v27  ;;  %8532 = vmatpush.bf16.msra.mxu1 %v13299_v30  ;;  %v18016_v27 = vld [vmem:[#allocation7 + $0x574] sm:$0xf0]  ;;  %v13658_v30 = vld [vmem:[#allocation7 + $0xa40] sm:$0xf] }
 0x2ab   : > { %v13011_v37 = vor.u32 %v18016_v27, %v13010_v9  ;;  %v13659_v44 = vor.u32 %v18178_v31, %v13658_v30  ;;  %v8305_v57 = vpop.f32.mrf.mxu3 }
 0x2ac   : > { %8544 = vmatpush.bf16.msra.mxu2 %v13947_v32  ;;  %v12435_v32 = vor.u32 %v17872_v20, %v12434_v22  ;;  %v16898_v20 = vld [vmem:[#allocation7 + $0x2390] sm:$0xf] }
 0x2ad   : > { %8557 = vmatpush.bf16.msra.mxu3 %v14523_v36  ;;  %v12362_v36 = vld [vmem:[#allocation7 + $0x20] sm:$0xf] }
 0x2ae   : > { %8520 = vmatpush.bf16.msra.mxu0 %v12651_v43  ;;  %8533 = vmatpush.bf16.msra.mxu1 %v13227_v40  ;;  %v12938_v43 = vld [vmem:[#allocation7 + $0x4a0] sm:$0xf]  ;;  %v15170_v40 = vld [vmem:[#allocation7 + $0x1610] sm:$0xf]  ;;  %v12363_v26 = vor.u32 %v17854_v42, %v12362_v36  ;;  %v18826_v42 = vld [vmem:[#allocation7 + $0x1ec4] sm:$0xf0] }
 0x2af   : > { %v12939_v4 = vor.u32 %v17998_v39, %v12938_v43  ;;  %v15171_v5 = vor.u32 %v18556_v47, %v15170_v40  ;;  %v16826_v39 = vld [vmem:[#allocation7 + $0x2300] sm:$0xf] }
 0x2b0   : > { %8545 = vmatpush.bf16.msra.mxu2 %v13875_v50  ;;  %v8292_v50 = vpop.f32.mrf.mxu2  ;;  %v14954_v47 = vld [vmem:[#allocation7 + $0x1460] sm:$0xf] }
 0x2b1   : > { %8558 = vmatpush.bf16.msra.mxu3 %v14451_v55  ;;  %v18160_v55 = vld [vmem:[#allocation7 + $0x9f4] sm:$0xf0]  ;;  %v8293_v56 = vadd.f32 %v8292_v50, %v8280_v11  ;;  %v13514_v11 = vld [vmem:[#allocation7 + $0x920] sm:$0xf] }
 0x2b2   : > { %8521 = vmatpush.bf16.msra.mxu0 %v12579_v62  ;;  %8534 = vmatpush.bf16.msra.mxu1 %v13155_v6  ;;  %v18304_v62 = vld [vmem:[#allocation7 + $0xe74] sm:$0xf0]  ;;  %v15098_v6 = vld [vmem:[#allocation7 + $0x1580] sm:$0xf]  ;;  %v13515_v27 = vor.u32 %v18142_v18, %v13514_v11 }
 0x2b3   : > { %v20179_v3 = vadd.f32 %v8305_v57, %v8293_v56  ;;  %v14163_v59 = vor.u32 %v18304_v62, %v14162_v60  ;;  %v15099_v22 = vor.u32 %v18538_v1, %v15098_v6  ;;  %v8307_v12 = vpop.f32.mrf.mxu3  ;;  %v18808_v56 = vld [vmem:[#allocation7 + $0x1e34] sm:$0xf0]  ;;  %v14955_v57 = vor.u32 %v18502_v48, %v14954_v47  ;;  %v18754_v47 = vld [vmem:[#allocation7 + $0x1c84] sm:$0xf0] }
 0x2b4   : > { %8546 = vmatpush.bf16.msra.mxu2 %v13803_v13  ;;  %v13587_v13 = vor.u32 %v18160_v55, %v13586_v54  ;;  %v16178_v55 = vld [vmem:[#allocation7 + $0x1df0] sm:$0xf]  ;;  %v18952_v60 = vld [vmem:[#allocation7 + $0x22b4] sm:$0xf0] }
 0x2b5   : > { %8559 = vmatpush.bf16.msra.mxu3 %v14379_v17  ;;  %v18682_v17 = vld [vmem:[#allocation7 + $0x1a44] sm:$0xf0]  ;;  %v16179_v6 = vor.u32 %v18808_v56, %v16178_v55  ;;  %v14738_v12 = vld [vmem:[#allocation7 + $0x12b0] sm:$0xf] }
 0x2b6   : > { %8522 = vmatpush.bf16.msra.mxu0 %v12507_v51  ;;  %8535 = vmatpush.bf16.msra.mxu1 %v13083_v21  ;;  %v14090_v51 = vld [vmem:[#allocation7 + $0xda0] sm:$0xf]  ;;  %v18844_v21 = vld [vmem:[#allocation7 + $0x1f54] sm:$0xf0]  ;;  %v15675_v9 = vor.u32 %v18682_v17, %v15674_v16  ;;  %v18430_v56 = vld [vmem:[#allocation7 + $0x1264] sm:$0xf0] }
 0x2b7   : > { %v14091_v31 = vor.u32 %v18286_v19, %v14090_v51  ;;  %v16323_v24 = vor.u32 %v18844_v21, %v16322_v34  ;;  %v16106_v17 = vld [vmem:[#allocation7 + $0x1d60] sm:$0xf]  ;;  %v18934_v19 = vld [vmem:[#allocation7 + $0x2224] sm:$0xf0] }
 0x2b8   : > { %8547 = vmatpush.bf16.msra.mxu2 %v13731_v23  ;;  %v18988_v23 = vld [vmem:[#allocation7 + $0x23d4] sm:$0xf0]  ;;  %v8294_v30 = vpop.f32.mrf.mxu2  ;;  %v16682_v51 = vld [vmem:[#allocation7 + $0x21e0] sm:$0xf] }
 0x2b9   : > { %8560 = vmatpush.bf16.msra.mxu3 %v14307_v29  ;;  %v18520_v29 = vld [vmem:[#allocation7 + $0x1534] sm:$0xf0]  ;;  %v16899_v36 = vor.u32 %v18988_v23, %v16898_v20  ;;  %v18466_v20 = vld [vmem:[#allocation7 + $0x1384] sm:$0xf0] }
 0x2ba   : > { %8523 = vmatpush.bf16.msra.mxu0 %v12435_v32  ;;  %8536 = vmatpush.bf16.msra.mxu1 %v13011_v37  ;;  %v15602_v32 = vld [vmem:[#allocation7 + $0x1970] sm:$0xf]  ;;  %v16250_v37 = vld [vmem:[#allocation7 + $0x1e80] sm:$0xf]  ;;  %v15027_v43 = vor.u32 %v18520_v29, %v15026_v28  ;;  %v16683_v28 = vor.u32 %v18934_v19, %v16682_v51  ;;  %v18772_v30 = vld [vmem:[#allocation7 + $0x1d14] sm:$0xf0] }
 0x2bb   : > { %v15603_v40 = vor.u32 %v18664_v33, %v15602_v32  ;;  %v16251_v50 = vor.u32 %v18826_v42, %v16250_v37  ;;  %v16034_v29 = vld [vmem:[#allocation7 + $0x1cd0] sm:$0xf]  ;;  %v18916_v32 = vld [vmem:[#allocation7 + $0x2194] sm:$0xf0] }
 0x2bc   : > { %8548 = vmatpush.bf16.msra.mxu2 %v13659_v44  ;;  %v18970_v44 = vld [vmem:[#allocation7 + $0x2344] sm:$0xf0]  ;;  %v16035_v37 = vor.u32 %v18772_v30, %v16034_v29  ;;  %v15314_v42 = vld [vmem:[#allocation7 + $0x1730] sm:$0xf]  ;;  %v18880_v51 = vld [vmem:[#allocation7 + $0x2074] sm:$0xf0] }
 0x2bd   : > { %8561 = vmatpush.bf16.msra.mxu3 %v14235_v52  ;;  %v15530_v52 = vld [vmem:[#allocation7 + $0x18e0] sm:$0xf]  ;;  %v16827_v54 = vor.u32 %v18970_v44, %v16826_v39  ;;  %v13372_v29 = vld [vmem:[#allocation7 + $0x848] sm:$0xf0] }
 0x2be   : > { %8524 = vmatpush.bf16.msra.mxu0 %v12363_v26  ;;  %8537 = vmatpush.bf16.msra.mxu1 %v12939_v4  ;;  %v16754_v26 = vld [vmem:[#allocation7 + $0x2270] sm:$0xf]  ;;  %v15531_v62 = vor.u32 %v18646_v53, %v15530_v52  ;;  %v8318_v1 = vpop.f32.mrf.mxu0  ;;  %v16538_v52 = vld [vmem:[#allocation7 + $0x20c0] sm:$0xf]  ;;  %v18898_v53 = vld [vmem:[#allocation7 + $0x2104] sm:$0xf0] }
 0x2bf   : > { %v14882_v4 = vld [vmem:[#allocation7 + $0x13d0] sm:$0xf]  ;;  %v16755_v16 = vor.u32 %v18952_v60, %v16754_v26  ;;  %v18574_v26 = vld [vmem:[#allocation7 + $0x16e4] sm:$0xf0] }
 0x2c0   : > { %8549 = vmatpush.bf16.msra.mxu2 %v13587_v13  ;;  %v18628_v13 = vld [vmem:[#allocation7 + $0x1894] sm:$0xf0]  ;;  %v8331_v11 = vpop.f32.mrf.mxu1 }
 0x2c1   : > { %8562 = vmatpush.bf16.msra.mxu3 %v14163_v59  ;;  %8525 = vmatmul.bf16.vlgmr.msra.gmra.mxu0 %v20064_v41  ;;  %v18790_v59 = vld [vmem:[#allocation7 + $0x1da4] sm:$0xf0]  ;;  %v8332_v34 = vadd.f32 %v8331_v11, %v8318_v1  ;;  %v15890_v1 = vld [vmem:[#allocation7 + $0x1bb0] sm:$0xf] }
 0x2c2   : > { %8569 = vmatpush.bf16.msrb.mxu0 %v15171_v5  ;;  %8582 = vmatpush.bf16.msrb.mxu1 %v15747_v61  ;;  %v18484_v5 = vld [vmem:[#allocation7 + $0x1414] sm:$0xf0]  ;;  %v15458_v61 = vld [vmem:[#allocation7 + $0x1850] sm:$0xf]  ;;  %v16107_v23 = vor.u32 %v18790_v59, %v16106_v17 }
 0x2c3   : > { %8538 = vmatmul.bf16.vlgmr.msra.gmra.mxu1 %v20066_v45  ;;  %v14883_v18 = vor.u32 %v18484_v5, %v14882_v4  ;;  %v15459_v21 = vor.u32 %v18628_v13, %v15458_v61  ;;  %v12868_v4 = vld [vmem:[#allocation7 + $0x458] sm:$0xf0]  ;;  %v18115_v5 = vld [vmem:[#allocation7 + $0x894] sm:$0xf]  ;;  %v16539_v61 = vor.u32 %v18898_v53, %v16538_v52 }
 0x2c4   : > { %8550 = vmatpush.bf16.msra.mxu2 %v13515_v27  ;;  %v18610_v27 = vld [vmem:[#allocation7 + $0x1804] sm:$0xf0]  ;;  %v13444_v13 = vld [vmem:[#allocation7 + $0x8d8] sm:$0xf0]  ;;  %v18079_v52 = vld [vmem:[#allocation7 + $0x774] sm:$0xf] }
 0x2c5   : > { %8563 = vmatpush.bf16.msra.mxu3 %v14091_v31  ;;  %v13300_v53 = vld [vmem:[#allocation7 + $0x7b8] sm:$0xf0] }
 0x2c6   : > { %8570 = vmatpush.bf16.msrb.mxu0 %v15099_v22  ;;  %8583 = vmatpush.bf16.msrb.mxu1 %v15675_v9  ;;  %v14810_v22 = vld [vmem:[#allocation7 + $0x1340] sm:$0xf]  ;;  %v8320_v39 = vpop.f32.mrf.mxu0 }
 0x2c7   : > { %8551 = vmatmul.bf16.vlgmr.msra.gmra.mxu2 %v20072_v2  ;;  %v15386_v9 = vld [vmem:[#allocation7 + $0x17c0] sm:$0xf]  ;;  %v14811_v31 = vor.u32 %v18466_v20, %v14810_v22  ;;  %v17953_v22 = vld [vmem:[#allocation7 + $0x384] sm:$0xf] }
 0x2c8   : > { %8595 = vmatpush.bf16.msrb.mxu2 %v16323_v24  ;;  %8564 = vmatmul.bf16.vlgmr.msra.gmra.mxu3 %v20074_v8  ;;  %v16610_v24 = vld [vmem:[#allocation7 + $0x2150] sm:$0xf]  ;;  %v15387_v33 = vor.u32 %v18610_v27, %v15386_v9  ;;  %v8333_v48 = vpop.f32.mrf.mxu1  ;;  %v12796_v27 = vld [vmem:[#allocation7 + $0x3c8] sm:$0xf0] }
 0x2c9   : > { %8608 = vmatpush.bf16.msrb.mxu3 %v16899_v36  ;;  %v18448_v36 = vld [vmem:[#allocation7 + $0x12f4] sm:$0xf0]  ;;  %v16611_v44 = vor.u32 %v18916_v32, %v16610_v24  ;;  %v16394_v24 = vld [vmem:[#allocation7 + $0x1fa0] sm:$0xf]  ;;  %v18862_v32 = vld [vmem:[#allocation7 + $0x1fe4] sm:$0xf0] }
 0x2ca   : > { %8571 = vmatpush.bf16.msrb.mxu0 %v15027_v43  ;;  %8584 = vmatpush.bf16.msrb.mxu1 %v15603_v40  ;;  %v18592_v43 = vld [vmem:[#allocation7 + $0x1774] sm:$0xf0]  ;;  %v15962_v40 = vld [vmem:[#allocation7 + $0x1c40] sm:$0xf]  ;;  %v16395_v48 = vor.u32 %v18862_v32, %v16394_v24 }
 0x2cb   : > { %v15315_v55 = vor.u32 %v18592_v43, %v15314_v42  ;;  %v15963_v60 = vor.u32 %v18754_v47, %v15962_v40  ;;  %v8357_v59 = vpop.f32.mrf.mxu3  ;;  %v14596_v42 = vld [vmem:[#allocation7 + $0x11d8] sm:$0xf0] }
 0x2cc   : > { %8596 = vmatpush.bf16.msrb.mxu2 %v16251_v50  ;;  %v14739_v50 = vor.u32 %v18448_v36, %v14738_v12  ;;  %v14020_v12 = vld [vmem:[#allocation7 + $0xd58] sm:$0xf0]  ;;  %v12799_v36 = vor.u32 %v17953_v22, %v12796_v27 }
 0x2cd   : > { %8609 = vmatpush.bf16.msrb.mxu3 %v16827_v54  ;;  %v14666_v54 = vld [vmem:[#allocation7 + $0x1220] sm:$0xf]  ;;  %v12724_v40 = vld [vmem:[#allocation7 + $0x338] sm:$0xf0] }
 0x2ce   : > { %8572 = vmatpush.bf16.msrb.mxu0 %v14955_v57  ;;  %8585 = vmatpush.bf16.msrb.mxu1 %v15531_v62  ;;  %v15242_v57 = vld [vmem:[#allocation7 + $0x16a0] sm:$0xf]  ;;  %v17971_v62 = vld [vmem:[#allocation7 + $0x414] sm:$0xf]  ;;  %v14667_v11 = vor.u32 %v18430_v56, %v14666_v54  ;;  %v18241_v56 = vld [vmem:[#allocation7 + $0xc84] sm:$0xf] }
 0x2cf   : > { %v15243_v19 = vor.u32 %v18574_v26, %v15242_v57  ;;  %v13948_v57 = vld [vmem:[#allocation7 + $0xcc8] sm:$0xf0]  ;;  %v12580_v22 = vld [vmem:[#allocation7 + $0x218] sm:$0xf0] }
 0x2d0   : > { %8597 = vmatpush.bf16.msrb.mxu2 %v16179_v6  ;;  %v8344_v6 = vpop.f32.mrf.mxu2  ;;  %v13156_v27 = vld [vmem:[#allocation7 + $0x698] sm:$0xf0] }
 0x2d1   : > { %8610 = vmatpush.bf16.msrb.mxu3 %v16755_v16  ;;  %v18736_v16 = vld [vmem:[#allocation7 + $0x1bf4] sm:$0xf0]  ;;  %v8345_v17 = vadd.f32 %v8344_v6, %v8332_v34  ;;  %v15818_v34 = vld [vmem:[#allocation7 + $0x1b20] sm:$0xf]  ;;  %v12652_v6 = vld [vmem:[#allocation7 + $0x2a8] sm:$0xf0] }
 0x2d2   : > { %8573 = vmatpush.bf16.msrb.mxu0 %v14883_v18  ;;  %8586 = vmatpush.bf16.msrb.mxu1 %v15459_v21  ;;  %v16466_v18 = vld [vmem:[#allocation7 + $0x2030] sm:$0xf]  ;;  %v12871_v21 = vor.u32 %v17971_v62, %v12868_v4  ;;  %v15891_v9 = vor.u32 %v18736_v16, %v15890_v1  ;;  %v14524_v62 = vld [vmem:[#allocation7 + $0x1148] sm:$0xf0]  ;;  %v13303_v4 = vor.u32 %v18079_v52, %v13300_v53  ;;  %v18331_v52 = vld [vmem:[#allocation7 + $0xf54] sm:$0xf] }
 0x2d3   : > { %v20185_v20 = vadd.f32 %v8357_v59, %v8345_v17  ;;  %v16467_v30 = vor.u32 %v18880_v51, %v16466_v18  ;;  %v8359_v54 = vpop.f32.mrf.mxu3  ;;  %v13228_v1 = vld [vmem:[#allocation7 + $0x728] sm:$0xf0]  ;;  %v18223_v17 = vld [vmem:[#allocation7 + $0xbf4] sm:$0xf]  ;;  %v13876_v59 = vld [vmem:[#allocation7 + $0xc38] sm:$0xf0] }
 0x2d4   : > { %8598 = vmatpush.bf16.msrb.mxu2 %v16107_v23  ;;  %v13447_v23 = vor.u32 %v18115_v5, %v13444_v13  ;;  %v17917_v5 = vld [vmem:[#allocation7 + $0x264] sm:$0xf]  ;;  %v18367_v18 = vld [vmem:[#allocation7 + $0x1074] sm:$0xf]  ;;  %v14452_v51 = vld [vmem:[#allocation7 + $0x10b8] sm:$0xf0] }
 0x2d5   : > { %8611 = vmatpush.bf16.msrb.mxu3 %v16683_v28  ;;  %v18097_v28 = vld [vmem:[#allocation7 + $0x804] sm:$0xf]  ;;  %v14308_v53 = vld [vmem:[#allocation7 + $0xf98] sm:$0xf0] }
 0x2d6   : > { %8574 = vmatpush.bf16.msrb.mxu0 %v14811_v31  ;;  %8587 = vmatpush.bf16.msrb.mxu1 %v15387_v33  ;;  %v18718_v31 = vld [vmem:[#allocation7 + $0x1b64] sm:$0xf0]  ;;  %v18259_v33 = vld [vmem:[#allocation7 + $0xd14] sm:$0xf]  ;;  %v13375_v43 = vor.u32 %v18097_v28, %v13372_v29  ;;  %v18061_v13 = vld [vmem:[#allocation7 + $0x6e4] sm:$0xf]  ;;  %v14455_v29 = vor.u32 %v18367_v18, %v14452_v51 }
 0x2d7   : > { %v15819_v39 = vor.u32 %v18718_v31, %v15818_v34  ;;  %v13804_v34 = vld [vmem:[#allocation7 + $0xba8] sm:$0xf0]  ;;  %v17989_v18 = vld [vmem:[#allocation7 + $0x4a4] sm:$0xf] }
 0x2d8   : > { %8599 = vmatpush.bf16.msrb.mxu2 %v16035_v37  ;;  %v18403_v37 = vld [vmem:[#allocation7 + $0x1194] sm:$0xf]  ;;  %v8346_v47 = vpop.f32.mrf.mxu2  ;;  %v12940_v51 = vld [vmem:[#allocation7 + $0x4e8] sm:$0xf0] }
 0x2d9   : > { %8612 = vmatpush.bf16.msrb.mxu3 %v16611_v44  ;;  %v17935_v44 = vld [vmem:[#allocation7 + $0x2f4] sm:$0xf] }
 0x2da   : > { %8575 = vmatpush.bf16.msrb.mxu0 %v14739_v50  ;;  %8588 = vmatpush.bf16.msrb.mxu1 %v15315_v55  ;;  %v14023_v50 = vor.u32 %v18259_v33, %v14020_v12  ;;  %v14599_v55 = vor.u32 %v18403_v37, %v14596_v42  ;;  %v12727_v26 = vor.u32 %v17935_v44, %v12724_v40  ;;  %v18349_v33 = vld [vmem:[#allocation7 + $0xfe4] sm:$0xf]  ;;  %v14380_v12 = vld [vmem:[#allocation7 + $0x1028] sm:$0xf0] }
 0x2db   : > { %v17881_v37 = vld [vmem:[#allocation7 + $0x144] sm:$0xf]  ;;  %v12508_v42 = vld [vmem:[#allocation7 + $0x188] sm:$0xf0]  ;;  %v14383_v47 = vor.u32 %v18349_v33, %v14380_v12  ;;  %v14164_v33 = vld [vmem:[#allocation7 + $0xe78] sm:$0xf0]  ;;  %v12943_v12 = vor.u32 %v17989_v18, %v12940_v51 }
 0x2dc   : > { %8600 = vmatpush.bf16.msrb.mxu2 %v15963_v60  ;;  %v18385_v60 = vld [vmem:[#allocation7 + $0x1104] sm:$0xf]  ;;  %v13084_v40 = vld [vmem:[#allocation7 + $0x608] sm:$0xf0] }
 0x2dd   : > { %8613 = vmatpush.bf16.msrb.mxu3 %v16539_v61  ;;  %v13951_v61 = vor.u32 %v18241_v56, %v13948_v57  ;;  %v14527_v16 = vor.u32 %v18385_v60, %v14524_v62  ;;  %v18025_v44 = vld [vmem:[#allocation7 + $0x5c4] sm:$0xf]  ;;  %v12436_v56 = vld [vmem:[#allocation7 + $0xf8] sm:$0xf0]  ;;  %v16252_v51 = vld [vmem:[#allocation7 + $0x1ec8] sm:$0xf0] }
 0x2de   : > { %8576 = vmatpush.bf16.msrb.mxu0 %v14667_v11  ;;  %8589 = vmatpush.bf16.msrb.mxu1 %v15243_v19  ;;  %v12655_v11 = vor.u32 %v17917_v5, %v12652_v6  ;;  %v13231_v19 = vor.u32 %v18061_v13, %v13228_v1  ;;  %v8370_v28 = vpop.f32.mrf.mxu0  ;;  %v13087_v54 = vor.u32 %v18025_v44, %v13084_v40  ;;  %v13012_v60 = vld [vmem:[#allocation7 + $0x578] sm:$0xf0]  ;;  %v18169_v5 = vld [vmem:[#allocation7 + $0xa44] sm:$0xf]  ;;  %v13660_v6 = vld [vmem:[#allocation7 + $0xa88] sm:$0xf0] }
 0x2df   : > { %v8371_v31 = vadd.f32 %v8370_v28, %v20185_v20  ;;  %v12511_v20 = vor.u32 %v17881_v37, %v12508_v42  ;;  %v18313_v1 = vld [vmem:[#allocation7 + $0xec4] sm:$0xf]  ;;  %v15748_v28 = vld [vmem:[#allocation7 + $0x1ad8] sm:$0xf0]  ;;  %v15100_v40 = vld [vmem:[#allocation7 + $0x15c8] sm:$0xf0] }
 0x2e0   : > { %8601 = vmatpush.bf16.msrb.mxu2 %v15891_v9  ;;  %v18043_v9 = vld [vmem:[#allocation7 + $0x654] sm:$0xf]  ;;  %v8383_v24 = vpop.f32.mrf.mxu1  ;;  %v18529_v37 = vld [vmem:[#allocation7 + $0x1584] sm:$0xf] }
 0x2e1   : > { %8614 = vmatpush.bf16.msrb.mxu3 %v16467_v30  ;;  %8577 = vmatmul.bf16.vlgmr.msrb.gmra.mxu0 %v20080_v38  ;;  %v18205_v30 = vld [vmem:[#allocation7 + $0xb64] sm:$0xf] }
 0x2e2   : > { %8621 = vmatpush.bf16.msra.mxu0 %v12871_v21  ;;  %8634 = vmatpush.bf16.msra.mxu1 %v13447_v23  ;;  %v17899_v21 = vld [vmem:[#allocation7 + $0x1d4] sm:$0xf]  ;;  %v13879_v23 = vor.u32 %v18223_v17, %v13876_v59  ;;  %v17845_v17 = vld [vmem:[#allocation7 + $0x24] sm:$0xf] }
 0x2e3   : > { %8590 = vmatmul.bf16.vlgmr.msrb.gmra.mxu1 %v20082_v46  ;;  %v12583_v32 = vor.u32 %v17899_v21, %v12580_v22  ;;  %v18547_v21 = vld [vmem:[#allocation7 + $0x1614] sm:$0xf]  ;;  %v15172_v22 = vld [vmem:[#allocation7 + $0x1658] sm:$0xf0]  ;;  %v18817_v18 = vld [vmem:[#allocation7 + $0x1e84] sm:$0xf] }
 0x2e4   : > { %8602 = vmatpush.bf16.msrb.mxu2 %v15819_v39  ;;  %v13807_v39 = vor.u32 %v18205_v30, %v13804_v34  ;;  %v13588_v30 = vld [vmem:[#allocation7 + $0x9f8] sm:$0xf0] }
 0x2e5   : > { %8615 = vmatpush.bf16.msrb.mxu3 %v16395_v48  ;;  %v18187_v48 = vld [vmem:[#allocation7 + $0xad4] sm:$0xf] }
 0x2e6   : > { %8622 = vmatpush.bf16.msra.mxu0 %v12799_v36  ;;  %8635 = vmatpush.bf16.msra.mxu1 %v13375_v43  ;;  %v13159_v36 = vor.u32 %v18043_v9, %v13156_v27  ;;  %v8384_v43 = vadd.f32 %v8383_v24, %v8371_v31  ;;  %v8372_v62 = vpop.f32.mrf.mxu0 }
 0x2e7   : > { %8603 = vmatmul.bf16.vlgmr.msrb.gmra.mxu2 %v20088_v7 }
 0x2e8   : > { %8647 = vmatpush.bf16.msra.mxu2 %v14023_v50  ;;  %8616 = vmatmul.bf16.vlgmr.msrb.gmra.mxu3 %v20090_v14  ;;  %v13732_v50 = vld [vmem:[#allocation7 + $0xb18] sm:$0xf0] }
 0x2e9   : > { %8660 = vmatpush.bf16.msra.mxu3 %v14599_v55  ;;  %v17863_v55 = vld [vmem:[#allocation7 + $0xb4] sm:$0xf]  ;;  %v13735_v57 = vor.u32 %v18187_v48, %v13732_v50  ;;  %v15676_v48 = vld [vmem:[#allocation7 + $0x1a48] sm:$0xf0] }
 0x2ea   : > { %8623 = vmatpush.bf16.msra.mxu0 %v12727_v26  ;;  %8636 = vmatpush.bf16.msra.mxu1 %v13303_v4  ;;  %v18007_v26 = vld [vmem:[#allocation7 + $0x534] sm:$0xf]  ;;  %v14311_v4 = vor.u32 %v18331_v52, %v14308_v53  ;;  %v12439_v13 = vor.u32 %v17863_v55, %v12436_v56  ;;  %v8396_v9 = vpop.f32.mrf.mxu2  ;;  %v18277_v52 = vld [vmem:[#allocation7 + $0xda4] sm:$0xf]  ;;  %v16324_v56 = vld [vmem:[#allocation7 + $0x1f58] sm:$0xf0] }
 0x2eb   : > { %v13015_v59 = vor.u32 %v18007_v26, %v13012_v60  ;;  %v8397_v34 = vadd.f32 %v8396_v9, %v8384_v43  ;;  %v8409_v31 = vpop.f32.mrf.mxu3  ;;  %v18133_v43 = vld [vmem:[#allocation7 + $0x924] sm:$0xf]  ;;  %v18835_v55 = vld [vmem:[#allocation7 + $0x1f14] sm:$0xf]  ;;  %v16900_v60 = vld [vmem:[#allocation7 + $0x23d8] sm:$0xf0] }
 0x2ec   : > { %8648 = vmatpush.bf16.msra.mxu2 %v13951_v61  ;;  %v8385_v61 = vpop.f32.mrf.mxu1  ;;  %v18979_v26 = vld [vmem:[#allocation7 + $0x2394] sm:$0xf]  ;;  %v18493_v9 = vld [vmem:[#allocation7 + $0x1464] sm:$0xf] }
 0x2ed   : > { %8661 = vmatpush.bf16.msra.mxu3 %v14527_v16  ;;  %v14236_v16 = vld [vmem:[#allocation7 + $0xf08] sm:$0xf0]  ;;  %v20192_v42 = vadd.f32 %v8409_v31, %v8397_v34  ;;  %v18799_v31 = vld [vmem:[#allocation7 + $0x1df4] sm:$0xf] }
 0x2ee   : > { %8624 = vmatpush.bf16.msra.mxu0 %v12655_v11  ;;  %8637 = vmatpush.bf16.msra.mxu1 %v13231_v19  ;;  %v12364_v11 = vld [vmem:[#allocation7 + $0x68] sm:$0xf0]  ;;  %v13663_v19 = vor.u32 %v18169_v5, %v13660_v6  ;;  %v14239_v27 = vor.u32 %v18313_v1, %v14236_v16  ;;  %v18511_v5 = vld [vmem:[#allocation7 + $0x14f4] sm:$0xf]  ;;  %v15028_v6 = vld [vmem:[#allocation7 + $0x1538] sm:$0xf0]  ;;  %v16327_v1 = vor.u32 %v18835_v55, %v16324_v56 }
 0x2ef   : > { %v12367_v24 = vor.u32 %v17845_v17, %v12364_v11  ;;  %v9559_v53 = vpack.c.bf16 %v20192_v42, %v20166_v35  ;;  %v18655_v16 = vld [vmem:[#allocation7 + $0x1974] sm:$0xf]  ;;  %v15604_v17 = vld [vmem:[#allocation7 + $0x19b8] sm:$0xf0]  ;;  %v16903_v11 = vor.u32 %v18979_v26, %v16900_v60  ;;  %v18925_v55 = vld [vmem:[#allocation7 + $0x21e4] sm:$0xf] }
 0x2f0   : > { %8649 = vmatpush.bf16.msra.mxu2 %v13879_v23  ;;  %v18691_v23 = vld [vmem:[#allocation7 + $0x1a94] sm:$0xf]  ;;  %v16684_v56 = vld [vmem:[#allocation7 + $0x2228] sm:$0xf0]  ;;  %v18457_v60 = vld [vmem:[#allocation7 + $0x1344] sm:$0xf] }
 0x2f1   : > { %8662 = vmatpush.bf16.msra.mxu3 %v14455_v29  ;;  %v18151_v29 = vld [vmem:[#allocation7 + $0x9b4] sm:$0xf] }
 0x2f2   : > { %8625 = vmatpush.bf16.msra.mxu0 %v12583_v32  ;;  %8638 = vmatpush.bf16.msra.mxu1 %v13159_v36  ;;  %v18295_v32 = vld [vmem:[#allocation7 + $0xe34] sm:$0xf]  ;;  %v15175_v36 = vor.u32 %v18547_v21, %v15172_v22  ;;  %v13591_v44 = vor.u32 %v18151_v29, %v13588_v30  ;;  %v8398_v61 = vpop.f32.mrf.mxu2  ;;  %v18961_v21 = vld [vmem:[#allocation7 + $0x2304] sm:$0xf]  ;;  %v16828_v22 = vld [vmem:[#allocation7 + $0x2348] sm:$0xf0] }
 0x2f3   : > { %v14167_v50 = vor.u32 %v18295_v32, %v14164_v33  ;;  %v18637_v29 = vld [vmem:[#allocation7 + $0x18e4] sm:$0xf]  ;;  %v15532_v30 = vld [vmem:[#allocation7 + $0x1928] sm:$0xf0]  ;;  %v16831_v34 = vor.u32 %v18961_v21, %v16828_v22  ;;  %v18943_v33 = vld [vmem:[#allocation7 + $0x2274] sm:$0xf]  ;;  %v16687_v61 = vor.u32 %v18925_v55, %v16684_v56 }
 0x2f4   : > { %8650 = vmatpush.bf16.msra.mxu2 %v13807_v39  ;;  %v15751_v39 = vor.u32 %v18691_v23, %v15748_v28  ;;  %v15607_v23 = vor.u32 %v18655_v16, %v15604_v17  ;;  %v16255_v28 = vor.u32 %v18817_v18, %v16252_v51  ;;  %v18907_v17 = vld [vmem:[#allocation7 + $0x2154] sm:$0xf]  ;;  %v14740_v51 = vld [vmem:[#allocation7 + $0x12f8] sm:$0xf0] }
 0x2f5   : > { %8663 = vmatpush.bf16.msra.mxu3 %v14383_v47  ;;  %v18673_v47 = vld [vmem:[#allocation7 + $0x1a04] sm:$0xf]  ;;  %v18439_v18 = vld [vmem:[#allocation7 + $0x12b4] sm:$0xf]  ;;  %v15316_v22 = vld [vmem:[#allocation7 + $0x1778] sm:$0xf0] }
 0x2f6   : > { %8626 = vmatpush.bf16.msra.mxu0 %v12511_v20  ;;  %8639 = vmatpush.bf16.msra.mxu1 %v13087_v54  ;;  %v13516_v20 = vld [vmem:[#allocation7 + $0x968] sm:$0xf0]  ;;  %v15679_v62 = vor.u32 %v18673_v47, %v15676_v48  ;;  %v15460_v47 = vld [vmem:[#allocation7 + $0x1898] sm:$0xf0]  ;;  %v18583_v21 = vld [vmem:[#allocation7 + $0x1734] sm:$0xf] }
 0x2f7   : > { %v14092_v54 = vld [vmem:[#allocation7 + $0xde8] sm:$0xf0]  ;;  %v18871_v56 = vld [vmem:[#allocation7 + $0x2034] sm:$0xf] }
 0x2f8   : > { %8651 = vmatpush.bf16.msra.mxu2 %v13735_v57  ;;  %v15103_v57 = vor.u32 %v18529_v37, %v15100_v40  ;;  %v18475_v37 = vld [vmem:[#allocation7 + $0x13d4] sm:$0xf] }
 0x2f9   : > { %8664 = vmatpush.bf16.msra.mxu3 %v14311_v4  ;;  %v13519_v4 = vor.u32 %v18133_v43, %v13516_v20  ;;  %v18619_v40 = vld [vmem:[#allocation7 + $0x1854] sm:$0xf]  ;;  %v18781_v43 = vld [vmem:[#allocation7 + $0x1d64] sm:$0xf]  ;;  %v16108_v20 = vld [vmem:[#allocation7 + $0x1da8] sm:$0xf0] }
 0x2fa   : > { %8627 = vmatpush.bf16.msra.mxu0 %v12439_v13  ;;  %8640 = vmatpush.bf16.msra.mxu1 %v13015_v59  ;;  %v14095_v13 = vor.u32 %v18277_v52, %v14092_v54  ;;  %v8411_v59 = vpop.f32.mrf.mxu3  ;;  %v15463_v26 = vor.u32 %v18619_v40, %v15460_v47  ;;  %v13450_v40 = vld [vmem:[#allocation7 + $0x898] sm:$0xf] }
 0x2fb   : > { %v16612_v59 = vld [vmem:[#allocation7 + $0x2198] sm:$0xf0] }
 0x2fc   : > { %8652 = vmatpush.bf16.msra.mxu2 %v13663_v19  ;;  %v15031_v19 = vor.u32 %v18511_v5, %v15028_v6  ;;  %v18601_v5 = vld [vmem:[#allocation7 + $0x17c4] sm:$0xf]  ;;  %v15388_v6 = vld [vmem:[#allocation7 + $0x1808] sm:$0xf0] }
 0x2fd   : > { %8665 = vmatpush.bf16.msra.mxu3 %v14239_v27  ;;  %v14956_v27 = vld [vmem:[#allocation7 + $0x14a8] sm:$0xf0] }
 0x2fe   : > { %8628 = vmatpush.bf16.msra.mxu0 %v12367_v24  ;;  %8641 = vmatpush.bf16.msra.mxu1 %v12943_v12  ;;  %v16180_v24 = vld [vmem:[#allocation7 + $0x1e38] sm:$0xf0]  ;;  %v14959_v32 = vor.u32 %v18493_v9, %v14956_v27  ;;  %v8422_v48 = vpop.f32.mrf.mxu0  ;;  %v16615_v9 = vor.u32 %v18907_v17, %v16612_v59  ;;  %v18745_v27 = vld [vmem:[#allocation7 + $0x1c44] sm:$0xf]  ;;  %v15820_v59 = vld [vmem:[#allocation7 + $0x1b68] sm:$0xf0] }
 0x2ff   : > { %v16756_v12 = vld [vmem:[#allocation7 + $0x22b8] sm:$0xf0] }
 0x300   : > { %8653 = vmatpush.bf16.msra.mxu2 %v13591_v44  ;;  %v16183_v44 = vor.u32 %v18799_v31, %v16180_v24  ;;  %v8435_v52 = vpop.f32.mrf.mxu1  ;;  %v16540_v31 = vld [vmem:[#allocation7 + $0x2108] sm:$0xf0]  ;;  %v18421_v24 = vld [vmem:[#allocation7 + $0x1224] sm:$0xf] }
 0x301   : > { %8666 = vmatpush.bf16.msra.mxu3 %v14167_v50  ;;  %8629 = vmatmul.bf16.vlgmr.msra.gmra.mxu0 %v20064_v41  ;;  %v16759_v50 = vor.u32 %v18943_v33, %v16756_v12  ;;  %v14668_v33 = vld [vmem:[#allocation7 + $0x1268] sm:$0xf0]  ;;  %v18565_v12 = vld [vmem:[#allocation7 + $0x16a4] sm:$0xf] }
 0x302   : > { %8673 = vmatpush.bf16.msrb.mxu0 %v15175_v36  ;;  %8686 = vmatpush.bf16.msrb.mxu1 %v15751_v39  ;;  %v15535_v36 = vor.u32 %v18637_v29, %v15532_v30  ;;  %v14884_v39 = vld [vmem:[#allocation7 + $0x1418] sm:$0xf0]  ;;  %v14743_v30 = vor.u32 %v18439_v18, %v14740_v51  ;;  %v14671_v55 = vor.u32 %v18421_v24, %v14668_v33  ;;  %v16396_v18 = vld [vmem:[#allocation7 + $0x1fe8] sm:$0xf0]  ;;  %v14026_v51 = vld [vmem:[#allocation7 + $0xd18] sm:$0xf] }
 0x303   : > { %8642 = vmatmul.bf16.vlgmr.msra.gmra.mxu1 %v20066_v45  ;;  %v14887_v54 = vor.u32 %v18475_v37, %v14884_v39  ;;  %v12874_v39 = vld [vmem:[#allocation7 + $0x418] sm:$0xf] }
 0x304   : > { %8654 = vmatpush.bf16.msra.mxu2 %v13519_v4  ;;  %v16111_v4 = vor.u32 %v18781_v43, %v16108_v20  ;;  %v18727_v43 = vld [vmem:[#allocation7 + $0x1bb4] sm:$0xf]  ;;  %v15892_v20 = vld [vmem:[#allocation7 + $0x1bf8] sm:$0xf0]  ;;  %v13306_v24 = vld [vmem:[#allocation7 + $0x778] sm:$0xf] }
 0x305   : > { %8667 = vmatpush.bf16.msra.mxu3 %v14095_v13  ;;  %v18763_v13 = vld [vmem:[#allocation7 + $0x1cd4] sm:$0xf] }
 0x306   : > { %8674 = vmatpush.bf16.msrb.mxu0 %v15103_v57  ;;  %8687 = vmatpush.bf16.msrb.mxu1 %v15679_v62  ;;  %v8436_v57 = vadd.f32 %v8435_v52, %v8422_v48  ;;  %v14812_v62 = vld [vmem:[#allocation7 + $0x1388] sm:$0xf0] }
 0x307   : > { %8655 = vmatmul.bf16.vlgmr.msra.gmra.mxu2 %v20072_v2  ;;  %v14815_v16 = vor.u32 %v18457_v60, %v14812_v62 }
 0x308   : > { %8699 = vmatpush.bf16.msrb.mxu2 %v16327_v1  ;;  %8668 = vmatmul.bf16.vlgmr.msra.gmra.mxu3 %v20074_v8  ;;  %v16036_v1 = vld [vmem:[#allocation7 + $0x1d18] sm:$0xf0]  ;;  %v8437_v29 = vpop.f32.mrf.mxu1 }
 0x309   : > { %8712 = vmatpush.bf16.msrb.mxu3 %v16903_v11  ;;  %v15391_v11 = vor.u32 %v18601_v5, %v15388_v6  ;;  %v17945_v29 = vld [vmem:[#allocation7 + $0x33c] sm:$0xf0] }
 0x30a   : > { %8675 = vmatpush.bf16.msrb.mxu0 %v15031_v19  ;;  %8688 = vmatpush.bf16.msrb.mxu1 %v15607_v23  ;;  %v16039_v19 = vor.u32 %v18763_v13, %v16036_v1  ;;  %v8424_v23 = vpop.f32.mrf.mxu0  ;;  %v8448_v47 = vpop.f32.mrf.mxu2  ;;  %v17963_v13 = vld [vmem:[#allocation7 + $0x3cc] sm:$0xf0]  ;;  %v13378_v1 = vld [vmem:[#allocation7 + $0x808] sm:$0xf] }
 0x30b   : > { %v8449_v52 = vadd.f32 %v8448_v47, %v8436_v57  ;;  %v18709_v57 = vld [vmem:[#allocation7 + $0x1b24] sm:$0xf]  ;;  %v18413_v23 = vld [vmem:[#allocation7 + $0x11dc] sm:$0xf0] }
 0x30c   : > { %8700 = vmatpush.bf16.msrb.mxu2 %v16255_v28  ;;  %v15964_v28 = vld [vmem:[#allocation7 + $0x1c88] sm:$0xf0] }
 0x30d   : > { %8713 = vmatpush.bf16.msrb.mxu3 %v16831_v34  ;;  %v18889_v34 = vld [vmem:[#allocation7 + $0x20c4] sm:$0xf]  ;;  %v15967_v37 = vor.u32 %v18745_v27, %v15964_v28  ;;  %v15823_v27 = vor.u32 %v18709_v57, %v15820_v59  ;;  %v12730_v28 = vld [vmem:[#allocation7 + $0x2f8] sm:$0xf]  ;;  %v13810_v59 = vld [vmem:[#allocation7 + $0xb68] sm:$0xf] }
 0x30e   : > { %8676 = vmatpush.bf16.msrb.mxu0 %v14959_v32  ;;  %8689 = vmatpush.bf16.msrb.mxu1 %v15535_v36  ;;  %v15319_v32 = vor.u32 %v18583_v21, %v15316_v22  ;;  %v15244_v36 = vld [vmem:[#allocation7 + $0x16e8] sm:$0xf0]  ;;  %v16543_v48 = vor.u32 %v18889_v34, %v16540_v31  ;;  %v14602_v22 = vld [vmem:[#allocation7 + $0x1198] sm:$0xf] }
 0x30f   : > { %v15247_v60 = vor.u32 %v18565_v12, %v15244_v36  ;;  %v14603_v12 = vor.u32 %v18413_v23, %v14602_v22  ;;  %v13954_v36 = vld [vmem:[#allocation7 + $0xc88] sm:$0xf]  ;;  %v18359_v22 = vld [vmem:[#allocation7 + $0x102c] sm:$0xf0] }
 0x310   : > { %8701 = vmatpush.bf16.msrb.mxu2 %v16183_v44  ;;  %v17981_v44 = vld [vmem:[#allocation7 + $0x45c] sm:$0xf0] }
 0x311   : > { %8714 = vmatpush.bf16.msrb.mxu3 %v16759_v50  ;;  %v18125_v50 = vld [vmem:[#allocation7 + $0x8dc] sm:$0xf0]  ;;  %v12875_v62 = vor.u32 %v17981_v44, %v12874_v39  ;;  %v12731_v39 = vor.u32 %v17945_v29, %v12730_v28  ;;  %v14530_v44 = vld [vmem:[#allocation7 + $0x1108] sm:$0xf] }
 0x312   : > { %8677 = vmatpush.bf16.msrb.mxu0 %v14887_v54  ;;  %8690 = vmatpush.bf16.msrb.mxu1 %v15463_v26  ;;  %v8461_v54 = vpop.f32.mrf.mxu3  ;;  %v16468_v26 = vld [vmem:[#allocation7 + $0x2078] sm:$0xf0]  ;;  %v13451_v6 = vor.u32 %v18125_v50, %v13450_v40  ;;  %v18395_v40 = vld [vmem:[#allocation7 + $0x114c] sm:$0xf0] }
 0x313   : > { %v20200_v5 = vadd.f32 %v8461_v54, %v8449_v52  ;;  %v16471_v17 = vor.u32 %v18871_v56, %v16468_v26  ;;  %v17927_v50 = vld [vmem:[#allocation7 + $0x2ac] sm:$0xf0]  ;;  %v14531_v54 = vor.u32 %v18395_v40, %v14530_v44  ;;  %v18233_v56 = vld [vmem:[#allocation7 + $0xc3c] sm:$0xf0]  ;;  %v13018_v40 = vld [vmem:[#allocation7 + $0x538] sm:$0xf] }
 0x314   : > { %8702 = vmatpush.bf16.msrb.mxu2 %v16111_v4  ;;  %v12802_v4 = vld [vmem:[#allocation7 + $0x388] sm:$0xf]  ;;  %v18071_v52 = vld [vmem:[#allocation7 + $0x72c] sm:$0xf0] }
 0x315   : > { %8715 = vmatpush.bf16.msrb.mxu3 %v16687_v61  ;;  %v15895_v61 = vor.u32 %v18727_v43, %v15892_v20  ;;  %v12803_v21 = vor.u32 %v17963_v13, %v12802_v4  ;;  %v13234_v20 = vld [vmem:[#allocation7 + $0x6e8] sm:$0xf] }
 0x316   : > { %8678 = vmatpush.bf16.msrb.mxu0 %v14815_v16  ;;  %8691 = vmatpush.bf16.msrb.mxu1 %v15391_v11  ;;  %v18107_v16 = vld [vmem:[#allocation7 + $0x84c] sm:$0xf0]  ;;  %v18853_v11 = vld [vmem:[#allocation7 + $0x1fa4] sm:$0xf]  ;;  %v13235_v4 = vor.u32 %v18071_v52, %v13234_v20 }
 0x317   : > { %v16399_v34 = vor.u32 %v18853_v11, %v16396_v18  ;;  %v18215_v11 = vld [vmem:[#allocation7 + $0xbac] sm:$0xf0] }
 0x318   : > { %8703 = vmatpush.bf16.msrb.mxu2 %v16039_v19  ;;  %v18269_v19 = vld [vmem:[#allocation7 + $0xd5c] sm:$0xf0]  ;;  %v13811_v29 = vor.u32 %v18215_v11, %v13810_v59  ;;  %v18179_v20 = vld [vmem:[#allocation7 + $0xa8c] sm:$0xf0]  ;;  %v13594_v11 = vld [vmem:[#allocation7 + $0x9b8] sm:$0xf] }
 0x319   : > { %8716 = vmatpush.bf16.msrb.mxu3 %v16615_v9  ;;  %v13379_v9 = vor.u32 %v18107_v16, %v13378_v1  ;;  %v14027_v31 = vor.u32 %v18269_v19, %v14026_v51  ;;  %v13162_v1 = vld [vmem:[#allocation7 + $0x658] sm:$0xf]  ;;  %v18053_v16 = vld [vmem:[#allocation7 + $0x69c] sm:$0xf0] }
 0x31a   : > { %8679 = vmatpush.bf16.msrb.mxu0 %v14743_v30  ;;  %8692 = vmatpush.bf16.msrb.mxu1 %v15319_v32  ;;  %v8450_v30 = vpop.f32.mrf.mxu2  ;;  %v18089_v32 = vld [vmem:[#allocation7 + $0x7bc] sm:$0xf0]  ;;  %v8463_v33 = vpop.f32.mrf.mxu3  ;;  %v13163_v23 = vor.u32 %v18053_v16, %v13162_v1  ;;  %v15754_v16 = vld [vmem:[#allocation7 + $0x1a98] sm:$0xf] }
 0x31b   : > { %v13307_v47 = vor.u32 %v18089_v32, %v13306_v24  ;;  %v13090_v30 = vld [vmem:[#allocation7 + $0x5c8] sm:$0xf]  ;;  %v13738_v24 = vld [vmem:[#allocation7 + $0xad8] sm:$0xf]  ;;  %v18197_v32 = vld [vmem:[#allocation7 + $0xb1c] sm:$0xf0] }
 0x31c   : > { %8704 = vmatpush.bf16.msrb.mxu2 %v15967_v37  ;;  %v18251_v37 = vld [vmem:[#allocation7 + $0xccc] sm:$0xf0]  ;;  %v14314_v33 = vld [vmem:[#allocation7 + $0xf58] sm:$0xf]  ;;  %v13739_v44 = vor.u32 %v18197_v32, %v13738_v24  ;;  %v18557_v1 = vld [vmem:[#allocation7 + $0x165c] sm:$0xf0] }
 0x31d   : > { %8717 = vmatpush.bf16.msrb.mxu3 %v16543_v48  ;;  %v12658_v48 = vld [vmem:[#allocation7 + $0x268] sm:$0xf]  ;;  %v13955_v43 = vor.u32 %v18251_v37, %v13954_v36  ;;  %v12442_v37 = vld [vmem:[#allocation7 + $0xb8] sm:$0xf]  ;;  %v18701_v59 = vld [vmem:[#allocation7 + $0x1adc] sm:$0xf0] }
 0x31e   : > { %8680 = vmatpush.bf16.msrb.mxu0 %v14671_v55  ;;  %8693 = vmatpush.bf16.msrb.mxu1 %v15247_v60  ;;  %v13882_v55 = vld [vmem:[#allocation7 + $0xbf8] sm:$0xf]  ;;  %v12659_v26 = vor.u32 %v17927_v50, %v12658_v48  ;;  %v18539_v24 = vld [vmem:[#allocation7 + $0x15cc] sm:$0xf0]  ;;  %v15682_v32 = vld [vmem:[#allocation7 + $0x1a08] sm:$0xf] }
 0x31f   : > { %v14458_v60 = vld [vmem:[#allocation7 + $0x1078] sm:$0xf]  ;;  %v13883_v13 = vor.u32 %v18233_v56, %v13882_v55  ;;  %v14242_v55 = vld [vmem:[#allocation7 + $0xec8] sm:$0xf]  ;;  %v18323_v56 = vld [vmem:[#allocation7 + $0xf0c] sm:$0xf0] }
 0x320   : > { %8705 = vmatpush.bf16.msrb.mxu2 %v15895_v61  ;;  %v17909_v61 = vld [vmem:[#allocation7 + $0x21c] sm:$0xf0]  ;;  %v8487_v51 = vpop.f32.mrf.mxu1 }
 0x321   : > { %8718 = vmatpush.bf16.msrb.mxu3 %v16471_v17  ;;  %8681 = vmatmul.bf16.vlgmr.msrb.gmra.mxu0 %v20080_v38  ;;  %v8474_v17 = vpop.f32.mrf.mxu0 }
 0x322   : > { %8725 = vmatpush.bf16.msra.mxu0 %v12875_v62  ;;  %8738 = vmatpush.bf16.msra.mxu1 %v13451_v6  ;;  %v18377_v62 = vld [vmem:[#allocation7 + $0x10bc] sm:$0xf0]  ;;  %v12586_v6 = vld [vmem:[#allocation7 + $0x1d8] sm:$0xf]  ;;  %v8475_v18 = vadd.f32 %v8474_v17, %v20200_v5 }
 0x323   : > { %8694 = vmatmul.bf16.vlgmr.msrb.gmra.mxu1 %v20082_v46  ;;  %v14459_v57 = vor.u32 %v18377_v62, %v14458_v60  ;;  %v12587_v19 = vor.u32 %v17909_v61, %v12586_v6  ;;  %v17855_v62 = vld [vmem:[#allocation7 + $0x6c] sm:$0xf0] }
 0x324   : > { %8706 = vmatpush.bf16.msrb.mxu2 %v15823_v27  ;;  %v17891_v27 = vld [vmem:[#allocation7 + $0x18c] sm:$0xf0]  ;;  %v8488_v28 = vadd.f32 %v8487_v51, %v8475_v18  ;;  %v18161_v18 = vld [vmem:[#allocation7 + $0x9fc] sm:$0xf0] }
 0x325   : > { %8719 = vmatpush.bf16.msrb.mxu3 %v16399_v34  ;;  %v18035_v34 = vld [vmem:[#allocation7 + $0x60c] sm:$0xf0] }
 0x326   : > { %8726 = vmatpush.bf16.msra.mxu0 %v12803_v21  ;;  %8739 = vmatpush.bf16.msra.mxu1 %v13379_v9  ;;  %v14386_v21 = vld [vmem:[#allocation7 + $0xfe8] sm:$0xf]  ;;  %v13091_v36 = vor.u32 %v18035_v34, %v13090_v30  ;;  %v17999_v6 = vld [vmem:[#allocation7 + $0x4ec] sm:$0xf0]  ;;  %v15755_v34 = vor.u32 %v18701_v59, %v15754_v16 }
 0x327   : > { %8707 = vmatmul.bf16.vlgmr.msrb.gmra.mxu2 %v20088_v7  ;;  %v12514_v9 = vld [vmem:[#allocation7 + $0x148] sm:$0xf] }
 0x328   : > { %8751 = vmatpush.bf16.msra.mxu2 %v14027_v31  ;;  %8720 = vmatmul.bf16.vlgmr.msrb.gmra.mxu3 %v20090_v14  ;;  %v14387_v31 = vor.u32 %v18359_v22, %v14386_v21  ;;  %v12515_v5 = vor.u32 %v17891_v27, %v12514_v9  ;;  %v8489_v52 = vpop.f32.mrf.mxu1  ;;  %v14170_v22 = vld [vmem:[#allocation7 + $0xe38] sm:$0xf]  ;;  %v16834_v16 = vld [vmem:[#allocation7 + $0x2308] sm:$0xf] }
 0x329   : > { %8764 = vmatpush.bf16.msra.mxu3 %v14603_v12  ;;  %v18341_v12 = vld [vmem:[#allocation7 + $0xf9c] sm:$0xf0]  ;;  %v8476_v48 = vpop.f32.mrf.mxu0  ;;  %v15034_v52 = vld [vmem:[#allocation7 + $0x14f8] sm:$0xf]  ;;  %v14962_v59 = vld [vmem:[#allocation7 + $0x1468] sm:$0xf] }
 0x32a   : > { %8727 = vmatpush.bf16.msra.mxu0 %v12731_v39  ;;  %8740 = vmatpush.bf16.msra.mxu1 %v13307_v47  ;;  %v17873_v39 = vld [vmem:[#allocation7 + $0xfc] sm:$0xf0]  ;;  %v14315_v50 = vor.u32 %v18341_v12, %v14314_v33  ;;  %v8500_v17 = vpop.f32.mrf.mxu2  ;;  %v18143_v12 = vld [vmem:[#allocation7 + $0x96c] sm:$0xf0]  ;;  %v16906_v48 = vld [vmem:[#allocation7 + $0x2398] sm:$0xf] }
 0x32b   : > { %v18017_v47 = vld [vmem:[#allocation7 + $0x57c] sm:$0xf0]  ;;  %v8501_v51 = vadd.f32 %v8500_v17, %v8488_v28  ;;  %v13522_v28 = vld [vmem:[#allocation7 + $0x928] sm:$0xf]  ;;  %v18971_v17 = vld [vmem:[#allocation7 + $0x234c] sm:$0xf0] }
 0x32c   : > { %8752 = vmatpush.bf16.msra.mxu2 %v13955_v43  ;;  %v13666_v43 = vld [vmem:[#allocation7 + $0xa48] sm:$0xf]  ;;  %v13019_v60 = vor.u32 %v18017_v47, %v13018_v40  ;;  %v18845_v40 = vld [vmem:[#allocation7 + $0x1f5c] sm:$0xf0] }
 0x32d   : > { %8765 = vmatpush.bf16.msra.mxu3 %v14531_v54  ;;  %v12443_v54 = vor.u32 %v17873_v39, %v12442_v37  ;;  %v13667_v61 = vor.u32 %v18179_v20, %v13666_v43  ;;  %v18287_v39 = vld [vmem:[#allocation7 + $0xdec] sm:$0xf0]  ;;  %v13523_v20 = vor.u32 %v18143_v12, %v13522_v28 }
 0x32e   : > { %8728 = vmatpush.bf16.msra.mxu0 %v12659_v26  ;;  %8741 = vmatpush.bf16.msra.mxu1 %v13235_v4  ;;  %v12370_v26 = vld [vmem:[#allocation7 + $0x28] sm:$0xf] }
 0x32f   : > { %v12946_v4 = vld [vmem:[#allocation7 + $0x4a8] sm:$0xf]  ;;  %v12371_v21 = vor.u32 %v17855_v62, %v12370_v26  ;;  %v18665_v62 = vld [vmem:[#allocation7 + $0x19bc] sm:$0xf0] }
 0x330   : > { %8753 = vmatpush.bf16.msra.mxu2 %v13883_v13  ;;  %v15178_v13 = vld [vmem:[#allocation7 + $0x1618] sm:$0xf]  ;;  %v12947_v9 = vor.u32 %v17999_v6, %v12946_v4 }
 0x331   : > { %8766 = vmatpush.bf16.msra.mxu3 %v14459_v57  ;;  %v14243_v57 = vor.u32 %v18323_v56, %v14242_v55  ;;  %v15179_v27 = vor.u32 %v18557_v1, %v15178_v13  ;;  %v18827_v13 = vld [vmem:[#allocation7 + $0x1ecc] sm:$0xf0] }
 0x332   : > { %8729 = vmatpush.bf16.msra.mxu0 %v12587_v19  ;;  %8742 = vmatpush.bf16.msra.mxu1 %v13163_v23  ;;  %v8513_v19 = vpop.f32.mrf.mxu3  ;;  %v18305_v23 = vld [vmem:[#allocation7 + $0xe7c] sm:$0xf0]  ;;  %v8502_v55 = vpop.f32.mrf.mxu2 }
 0x333   : > { %v20207_v30 = vadd.f32 %v8513_v19, %v8501_v51  ;;  %v14171_v33 = vor.u32 %v18305_v23, %v14170_v22  ;;  %v15538_v51 = vld [vmem:[#allocation7 + $0x18e8] sm:$0xf]  ;;  %v18647_v19 = vld [vmem:[#allocation7 + $0x192c] sm:$0xf0]  ;;  %v16186_v22 = vld [vmem:[#allocation7 + $0x1df8] sm:$0xf] }
 0x334   : > { %8754 = vmatpush.bf16.msra.mxu2 %v13811_v29  ;;  %v15106_v29 = vld [vmem:[#allocation7 + $0x1588] sm:$0xf]  ;;  %v18809_v23 = vld [vmem:[#allocation7 + $0x1e3c] sm:$0xf0] }
 0x335   : > { %8767 = vmatpush.bf16.msra.mxu3 %v14387_v31  ;;  %v13595_v31 = vor.u32 %v18161_v18, %v13594_v11  ;;  %v9560_v37 = vpack.c.bf16 %v20207_v30, %v20179_v3  ;;  %v15107_v47 = vor.u32 %v18539_v24, %v15106_v29  ;;  %v18503_v11 = vld [vmem:[#allocation7 + $0x14ac] sm:$0xf0]  ;;  %v18953_v29 = vld [vmem:[#allocation7 + $0x22bc] sm:$0xf0]  ;;  %v15394_v55 = vld [vmem:[#allocation7 + $0x17c8] sm:$0xf] }
 0x336   : > { %8730 = vmatpush.bf16.msra.mxu0 %v12515_v5  ;;  %8743 = vmatpush.bf16.msra.mxu1 %v13091_v36  ;;  %v18683_v5 = vld [vmem:[#allocation7 + $0x1a4c] sm:$0xf0]  ;;  %v14098_v36 = vld [vmem:[#allocation7 + $0xda8] sm:$0xf]  ;;  %v18485_v24 = vld [vmem:[#allocation7 + $0x141c] sm:$0xf0] }
 0x337   : > { %v15683_v43 = vor.u32 %v18683_v5, %v15682_v32  ;;  %v14099_v56 = vor.u32 %v18287_v39, %v14098_v36  ;;  %v16187_v32 = vor.u32 %v18809_v23, %v16186_v22  ;;  %v15466_v5 = vld [vmem:[#allocation7 + $0x1858] sm:$0xf]  ;;  %v16114_v36 = vld [vmem:[#allocation7 + $0x1d68] sm:$0xf]  ;;  %v18791_v39 = vld [vmem:[#allocation7 + $0x1dac] sm:$0xf0] }
 0x338   : > { %8755 = vmatpush.bf16.msra.mxu2 %v13739_v44  ;;  %v16330_v44 = vld [vmem:[#allocation7 + $0x1f18] sm:$0xf]  ;;  %v16546_v23 = vld [vmem:[#allocation7 + $0x20c8] sm:$0xf]  ;;  %v19036_v3 = vld [vmem:[#allocation10 + $0x15c] sm:$0xf] }
 0x339   : > { %8768 = vmatpush.bf16.msra.mxu3 %v14315_v50  ;;  %v18989_v50 = vld [vmem:[#allocation7 + $0x23dc] sm:$0xf0]  ;;  %v16331_v26 = vor.u32 %v18845_v40, %v16330_v44  ;;  %v17118_v30 = vld [vmem:[#allocation10 + $0x174] sm:$0xf0] }
 0x33a   : > { %8731 = vmatpush.bf16.msra.mxu0 %v12443_v54  ;;  %8744 = vmatpush.bf16.msra.mxu1 %v13019_v60  ;;  %v18521_v54 = vld [vmem:[#allocation7 + $0x153c] sm:$0xf0]  ;;  %v15610_v60 = vld [vmem:[#allocation7 + $0x1978] sm:$0xf]  ;;  %v8515_v4 = vpop.f32.mrf.mxu3  ;;  %v16907_v6 = vor.u32 %v18989_v50, %v16906_v48  ;;  %v18935_v48 = vld [vmem:[#allocation7 + $0x222c] sm:$0xf0] }
 0x33b   : > { %v15035_v1 = vor.u32 %v18521_v54, %v15034_v52  ;;  %v18467_v52 = vld [vmem:[#allocation7 + $0x138c] sm:$0xf0]  ;;  %v16115_v54 = vor.u32 %v18791_v39, %v16114_v36  ;;  %v13452_v39 = vld [vmem:[#allocation7 + $0x8e0] sm:$0xf0] }
 0x33c   : > { %8756 = vmatpush.bf16.msra.mxu2 %v13667_v61  ;;  %v16258_v61 = vld [vmem:[#allocation7 + $0x1e88] sm:$0xf] }
 0x33d   : > { %8769 = vmatpush.bf16.msra.mxu3 %v14243_v57  ;;  %v15611_v57 = vor.u32 %v18665_v62, %v15610_v60  ;;  %v16259_v18 = vor.u32 %v18827_v13, %v16258_v61  ;;  %v16042_v60 = vld [vmem:[#allocation7 + $0x1cd8] sm:$0xf]  ;;  %v18773_v62 = vld [vmem:[#allocation7 + $0x1d1c] sm:$0xf0] }
 0x33e   : > { %8732 = vmatpush.bf16.msra.mxu0 %v12371_v21  ;;  %8745 = vmatpush.bf16.msra.mxu1 %v12947_v9  ;;  %v16835_v21 = vor.u32 %v18971_v17, %v16834_v16  ;;  %v14963_v9 = vor.u32 %v18503_v11, %v14962_v59  ;;  %v8526_v28 = vpop.f32.mrf.mxu0  ;;  %v18917_v61 = vld [vmem:[#allocation7 + $0x219c] sm:$0xf0]  ;;  %v16043_v17 = vor.u32 %v18773_v62, %v16042_v60 }
 0x33f   : > { %v18449_v16 = vld [vmem:[#allocation7 + $0x12fc] sm:$0xf0] }
 0x340   : > { %8757 = vmatpush.bf16.msra.mxu2 %v13595_v31  ;;  %v14890_v31 = vld [vmem:[#allocation7 + $0x13d8] sm:$0xf]  ;;  %v8539_v44 = vpop.f32.mrf.mxu1  ;;  %v18593_v59 = vld [vmem:[#allocation7 + $0x177c] sm:$0xf0] }
 0x341   : > { %8770 = vmatpush.bf16.msra.mxu3 %v14171_v33  ;;  %8733 = vmatmul.bf16.vlgmr.msra.gmra.mxu0 %v20064_v41  ;;  %v18629_v33 = vld [vmem:[#allocation7 + $0x189c] sm:$0xf0]  ;;  %v14891_v40 = vor.u32 %v18485_v24, %v14890_v31  ;;  %v8540_v50 = vadd.f32 %v8539_v44, %v8526_v28  ;;  %v15250_v31 = vld [vmem:[#allocation7 + $0x16a8] sm:$0xf]  ;;  %v18575_v24 = vld [vmem:[#allocation7 + $0x16ec] sm:$0xf0] }
 0x342   : > { %8777 = vmatpush.bf16.msrb.mxu0 %v15179_v27  ;;  %8790 = vmatpush.bf16.msrb.mxu1 %v15755_v34  ;;  %v16762_v27 = vld [vmem:[#allocation7 + $0x2278] sm:$0xf]  ;;  %v15539_v34 = vor.u32 %v18647_v19, %v15538_v51  ;;  %v15970_v51 = vld [vmem:[#allocation7 + $0x1c48] sm:$0xf]  ;;  %v18755_v19 = vld [vmem:[#allocation7 + $0x1c8c] sm:$0xf0] }
 0x343   : > { %8746 = vmatmul.bf16.vlgmr.msra.gmra.mxu1 %v20066_v45  ;;  %v16763_v12 = vor.u32 %v18953_v29, %v16762_v27  ;;  %v14674_v27 = vld [vmem:[#allocation7 + $0x1228] sm:$0xf]  ;;  %v18116_v28 = vld [vmem:[#allocation7 + $0x89c] sm:$0xf]  ;;  %v15898_v44 = vld [vmem:[#allocation7 + $0x1bb8] sm:$0xf] }
 0x344   : > { %8758 = vmatpush.bf16.msra.mxu2 %v13523_v20  ;;  %v14818_v20 = vld [vmem:[#allocation7 + $0x1348] sm:$0xf]  ;;  %v13455_v60 = vor.u32 %v18116_v28, %v13452_v39 }
 0x345   : > { %8771 = vmatpush.bf16.msra.mxu3 %v14099_v56  ;;  %v18611_v56 = vld [vmem:[#allocation7 + $0x180c] sm:$0xf0]  ;;  %v14819_v4 = vor.u32 %v18467_v52, %v14818_v20  ;;  %v16474_v20 = vld [vmem:[#allocation7 + $0x2038] sm:$0xf]  ;;  %v18881_v52 = vld [vmem:[#allocation7 + $0x207c] sm:$0xf0] }
 0x346   : > { %8778 = vmatpush.bf16.msrb.mxu0 %v15107_v47  ;;  %8791 = vmatpush.bf16.msrb.mxu1 %v15683_v43  ;;  %v16690_v47 = vld [vmem:[#allocation7 + $0x21e8] sm:$0xf]  ;;  %v15467_v43 = vor.u32 %v18629_v33, %v15466_v5  ;;  %v15395_v13 = vor.u32 %v18611_v56, %v15394_v55  ;;  %v8528_v11 = vpop.f32.mrf.mxu0  ;;  %v17972_v5 = vld [vmem:[#allocation7 + $0x41c] sm:$0xf]  ;;  %v12876_v33 = vld [vmem:[#allocation7 + $0x460] sm:$0xf0] }
 0x347   : > { %8759 = vmatmul.bf16.vlgmr.msra.gmra.mxu2 %v20072_v2  ;;  %v12879_v55 = vor.u32 %v17972_v5, %v12876_v33  ;;  %v17954_v56 = vld [vmem:[#allocation7 + $0x38c] sm:$0xf]  ;;  %v13956_v33 = vld [vmem:[#allocation7 + $0xcd0] sm:$0xf0] }
 0x348   : > { %8803 = vmatpush.bf16.msrb.mxu2 %v16331_v26  ;;  %8772 = vmatmul.bf16.vlgmr.msra.gmra.mxu3 %v20074_v8  ;;  %v16691_v26 = vor.u32 %v18935_v48, %v16690_v47  ;;  %v18242_v5 = vld [vmem:[#allocation7 + $0xc8c] sm:$0xf] }
 0x349   : > { %8816 = vmatpush.bf16.msrb.mxu3 %v16907_v6  ;;  %v16618_v6 = vld [vmem:[#allocation7 + $0x2158] sm:$0xf] }
 0x34a   : > { %8779 = vmatpush.bf16.msrb.mxu0 %v15035_v1  ;;  %8792 = vmatpush.bf16.msrb.mxu1 %v15611_v57  ;;  %v14746_v1 = vld [vmem:[#allocation7 + $0x12b8] sm:$0xf] }
 0x34b   : > { %v15322_v57 = vld [vmem:[#allocation7 + $0x1738] sm:$0xf]  ;;  %v14747_v22 = vor.u32 %v18449_v16, %v14746_v1  ;;  %v8565_v48 = vpop.f32.mrf.mxu3  ;;  %v18719_v1 = vld [vmem:[#allocation7 + $0x1b6c] sm:$0xf0]  ;;  %v16402_v16 = vld [vmem:[#allocation7 + $0x1fa8] sm:$0xf] }
 0x34c   : > { %8804 = vmatpush.bf16.msrb.mxu2 %v16259_v18  ;;  %v16619_v18 = vor.u32 %v18917_v61, %v16618_v6  ;;  %v15323_v29 = vor.u32 %v18593_v59, %v15322_v57  ;;  %v18098_v6 = vld [vmem:[#allocation7 + $0x80c] sm:$0xf]  ;;  %v13380_v61 = vld [vmem:[#allocation7 + $0x850] sm:$0xf0]  ;;  %v18260_v57 = vld [vmem:[#allocation7 + $0xd1c] sm:$0xf] }
 0x34d   : > { %8817 = vmatpush.bf16.msrb.mxu3 %v16835_v21  ;;  %v8541_v21 = vpop.f32.mrf.mxu1  ;;  %v14028_v59 = vld [vmem:[#allocation7 + $0xd60] sm:$0xf0] }
 0x34e   : > { %8780 = vmatpush.bf16.msrb.mxu0 %v14963_v9  ;;  %8793 = vmatpush.bf16.msrb.mxu1 %v15539_v34  ;;  %v18899_v9 = vld [vmem:[#allocation7 + $0x210c] sm:$0xf0] }
 0x34f   : > { %v18431_v34 = vld [vmem:[#allocation7 + $0x126c] sm:$0xf0]  ;;  %v16547_v36 = vor.u32 %v18899_v9, %v16546_v23  ;;  %v12732_v23 = vld [vmem:[#allocation7 + $0x340] sm:$0xf0] }
 0x350   : > { %8805 = vmatpush.bf16.msrb.mxu2 %v16187_v32  ;;  %v15971_v32 = vor.u32 %v18755_v19, %v15970_v51  ;;  %v14604_v51 = vld [vmem:[#allocation7 + $0x11e0] sm:$0xf0]  ;;  %v13383_v19 = vor.u32 %v18098_v6, %v13380_v61 }
 0x351   : > { %8818 = vmatpush.bf16.msrb.mxu3 %v16763_v12  ;;  %v8552_v12 = vpop.f32.mrf.mxu2  ;;  %v12588_v6 = vld [vmem:[#allocation7 + $0x220] sm:$0xf0] }
 0x352   : > { %8781 = vmatpush.bf16.msrb.mxu0 %v14891_v40  ;;  %8794 = vmatpush.bf16.msrb.mxu1 %v15467_v43  ;;  %v18737_v40 = vld [vmem:[#allocation7 + $0x1bfc] sm:$0xf0]  ;;  %v8553_v47 = vadd.f32 %v8552_v12, %v8540_v50  ;;  %v14675_v43 = vor.u32 %v18431_v34, %v14674_v27  ;;  %v15826_v50 = vld [vmem:[#allocation7 + $0x1b28] sm:$0xf]  ;;  %v18080_v34 = vld [vmem:[#allocation7 + $0x77c] sm:$0xf] }
 0x353   : > { %v15899_v62 = vor.u32 %v18737_v40, %v15898_v44  ;;  %v15827_v21 = vor.u32 %v18719_v1, %v15826_v50  ;;  %v18386_v12 = vld [vmem:[#allocation7 + $0x110c] sm:$0xf]  ;;  %v12660_v40 = vld [vmem:[#allocation7 + $0x2b0] sm:$0xf0]  ;;  %v13164_v50 = vld [vmem:[#allocation7 + $0x6a0] sm:$0xf0] }
 0x354   : > { %8806 = vmatpush.bf16.msrb.mxu2 %v16115_v54  ;;  %v15251_v54 = vor.u32 %v18575_v24, %v15250_v31  ;;  %v13308_v31 = vld [vmem:[#allocation7 + $0x7c0] sm:$0xf0]  ;;  %v8567_v24 = vpop.f32.mrf.mxu3  ;;  %v17918_v44 = vld [vmem:[#allocation7 + $0x26c] sm:$0xf] }
 0x355   : > { %8819 = vmatpush.bf16.msrb.mxu3 %v16691_v26  ;;  %v20215_v26 = vadd.f32 %v8565_v48, %v8553_v47  ;;  %v13311_v39 = vor.u32 %v18080_v34, %v13308_v31  ;;  %v13959_v47 = vor.u32 %v18242_v5, %v13956_v33  ;;  %v18062_v48 = vld [vmem:[#allocation7 + $0x6ec] sm:$0xf]  ;;  %v13092_v34 = vld [vmem:[#allocation7 + $0x610] sm:$0xf0]  ;;  %v18188_v24 = vld [vmem:[#allocation7 + $0xadc] sm:$0xf] }
 0x356   : > { %8782 = vmatpush.bf16.msrb.mxu0 %v14819_v4  ;;  %8795 = vmatpush.bf16.msrb.mxu1 %v15395_v13  ;;  %v12804_v4 = vld [vmem:[#allocation7 + $0x3d0] sm:$0xf0]  ;;  %v16475_v13 = vor.u32 %v18881_v52, %v16474_v20  ;;  %v18224_v52 = vld [vmem:[#allocation7 + $0xbfc] sm:$0xf]  ;;  %v14316_v33 = vld [vmem:[#allocation7 + $0xfa0] sm:$0xf0] }
 0x357   : > { %v12807_v11 = vor.u32 %v17954_v56, %v12804_v4  ;;  %v18368_v56 = vld [vmem:[#allocation7 + $0x107c] sm:$0xf] }
 0x358   : > { %8807 = vmatpush.bf16.msrb.mxu2 %v16043_v17  ;;  %v18863_v17 = vld [vmem:[#allocation7 + $0x1fec] sm:$0xf0]  ;;  %v17900_v4 = vld [vmem:[#allocation7 + $0x1dc] sm:$0xf] }
 0x359   : > { %8820 = vmatpush.bf16.msrb.mxu3 %v16619_v18  ;;  %v18404_v18 = vld [vmem:[#allocation7 + $0x119c] sm:$0xf]  ;;  %v8554_v9 = vpop.f32.mrf.mxu2  ;;  %v16403_v27 = vor.u32 %v18863_v17, %v16402_v16  ;;  %v18206_v17 = vld [vmem:[#allocation7 + $0xb6c] sm:$0xf] }
 0x35a   : > { %8783 = vmatpush.bf16.msrb.mxu0 %v14747_v22  ;;  %8796 = vmatpush.bf16.msrb.mxu1 %v15323_v29  ;;  %v17936_v22 = vld [vmem:[#allocation7 + $0x2fc] sm:$0xf]  ;;  %v14031_v29 = vor.u32 %v18260_v57, %v14028_v59  ;;  %v13812_v57 = vld [vmem:[#allocation7 + $0xbb0] sm:$0xf0] }
 0x35b   : > { %v12735_v28 = vor.u32 %v17936_v22, %v12732_v23  ;;  %v17882_v22 = vld [vmem:[#allocation7 + $0x14c] sm:$0xf]  ;;  %v12516_v23 = vld [vmem:[#allocation7 + $0x190] sm:$0xf0]  ;;  %v18332_v5 = vld [vmem:[#allocation7 + $0xf5c] sm:$0xf] }
 0x35c   : > { %8808 = vmatpush.bf16.msrb.mxu2 %v15971_v32  ;;  %v14607_v32 = vor.u32 %v18404_v18, %v14604_v51  ;;  %v12591_v18 = vor.u32 %v17900_v4, %v12588_v6  ;;  %v18350_v51 = vld [vmem:[#allocation7 + $0xfec] sm:$0xf]  ;;  %v12372_v4 = vld [vmem:[#allocation7 + $0x70] sm:$0xf0] }
 0x35d   : > { %8821 = vmatpush.bf16.msrb.mxu3 %v16547_v36  ;;  %v14532_v36 = vld [vmem:[#allocation7 + $0x1150] sm:$0xf0]  ;;  %v17990_v6 = vld [vmem:[#allocation7 + $0x4ac] sm:$0xf] }
 0x35e   : > { %8784 = vmatpush.bf16.msrb.mxu0 %v14675_v43  ;;  %8797 = vmatpush.bf16.msrb.mxu1 %v15251_v54  ;;  %v13236_v43 = vld [vmem:[#allocation7 + $0x730] sm:$0xf0]  ;;  %v14535_v20 = vor.u32 %v18386_v12, %v14532_v36  ;;  %v13884_v54 = vld [vmem:[#allocation7 + $0xc40] sm:$0xf0]  ;;  %v8578_v1 = vpop.f32.mrf.mxu0  ;;  %v17864_v12 = vld [vmem:[#allocation7 + $0xbc] sm:$0xf] }
 0x35f   : > { %v13887_v61 = vor.u32 %v18224_v52, %v13884_v54  ;;  %v8579_v59 = vadd.f32 %v8578_v1, %v20215_v26  ;;  %v12519_v26 = vor.u32 %v17882_v22, %v12516_v23  ;;  %v12444_v36 = vld [vmem:[#allocation7 + $0x100] sm:$0xf0]  ;;  %v18296_v22 = vld [vmem:[#allocation7 + $0xe3c] sm:$0xf] }
 0x360   : > { %8809 = vmatpush.bf16.msrb.mxu2 %v15899_v62  ;;  %v13239_v62 = vor.u32 %v18062_v48, %v13236_v43  ;;  %v14319_v48 = vor.u32 %v18332_v5, %v14316_v33  ;;  %v18170_v43 = vld [vmem:[#allocation7 + $0xa4c] sm:$0xf]  ;;  %v12447_v54 = vor.u32 %v17864_v12, %v12444_v36  ;;  %v15180_v1 = vld [vmem:[#allocation7 + $0x1660] sm:$0xf0]  ;;  %v15684_v33 = vld [vmem:[#allocation7 + $0x1a50] sm:$0xf0] }
 0x361   : > { %8822 = vmatpush.bf16.msrb.mxu3 %v16475_v13  ;;  %8785 = vmatmul.bf16.vlgmr.msrb.gmra.mxu0 %v20080_v38  ;;  %v18044_v13 = vld [vmem:[#allocation7 + $0x65c] sm:$0xf]  ;;  %v14172_v23 = vld [vmem:[#allocation7 + $0xe80] sm:$0xf0]  ;;  %v18674_v5 = vld [vmem:[#allocation7 + $0x1a0c] sm:$0xf] }
 0x362   : > { %8829 = vmatpush.bf16.msra.mxu0 %v12879_v55  ;;  %8842 = vmatpush.bf16.msra.mxu1 %v13455_v60  ;;  %v12663_v55 = vor.u32 %v17918_v44, %v12660_v40  ;;  %v14460_v60 = vld [vmem:[#allocation7 + $0x10c0] sm:$0xf0]  ;;  %v18008_v44 = vld [vmem:[#allocation7 + $0x53c] sm:$0xf]  ;;  %v13524_v12 = vld [vmem:[#allocation7 + $0x970] sm:$0xf0] }
 0x363   : > { %8798 = vmatmul.bf16.vlgmr.msrb.gmra.mxu1 %v20082_v46  ;;  %v14463_v16 = vor.u32 %v18368_v56, %v14460_v60  ;;  %v13020_v40 = vld [vmem:[#allocation7 + $0x580] sm:$0xf0]  ;;  %v14244_v56 = vld [vmem:[#allocation7 + $0xf10] sm:$0xf0]  ;;  %v17846_v60 = vld [vmem:[#allocation7 + $0x2c] sm:$0xf] }
 0x364   : > { %8810 = vmatpush.bf16.msrb.mxu2 %v15827_v21  ;;  %v13167_v21 = vor.u32 %v18044_v13, %v13164_v50  ;;  %v18548_v50 = vld [vmem:[#allocation7 + $0x161c] sm:$0xf]  ;;  %v18278_v36 = vld [vmem:[#allocation7 + $0xdac] sm:$0xf] }
 0x365   : > { %8823 = vmatpush.bf16.msrb.mxu3 %v16403_v27  ;;  %v13815_v27 = vor.u32 %v18206_v17, %v13812_v57 }
 0x366   : > { %8830 = vmatpush.bf16.msra.mxu0 %v12807_v11  ;;  %8843 = vmatpush.bf16.msra.mxu1 %v13383_v19  ;;  %v8591_v11 = vpop.f32.mrf.mxu1  ;;  %v14388_v19 = vld [vmem:[#allocation7 + $0x1030] sm:$0xf0] }
 0x367   : > { %8811 = vmatmul.bf16.vlgmr.msrb.gmra.mxu2 %v20088_v7  ;;  %v8592_v9 = vadd.f32 %v8591_v11, %v8579_v59  ;;  %v14391_v31 = vor.u32 %v18350_v51, %v14388_v19  ;;  %v15756_v59 = vld [vmem:[#allocation7 + $0x1ae0] sm:$0xf0]  ;;  %v18152_v11 = vld [vmem:[#allocation7 + $0x9bc] sm:$0xf] }
 0x368   : > { %8855 = vmatpush.bf16.msra.mxu2 %v14031_v29  ;;  %8824 = vmatmul.bf16.vlgmr.msrb.gmra.mxu3 %v20090_v14  ;;  %v18026_v29 = vld [vmem:[#allocation7 + $0x5cc] sm:$0xf] }
 0x369   : > { %8868 = vmatpush.bf16.msra.mxu3 %v14607_v32  ;;  %v13740_v32 = vld [vmem:[#allocation7 + $0xb20] sm:$0xf0] }
 0x36a   : > { %8831 = vmatpush.bf16.msra.mxu0 %v12735_v28  ;;  %8844 = vmatpush.bf16.msra.mxu1 %v13311_v39  ;;  %v13095_v28 = vor.u32 %v18026_v29, %v13092_v34  ;;  %v13743_v39 = vor.u32 %v18188_v24, %v13740_v32  ;;  %v8604_v17 = vpop.f32.mrf.mxu2  ;;  %v15183_v29 = vor.u32 %v18548_v50, %v15180_v1  ;;  %v18530_v34 = vld [vmem:[#allocation7 + $0x158c] sm:$0xf]  ;;  %v16260_v1 = vld [vmem:[#allocation7 + $0x1ed0] sm:$0xf0] }
 0x36b   : > { %v8605_v51 = vadd.f32 %v8604_v17, %v8592_v9  ;;  %v8617_v19 = vpop.f32.mrf.mxu3  ;;  %v18134_v9 = vld [vmem:[#allocation7 + $0x92c] sm:$0xf] }
 0x36c   : > { %8856 = vmatpush.bf16.msra.mxu2 %v13959_v47  ;;  %v8580_v47 = vpop.f32.mrf.mxu0  ;;  %v18818_v50 = vld [vmem:[#allocation7 + $0x1e8c] sm:$0xf] }
 0x36d   : > { %8869 = vmatpush.bf16.msra.mxu3 %v14535_v20  ;;  %v13668_v20 = vld [vmem:[#allocation7 + $0xa90] sm:$0xf0]  ;;  %v18962_v17 = vld [vmem:[#allocation7 + $0x230c] sm:$0xf] }
 0x36e   : > { %8832 = vmatpush.bf16.msra.mxu0 %v12663_v55  ;;  %8845 = vmatpush.bf16.msra.mxu1 %v13239_v62  ;;  %v8593_v52 = vpop.f32.mrf.mxu1  ;;  %v18314_v55 = vld [vmem:[#allocation7 + $0xecc] sm:$0xf]  ;;  %v13023_v62 = vor.u32 %v18008_v44, %v13020_v40  ;;  %v13671_v13 = vor.u32 %v18170_v43, %v13668_v20  ;;  %v18836_v44 = vld [vmem:[#allocation7 + $0x1f1c] sm:$0xf]  ;;  %v16332_v40 = vld [vmem:[#allocation7 + $0x1f60] sm:$0xf0]  ;;  %v15687_v20 = vor.u32 %v18674_v5, %v15684_v33 }
 0x36f   : > { %v14247_v57 = vor.u32 %v18314_v55, %v14244_v56  ;;  %v16908_v43 = vld [vmem:[#allocation7 + $0x23e0] sm:$0xf0]  ;;  %v13527_v52 = vor.u32 %v18134_v9, %v13524_v12 }
 0x370   : > { %8857 = vmatpush.bf16.msra.mxu2 %v13887_v61  ;;  %v12948_v61 = vld [vmem:[#allocation7 + $0x4f0] sm:$0xf0]  ;;  %v15036_v55 = vld [vmem:[#allocation7 + $0x1540] sm:$0xf0] }
 0x371   : > { %8870 = vmatpush.bf16.msra.mxu3 %v14463_v16  ;;  %v18692_v16 = vld [vmem:[#allocation7 + $0x1a9c] sm:$0xf]  ;;  %v14892_v5 = vld [vmem:[#allocation7 + $0x1420] sm:$0xf0] }
 0x372   : > { %8833 = vmatpush.bf16.msra.mxu0 %v12591_v18  ;;  %8846 = vmatpush.bf16.msra.mxu1 %v13167_v21  ;;  %v13596_v18 = vld [vmem:[#allocation7 + $0xa00] sm:$0xf0]  ;;  %v12375_v21 = vor.u32 %v17846_v60, %v12372_v4  ;;  %v15759_v24 = vor.u32 %v18692_v16, %v15756_v59  ;;  %v8606_v56 = vpop.f32.mrf.mxu2  ;;  %v18656_v4 = vld [vmem:[#allocation7 + $0x197c] sm:$0xf] }
 0x373   : > { %v13599_v32 = vor.u32 %v18152_v11, %v13596_v18  ;;  %v18494_v11 = vld [vmem:[#allocation7 + $0x146c] sm:$0xf]  ;;  %v14964_v18 = vld [vmem:[#allocation7 + $0x14b0] sm:$0xf0]  ;;  %v15468_v9 = vld [vmem:[#allocation7 + $0x18a0] sm:$0xf0] }
 0x374   : > { %8858 = vmatpush.bf16.msra.mxu2 %v13815_v27  ;;  %v12951_v27 = vor.u32 %v17990_v6, %v12948_v61  ;;  %v15612_v6 = vld [vmem:[#allocation7 + $0x19c0] sm:$0xf0]  ;;  %v8619_v61 = vpop.f32.mrf.mxu3 }
 0x375   : > { %8871 = vmatpush.bf16.msra.mxu3 %v14391_v31  ;;  %v20222_v31 = vadd.f32 %v8617_v19, %v8605_v51  ;;  %v15615_v59 = vor.u32 %v18656_v4, %v15612_v6  ;;  %v16263_v51 = vor.u32 %v18818_v50, %v16260_v1  ;;  %v18638_v19 = vld [vmem:[#allocation7 + $0x18ec] sm:$0xf]  ;;  %v18764_v6 = vld [vmem:[#allocation7 + $0x1cdc] sm:$0xf]  ;;  %v16044_v61 = vld [vmem:[#allocation7 + $0x1d20] sm:$0xf0] }
 0x376   : > { %8834 = vmatpush.bf16.msra.mxu0 %v12519_v26  ;;  %8847 = vmatpush.bf16.msra.mxu1 %v13095_v28  ;;  %v15108_v26 = vld [vmem:[#allocation7 + $0x15d0] sm:$0xf0]  ;;  %v14175_v28 = vor.u32 %v18296_v22, %v14172_v23  ;;  %v18800_v23 = vld [vmem:[#allocation7 + $0x1dfc] sm:$0xf]  ;;  %v16620_v1 = vld [vmem:[#allocation7 + $0x21a0] sm:$0xf0] }
 0x377   : > { %v15111_v47 = vor.u32 %v18530_v34, %v15108_v26  ;;  %v18944_v34 = vld [vmem:[#allocation7 + $0x227c] sm:$0xf] }
 0x378   : > { %8859 = vmatpush.bf16.msra.mxu2 %v13743_v39  ;;  %v14100_v39 = vld [vmem:[#allocation7 + $0xdf0] sm:$0xf0]  ;;  %v18476_v26 = vld [vmem:[#allocation7 + $0x13dc] sm:$0xf] }
 0x379   : > { %8872 = vmatpush.bf16.msra.mxu3 %v14319_v48  ;;  %v18980_v48 = vld [vmem:[#allocation7 + $0x239c] sm:$0xf]  ;;  %v14103_v60 = vor.u32 %v18278_v36, %v14100_v39  ;;  %v18782_v39 = vld [vmem:[#allocation7 + $0x1d6c] sm:$0xf] }
 0x37a   : > { %8835 = vmatpush.bf16.msra.mxu0 %v12447_v54  ;;  %8848 = vmatpush.bf16.msra.mxu1 %v13023_v62  ;;  %v18512_v54 = vld [vmem:[#allocation7 + $0x14fc] sm:$0xf]  ;;  %v16335_v62 = vor.u32 %v18836_v44, %v16332_v40  ;;  %v16116_v44 = vld [vmem:[#allocation7 + $0x1db0] sm:$0xf0] }
 0x37b   : > { %v15039_v16 = vor.u32 %v18512_v54, %v15036_v55  ;;  %v18458_v54 = vld [vmem:[#allocation7 + $0x134c] sm:$0xf]  ;;  %v14820_v55 = vld [vmem:[#allocation7 + $0x1390] sm:$0xf0]  ;;  %v16119_v56 = vor.u32 %v18782_v39, %v16116_v44  ;;  %v18908_v50 = vld [vmem:[#allocation7 + $0x215c] sm:$0xf] }
 0x37c   : > { %8860 = vmatpush.bf16.msra.mxu2 %v13671_v13  ;;  %v16911_v13 = vor.u32 %v18980_v48, %v16908_v43  ;;  %v18926_v48 = vld [vmem:[#allocation7 + $0x21ec] sm:$0xf]  ;;  %v16692_v43 = vld [vmem:[#allocation7 + $0x2230] sm:$0xf0] }
 0x37d   : > { %8873 = vmatpush.bf16.msra.mxu3 %v14247_v57  ;;  %v16836_v57 = vld [vmem:[#allocation7 + $0x2350] sm:$0xf0]  ;;  %v16695_v4 = vor.u32 %v18926_v48, %v16692_v43  ;;  %v15900_v48 = vld [vmem:[#allocation7 + $0x1c00] sm:$0xf0] }
 0x37e   : > { %8836 = vmatpush.bf16.msra.mxu0 %v12375_v21  ;;  %8849 = vmatpush.bf16.msra.mxu1 %v12951_v27  ;;  %v15540_v21 = vld [vmem:[#allocation7 + $0x1930] sm:$0xf0]  ;;  %v16839_v22 = vor.u32 %v18962_v17, %v16836_v57  ;;  %v16188_v27 = vld [vmem:[#allocation7 + $0x1e40] sm:$0xf0]  ;;  %v8630_v12 = vpop.f32.mrf.mxu0  ;;  %v18440_v17 = vld [vmem:[#allocation7 + $0x12bc] sm:$0xf] }
 0x37f   : > { %v16191_v33 = vor.u32 %v18800_v23, %v16188_v27  ;;  %v14748_v57 = vld [vmem:[#allocation7 + $0x1300] sm:$0xf0] }
 0x380   : > { %8861 = vmatpush.bf16.msra.mxu2 %v13599_v32  ;;  %v15543_v32 = vor.u32 %v18638_v19, %v15540_v21  ;;  %v8643_v40 = vpop.f32.mrf.mxu1  ;;  %v16623_v19 = vor.u32 %v18908_v50, %v16620_v1  ;;  %v18746_v21 = vld [vmem:[#allocation7 + $0x1c4c] sm:$0xf]  ;;  %v14751_v27 = vor.u32 %v18440_v17, %v14748_v57  ;;  %v17964_v50 = vld [vmem:[#allocation7 + $0x3d4] sm:$0xf0]  ;;  %v13386_v1 = vld [vmem:[#allocation7 + $0x810] sm:$0xf] }
 0x381   : > { %8874 = vmatpush.bf16.msra.mxu3 %v14175_v28  ;;  %8837 = vmatmul.bf16.vlgmr.msra.gmra.mxu0 %v20064_v41  ;;  %v18620_v28 = vld [vmem:[#allocation7 + $0x185c] sm:$0xf]  ;;  %v15828_v57 = vld [vmem:[#allocation7 + $0x1b70] sm:$0xf0] }
 0x382   : > { %8881 = vmatpush.bf16.msrb.mxu0 %v15183_v29  ;;  %8894 = vmatpush.bf16.msrb.mxu1 %v15759_v24  ;;  %v14967_v29 = vor.u32 %v18494_v11, %v14964_v18  ;;  %v16764_v24 = vld [vmem:[#allocation7 + $0x22c0] sm:$0xf0]  ;;  %v18584_v11 = vld [vmem:[#allocation7 + $0x173c] sm:$0xf] }
 0x383   : > { %8850 = vmatmul.bf16.vlgmr.msra.gmra.mxu1 %v20066_v45  ;;  %v16767_v36 = vor.u32 %v18944_v34, %v16764_v24  ;;  %v15324_v18 = vld [vmem:[#allocation7 + $0x1780] sm:$0xf0]  ;;  %v16548_v34 = vld [vmem:[#allocation7 + $0x2110] sm:$0xf0]  ;;  %v18422_v24 = vld [vmem:[#allocation7 + $0x122c] sm:$0xf] }
 0x384   : > { %8862 = vmatpush.bf16.msra.mxu2 %v13527_v52  ;;  %v15471_v52 = vor.u32 %v18620_v28, %v15468_v9  ;;  %v12882_v9 = vld [vmem:[#allocation7 + $0x420] sm:$0xf] }
 0x385   : > { %8875 = vmatpush.bf16.msra.mxu3 %v14103_v60  ;;  %v18602_v60 = vld [vmem:[#allocation7 + $0x17cc] sm:$0xf] }
 0x386   : > { %8882 = vmatpush.bf16.msrb.mxu0 %v15111_v47  ;;  %8895 = vmatpush.bf16.msrb.mxu1 %v15687_v20  ;;  %v14895_v47 = vor.u32 %v18476_v26, %v14892_v5  ;;  %v8644_v20 = vadd.f32 %v8643_v40, %v8630_v12  ;;  %v14676_v26 = vld [vmem:[#allocation7 + $0x1270] sm:$0xf0]  ;;  %v18566_v5 = vld [vmem:[#allocation7 + $0x16ac] sm:$0xf]  ;;  %v17982_v12 = vld [vmem:[#allocation7 + $0x464] sm:$0xf0] }
 0x387   : > { %8863 = vmatmul.bf16.vlgmr.msra.gmra.mxu2 %v20072_v2  ;;  %v18126_v40 = vld [vmem:[#allocation7 + $0x8e4] sm:$0xf0] }
 0x388   : > { %8907 = vmatpush.bf16.msrb.mxu2 %v16335_v62  ;;  %8876 = vmatmul.bf16.vlgmr.msra.gmra.mxu3 %v20074_v8  ;;  %v15396_v62 = vld [vmem:[#allocation7 + $0x1810] sm:$0xf0]  ;;  %v8645_v23 = vpop.f32.mrf.mxu1 }
 0x389   : > { %8920 = vmatpush.bf16.msrb.mxu3 %v16911_v13  ;;  %v14823_v13 = vor.u32 %v18458_v54, %v14820_v55  ;;  %v14679_v54 = vor.u32 %v18422_v24, %v14676_v26  ;;  %v18872_v55 = vld [vmem:[#allocation7 + $0x203c] sm:$0xf] }
 0x38a   : > { %8883 = vmatpush.bf16.msrb.mxu0 %v15039_v16  ;;  %8896 = vmatpush.bf16.msrb.mxu1 %v15615_v59  ;;  %v15399_v16 = vor.u32 %v18602_v60, %v15396_v62  ;;  %v16047_v59 = vor.u32 %v18764_v6, %v16044_v61  ;;  %v8656_v39 = vpop.f32.mrf.mxu2  ;;  %v12883_v62 = vor.u32 %v17982_v12, %v12882_v9  ;;  %v13962_v12 = vld [vmem:[#allocation7 + $0xc90] sm:$0xf] }
 0x38b   : > { %v8657_v43 = vadd.f32 %v8656_v39, %v8644_v20  ;;  %v18710_v20 = vld [vmem:[#allocation7 + $0x1b2c] sm:$0xf] }
 0x38c   : > { %8908 = vmatpush.bf16.msrb.mxu2 %v16263_v51  ;;  %v8632_v51 = vpop.f32.mrf.mxu0 }
 0x38d   : > { %8921 = vmatpush.bf16.msrb.mxu3 %v16839_v22  ;;  %v15972_v22 = vld [vmem:[#allocation7 + $0x1c90] sm:$0xf0]  ;;  %v18270_v51 = vld [vmem:[#allocation7 + $0xd64] sm:$0xf0] }
 0x38e   : > { %8884 = vmatpush.bf16.msrb.mxu0 %v14967_v29  ;;  %8897 = vmatpush.bf16.msrb.mxu1 %v15543_v32  ;;  %v18890_v29 = vld [vmem:[#allocation7 + $0x20cc] sm:$0xf]  ;;  %v15327_v32 = vor.u32 %v18584_v11, %v15324_v18  ;;  %v15975_v28 = vor.u32 %v18746_v21, %v15972_v22  ;;  %v16404_v11 = vld [vmem:[#allocation7 + $0x1ff0] sm:$0xf0]  ;;  %v14034_v18 = vld [vmem:[#allocation7 + $0xd20] sm:$0xf] }
 0x38f   : > { %v16551_v44 = vor.u32 %v18890_v29, %v16548_v34  ;;  %v14610_v21 = vld [vmem:[#allocation7 + $0x11a0] sm:$0xf]  ;;  %v18414_v22 = vld [vmem:[#allocation7 + $0x11e4] sm:$0xf0]  ;;  %v14035_v26 = vor.u32 %v18270_v51, %v14034_v18  ;;  %v13818_v18 = vld [vmem:[#allocation7 + $0xb70] sm:$0xf] }
 0x390   : > { %8909 = vmatpush.bf16.msrb.mxu2 %v16191_v33  ;;  %v15252_v33 = vld [vmem:[#allocation7 + $0x16f0] sm:$0xf0]  ;;  %v12738_v29 = vld [vmem:[#allocation7 + $0x300] sm:$0xf]  ;;  %v17946_v34 = vld [vmem:[#allocation7 + $0x344] sm:$0xf0]  ;;  %v14611_v9 = vor.u32 %v18414_v22, %v14610_v21 }
 0x391   : > { %8922 = vmatpush.bf16.msrb.mxu3 %v16767_v36  ;;  %v13458_v36 = vld [vmem:[#allocation7 + $0x8a0] sm:$0xf]  ;;  %v15255_v60 = vor.u32 %v18566_v5, %v15252_v33  ;;  %v18090_v33 = vld [vmem:[#allocation7 + $0x7c4] sm:$0xf0]  ;;  %v12739_v39 = vor.u32 %v17946_v34, %v12738_v29  ;;  %v18216_v51 = vld [vmem:[#allocation7 + $0xbb4] sm:$0xf0] }
 0x392   : > { %8885 = vmatpush.bf16.msrb.mxu0 %v14895_v47  ;;  %8898 = vmatpush.bf16.msrb.mxu1 %v15471_v52  ;;  %v18728_v47 = vld [vmem:[#allocation7 + $0x1bbc] sm:$0xf]  ;;  %v8669_v52 = vpop.f32.mrf.mxu3  ;;  %v13459_v61 = vor.u32 %v18126_v40, %v13458_v36  ;;  %v8658_v24 = vpop.f32.mrf.mxu2  ;;  %v13314_v5 = vld [vmem:[#allocation7 + $0x780] sm:$0xf]  ;;  %v18252_v36 = vld [vmem:[#allocation7 + $0xcd4] sm:$0xf0] }
 0x393   : > { %v20228_v6 = vadd.f32 %v8669_v52, %v8657_v43  ;;  %v18396_v40 = vld [vmem:[#allocation7 + $0x1154] sm:$0xf0]  ;;  %v13963_v52 = vor.u32 %v18252_v36, %v13962_v12  ;;  %v12522_v34 = vld [vmem:[#allocation7 + $0x150] sm:$0xf]  ;;  %v18198_v12 = vld [vmem:[#allocation7 + $0xb24] sm:$0xf0] }
 0x394   : > { %8910 = vmatpush.bf16.msrb.mxu2 %v16119_v56  ;;  %v16476_v56 = vld [vmem:[#allocation7 + $0x2080] sm:$0xf0]  ;;  %v17928_v43 = vld [vmem:[#allocation7 + $0x2b4] sm:$0xf0]  ;;  %v14322_v36 = vld [vmem:[#allocation7 + $0xf60] sm:$0xf] }
 0x395   : > { %8923 = vmatpush.bf16.msrb.mxu3 %v16695_v4  ;;  %v12810_v4 = vld [vmem:[#allocation7 + $0x390] sm:$0xf]  ;;  %v16479_v17 = vor.u32 %v18872_v55, %v16476_v56  ;;  %v18072_v55 = vld [vmem:[#allocation7 + $0x734] sm:$0xf0] }
 0x396   : > { %8886 = vmatpush.bf16.msrb.mxu0 %v14823_v13  ;;  %8899 = vmatpush.bf16.msrb.mxu1 %v15399_v16  ;;  %v15903_v13 = vor.u32 %v18728_v47, %v15900_v48  ;;  %v18108_v16 = vld [vmem:[#allocation7 + $0x854] sm:$0xf0]  ;;  %v13315_v47 = vor.u32 %v18090_v33, %v13314_v5  ;;  %v12666_v48 = vld [vmem:[#allocation7 + $0x270] sm:$0xf] }
 0x397   : > { %v13387_v23 = vor.u32 %v18108_v16, %v13386_v1  ;;  %v12594_v1 = vld [vmem:[#allocation7 + $0x1e0] sm:$0xf]  ;;  %v17910_v16 = vld [vmem:[#allocation7 + $0x224] sm:$0xf0]  ;;  %v17892_v24 = vld [vmem:[#allocation7 + $0x194] sm:$0xf0] }
 0x398   : > { %8911 = vmatpush.bf16.msrb.mxu2 %v16047_v59  ;;  %v18854_v59 = vld [vmem:[#allocation7 + $0x1fac] sm:$0xf]  ;;  %v12595_v22 = vor.u32 %v17910_v16, %v12594_v1  ;;  %v13098_v5 = vld [vmem:[#allocation7 + $0x5d0] sm:$0xf]  ;;  %v18036_v33 = vld [vmem:[#allocation7 + $0x614] sm:$0xf0] }
 0x399   : > { %8924 = vmatpush.bf16.msrb.mxu3 %v16623_v19  ;;  %v12811_v19 = vor.u32 %v17964_v50, %v12810_v4  ;;  %v12667_v4 = vor.u32 %v17928_v43, %v12666_v48  ;;  %v13026_v43 = vld [vmem:[#allocation7 + $0x540] sm:$0xf]  ;;  %v17856_v16 = vld [vmem:[#allocation7 + $0x74] sm:$0xf0] }
 0x39a   : > { %8887 = vmatpush.bf16.msrb.mxu0 %v14751_v27  ;;  %8900 = vmatpush.bf16.msrb.mxu1 %v15327_v32  ;;  %v15831_v27 = vor.u32 %v18710_v20, %v15828_v57  ;;  %v16407_v32 = vor.u32 %v18854_v59, %v16404_v11  ;;  %v13170_v20 = vld [vmem:[#allocation7 + $0x660] sm:$0xf]  ;;  %v18054_v57 = vld [vmem:[#allocation7 + $0x6a4] sm:$0xf0] }
 0x39b   : > { %v13171_v29 = vor.u32 %v18054_v57, %v13170_v20  ;;  %v18000_v20 = vld [vmem:[#allocation7 + $0x4f4] sm:$0xf0] }
 0x39c   : > { %8912 = vmatpush.bf16.msrb.mxu2 %v15975_v28  ;;  %v8671_v28 = vpop.f32.mrf.mxu3 }
 0x39d   : > { %8925 = vmatpush.bf16.msrb.mxu3 %v16551_v44  ;;  %v14538_v44 = vld [vmem:[#allocation7 + $0x1110] sm:$0xf] }
 0x39e   : > { %8888 = vmatpush.bf16.msrb.mxu0 %v14679_v54  ;;  %8901 = vmatpush.bf16.msrb.mxu1 %v15255_v60  ;;  %v13242_v54 = vld [vmem:[#allocation7 + $0x6f0] sm:$0xf]  ;;  %v14539_v56 = vor.u32 %v18396_v40, %v14538_v44  ;;  %v13890_v60 = vld [vmem:[#allocation7 + $0xc00] sm:$0xf]  ;;  %v8682_v59 = vpop.f32.mrf.mxu0  ;;  %v13099_v44 = vor.u32 %v18036_v33, %v13098_v5 }
 0x39f   : > { %v13243_v50 = vor.u32 %v18072_v55, %v13242_v54  ;;  %v12450_v40 = vld [vmem:[#allocation7 + $0xc0] sm:$0xf] }
 0x3a0   : > { %8913 = vmatpush.bf16.msrb.mxu2 %v15903_v13  ;;  %v18378_v13 = vld [vmem:[#allocation7 + $0x10c4] sm:$0xf0]  ;;  %v8695_v21 = vpop.f32.mrf.mxu1 }
 0x3a1   : > { %8926 = vmatpush.bf16.msrb.mxu3 %v16479_v17  ;;  %8889 = vmatmul.bf16.vlgmr.msrb.gmra.mxu0 %v20080_v38 }
 0x3a2   : > { %8933 = vmatpush.bf16.msra.mxu0 %v12883_v62  ;;  %8946 = vmatpush.bf16.msra.mxu1 %v13459_v61  ;;  %v18234_v62 = vld [vmem:[#allocation7 + $0xc44] sm:$0xf0]  ;;  %v14466_v61 = vld [vmem:[#allocation7 + $0x1080] sm:$0xf] }
 0x3a3   : > { %8902 = vmatmul.bf16.vlgmr.msrb.gmra.mxu1 %v20082_v46  ;;  %v13891_v17 = vor.u32 %v18234_v62, %v13890_v60  ;;  %v14467_v11 = vor.u32 %v18378_v13, %v14466_v61  ;;  %v18180_v60 = vld [vmem:[#allocation7 + $0xa94] sm:$0xf0]  ;;  %v14250_v61 = vld [vmem:[#allocation7 + $0xed0] sm:$0xf] }
 0x3a4   : > { %8914 = vmatpush.bf16.msrb.mxu2 %v15831_v27  ;;  %v18360_v27 = vld [vmem:[#allocation7 + $0x1034] sm:$0xf0] }
 0x3a5   : > { %8927 = vmatpush.bf16.msrb.mxu3 %v16407_v32  ;;  %v18324_v13 = vld [vmem:[#allocation7 + $0xf14] sm:$0xf0] }
 0x3a6   : > { %8934 = vmatpush.bf16.msra.mxu0 %v12811_v19  ;;  %8947 = vmatpush.bf16.msra.mxu1 %v13387_v23  ;;  %v8683_v19 = vadd.f32 %v8682_v59, %v20228_v6  ;;  %v14394_v23 = vld [vmem:[#allocation7 + $0xff0] sm:$0xf]  ;;  %v12523_v6 = vor.u32 %v17892_v24, %v12522_v34  ;;  %v8684_v54 = vpop.f32.mrf.mxu0  ;;  %v15186_v59 = vld [vmem:[#allocation7 + $0x1620] sm:$0xf] }
 0x3a7   : > { %8915 = vmatmul.bf16.vlgmr.msrb.gmra.mxu2 %v20088_v7  ;;  %v14395_v28 = vor.u32 %v18360_v27, %v14394_v23  ;;  %v18162_v23 = vld [vmem:[#allocation7 + $0xa04] sm:$0xf0]  ;;  %v14178_v24 = vld [vmem:[#allocation7 + $0xe40] sm:$0xf] }
 0x3a8   : > { %8959 = vmatpush.bf16.msra.mxu2 %v14035_v26  ;;  %8928 = vmatmul.bf16.vlgmr.msrb.gmra.mxu3 %v20090_v14  ;;  %v8696_v32 = vadd.f32 %v8695_v21, %v8683_v19  ;;  %v13819_v26 = vor.u32 %v18216_v51, %v13818_v18  ;;  %v8697_v62 = vpop.f32.mrf.mxu1  ;;  %v15762_v18 = vld [vmem:[#allocation7 + $0x1aa0] sm:$0xf]  ;;  %v14251_v19 = vor.u32 %v18324_v13, %v14250_v61  ;;  %v18702_v21 = vld [vmem:[#allocation7 + $0x1ae4] sm:$0xf0] }
 0x3a9   : > { %8972 = vmatpush.bf16.msra.mxu3 %v14611_v9  ;;  %v13746_v9 = vld [vmem:[#allocation7 + $0xae0] sm:$0xf]  ;;  %v18846_v54 = vld [vmem:[#allocation7 + $0x1f64] sm:$0xf0] }
 0x3aa   : > { %8935 = vmatpush.bf16.msra.mxu0 %v12739_v39  ;;  %8948 = vmatpush.bf16.msra.mxu1 %v13315_v47  ;;  %v18342_v39 = vld [vmem:[#allocation7 + $0xfa4] sm:$0xf0]  ;;  %v13747_v48 = vor.u32 %v18198_v12, %v13746_v9  ;;  %v8708_v51 = vpop.f32.mrf.mxu2  ;;  %v15763_v12 = vor.u32 %v18702_v21, %v15762_v18  ;;  %v15042_v61 = vld [vmem:[#allocation7 + $0x1500] sm:$0xf]  ;;  %v18828_v18 = vld [vmem:[#allocation7 + $0x1ed4] sm:$0xf0] }
 0x3ab   : > { %v17874_v47 = vld [vmem:[#allocation7 + $0x104] sm:$0xf0]  ;;  %v14323_v55 = vor.u32 %v18342_v39, %v14322_v36  ;;  %v8709_v27 = vadd.f32 %v8708_v51, %v8696_v32  ;;  %v18540_v36 = vld [vmem:[#allocation7 + $0x15d4] sm:$0xf0]  ;;  %v15690_v39 = vld [vmem:[#allocation7 + $0x1a10] sm:$0xf] }
 0x3ac   : > { %8960 = vmatpush.bf16.msra.mxu2 %v13963_v52  ;;  %v18018_v52 = vld [vmem:[#allocation7 + $0x584] sm:$0xf0]  ;;  %v13530_v32 = vld [vmem:[#allocation7 + $0x930] sm:$0xf]  ;;  %v18972_v21 = vld [vmem:[#allocation7 + $0x2354] sm:$0xf0] }
 0x3ad   : > { %8973 = vmatpush.bf16.msra.mxu3 %v14539_v56  ;;  %v13674_v56 = vld [vmem:[#allocation7 + $0xa50] sm:$0xf]  ;;  %v13027_v1 = vor.u32 %v18018_v52, %v13026_v43  ;;  %v18288_v43 = vld [vmem:[#allocation7 + $0xdf4] sm:$0xf0]  ;;  %v16338_v52 = vld [vmem:[#allocation7 + $0x1f20] sm:$0xf] }
 0x3ae   : > { %8936 = vmatpush.bf16.msra.mxu0 %v12667_v4  ;;  %8949 = vmatpush.bf16.msra.mxu1 %v13243_v50  ;;  %v12451_v4 = vor.u32 %v17874_v47, %v12450_v40  ;;  %v12378_v50 = vld [vmem:[#allocation7 + $0x30] sm:$0xf]  ;;  %v13675_v57 = vor.u32 %v18180_v60, %v13674_v56  ;;  %v18144_v47 = vld [vmem:[#allocation7 + $0x974] sm:$0xf0]  ;;  %v16914_v56 = vld [vmem:[#allocation7 + $0x23a0] sm:$0xf] }
 0x3af   : > { %v12379_v34 = vor.u32 %v17856_v16, %v12378_v50  ;;  %v18990_v60 = vld [vmem:[#allocation7 + $0x23e4] sm:$0xf0]  ;;  %v16339_v16 = vor.u32 %v18846_v54, %v16338_v52  ;;  %v16122_v52 = vld [vmem:[#allocation7 + $0x1d70] sm:$0xf]  ;;  %v18792_v54 = vld [vmem:[#allocation7 + $0x1db4] sm:$0xf0] }
 0x3b0   : > { %8961 = vmatpush.bf16.msra.mxu2 %v13891_v17  ;;  %v12954_v17 = vld [vmem:[#allocation7 + $0x4b0] sm:$0xf]  ;;  %v18522_v13 = vld [vmem:[#allocation7 + $0x1544] sm:$0xf0] }
 0x3b1   : > { %8974 = vmatpush.bf16.msra.mxu3 %v14467_v11  ;;  %v18558_v11 = vld [vmem:[#allocation7 + $0x1664] sm:$0xf0]  ;;  %v12955_v5 = vor.u32 %v18000_v20, %v12954_v17  ;;  %v15618_v17 = vld [vmem:[#allocation7 + $0x1980] sm:$0xf]  ;;  %v15043_v51 = vor.u32 %v18522_v13, %v15042_v61  ;;  %v14826_v13 = vld [vmem:[#allocation7 + $0x1350] sm:$0xf] }
 0x3b2   : > { %8937 = vmatpush.bf16.msra.mxu0 %v12595_v22  ;;  %8950 = vmatpush.bf16.msra.mxu1 %v13171_v29  ;;  %v13602_v22 = vld [vmem:[#allocation7 + $0x9c0] sm:$0xf]  ;;  %v8721_v29 = vpop.f32.mrf.mxu3  ;;  %v15187_v33 = vor.u32 %v18558_v11, %v15186_v59  ;;  %v8710_v50 = vpop.f32.mrf.mxu2  ;;  %v18666_v20 = vld [vmem:[#allocation7 + $0x19c4] sm:$0xf0]  ;;  %v16915_v59 = vor.u32 %v18990_v60, %v16914_v56  ;;  %v16266_v11 = vld [vmem:[#allocation7 + $0x1e90] sm:$0xf] }
 0x3b3   : > { %v20235_v9 = vadd.f32 %v8721_v29, %v8709_v27  ;;  %v18504_v27 = vld [vmem:[#allocation7 + $0x14b4] sm:$0xf0]  ;;  %v16267_v29 = vor.u32 %v18828_v18, %v16266_v11  ;;  %v16698_v60 = vld [vmem:[#allocation7 + $0x21f0] sm:$0xf]  ;;  %v16626_v18 = vld [vmem:[#allocation7 + $0x2160] sm:$0xf] }
 0x3b4   : > { %8962 = vmatpush.bf16.msra.mxu2 %v13819_v26  ;;  %v18306_v26 = vld [vmem:[#allocation7 + $0xe84] sm:$0xf0]  ;;  %v18468_v50 = vld [vmem:[#allocation7 + $0x1394] sm:$0xf0] }
 0x3b5   : > { %8975 = vmatpush.bf16.msra.mxu3 %v14395_v28  ;;  %v15114_v28 = vld [vmem:[#allocation7 + $0x1590] sm:$0xf]  ;;  %v14179_v40 = vor.u32 %v18306_v26, %v14178_v24  ;;  %v18648_v24 = vld [vmem:[#allocation7 + $0x1934] sm:$0xf0]  ;;  %v14827_v11 = vor.u32 %v18468_v50, %v14826_v13 }
 0x3b6   : > { %8938 = vmatpush.bf16.msra.mxu0 %v12523_v6  ;;  %8951 = vmatpush.bf16.msra.mxu1 %v13099_v44  ;;  %v13603_v6 = vor.u32 %v18162_v23, %v13602_v22  ;;  %v18684_v44 = vld [vmem:[#allocation7 + $0x1a54] sm:$0xf0]  ;;  %v15619_v22 = vor.u32 %v18666_v20, %v15618_v17  ;;  %v14970_v23 = vld [vmem:[#allocation7 + $0x1470] sm:$0xf] }
 0x3b7   : > { %v15691_v62 = vor.u32 %v18684_v44, %v15690_v39  ;;  %v14898_v39 = vld [vmem:[#allocation7 + $0x13e0] sm:$0xf]  ;;  %v18486_v44 = vld [vmem:[#allocation7 + $0x1424] sm:$0xf0]  ;;  %v18612_v17 = vld [vmem:[#allocation7 + $0x1814] sm:$0xf0] }
 0x3b8   : > { %8963 = vmatpush.bf16.msra.mxu2 %v13747_v48  ;;  %v14106_v48 = vld [vmem:[#allocation7 + $0xdb0] sm:$0xf]  ;;  %v14899_v56 = vor.u32 %v18486_v44, %v14898_v39  ;;  %v18432_v44 = vld [vmem:[#allocation7 + $0x1274] sm:$0xf0] }
 0x3b9   : > { %8976 = vmatpush.bf16.msra.mxu3 %v14323_v55  ;;  %v15115_v55 = vor.u32 %v18540_v36, %v15114_v28  ;;  %v14971_v28 = vor.u32 %v18504_v27, %v14970_v23  ;;  %v15330_v27 = vld [vmem:[#allocation7 + $0x1740] sm:$0xf] }
 0x3ba   : > { %8939 = vmatpush.bf16.msra.mxu0 %v12451_v4  ;;  %8952 = vmatpush.bf16.msra.mxu1 %v13027_v1  ;;  %v13531_v4 = vor.u32 %v18144_v47, %v13530_v32  ;;  %v14107_v1 = vor.u32 %v18288_v43, %v14106_v48  ;;  %v15474_v32 = vld [vmem:[#allocation7 + $0x1860] sm:$0xf]  ;;  %v18630_v47 = vld [vmem:[#allocation7 + $0x18a4] sm:$0xf0] }
 0x3bb   : > { %v15475_v61 = vor.u32 %v18630_v47, %v15474_v32  ;;  %v18576_v32 = vld [vmem:[#allocation7 + $0x16f4] sm:$0xf0] }
 0x3bc   : > { %8964 = vmatpush.bf16.msra.mxu2 %v13675_v57  ;;  %v8723_v57 = vpop.f32.mrf.mxu3 }
 0x3bd   : > { %8977 = vmatpush.bf16.msra.mxu3 %v14251_v19  ;;  %v16842_v19 = vld [vmem:[#allocation7 + $0x2310] sm:$0xf]  ;;  %v16050_v57 = vld [vmem:[#allocation7 + $0x1ce0] sm:$0xf] }
 0x3be   : > { %8940 = vmatpush.bf16.msra.mxu0 %v12379_v34  ;;  %8953 = vmatpush.bf16.msra.mxu1 %v12955_v5  ;;  %v15546_v34 = vld [vmem:[#allocation7 + $0x18f0] sm:$0xf]  ;;  %v16843_v26 = vor.u32 %v18972_v21, %v16842_v19  ;;  %v16194_v5 = vld [vmem:[#allocation7 + $0x1e00] sm:$0xf]  ;;  %v8734_v48 = vpop.f32.mrf.mxu0 }
 0x3bf   : > { %v15547_v36 = vor.u32 %v18648_v24, %v15546_v34  ;;  %v14754_v21 = vld [vmem:[#allocation7 + $0x12c0] sm:$0xf] }
 0x3c0   : > { %8965 = vmatpush.bf16.msra.mxu2 %v13603_v6  ;;  %v18954_v6 = vld [vmem:[#allocation7 + $0x22c4] sm:$0xf0] }
 0x3c1   : > { %8978 = vmatpush.bf16.msra.mxu3 %v14179_v40  ;;  %8941 = vmatmul.bf16.vlgmr.msra.gmra.mxu0 %v20064_v41 }
 0x3c2   : > { %8985 = vmatpush.bf16.msrb.mxu0 %v15187_v33  ;;  %8998 = vmatpush.bf16.msrb.mxu1 %v15763_v12  ;;  %v18810_v33 = vld [vmem:[#allocation7 + $0x1e44] sm:$0xf0]  ;;  %v16770_v12 = vld [vmem:[#allocation7 + $0x2280] sm:$0xf] }
 0x3c3   : > { %8954 = vmatmul.bf16.vlgmr.msra.gmra.mxu1 %v20066_v45  ;;  %v16195_v40 = vor.u32 %v18810_v33, %v16194_v5  ;;  %v16771_v43 = vor.u32 %v18954_v6, %v16770_v12  ;;  %v18756_v5 = vld [vmem:[#allocation7 + $0x1c94] sm:$0xf0]  ;;  %v16554_v12 = vld [vmem:[#allocation7 + $0x20d0] sm:$0xf] }
 0x3c4   : > { %8966 = vmatpush.bf16.msra.mxu2 %v13531_v4  ;;  %v18900_v6 = vld [vmem:[#allocation7 + $0x2114] sm:$0xf0] }
 0x3c5   : > { %8979 = vmatpush.bf16.msra.mxu3 %v14107_v1  ;;  %v16123_v1 = vor.u32 %v18792_v54, %v16122_v52  ;;  %v18117_v52 = vld [vmem:[#allocation7 + $0x8a4] sm:$0xf] }
 0x3c6   : > { %8986 = vmatpush.bf16.msrb.mxu0 %v15115_v55  ;;  %8999 = vmatpush.bf16.msrb.mxu1 %v15691_v62  ;;  %v8747_v55 = vpop.f32.mrf.mxu1  ;;  %v18936_v62 = vld [vmem:[#allocation7 + $0x2234] sm:$0xf0]  ;;  %v8736_v34 = vpop.f32.mrf.mxu0 }
 0x3c7   : > { %8967 = vmatmul.bf16.vlgmr.msra.gmra.mxu2 %v20072_v2  ;;  %v8748_v4 = vadd.f32 %v8747_v55, %v8734_v48  ;;  %v16699_v20 = vor.u32 %v18936_v62, %v16698_v60  ;;  %v17973_v48 = vld [vmem:[#allocation7 + $0x424] sm:$0xf]  ;;  %v16555_v55 = vor.u32 %v18900_v6, %v16554_v12  ;;  %v15906_v60 = vld [vmem:[#allocation7 + $0x1bc0] sm:$0xf]  ;;  %v18738_v62 = vld [vmem:[#allocation7 + $0x1c04] sm:$0xf0] }
 0x3c8   : > { %9011 = vmatpush.bf16.msrb.mxu2 %v16339_v16  ;;  %8980 = vmatmul.bf16.vlgmr.msra.gmra.mxu3 %v20074_v8  ;;  %v15402_v16 = vld [vmem:[#allocation7 + $0x17d0] sm:$0xf]  ;;  %v18261_v34 = vld [vmem:[#allocation7 + $0xd24] sm:$0xf] }
 0x3c9   : > { %9024 = vmatpush.bf16.msrb.mxu3 %v16915_v59  ;;  %v18774_v59 = vld [vmem:[#allocation7 + $0x1d24] sm:$0xf0]  ;;  %v15403_v19 = vor.u32 %v18612_v17, %v15402_v16  ;;  %v17937_v6 = vld [vmem:[#allocation7 + $0x304] sm:$0xf] }
 0x3ca   : > { %8987 = vmatpush.bf16.msrb.mxu0 %v15043_v51  ;;  %9000 = vmatpush.bf16.msrb.mxu1 %v15619_v22  ;;  %v18918_v51 = vld [vmem:[#allocation7 + $0x21a4] sm:$0xf0]  ;;  %v16051_v23 = vor.u32 %v18774_v59, %v16050_v57  ;;  %v8760_v54 = vpop.f32.mrf.mxu2  ;;  %v17955_v57 = vld [vmem:[#allocation7 + $0x394] sm:$0xf] }
 0x3cb   : > { %v18450_v22 = vld [vmem:[#allocation7 + $0x1304] sm:$0xf0]  ;;  %v16627_v24 = vor.u32 %v18918_v51, %v16626_v18  ;;  %v8773_v13 = vpop.f32.mrf.mxu3  ;;  %v15907_v18 = vor.u32 %v18738_v62, %v15906_v60  ;;  %v12812_v51 = vld [vmem:[#allocation7 + $0x3d8] sm:$0xf0] }
 0x3cc   : > { %9012 = vmatpush.bf16.msrb.mxu2 %v16267_v29  ;;  %v18594_v29 = vld [vmem:[#allocation7 + $0x1784] sm:$0xf0]  ;;  %v14540_v60 = vld [vmem:[#allocation7 + $0x1158] sm:$0xf0] }
 0x3cd   : > { %9025 = vmatpush.bf16.msrb.mxu3 %v16843_v26  ;;  %v15978_v26 = vld [vmem:[#allocation7 + $0x1c50] sm:$0xf]  ;;  %v15331_v39 = vor.u32 %v18594_v29, %v15330_v27  ;;  %v18882_v16 = vld [vmem:[#allocation7 + $0x2084] sm:$0xf0]  ;;  %v18864_v29 = vld [vmem:[#allocation7 + $0x1ff4] sm:$0xf0] }
 0x3ce   : > { %8988 = vmatpush.bf16.msrb.mxu0 %v14971_v28  ;;  %9001 = vmatpush.bf16.msrb.mxu1 %v15547_v36  ;;  %v8749_v33 = vpop.f32.mrf.mxu1  ;;  %v14755_v28 = vor.u32 %v18450_v22, %v14754_v21  ;;  %v14682_v36 = vld [vmem:[#allocation7 + $0x1230] sm:$0xf]  ;;  %v15979_v47 = vor.u32 %v18756_v5, %v15978_v26  ;;  %v13388_v21 = vld [vmem:[#allocation7 + $0x858] sm:$0xf0]  ;;  %v12815_v26 = vor.u32 %v17955_v57, %v12812_v51  ;;  %v18405_v5 = vld [vmem:[#allocation7 + $0x11a4] sm:$0xf] }
 0x3cf   : > { %v14683_v50 = vor.u32 %v18432_v44, %v14682_v36  ;;  %v16410_v27 = vld [vmem:[#allocation7 + $0x1fb0] sm:$0xf]  ;;  %v14612_v33 = vld [vmem:[#allocation7 + $0x11e8] sm:$0xf0] }
 0x3d0   : > { %9013 = vmatpush.bf16.msrb.mxu2 %v16195_v40  ;;  %v15258_v40 = vld [vmem:[#allocation7 + $0x16b0] sm:$0xf]  ;;  %v12740_v36 = vld [vmem:[#allocation7 + $0x348] sm:$0xf0]  ;;  %v16411_v44 = vor.u32 %v18864_v29, %v16410_v27 }
 0x3d1   : > { %9026 = vmatpush.bf16.msrb.mxu3 %v16771_v43  ;;  %v12884_v43 = vld [vmem:[#allocation7 + $0x468] sm:$0xf0]  ;;  %v15259_v17 = vor.u32 %v18576_v32, %v15258_v40  ;;  %v18081_v32 = vld [vmem:[#allocation7 + $0x784] sm:$0xf] }
 0x3d2   : > { %8989 = vmatpush.bf16.msrb.mxu0 %v14899_v56  ;;  %9002 = vmatpush.bf16.msrb.mxu1 %v15475_v61  ;;  %v13460_v56 = vld [vmem:[#allocation7 + $0x8e8] sm:$0xf0]  ;;  %v8761_v61 = vadd.f32 %v8760_v54, %v8748_v4  ;;  %v15834_v4 = vld [vmem:[#allocation7 + $0x1b30] sm:$0xf]  ;;  %v13964_v54 = vld [vmem:[#allocation7 + $0xcd8] sm:$0xf0] }
 0x3d3   : > { %v13892_v57 = vld [vmem:[#allocation7 + $0xc48] sm:$0xf0] }
 0x3d4   : > { %9014 = vmatpush.bf16.msrb.mxu2 %v16123_v1  ;;  %v16482_v1 = vld [vmem:[#allocation7 + $0x2040] sm:$0xf]  ;;  %v20241_v59 = vadd.f32 %v8773_v13, %v8761_v61  ;;  %v17919_v61 = vld [vmem:[#allocation7 + $0x274] sm:$0xf]  ;;  %v12668_v13 = vld [vmem:[#allocation7 + $0x2b8] sm:$0xf0] }
 0x3d5   : > { %9027 = vmatpush.bf16.msrb.mxu3 %v16699_v20  ;;  %v12887_v20 = vor.u32 %v17973_v48, %v12884_v43  ;;  %v16483_v22 = vor.u32 %v18882_v16, %v16482_v1  ;;  %v8775_v48 = vpop.f32.mrf.mxu3  ;;  %v14615_v43 = vor.u32 %v18405_v5, %v14612_v33  ;;  %v18063_v1 = vld [vmem:[#allocation7 + $0x6f4] sm:$0xf]  ;;  %v13244_v16 = vld [vmem:[#allocation7 + $0x738] sm:$0xf0]  ;;  %v14468_v51 = vld [vmem:[#allocation7 + $0x10c8] sm:$0xf0] }
 0x3d6   : > { %8990 = vmatpush.bf16.msrb.mxu0 %v14827_v11  ;;  %9003 = vmatpush.bf16.msrb.mxu1 %v15403_v19  ;;  %v13463_v11 = vor.u32 %v18117_v52, %v13460_v56  ;;  %v18099_v19 = vld [vmem:[#allocation7 + $0x814] sm:$0xf]  ;;  %v13172_v27 = vld [vmem:[#allocation7 + $0x6a8] sm:$0xf0]  ;;  %v13100_v48 = vld [vmem:[#allocation7 + $0x618] sm:$0xf0] }
 0x3d7   : > { %v18243_v52 = vld [vmem:[#allocation7 + $0xc94] sm:$0xf] }
 0x3d8   : > { %9015 = vmatpush.bf16.msrb.mxu2 %v16051_v23  ;;  %v18720_v23 = vld [vmem:[#allocation7 + $0x1b74] sm:$0xf0]  ;;  %v18387_v56 = vld [vmem:[#allocation7 + $0x1114] sm:$0xf] }
 0x3d9   : > { %9028 = vmatpush.bf16.msrb.mxu3 %v16627_v24  ;;  %v14036_v24 = vld [vmem:[#allocation7 + $0xd68] sm:$0xf0]  ;;  %v15835_v12 = vor.u32 %v18720_v23, %v15834_v4  ;;  %v18045_v23 = vld [vmem:[#allocation7 + $0x664] sm:$0xf] }
 0x3da   : > { %8991 = vmatpush.bf16.msrb.mxu0 %v14755_v28  ;;  %9004 = vmatpush.bf16.msrb.mxu1 %v15331_v39  ;;  %v13391_v28 = vor.u32 %v18099_v19, %v13388_v21  ;;  %v8762_v39 = vpop.f32.mrf.mxu2  ;;  %v14039_v40 = vor.u32 %v18261_v34, %v14036_v24  ;;  %v13247_v19 = vor.u32 %v18063_v1, %v13244_v16  ;;  %v17901_v21 = vld [vmem:[#allocation7 + $0x1e4] sm:$0xf]  ;;  %v18207_v24 = vld [vmem:[#allocation7 + $0xb74] sm:$0xf]  ;;  %v13028_v1 = vld [vmem:[#allocation7 + $0x588] sm:$0xf0] }
 0x3db   : > { %v17883_v39 = vld [vmem:[#allocation7 + $0x154] sm:$0xf] }
 0x3dc   : > { %9016 = vmatpush.bf16.msrb.mxu2 %v15979_v47  ;;  %v13316_v47 = vld [vmem:[#allocation7 + $0x7c8] sm:$0xf0] }
 0x3dd   : > { %9029 = vmatpush.bf16.msrb.mxu3 %v16555_v55  ;;  %v12743_v55 = vor.u32 %v17937_v6, %v12740_v36  ;;  %v13319_v62 = vor.u32 %v18081_v32, %v13316_v47  ;;  %v14396_v6 = vld [vmem:[#allocation7 + $0x1038] sm:$0xf0]  ;;  %v13175_v36 = vor.u32 %v18045_v23, %v13172_v27  ;;  %v18027_v47 = vld [vmem:[#allocation7 + $0x5d4] sm:$0xf] }
 0x3de   : > { %8992 = vmatpush.bf16.msrb.mxu0 %v14683_v50  ;;  %9005 = vmatpush.bf16.msrb.mxu1 %v15259_v17  ;;  %v13967_v50 = vor.u32 %v18243_v52, %v13964_v54  ;;  %v14543_v17 = vor.u32 %v18387_v56, %v14540_v60  ;;  %v8786_v29 = vpop.f32.mrf.mxu0  ;;  %v18189_v52 = vld [vmem:[#allocation7 + $0xae4] sm:$0xf]  ;;  %v13748_v54 = vld [vmem:[#allocation7 + $0xb28] sm:$0xf0]  ;;  %v13103_v60 = vor.u32 %v18027_v47, %v13100_v48  ;;  %v17991_v23 = vld [vmem:[#allocation7 + $0x4b4] sm:$0xf] }
 0x3df   : > { %v8787_v5 = vadd.f32 %v8786_v29, %v20241_v59  ;;  %v14324_v56 = vld [vmem:[#allocation7 + $0xfa8] sm:$0xf0]  ;;  %v12956_v27 = vld [vmem:[#allocation7 + $0x4f8] sm:$0xf0] }
 0x3e0   : > { %9017 = vmatpush.bf16.msrb.mxu2 %v15907_v18  ;;  %v18369_v18 = vld [vmem:[#allocation7 + $0x1084] sm:$0xf]  ;;  %v8799_v33 = vpop.f32.mrf.mxu1  ;;  %v14180_v47 = vld [vmem:[#allocation7 + $0xe88] sm:$0xf0]  ;;  %v12959_v48 = vor.u32 %v17991_v23, %v12956_v27 }
 0x3e1   : > { %9030 = vmatpush.bf16.msrb.mxu3 %v16483_v22  ;;  %8993 = vmatmul.bf16.vlgmr.msrb.gmra.mxu0 %v20080_v38  ;;  %v12596_v22 = vld [vmem:[#allocation7 + $0x228] sm:$0xf0]  ;;  %v14471_v34 = vor.u32 %v18369_v18, %v14468_v51  ;;  %v18315_v51 = vld [vmem:[#allocation7 + $0xed4] sm:$0xf] }
 0x3e2   : > { %9037 = vmatpush.bf16.msra.mxu0 %v12887_v20  ;;  %9050 = vmatpush.bf16.msra.mxu1 %v13463_v11  ;;  %v18225_v20 = vld [vmem:[#allocation7 + $0xc04] sm:$0xf]  ;;  %v12671_v11 = vor.u32 %v17919_v61, %v12668_v13  ;;  %v12452_v61 = vld [vmem:[#allocation7 + $0x108] sm:$0xf0]  ;;  %v13751_v13 = vor.u32 %v18189_v52, %v13748_v54  ;;  %v18531_v52 = vld [vmem:[#allocation7 + $0x1594] sm:$0xf] }
 0x3e3   : > { %9006 = vmatmul.bf16.vlgmr.msrb.gmra.mxu1 %v20082_v46  ;;  %v13895_v4 = vor.u32 %v18225_v20, %v13892_v57  ;;  %v18171_v20 = vld [vmem:[#allocation7 + $0xa54] sm:$0xf]  ;;  %v13676_v57 = vld [vmem:[#allocation7 + $0xa98] sm:$0xf0] }
 0x3e4   : > { %9018 = vmatpush.bf16.msrb.mxu2 %v15835_v12  ;;  %v18351_v12 = vld [vmem:[#allocation7 + $0xff4] sm:$0xf]  ;;  %v13679_v29 = vor.u32 %v18171_v20, %v13676_v57  ;;  %v16340_v20 = vld [vmem:[#allocation7 + $0x1f68] sm:$0xf0] }
 0x3e5   : > { %9031 = vmatpush.bf16.msrb.mxu3 %v16411_v44  ;;  %v12524_v44 = vld [vmem:[#allocation7 + $0x198] sm:$0xf0] }
 0x3e6   : > { %9038 = vmatpush.bf16.msra.mxu0 %v12815_v26  ;;  %9051 = vmatpush.bf16.msra.mxu1 %v13391_v28  ;;  %v13820_v26 = vld [vmem:[#allocation7 + $0xbb8] sm:$0xf0]  ;;  %v12599_v28 = vor.u32 %v17901_v21, %v12596_v22  ;;  %v12527_v59 = vor.u32 %v17883_v39, %v12524_v44  ;;  %v8788_v16 = vpop.f32.mrf.mxu0  ;;  %v17847_v21 = vld [vmem:[#allocation7 + $0x34] sm:$0xf] }
 0x3e7   : > { %9019 = vmatmul.bf16.vlgmr.msrb.gmra.mxu2 %v20088_v7  ;;  %v13823_v32 = vor.u32 %v18207_v24, %v13820_v26  ;;  %v15188_v24 = vld [vmem:[#allocation7 + $0x1668] sm:$0xf0]  ;;  %v18693_v26 = vld [vmem:[#allocation7 + $0x1aa4] sm:$0xf]  ;;  %v14108_v16 = vld [vmem:[#allocation7 + $0xdf8] sm:$0xf0] }
 0x3e8   : > { %9063 = vmatpush.bf16.msra.mxu2 %v14039_v40  ;;  %9032 = vmatmul.bf16.vlgmr.msrb.gmra.mxu3 %v20090_v14  ;;  %v8800_v40 = vadd.f32 %v8799_v33, %v8787_v5 }
 0x3e9   : > { %9076 = vmatpush.bf16.msra.mxu3 %v14615_v43  ;;  %v14399_v43 = vor.u32 %v18351_v12, %v14396_v6  ;;  %v18153_v12 = vld [vmem:[#allocation7 + $0x9c4] sm:$0xf]  ;;  %v13604_v6 = vld [vmem:[#allocation7 + $0xa08] sm:$0xf0] }
 0x3ea   : > { %9039 = vmatpush.bf16.msra.mxu0 %v12743_v55  ;;  %9052 = vmatpush.bf16.msra.mxu1 %v13319_v62  ;;  %v18333_v55 = vld [vmem:[#allocation7 + $0xf64] sm:$0xf]  ;;  %v8812_v5 = vpop.f32.mrf.mxu2 }
 0x3eb   : > { %v17865_v62 = vld [vmem:[#allocation7 + $0xc4] sm:$0xf]  ;;  %v8825_v39 = vpop.f32.mrf.mxu3 }
 0x3ec   : > { %9064 = vmatpush.bf16.msra.mxu2 %v13967_v50  ;;  %v18009_v50 = vld [vmem:[#allocation7 + $0x544] sm:$0xf]  ;;  %v12455_v18 = vor.u32 %v17865_v62, %v12452_v61  ;;  %v15692_v62 = vld [vmem:[#allocation7 + $0x1a58] sm:$0xf0] }
 0x3ed   : > { %9077 = vmatpush.bf16.msra.mxu3 %v14543_v17  ;;  %v14327_v17 = vor.u32 %v18333_v55, %v14324_v56  ;;  %v13031_v22 = vor.u32 %v18009_v50, %v13028_v1  ;;  %v13607_v55 = vor.u32 %v18153_v12, %v13604_v6  ;;  %v15116_v56 = vld [vmem:[#allocation7 + $0x15d8] sm:$0xf0]  ;;  %v18279_v50 = vld [vmem:[#allocation7 + $0xdb4] sm:$0xf] }
 0x3ee   : > { %9040 = vmatpush.bf16.msra.mxu0 %v12671_v11  ;;  %9053 = vmatpush.bf16.msra.mxu1 %v13247_v19  ;;  %v8801_v11 = vpop.f32.mrf.mxu1  ;;  %v14252_v19 = vld [vmem:[#allocation7 + $0xf18] sm:$0xf0]  ;;  %v15119_v57 = vor.u32 %v18531_v52, %v15116_v56  ;;  %v14111_v23 = vor.u32 %v18279_v50, %v14108_v16  ;;  %v18963_v12 = vld [vmem:[#allocation7 + $0x2314] sm:$0xf]  ;;  %v18801_v52 = vld [vmem:[#allocation7 + $0x1e04] sm:$0xf] }
 0x3ef   : > { %v14255_v33 = vor.u32 %v18315_v51, %v14252_v19  ;;  %v18981_v11 = vld [vmem:[#allocation7 + $0x23a4] sm:$0xf]  ;;  %v16844_v6 = vld [vmem:[#allocation7 + $0x2358] sm:$0xf0]  ;;  %v15476_v16 = vld [vmem:[#allocation7 + $0x18a8] sm:$0xf0] }
 0x3f0   : > { %9065 = vmatpush.bf16.msra.mxu2 %v13895_v4  ;;  %v12380_v4 = vld [vmem:[#allocation7 + $0x78] sm:$0xf0]  ;;  %v18945_v56 = vld [vmem:[#allocation7 + $0x2284] sm:$0xf] }
 0x3f1   : > { %9078 = vmatpush.bf16.msra.mxu3 %v14471_v34  ;;  %v18549_v34 = vld [vmem:[#allocation7 + $0x1624] sm:$0xf]  ;;  %v12383_v44 = vor.u32 %v17847_v21, %v12380_v4 }
 0x3f2   : > { %9041 = vmatpush.bf16.msra.mxu0 %v12599_v28  ;;  %9054 = vmatpush.bf16.msra.mxu1 %v13175_v36  ;;  %v15764_v28 = vld [vmem:[#allocation7 + $0x1ae8] sm:$0xf0]  ;;  %v8813_v36 = vadd.f32 %v8812_v5, %v8800_v40  ;;  %v18135_v40 = vld [vmem:[#allocation7 + $0x934] sm:$0xf]  ;;  %v18513_v21 = vld [vmem:[#allocation7 + $0x1504] sm:$0xf]  ;;  %v8814_v4 = vpop.f32.mrf.mxu2 }
 0x3f3   : > { %v18819_v5 = vld [vmem:[#allocation7 + $0x1e94] sm:$0xf]  ;;  %v18621_v50 = vld [vmem:[#allocation7 + $0x1864] sm:$0xf] }
 0x3f4   : > { %9066 = vmatpush.bf16.msra.mxu2 %v13823_v32  ;;  %v18297_v32 = vld [vmem:[#allocation7 + $0xe44] sm:$0xf]  ;;  %v20248_v54 = vadd.f32 %v8825_v39, %v8813_v36  ;;  %v18495_v39 = vld [vmem:[#allocation7 + $0x1474] sm:$0xf]  ;;  %v15479_v4 = vor.u32 %v18621_v50, %v15476_v16  ;;  %v14684_v50 = vld [vmem:[#allocation7 + $0x1278] sm:$0xf0] }
 0x3f5   : > { %9079 = vmatpush.bf16.msra.mxu3 %v14399_v43  ;;  %v15191_v43 = vor.u32 %v18549_v34, %v15188_v24  ;;  %v14183_v61 = vor.u32 %v18297_v32, %v14180_v47  ;;  %v15620_v34 = vld [vmem:[#allocation7 + $0x19c8] sm:$0xf0]  ;;  %v8827_v24 = vpop.f32.mrf.mxu3  ;;  %v18639_v47 = vld [vmem:[#allocation7 + $0x18f4] sm:$0xf] }
 0x3f6   : > { %9042 = vmatpush.bf16.msra.mxu0 %v12527_v59  ;;  %9055 = vmatpush.bf16.msra.mxu1 %v13103_v60  ;;  %v15767_v59 = vor.u32 %v18693_v26, %v15764_v28  ;;  %v18675_v60 = vld [vmem:[#allocation7 + $0x1a14] sm:$0xf]  ;;  %v9561_v1 = vpack.c.bf16 %v20248_v54, %v20222_v31  ;;  %v15404_v24 = vld [vmem:[#allocation7 + $0x1818] sm:$0xf0] }
 0x3f7   : > { %v15695_v51 = vor.u32 %v18675_v60, %v15692_v62  ;;  %v16772_v60 = vld [vmem:[#allocation7 + $0x22c8] sm:$0xf0]  ;;  %v18567_v16 = vld [vmem:[#allocation7 + $0x16b4] sm:$0xf] }
 0x3f8   : > { %9067 = vmatpush.bf16.msra.mxu2 %v13751_v13  ;;  %v13532_v13 = vld [vmem:[#allocation7 + $0x978] sm:$0xf0] }
 0x3f9   : > { %9080 = vmatpush.bf16.msra.mxu3 %v14327_v17  ;;  %v18837_v17 = vld [vmem:[#allocation7 + $0x1f24] sm:$0xf]  ;;  %v13535_v19 = vor.u32 %v18135_v40, %v13532_v13  ;;  %v14900_v40 = vld [vmem:[#allocation7 + $0x1428] sm:$0xf0] }
 0x3fa   : > { %9043 = vmatpush.bf16.msra.mxu0 %v12455_v18  ;;  %9056 = vmatpush.bf16.msra.mxu1 %v13031_v22  ;;  %v16916_v18 = vld [vmem:[#allocation7 + $0x23e8] sm:$0xf0]  ;;  %v16343_v27 = vor.u32 %v18837_v17, %v16340_v20  ;;  %v16775_v20 = vor.u32 %v18945_v56, %v16772_v60 }
 0x3fb   : > { %v15044_v22 = vld [vmem:[#allocation7 + $0x1548] sm:$0xf0]  ;;  %v16919_v26 = vor.u32 %v18981_v11, %v16916_v18  ;;  %v16124_v11 = vld [vmem:[#allocation7 + $0x1db8] sm:$0xf0] }
 0x3fc   : > { %9068 = vmatpush.bf16.msra.mxu2 %v13679_v29  ;;  %v18657_v29 = vld [vmem:[#allocation7 + $0x1984] sm:$0xf]  ;;  %v15047_v28 = vor.u32 %v18513_v21, %v15044_v22  ;;  %v16700_v21 = vld [vmem:[#allocation7 + $0x2238] sm:$0xf0] }
 0x3fd   : > { %9081 = vmatpush.bf16.msra.mxu3 %v14255_v33  ;;  %v16268_v33 = vld [vmem:[#allocation7 + $0x1ed8] sm:$0xf0]  ;;  %v15623_v36 = vor.u32 %v18657_v29, %v15620_v34  ;;  %v18603_v34 = vld [vmem:[#allocation7 + $0x17d4] sm:$0xf] }
 0x3fe   : > { %9044 = vmatpush.bf16.msra.mxu0 %v12383_v44  ;;  %9057 = vmatpush.bf16.msra.mxu1 %v12959_v48  ;;  %v14972_v44 = vld [vmem:[#allocation7 + $0x14b8] sm:$0xf0]  ;;  %v16271_v32 = vor.u32 %v18819_v5, %v16268_v33  ;;  %v8838_v17 = vpop.f32.mrf.mxu0  ;;  %v18765_v5 = vld [vmem:[#allocation7 + $0x1ce4] sm:$0xf]  ;;  %v16052_v33 = vld [vmem:[#allocation7 + $0x1d28] sm:$0xf0] }
 0x3ff   : > { %v15548_v48 = vld [vmem:[#allocation7 + $0x1938] sm:$0xf0] }
 0x400   : > { %9069 = vmatpush.bf16.msra.mxu2 %v13607_v55  ;;  %v14975_v55 = vor.u32 %v18495_v39, %v14972_v44  ;;  %v15551_v62 = vor.u32 %v18639_v47, %v15548_v48  ;;  %v8851_v18 = vpop.f32.mrf.mxu1  ;;  %v18441_v39 = vld [vmem:[#allocation7 + $0x12c4] sm:$0xf]  ;;  %v14756_v44 = vld [vmem:[#allocation7 + $0x1308] sm:$0xf0] }
 0x401   : > { %9082 = vmatpush.bf16.msra.mxu3 %v14183_v61  ;;  %9045 = vmatmul.bf16.vlgmr.msra.gmra.mxu0 %v20064_v41  ;;  %v18477_v61 = vld [vmem:[#allocation7 + $0x13e4] sm:$0xf]  ;;  %v8852_v22 = vadd.f32 %v8851_v18, %v8838_v17  ;;  %v15332_v48 = vld [vmem:[#allocation7 + $0x1788] sm:$0xf0]  ;;  %v14759_v60 = vor.u32 %v18441_v39, %v14756_v44  ;;  %v15260_v17 = vld [vmem:[#allocation7 + $0x16f8] sm:$0xf0] }
 0x402   : > { %9089 = vmatpush.bf16.msrb.mxu0 %v15191_v43  ;;  %9102 = vmatpush.bf16.msrb.mxu1 %v15767_v59  ;;  %v16847_v43 = vor.u32 %v18963_v12, %v16844_v6  ;;  %v16196_v59 = vld [vmem:[#allocation7 + $0x1e48] sm:$0xf0]  ;;  %v18909_v12 = vld [vmem:[#allocation7 + $0x2164] sm:$0xf]  ;;  %v13466_v18 = vld [vmem:[#allocation7 + $0x8a8] sm:$0xf] }
 0x403   : > { %9058 = vmatmul.bf16.vlgmr.msra.gmra.mxu1 %v20066_v45  ;;  %v16199_v13 = vor.u32 %v18801_v52, %v16196_v59  ;;  %v16628_v6 = vld [vmem:[#allocation7 + $0x21a8] sm:$0xf0]  ;;  %v18585_v47 = vld [vmem:[#allocation7 + $0x1744] sm:$0xf]  ;;  %v18747_v59 = vld [vmem:[#allocation7 + $0x1c54] sm:$0xf] }
 0x404   : > { %9070 = vmatpush.bf16.msra.mxu2 %v13535_v19  ;;  %v18927_v19 = vld [vmem:[#allocation7 + $0x21f4] sm:$0xf]  ;;  %v16631_v52 = vor.u32 %v18909_v12, %v16628_v6  ;;  %v17965_v39 = vld [vmem:[#allocation7 + $0x3dc] sm:$0xf0]  ;;  %v13394_v44 = vld [vmem:[#allocation7 + $0x818] sm:$0xf] }
 0x405   : > { %9083 = vmatpush.bf16.msra.mxu3 %v14111_v23  ;;  %v18459_v23 = vld [vmem:[#allocation7 + $0x1354] sm:$0xf] }
 0x406   : > { %9090 = vmatpush.bf16.msrb.mxu0 %v15119_v57  ;;  %9103 = vmatpush.bf16.msrb.mxu1 %v15695_v51  ;;  %v18783_v57 = vld [vmem:[#allocation7 + $0x1d74] sm:$0xf]  ;;  %v14903_v51 = vor.u32 %v18477_v61, %v14900_v40  ;;  %v16556_v61 = vld [vmem:[#allocation7 + $0x2118] sm:$0xf0] }
 0x407   : > { %9071 = vmatmul.bf16.vlgmr.msra.gmra.mxu2 %v20072_v2  ;;  %v16127_v29 = vor.u32 %v18783_v57, %v16124_v11  ;;  %v18423_v40 = vld [vmem:[#allocation7 + $0x1234] sm:$0xf]  ;;  %v12890_v57 = vld [vmem:[#allocation7 + $0x428] sm:$0xf]  ;;  %v17983_v11 = vld [vmem:[#allocation7 + $0x46c] sm:$0xf0] }
 0x408   : > { %9115 = vmatpush.bf16.msrb.mxu2 %v16343_v27  ;;  %9084 = vmatmul.bf16.vlgmr.msra.gmra.mxu3 %v20074_v8  ;;  %v14828_v27 = vld [vmem:[#allocation7 + $0x1398] sm:$0xf0]  ;;  %v8853_v56 = vpop.f32.mrf.mxu1 }
 0x409   : > { %9128 = vmatpush.bf16.msrb.mxu3 %v16919_v26  ;;  %v16703_v26 = vor.u32 %v18927_v19, %v16700_v21  ;;  %v18127_v21 = vld [vmem:[#allocation7 + $0x8ec] sm:$0xf0] }
 0x40a   : > { %9091 = vmatpush.bf16.msrb.mxu0 %v15047_v28  ;;  %9104 = vmatpush.bf16.msrb.mxu1 %v15623_v36  ;;  %v14831_v28 = vor.u32 %v18459_v23, %v14828_v27  ;;  %v15407_v36 = vor.u32 %v18603_v34, %v15404_v24  ;;  %v15908_v23 = vld [vmem:[#allocation7 + $0x1c08] sm:$0xf0]  ;;  %v14687_v34 = vor.u32 %v18423_v40, %v14684_v50  ;;  %v18873_v24 = vld [vmem:[#allocation7 + $0x2044] sm:$0xf]  ;;  %v17947_v50 = vld [vmem:[#allocation7 + $0x34c] sm:$0xf0] }
 0x40b   : > { %v13467_v6 = vor.u32 %v18127_v21, %v13466_v18  ;;  %v18253_v21 = vld [vmem:[#allocation7 + $0xcdc] sm:$0xf0] }
 0x40c   : > { %9116 = vmatpush.bf16.msrb.mxu2 %v16271_v32  ;;  %v16055_v32 = vor.u32 %v18765_v5, %v16052_v33  ;;  %v15263_v5 = vor.u32 %v18567_v16, %v15260_v17  ;;  %v12891_v33 = vor.u32 %v17983_v11, %v12890_v57  ;;  %v13322_v57 = vld [vmem:[#allocation7 + $0x788] sm:$0xf]  ;;  %v18091_v11 = vld [vmem:[#allocation7 + $0x7cc] sm:$0xf0] }
 0x40d   : > { %9129 = vmatpush.bf16.msrb.mxu3 %v16847_v43  ;;  %v8840_v43 = vpop.f32.mrf.mxu0 }
 0x40e   : > { %9092 = vmatpush.bf16.msrb.mxu0 %v14975_v55  ;;  %9105 = vmatpush.bf16.msrb.mxu1 %v15551_v62  ;;  %v15980_v55 = vld [vmem:[#allocation7 + $0x1c98] sm:$0xf0]  ;;  %v18891_v62 = vld [vmem:[#allocation7 + $0x20d4] sm:$0xf] }
 0x40f   : > { %v16559_v19 = vor.u32 %v18891_v62, %v16556_v61  ;;  %v18855_v43 = vld [vmem:[#allocation7 + $0x1fb4] sm:$0xf]  ;;  %v18415_v62 = vld [vmem:[#allocation7 + $0x11ec] sm:$0xf0] }
 0x410   : > { %9117 = vmatpush.bf16.msrb.mxu2 %v16199_v13  ;;  %v15335_v13 = vor.u32 %v18585_v47, %v15332_v48  ;;  %v15836_v48 = vld [vmem:[#allocation7 + $0x1b78] sm:$0xf0] }
 0x411   : > { %9130 = vmatpush.bf16.msrb.mxu3 %v16775_v20  ;;  %v15983_v20 = vor.u32 %v18747_v59, %v15980_v55  ;;  %v14042_v59 = vld [vmem:[#allocation7 + $0xd28] sm:$0xf]  ;;  %v18271_v55 = vld [vmem:[#allocation7 + $0xd6c] sm:$0xf0] }
 0x412   : > { %9093 = vmatpush.bf16.msrb.mxu0 %v14903_v51  ;;  %9106 = vmatpush.bf16.msrb.mxu1 %v15479_v4  ;;  %v8864_v51 = vpop.f32.mrf.mxu2  ;;  %v18729_v4 = vld [vmem:[#allocation7 + $0x1bc4] sm:$0xf] }
 0x413   : > { %v8865_v27 = vadd.f32 %v8864_v51, %v8852_v22  ;;  %v18711_v22 = vld [vmem:[#allocation7 + $0x1b34] sm:$0xf] }
 0x414   : > { %9118 = vmatpush.bf16.msrb.mxu2 %v16127_v29  ;;  %v8877_v29 = vpop.f32.mrf.mxu3  ;;  %v15839_v40 = vor.u32 %v18711_v22, %v15836_v48  ;;  %v12602_v22 = vld [vmem:[#allocation7 + $0x1e8] sm:$0xf]  ;;  %v17911_v48 = vld [vmem:[#allocation7 + $0x22c] sm:$0xf0] }
 0x415   : > { %9131 = vmatpush.bf16.msrb.mxu3 %v16703_v26  ;;  %v16484_v26 = vld [vmem:[#allocation7 + $0x2088] sm:$0xf0]  ;;  %v20256_v12 = vadd.f32 %v8877_v29, %v8865_v27  ;;  %v18397_v27 = vld [vmem:[#allocation7 + $0x115c] sm:$0xf0]  ;;  %v13323_v29 = vor.u32 %v18091_v11, %v13322_v57 }
 0x416   : > { %9094 = vmatpush.bf16.msrb.mxu0 %v14831_v28  ;;  %9107 = vmatpush.bf16.msrb.mxu1 %v15407_v36  ;;  %v12818_v28 = vld [vmem:[#allocation7 + $0x398] sm:$0xf]  ;;  %v15911_v36 = vor.u32 %v18729_v4, %v15908_v23  ;;  %v16487_v47 = vor.u32 %v18873_v24, %v16484_v26  ;;  %v17929_v24 = vld [vmem:[#allocation7 + $0x2bc] sm:$0xf0] }
 0x417   : > { %v12819_v56 = vor.u32 %v17965_v39, %v12818_v28  ;;  %v14546_v23 = vld [vmem:[#allocation7 + $0x1118] sm:$0xf]  ;;  %v17893_v57 = vld [vmem:[#allocation7 + $0x19c] sm:$0xf0] }
 0x418   : > { %9119 = vmatpush.bf16.msrb.mxu2 %v16055_v32  ;;  %v18109_v32 = vld [vmem:[#allocation7 + $0x85c] sm:$0xf0]  ;;  %v14547_v28 = vor.u32 %v18397_v27, %v14546_v23  ;;  %v18199_v23 = vld [vmem:[#allocation7 + $0xb2c] sm:$0xf0]  ;;  %v14330_v27 = vld [vmem:[#allocation7 + $0xf68] sm:$0xf] }
 0x419   : > { %9132 = vmatpush.bf16.msrb.mxu3 %v16631_v52  ;;  %v16412_v52 = vld [vmem:[#allocation7 + $0x1ff8] sm:$0xf0]  ;;  %v13395_v61 = vor.u32 %v18109_v32, %v13394_v44  ;;  %v14474_v44 = vld [vmem:[#allocation7 + $0x1088] sm:$0xf]  ;;  %v18379_v32 = vld [vmem:[#allocation7 + $0x10cc] sm:$0xf0] }
 0x41a   : > { %9095 = vmatpush.bf16.msrb.mxu0 %v14759_v60  ;;  %9108 = vmatpush.bf16.msrb.mxu1 %v15335_v13  ;;  %v14618_v60 = vld [vmem:[#allocation7 + $0x11a8] sm:$0xf]  ;;  %v8866_v16 = vpop.f32.mrf.mxu2  ;;  %v16415_v17 = vor.u32 %v18855_v43, %v16412_v52 }
 0x41b   : > { %v12746_v13 = vld [vmem:[#allocation7 + $0x308] sm:$0xf]  ;;  %v14619_v51 = vor.u32 %v18415_v62, %v14618_v60  ;;  %v13826_v60 = vld [vmem:[#allocation7 + $0xb78] sm:$0xf]  ;;  %v18217_v62 = vld [vmem:[#allocation7 + $0xbbc] sm:$0xf0] }
 0x41c   : > { %9120 = vmatpush.bf16.msrb.mxu2 %v15983_v20  ;;  %v14043_v20 = vor.u32 %v18271_v55, %v14042_v59  ;;  %v8879_v18 = vpop.f32.mrf.mxu3  ;;  %v12747_v4 = vor.u32 %v17947_v50, %v12746_v13  ;;  %v13178_v52 = vld [vmem:[#allocation7 + $0x668] sm:$0xf]  ;;  %v18055_v59 = vld [vmem:[#allocation7 + $0x6ac] sm:$0xf0]  ;;  %v12603_v13 = vor.u32 %v17911_v48, %v12602_v22  ;;  %v14402_v50 = vld [vmem:[#allocation7 + $0xff8] sm:$0xf] }
 0x41d   : > { %9133 = vmatpush.bf16.msrb.mxu3 %v16559_v19  ;;  %v13970_v19 = vld [vmem:[#allocation7 + $0xc98] sm:$0xf]  ;;  %v18361_v16 = vld [vmem:[#allocation7 + $0x103c] sm:$0xf0]  ;;  %v13827_v18 = vor.u32 %v18217_v62, %v13826_v60  ;;  %v15194_v62 = vld [vmem:[#allocation7 + $0x1628] sm:$0xf] }
 0x41e   : > { %9096 = vmatpush.bf16.msrb.mxu0 %v14687_v34  ;;  %9109 = vmatpush.bf16.msrb.mxu1 %v15263_v5  ;;  %v12674_v34 = vld [vmem:[#allocation7 + $0x278] sm:$0xf]  ;;  %v13971_v26 = vor.u32 %v18253_v21, %v13970_v19  ;;  %v8890_v55 = vpop.f32.mrf.mxu0  ;;  %v18037_v19 = vld [vmem:[#allocation7 + $0x61c] sm:$0xf0]  ;;  %v14403_v21 = vor.u32 %v18361_v16, %v14402_v50  ;;  %v18703_v16 = vld [vmem:[#allocation7 + $0x1aec] sm:$0xf0] }
 0x41f   : > { %v13250_v5 = vld [vmem:[#allocation7 + $0x6f8] sm:$0xf]  ;;  %v12675_v39 = vor.u32 %v17929_v24, %v12674_v34  ;;  %v12458_v24 = vld [vmem:[#allocation7 + $0xc8] sm:$0xf]  ;;  %v18325_v48 = vld [vmem:[#allocation7 + $0xf1c] sm:$0xf0] }
 0x420   : > { %9121 = vmatpush.bf16.msrb.mxu2 %v15911_v36  ;;  %v18235_v36 = vld [vmem:[#allocation7 + $0xc4c] sm:$0xf0]  ;;  %v14258_v22 = vld [vmem:[#allocation7 + $0xed8] sm:$0xf] }
 0x421   : > { %9134 = vmatpush.bf16.msrb.mxu3 %v16487_v47  ;;  %9097 = vmatmul.bf16.vlgmr.msrb.gmra.mxu0 %v20080_v38  ;;  %v14259_v50 = vor.u32 %v18325_v48, %v14258_v22  ;;  %v16922_v22 = vld [vmem:[#allocation7 + $0x23a8] sm:$0xf]  ;;  %v18991_v48 = vld [vmem:[#allocation7 + $0x23ec] sm:$0xf0] }
 0x422   : > { %9141 = vmatpush.bf16.msra.mxu0 %v12891_v33  ;;  %9154 = vmatpush.bf16.msra.mxu1 %v13467_v6  ;;  %v18073_v33 = vld [vmem:[#allocation7 + $0x73c] sm:$0xf0]  ;;  %v13898_v6 = vld [vmem:[#allocation7 + $0xc08] sm:$0xf] }
 0x423   : > { %9110 = vmatmul.bf16.vlgmr.msrb.gmra.mxu1 %v20082_v46  ;;  %v13251_v47 = vor.u32 %v18073_v33, %v13250_v5  ;;  %v13899_v43 = vor.u32 %v18235_v36, %v13898_v6  ;;  %v13034_v33 = vld [vmem:[#allocation7 + $0x548] sm:$0xf] }
 0x424   : > { %9122 = vmatpush.bf16.msrb.mxu2 %v15839_v40  ;;  %v8903_v40 = vpop.f32.mrf.mxu1 }
 0x425   : > { %9135 = vmatpush.bf16.msrb.mxu3 %v16415_v17  ;;  %v13179_v17 = vor.u32 %v18055_v59, %v13178_v52  ;;  %v17857_v59 = vld [vmem:[#allocation7 + $0x7c] sm:$0xf0] }
 0x426   : > { %9142 = vmatpush.bf16.msra.mxu0 %v12819_v56  ;;  %9155 = vmatpush.bf16.msra.mxu1 %v13395_v61  ;;  %v14475_v56 = vor.u32 %v18379_v32, %v14474_v44  ;;  %v8891_v61 = vadd.f32 %v8890_v55, %v20256_v12  ;;  %v8892_v6 = vpop.f32.mrf.mxu0  ;;  %v18181_v44 = vld [vmem:[#allocation7 + $0xa9c] sm:$0xf0]  ;;  %v12962_v55 = vld [vmem:[#allocation7 + $0x4b8] sm:$0xf] }
 0x427   : > { %9123 = vmatmul.bf16.vlgmr.msrb.gmra.mxu2 %v20088_v7  ;;  %v14114_v6 = vld [vmem:[#allocation7 + $0xdb8] sm:$0xf] }
 0x428   : > { %9167 = vmatpush.bf16.msra.mxu2 %v14043_v20  ;;  %9136 = vmatmul.bf16.vlgmr.msrb.gmra.mxu3 %v20090_v14  ;;  %v12530_v20 = vld [vmem:[#allocation7 + $0x158] sm:$0xf]  ;;  %v8904_v11 = vadd.f32 %v8903_v40, %v8891_v61  ;;  %v18559_v61 = vld [vmem:[#allocation7 + $0x166c] sm:$0xf0]  ;;  %v15770_v40 = vld [vmem:[#allocation7 + $0x1aa8] sm:$0xf] }
 0x429   : > { %9180 = vmatpush.bf16.msra.mxu3 %v14619_v51  ;;  %v13106_v51 = vld [vmem:[#allocation7 + $0x5d8] sm:$0xf]  ;;  %v12531_v12 = vor.u32 %v17893_v57, %v12530_v20  ;;  %v18163_v20 = vld [vmem:[#allocation7 + $0xa0c] sm:$0xf0] }
 0x42a   : > { %9143 = vmatpush.bf16.msra.mxu0 %v12747_v4  ;;  %9156 = vmatpush.bf16.msra.mxu1 %v13323_v29  ;;  %v13754_v4 = vld [vmem:[#allocation7 + $0xae8] sm:$0xf]  ;;  %v18343_v29 = vld [vmem:[#allocation7 + $0xfac] sm:$0xf0]  ;;  %v13107_v34 = vor.u32 %v18037_v19, %v13106_v51 }
 0x42b   : > { %v13755_v5 = vor.u32 %v18199_v23, %v13754_v4  ;;  %v14331_v36 = vor.u32 %v18343_v29, %v14330_v27  ;;  %v14186_v19 = vld [vmem:[#allocation7 + $0xe48] sm:$0xf]  ;;  %v15195_v23 = vor.u32 %v18559_v61, %v15194_v62  ;;  %v15771_v29 = vor.u32 %v18703_v16, %v15770_v40  ;;  %v18667_v40 = vld [vmem:[#allocation7 + $0x19cc] sm:$0xf0]  ;;  %v16274_v16 = vld [vmem:[#allocation7 + $0x1e98] sm:$0xf] }
 0x42c   : > { %9168 = vmatpush.bf16.msra.mxu2 %v13971_v26  ;;  %v17875_v26 = vld [vmem:[#allocation7 + $0x10c] sm:$0xf0]  ;;  %v8905_v32 = vpop.f32.mrf.mxu1  ;;  %v15626_v61 = vld [vmem:[#allocation7 + $0x1988] sm:$0xf] }
 0x42d   : > { %9181 = vmatpush.bf16.msra.mxu3 %v14547_v28  ;;  %v18019_v28 = vld [vmem:[#allocation7 + $0x58c] sm:$0xf0] }
 0x42e   : > { %9144 = vmatpush.bf16.msra.mxu0 %v12675_v39  ;;  %9157 = vmatpush.bf16.msra.mxu1 %v13251_v47  ;;  %v13682_v39 = vld [vmem:[#allocation7 + $0xa58] sm:$0xf]  ;;  %v12459_v47 = vor.u32 %v17875_v26, %v12458_v24  ;;  %v13035_v52 = vor.u32 %v18019_v28, %v13034_v33  ;;  %v18541_v24 = vld [vmem:[#allocation7 + $0x15dc] sm:$0xf0]  ;;  %v18847_v32 = vld [vmem:[#allocation7 + $0x1f6c] sm:$0xf0] }
 0x42f   : > { %v13683_v60 = vor.u32 %v18181_v44, %v13682_v39  ;;  %v15698_v26 = vld [vmem:[#allocation7 + $0x1a18] sm:$0xf]  ;;  %v18145_v28 = vld [vmem:[#allocation7 + $0x97c] sm:$0xf0]  ;;  %v16346_v44 = vld [vmem:[#allocation7 + $0x1f28] sm:$0xf] }
 0x430   : > { %9169 = vmatpush.bf16.msra.mxu2 %v13899_v43  ;;  %v12386_v43 = vld [vmem:[#allocation7 + $0x38] sm:$0xf]  ;;  %v18289_v39 = vld [vmem:[#allocation7 + $0xdfc] sm:$0xf0]  ;;  %v16347_v62 = vor.u32 %v18847_v32, %v16346_v44  ;;  %v15482_v44 = vld [vmem:[#allocation7 + $0x1868] sm:$0xf] }
 0x431   : > { %9182 = vmatpush.bf16.msra.mxu3 %v14475_v56  ;;  %v18001_v56 = vld [vmem:[#allocation7 + $0x4fc] sm:$0xf0]  ;;  %v12387_v51 = vor.u32 %v17857_v59, %v12386_v43  ;;  %v15050_v59 = vld [vmem:[#allocation7 + $0x1508] sm:$0xf]  ;;  %v18631_v32 = vld [vmem:[#allocation7 + $0x18ac] sm:$0xf0] }
 0x432   : > { %9145 = vmatpush.bf16.msra.mxu0 %v12603_v13  ;;  %9158 = vmatpush.bf16.msra.mxu1 %v13179_v17  ;;  %v8916_v13 = vpop.f32.mrf.mxu2  ;;  %v13610_v17 = vld [vmem:[#allocation7 + $0x9c8] sm:$0xf]  ;;  %v12963_v4 = vor.u32 %v18001_v56, %v12962_v55  ;;  %v18523_v55 = vld [vmem:[#allocation7 + $0x154c] sm:$0xf0] }
 0x433   : > { %v8917_v57 = vadd.f32 %v8916_v13, %v8904_v11  ;;  %v13538_v11 = vld [vmem:[#allocation7 + $0x938] sm:$0xf] }
 0x434   : > { %9170 = vmatpush.bf16.msra.mxu2 %v13827_v18  ;;  %v8929_v18 = vpop.f32.mrf.mxu3 }
 0x435   : > { %9183 = vmatpush.bf16.msra.mxu3 %v14403_v21  ;;  %v18307_v21 = vld [vmem:[#allocation7 + $0xe8c] sm:$0xf0]  ;;  %v20263_v27 = vadd.f32 %v8929_v18, %v8917_v57  ;;  %v16850_v57 = vld [vmem:[#allocation7 + $0x2318] sm:$0xf]  ;;  %v18973_v18 = vld [vmem:[#allocation7 + $0x235c] sm:$0xf0] }
 0x436   : > { %9146 = vmatpush.bf16.msra.mxu0 %v12531_v12  ;;  %9159 = vmatpush.bf16.msra.mxu1 %v13107_v34  ;;  %v15122_v12 = vld [vmem:[#allocation7 + $0x1598] sm:$0xf]  ;;  %v13611_v34 = vor.u32 %v18163_v20, %v13610_v17  ;;  %v14187_v33 = vor.u32 %v18307_v21, %v14186_v19  ;;  %v18829_v17 = vld [vmem:[#allocation7 + $0x1edc] sm:$0xf0]  ;;  %v15051_v20 = vor.u32 %v18523_v55, %v15050_v59 }
 0x437   : > { %v14978_v19 = vld [vmem:[#allocation7 + $0x1478] sm:$0xf]  ;;  %v18505_v21 = vld [vmem:[#allocation7 + $0x14bc] sm:$0xf0] }
 0x438   : > { %9171 = vmatpush.bf16.msra.mxu2 %v13755_v5  ;;  %v18685_v5 = vld [vmem:[#allocation7 + $0x1a5c] sm:$0xf0]  ;;  %v16706_v55 = vld [vmem:[#allocation7 + $0x21f8] sm:$0xf] }
 0x439   : > { %9184 = vmatpush.bf16.msra.mxu3 %v14331_v36  ;;  %v9562_v36 = vpack.c.bf16 %v20263_v27, %v20235_v9  ;;  %v15699_v43 = vor.u32 %v18685_v5, %v15698_v26  ;;  %v14979_v26 = vor.u32 %v18505_v21, %v14978_v19  ;;  %v16778_v5 = vld [vmem:[#allocation7 + $0x2288] sm:$0xf]  ;;  %v18919_v19 = vld [vmem:[#allocation7 + $0x21ac] sm:$0xf0] }
 0x43a   : > { %9147 = vmatpush.bf16.msra.mxu0 %v12459_v47  ;;  %9160 = vmatpush.bf16.msra.mxu1 %v13035_v52  ;;  %v15123_v47 = vor.u32 %v18541_v24, %v15122_v12  ;;  %v13539_v52 = vor.u32 %v18145_v28, %v13538_v11  ;;  %v8918_v56 = vpop.f32.mrf.mxu2  ;;  %v18649_v12 = vld [vmem:[#allocation7 + $0x193c] sm:$0xf0]  ;;  %v18811_v24 = vld [vmem:[#allocation7 + $0x1e4c] sm:$0xf0]  ;;  %v14906_v28 = vld [vmem:[#allocation7 + $0x13e8] sm:$0xf] }
 0x43b   : > { %v18937_v56 = vld [vmem:[#allocation7 + $0x223c] sm:$0xf0] }
 0x43c   : > { %9172 = vmatpush.bf16.msra.mxu2 %v13683_v60  ;;  %v14115_v60 = vor.u32 %v18289_v39, %v14114_v6  ;;  %v8931_v13 = vpop.f32.mrf.mxu3  ;;  %v18487_v6 = vld [vmem:[#allocation7 + $0x142c] sm:$0xf0] }
 0x43d   : > { %9185 = vmatpush.bf16.msra.mxu3 %v14259_v50  ;;  %v16923_v50 = vor.u32 %v18991_v48, %v16922_v22  ;;  %v16130_v48 = vld [vmem:[#allocation7 + $0x1d78] sm:$0xf]  ;;  %v14907_v59 = vor.u32 %v18487_v6, %v14906_v28 }
 0x43e   : > { %9148 = vmatpush.bf16.msra.mxu0 %v12387_v51  ;;  %9161 = vmatpush.bf16.msra.mxu1 %v12963_v4  ;;  %v15627_v51 = vor.u32 %v18667_v40, %v15626_v61  ;;  %v16275_v4 = vor.u32 %v18829_v17, %v16274_v16  ;;  %v14834_v61 = vld [vmem:[#allocation7 + $0x1358] sm:$0xf]  ;;  %v18469_v40 = vld [vmem:[#allocation7 + $0x139c] sm:$0xf0]  ;;  %v16707_v17 = vor.u32 %v18937_v56, %v16706_v55  ;;  %v18118_v55 = vld [vmem:[#allocation7 + $0x8ac] sm:$0xf] }
 0x43f   : > { %v18613_v16 = vld [vmem:[#allocation7 + $0x181c] sm:$0xf0]  ;;  %v16562_v6 = vld [vmem:[#allocation7 + $0x20d8] sm:$0xf] }
 0x440   : > { %9173 = vmatpush.bf16.msra.mxu2 %v13611_v34  ;;  %v16202_v34 = vld [vmem:[#allocation7 + $0x1e08] sm:$0xf] }
 0x441   : > { %9186 = vmatpush.bf16.msra.mxu3 %v14187_v33  ;;  %9149 = vmatmul.bf16.vlgmr.msra.gmra.mxu0 %v20064_v41  ;;  %v18955_v33 = vld [vmem:[#allocation7 + $0x22cc] sm:$0xf0]  ;;  %v16203_v39 = vor.u32 %v18811_v24, %v16202_v34 }
 0x442   : > { %9193 = vmatpush.bf16.msrb.mxu0 %v15195_v23  ;;  %9206 = vmatpush.bf16.msrb.mxu1 %v15771_v29  ;;  %v15554_v23 = vld [vmem:[#allocation7 + $0x18f8] sm:$0xf]  ;;  %v16851_v29 = vor.u32 %v18973_v18, %v16850_v57  ;;  %v16779_v22 = vor.u32 %v18955_v33, %v16778_v5  ;;  %v18775_v57 = vld [vmem:[#allocation7 + $0x1d2c] sm:$0xf0]  ;;  %v14835_v18 = vor.u32 %v18469_v40, %v14834_v61  ;;  %v18757_v33 = vld [vmem:[#allocation7 + $0x1c9c] sm:$0xf0] }
 0x443   : > { %9162 = vmatmul.bf16.vlgmr.msra.gmra.mxu1 %v20066_v45  ;;  %v15555_v11 = vor.u32 %v18649_v12, %v15554_v23  ;;  %v18451_v23 = vld [vmem:[#allocation7 + $0x130c] sm:$0xf0]  ;;  %v15986_v5 = vld [vmem:[#allocation7 + $0x1c58] sm:$0xf]  ;;  %v13468_v61 = vld [vmem:[#allocation7 + $0x8f0] sm:$0xf0] }
 0x444   : > { %9174 = vmatpush.bf16.msra.mxu2 %v13539_v52  ;;  %v8955_v52 = vpop.f32.mrf.mxu1  ;;  %v18595_v34 = vld [vmem:[#allocation7 + $0x178c] sm:$0xf0]  ;;  %v15914_v40 = vld [vmem:[#allocation7 + $0x1bc8] sm:$0xf] }
 0x445   : > { %9187 = vmatpush.bf16.msra.mxu3 %v14115_v60 }
 0x446   : > { %9194 = vmatpush.bf16.msrb.mxu0 %v15123_v47  ;;  %9207 = vmatpush.bf16.msrb.mxu1 %v15699_v43  ;;  %v8942_v47 = vpop.f32.mrf.mxu0  ;;  %v18793_v43 = vld [vmem:[#allocation7 + $0x1dbc] sm:$0xf0] }
 0x447   : > { %9175 = vmatmul.bf16.vlgmr.msra.gmra.mxu2 %v20072_v2  ;;  %v8956_v60 = vadd.f32 %v8955_v52, %v8942_v47  ;;  %v16131_v13 = vor.u32 %v18793_v43, %v16130_v48  ;;  %v18433_v47 = vld [vmem:[#allocation7 + $0x127c] sm:$0xf0]  ;;  %v15987_v43 = vor.u32 %v18757_v33, %v15986_v5  ;;  %v17974_v52 = vld [vmem:[#allocation7 + $0x42c] sm:$0xf]  ;;  %v16418_v5 = vld [vmem:[#allocation7 + $0x1fb8] sm:$0xf] }
 0x448   : > { %9219 = vmatpush.bf16.msrb.mxu2 %v16347_v62  ;;  %9188 = vmatmul.bf16.vlgmr.msra.gmra.mxu3 %v20074_v8  ;;  %v15483_v62 = vor.u32 %v18631_v32, %v15482_v44  ;;  %v14690_v44 = vld [vmem:[#allocation7 + $0x1238] sm:$0xf]  ;;  %v18577_v48 = vld [vmem:[#allocation7 + $0x16fc] sm:$0xf0] }
 0x449   : > { %9232 = vmatpush.bf16.msrb.mxu3 %v16923_v50  ;;  %v15410_v50 = vld [vmem:[#allocation7 + $0x17d8] sm:$0xf]  ;;  %v18865_v33 = vld [vmem:[#allocation7 + $0x1ffc] sm:$0xf0] }
 0x44a   : > { %9195 = vmatpush.bf16.msrb.mxu0 %v15051_v20  ;;  %9208 = vmatpush.bf16.msrb.mxu1 %v15627_v51  ;;  %v16058_v20 = vld [vmem:[#allocation7 + $0x1ce8] sm:$0xf]  ;;  %v15411_v21 = vor.u32 %v18613_v16, %v15410_v50  ;;  %v8968_v56 = vpop.f32.mrf.mxu2 }
 0x44b   : > { %v16634_v51 = vld [vmem:[#allocation7 + $0x2168] sm:$0xf]  ;;  %v16059_v12 = vor.u32 %v18775_v57, %v16058_v20  ;;  %v8969_v50 = vadd.f32 %v8968_v56, %v8956_v60  ;;  %v8981_v16 = vpop.f32.mrf.mxu3  ;;  %v18883_v57 = vld [vmem:[#allocation7 + $0x208c] sm:$0xf0]  ;;  %v15842_v60 = vld [vmem:[#allocation7 + $0x1b38] sm:$0xf] }
 0x44c   : > { %9220 = vmatpush.bf16.msrb.mxu2 %v16275_v4  ;;  %v14762_v4 = vld [vmem:[#allocation7 + $0x12c8] sm:$0xf]  ;;  %v13324_v56 = vld [vmem:[#allocation7 + $0x7d0] sm:$0xf0] }
 0x44d   : > { %9233 = vmatpush.bf16.msrb.mxu3 %v16851_v29  ;;  %v15338_v29 = vld [vmem:[#allocation7 + $0x1748] sm:$0xf]  ;;  %v14763_v28 = vor.u32 %v18451_v23, %v14762_v4  ;;  %v13471_v4 = vor.u32 %v18118_v55, %v13468_v61  ;;  %v18082_v55 = vld [vmem:[#allocation7 + $0x78c] sm:$0xf] }
 0x44e   : > { %9196 = vmatpush.bf16.msrb.mxu0 %v14979_v26  ;;  %9209 = vmatpush.bf16.msrb.mxu1 %v15555_v11  ;;  %v8944_v24 = vpop.f32.mrf.mxu0  ;;  %v16635_v26 = vor.u32 %v18919_v19, %v16634_v51  ;;  %v8957_v11 = vpop.f32.mrf.mxu1  ;;  %v15339_v32 = vor.u32 %v18595_v34, %v15338_v29  ;;  %v16490_v20 = vld [vmem:[#allocation7 + $0x2048] sm:$0xf]  ;;  %v17956_v19 = vld [vmem:[#allocation7 + $0x39c] sm:$0xf]  ;;  %v13396_v34 = vld [vmem:[#allocation7 + $0x860] sm:$0xf0] }
 0x44f   : > { %v18100_v29 = vld [vmem:[#allocation7 + $0x81c] sm:$0xf]  ;;  %v16491_v24 = vor.u32 %v18883_v57, %v16490_v20  ;;  %v18262_v11 = vld [vmem:[#allocation7 + $0xd2c] sm:$0xf]  ;;  %v13327_v20 = vor.u32 %v18082_v55, %v13324_v56 }
 0x450   : > { %9221 = vmatpush.bf16.msrb.mxu2 %v16203_v39  ;;  %v18901_v39 = vld [vmem:[#allocation7 + $0x211c] sm:$0xf0]  ;;  %v17920_v57 = vld [vmem:[#allocation7 + $0x27c] sm:$0xf] }
 0x451   : > { %9234 = vmatpush.bf16.msrb.mxu3 %v16779_v22  ;;  %v15266_v22 = vld [vmem:[#allocation7 + $0x16b8] sm:$0xf]  ;;  %v17884_v56 = vld [vmem:[#allocation7 + $0x15c] sm:$0xf] }
 0x452   : > { %9197 = vmatpush.bf16.msrb.mxu0 %v14907_v59  ;;  %9210 = vmatpush.bf16.msrb.mxu1 %v15483_v62  ;;  %v12892_v59 = vld [vmem:[#allocation7 + $0x470] sm:$0xf0]  ;;  %v16563_v62 = vor.u32 %v18901_v39, %v16562_v6  ;;  %v18406_v39 = vld [vmem:[#allocation7 + $0x11ac] sm:$0xf] }
 0x453   : > { %v12895_v51 = vor.u32 %v17974_v52, %v12892_v59  ;;  %v16419_v52 = vor.u32 %v18865_v33, %v16418_v5  ;;  %v17902_v5 = vld [vmem:[#allocation7 + $0x1ec] sm:$0xf]  ;;  %v12604_v33 = vld [vmem:[#allocation7 + $0x230] sm:$0xf0] }
 0x454   : > { %9222 = vmatpush.bf16.msrb.mxu2 %v16131_v13  ;;  %v18739_v13 = vld [vmem:[#allocation7 + $0x1c0c] sm:$0xf0] }
 0x455   : > { %9235 = vmatpush.bf16.msrb.mxu3 %v16707_v17  ;;  %v14691_v17 = vor.u32 %v18433_v47, %v14690_v44  ;;  %v15915_v23 = vor.u32 %v18739_v13, %v15914_v40  ;;  %v14620_v44 = vld [vmem:[#allocation7 + $0x11f0] sm:$0xf0]  ;;  %v18244_v40 = vld [vmem:[#allocation7 + $0xc9c] sm:$0xf]  ;;  %v13972_v13 = vld [vmem:[#allocation7 + $0xce0] sm:$0xf0] }
 0x456   : > { %9198 = vmatpush.bf16.msrb.mxu0 %v14835_v18  ;;  %9211 = vmatpush.bf16.msrb.mxu1 %v15411_v21  ;;  %v15267_v18 = vor.u32 %v18577_v48, %v15266_v22  ;;  %v20271_v21 = vadd.f32 %v8981_v16, %v8969_v50  ;;  %v17938_v22 = vld [vmem:[#allocation7 + $0x30c] sm:$0xf]  ;;  %v12748_v48 = vld [vmem:[#allocation7 + $0x350] sm:$0xf0]  ;;  %v14623_v61 = vor.u32 %v18406_v39, %v14620_v44  ;;  %v18388_v16 = vld [vmem:[#allocation7 + $0x111c] sm:$0xf] }
 0x457   : > { %v12751_v50 = vor.u32 %v17938_v22, %v12748_v48 }
 0x458   : > { %9223 = vmatpush.bf16.msrb.mxu2 %v16059_v12  ;;  %v12820_v12 = vld [vmem:[#allocation7 + $0x3e0] sm:$0xf0] }
 0x459   : > { %9236 = vmatpush.bf16.msrb.mxu3 %v16635_v26  ;;  %v18721_v26 = vld [vmem:[#allocation7 + $0x1b7c] sm:$0xf0]  ;;  %v12823_v6 = vor.u32 %v17956_v19, %v12820_v12  ;;  %v18064_v19 = vld [vmem:[#allocation7 + $0x6fc] sm:$0xf]  ;;  %v18226_v12 = vld [vmem:[#allocation7 + $0xc0c] sm:$0xf] }
 0x45a   : > { %9199 = vmatpush.bf16.msrb.mxu0 %v14763_v28  ;;  %9212 = vmatpush.bf16.msrb.mxu1 %v15339_v32  ;;  %v14044_v28 = vld [vmem:[#allocation7 + $0xd70] sm:$0xf0]  ;;  %v13399_v32 = vor.u32 %v18100_v29, %v13396_v34  ;;  %v15843_v47 = vor.u32 %v18721_v26, %v15842_v60 }
 0x45b   : > { %v14047_v59 = vor.u32 %v18262_v11, %v14044_v28  ;;  %v13900_v29 = vld [vmem:[#allocation7 + $0xc50] sm:$0xf0]  ;;  %v18046_v28 = vld [vmem:[#allocation7 + $0x66c] sm:$0xf] }
 0x45c   : > { %9224 = vmatpush.bf16.msrb.mxu2 %v15987_v43  ;;  %v8970_v43 = vpop.f32.mrf.mxu2  ;;  %v14476_v60 = vld [vmem:[#allocation7 + $0x10d0] sm:$0xf0]  ;;  %v13903_v11 = vor.u32 %v18226_v12, %v13900_v29  ;;  %v18010_v12 = vld [vmem:[#allocation7 + $0x54c] sm:$0xf] }
 0x45d   : > { %9237 = vmatpush.bf16.msrb.mxu3 %v16563_v62  ;;  %v8983_v62 = vpop.f32.mrf.mxu3  ;;  %v12607_v43 = vor.u32 %v17902_v5, %v12604_v33  ;;  %v13036_v29 = vld [vmem:[#allocation7 + $0x590] sm:$0xf0] }
 0x45e   : > { %9200 = vmatpush.bf16.msrb.mxu0 %v14691_v17  ;;  %9213 = vmatpush.bf16.msrb.mxu1 %v15267_v18  ;;  %v14548_v17 = vld [vmem:[#allocation7 + $0x1160] sm:$0xf0]  ;;  %v8994_v39 = vpop.f32.mrf.mxu0 }
 0x45f   : > { %v12676_v18 = vld [vmem:[#allocation7 + $0x2c0] sm:$0xf0]  ;;  %v8995_v22 = vadd.f32 %v8994_v39, %v20271_v21  ;;  %v13039_v39 = vor.u32 %v18010_v12, %v13036_v29  ;;  %v18676_v12 = vld [vmem:[#allocation7 + $0x1a1c] sm:$0xf] }
 0x460   : > { %9225 = vmatpush.bf16.msrb.mxu2 %v15915_v23  ;;  %v14551_v23 = vor.u32 %v18388_v16, %v14548_v17  ;;  %v12679_v34 = vor.u32 %v17920_v57, %v12676_v18  ;;  %v9007_v48 = vpop.f32.mrf.mxu1  ;;  %v12532_v62 = vld [vmem:[#allocation7 + $0x1a0] sm:$0xf0]  ;;  %v18190_v17 = vld [vmem:[#allocation7 + $0xaec] sm:$0xf]  ;;  %v14332_v18 = vld [vmem:[#allocation7 + $0xfb0] sm:$0xf0] }
 0x461   : > { %9238 = vmatpush.bf16.msrb.mxu3 %v16491_v24  ;;  %9201 = vmatmul.bf16.vlgmr.msrb.gmra.mxu0 %v20080_v38  ;;  %v18370_v24 = vld [vmem:[#allocation7 + $0x108c] sm:$0xf]  ;;  %v12535_v21 = vor.u32 %v17884_v56, %v12532_v62  ;;  %v15772_v56 = vld [vmem:[#allocation7 + $0x1af0] sm:$0xf0]  ;;  %v15700_v29 = vld [vmem:[#allocation7 + $0x1a60] sm:$0xf0] }
 0x462   : > { %9245 = vmatpush.bf16.msra.mxu0 %v12895_v51  ;;  %9258 = vmatpush.bf16.msra.mxu1 %v13471_v4  ;;  %v13975_v51 = vor.u32 %v18244_v40, %v13972_v13  ;;  %v13252_v4 = vld [vmem:[#allocation7 + $0x740] sm:$0xf0]  ;;  %v14479_v44 = vor.u32 %v18370_v24, %v14476_v60  ;;  %v18028_v13 = vld [vmem:[#allocation7 + $0x5dc] sm:$0xf]  ;;  %v18334_v57 = vld [vmem:[#allocation7 + $0xf6c] sm:$0xf] }
 0x463   : > { %9214 = vmatmul.bf16.vlgmr.msrb.gmra.mxu1 %v20082_v46  ;;  %v13255_v26 = vor.u32 %v18064_v19, %v13252_v4  ;;  %v17866_v19 = vld [vmem:[#allocation7 + $0xcc] sm:$0xf]  ;;  %v12460_v4 = vld [vmem:[#allocation7 + $0x110] sm:$0xf0]  ;;  %v14335_v24 = vor.u32 %v18334_v57, %v14332_v18  ;;  %v18172_v60 = vld [vmem:[#allocation7 + $0xa5c] sm:$0xf] }
 0x464   : > { %9226 = vmatpush.bf16.msrb.mxu2 %v15843_v47  ;;  %v13828_v47 = vld [vmem:[#allocation7 + $0xbc0] sm:$0xf0]  ;;  %v12463_v33 = vor.u32 %v17866_v19, %v12460_v4  ;;  %v18154_v62 = vld [vmem:[#allocation7 + $0x9cc] sm:$0xf]  ;;  %v18532_v18 = vld [vmem:[#allocation7 + $0x159c] sm:$0xf] }
 0x465   : > { %9239 = vmatpush.bf16.msrb.mxu3 %v16419_v52  ;;  %v18352_v52 = vld [vmem:[#allocation7 + $0xffc] sm:$0xf] }
 0x466   : > { %9246 = vmatpush.bf16.msra.mxu0 %v12823_v6  ;;  %9259 = vmatpush.bf16.msra.mxu1 %v13399_v32  ;;  %v13180_v6 = vld [vmem:[#allocation7 + $0x6b0] sm:$0xf0]  ;;  %v18208_v32 = vld [vmem:[#allocation7 + $0xb7c] sm:$0xf] }
 0x467   : > { %9227 = vmatmul.bf16.vlgmr.msrb.gmra.mxu2 %v20088_v7  ;;  %v13183_v55 = vor.u32 %v18046_v28, %v13180_v6  ;;  %v13831_v40 = vor.u32 %v18208_v32, %v13828_v47  ;;  %v14260_v28 = vld [vmem:[#allocation7 + $0xf20] sm:$0xf0]  ;;  %v17848_v6 = vld [vmem:[#allocation7 + $0x3c] sm:$0xf] }
 0x468   : > { %9271 = vmatpush.bf16.msra.mxu2 %v14047_v59  ;;  %9240 = vmatmul.bf16.vlgmr.msrb.gmra.mxu3 %v20090_v14  ;;  %v14404_v59 = vld [vmem:[#allocation7 + $0x1040] sm:$0xf0]  ;;  %v9009_v5 = vpop.f32.mrf.mxu1  ;;  %v17992_v32 = vld [vmem:[#allocation7 + $0x4bc] sm:$0xf] }
 0x469   : > { %9284 = vmatpush.bf16.msra.mxu3 %v14623_v61  ;;  %v9008_v61 = vadd.f32 %v9007_v48, %v8995_v22  ;;  %v14407_v16 = vor.u32 %v18352_v52, %v14404_v59  ;;  %v12964_v47 = vld [vmem:[#allocation7 + $0x500] sm:$0xf0]  ;;  %v18550_v48 = vld [vmem:[#allocation7 + $0x162c] sm:$0xf] }
 0x46a   : > { %9247 = vmatpush.bf16.msra.mxu0 %v12751_v50  ;;  %9260 = vmatpush.bf16.msra.mxu1 %v13327_v20  ;;  %v13108_v50 = vld [vmem:[#allocation7 + $0x620] sm:$0xf0]  ;;  %v13756_v20 = vld [vmem:[#allocation7 + $0xb30] sm:$0xf0]  ;;  %v18694_v52 = vld [vmem:[#allocation7 + $0x1aac] sm:$0xf]  ;;  %v9020_v59 = vpop.f32.mrf.mxu2 }
 0x46b   : > { %v15775_v19 = vor.u32 %v18694_v52, %v15772_v56  ;;  %v18838_v5 = vld [vmem:[#allocation7 + $0x1f2c] sm:$0xf] }
 0x46c   : > { %9272 = vmatpush.bf16.msra.mxu2 %v13975_v51  ;;  %v13111_v51 = vor.u32 %v18028_v13, %v13108_v50  ;;  %v9021_v13 = vadd.f32 %v9020_v59, %v9008_v61  ;;  %v9033_v50 = vpop.f32.mrf.mxu3  ;;  %v18136_v61 = vld [vmem:[#allocation7 + $0x93c] sm:$0xf]  ;;  %v18658_v52 = vld [vmem:[#allocation7 + $0x198c] sm:$0xf]  ;;  %v15628_v59 = vld [vmem:[#allocation7 + $0x19d0] sm:$0xf0] }
 0x46d   : > { %9285 = vmatpush.bf16.msra.mxu3 %v14551_v23  ;;  %v13759_v23 = vor.u32 %v18190_v17, %v13756_v20  ;;  %v18298_v17 = vld [vmem:[#allocation7 + $0xe4c] sm:$0xf]  ;;  %v14188_v20 = vld [vmem:[#allocation7 + $0xe90] sm:$0xf0] }
 0x46e   : > { %9248 = vmatpush.bf16.msra.mxu0 %v12679_v34  ;;  %9261 = vmatpush.bf16.msra.mxu1 %v13255_v26  ;;  %v8996_v34 = vpop.f32.mrf.mxu0  ;;  %v13684_v26 = vld [vmem:[#allocation7 + $0xaa0] sm:$0xf0] }
 0x46f   : > { %v13687_v22 = vor.u32 %v18172_v60, %v13684_v26  ;;  %v14191_v34 = vor.u32 %v18298_v17, %v14188_v20  ;;  %v18280_v60 = vld [vmem:[#allocation7 + $0xdbc] sm:$0xf]  ;;  %v14116_v26 = vld [vmem:[#allocation7 + $0xe00] sm:$0xf0]  ;;  %v15631_v17 = vor.u32 %v18658_v52, %v15628_v59 }
 0x470   : > { %9273 = vmatpush.bf16.msra.mxu2 %v13903_v11  ;;  %v18316_v11 = vld [vmem:[#allocation7 + $0xedc] sm:$0xf] }
 0x471   : > { %9286 = vmatpush.bf16.msra.mxu3 %v14479_v44  ;;  %v12388_v44 = vld [vmem:[#allocation7 + $0x80] sm:$0xf0]  ;;  %v18496_v20 = vld [vmem:[#allocation7 + $0x147c] sm:$0xf] }
 0x472   : > { %9249 = vmatpush.bf16.msra.mxu0 %v12607_v43  ;;  %9262 = vmatpush.bf16.msra.mxu1 %v13183_v55  ;;  %v15196_v43 = vld [vmem:[#allocation7 + $0x1670] sm:$0xf0]  ;;  %v14263_v55 = vor.u32 %v18316_v11, %v14260_v28  ;;  %v18982_v28 = vld [vmem:[#allocation7 + $0x23ac] sm:$0xf]  ;;  %v18460_v59 = vld [vmem:[#allocation7 + $0x135c] sm:$0xf] }
 0x473   : > { %v15199_v57 = vor.u32 %v18550_v48, %v15196_v43  ;;  %v14119_v48 = vor.u32 %v18280_v60, %v14116_v26  ;;  %v18478_v60 = vld [vmem:[#allocation7 + $0x13ec] sm:$0xf]  ;;  %v14908_v26 = vld [vmem:[#allocation7 + $0x1430] sm:$0xf0] }
 0x474   : > { %9274 = vmatpush.bf16.msra.mxu2 %v13831_v40  ;;  %v13612_v40 = vld [vmem:[#allocation7 + $0xa10] sm:$0xf0] }
 0x475   : > { %9287 = vmatpush.bf16.msra.mxu3 %v14407_v16  ;;  %v12391_v16 = vor.u32 %v17848_v6, %v12388_v44  ;;  %v13615_v4 = vor.u32 %v18154_v62, %v13612_v40  ;;  %v16924_v6 = vld [vmem:[#allocation7 + $0x23f0] sm:$0xf0]  ;;  %v18820_v62 = vld [vmem:[#allocation7 + $0x1e9c] sm:$0xf]  ;;  %v16276_v40 = vld [vmem:[#allocation7 + $0x1ee0] sm:$0xf0] }
 0x476   : > { %9250 = vmatpush.bf16.msra.mxu0 %v12535_v21  ;;  %9263 = vmatpush.bf16.msra.mxu1 %v13111_v51  ;;  %v12967_v21 = vor.u32 %v17992_v32, %v12964_v47  ;;  %v20278_v51 = vadd.f32 %v9033_v50, %v9021_v13  ;;  %v18514_v32 = vld [vmem:[#allocation7 + $0x150c] sm:$0xf]  ;;  %v15052_v47 = vld [vmem:[#allocation7 + $0x1550] sm:$0xf0]  ;;  %v16927_v56 = vor.u32 %v18982_v28, %v16924_v6  ;;  %v18964_v50 = vld [vmem:[#allocation7 + $0x231c] sm:$0xf] }
 0x477   : > { %v15055_v13 = vor.u32 %v18514_v32, %v15052_v47  ;;  %v14911_v47 = vor.u32 %v18478_v60, %v14908_v26 }
 0x478   : > { %9275 = vmatpush.bf16.msra.mxu2 %v13759_v23  ;;  %v15124_v23 = vld [vmem:[#allocation7 + $0x15e0] sm:$0xf0] }
 0x479   : > { %9288 = vmatpush.bf16.msra.mxu3 %v14335_v24  ;;  %v13540_v24 = vld [vmem:[#allocation7 + $0x980] sm:$0xf0]  ;;  %v15127_v11 = vor.u32 %v18532_v18, %v15124_v23  ;;  %v18640_v18 = vld [vmem:[#allocation7 + $0x18fc] sm:$0xf]  ;;  %v18802_v23 = vld [vmem:[#allocation7 + $0x1e0c] sm:$0xf] }
 0x47a   : > { %9251 = vmatpush.bf16.msra.mxu0 %v12463_v33  ;;  %9264 = vmatpush.bf16.msra.mxu1 %v13039_v39  ;;  %v16348_v33 = vld [vmem:[#allocation7 + $0x1f70] sm:$0xf0]  ;;  %v15703_v39 = vor.u32 %v18676_v12, %v15700_v29  ;;  %v13543_v44 = vor.u32 %v18136_v61, %v13540_v24 }
 0x47b   : > { %v16351_v43 = vor.u32 %v18838_v5, %v16348_v33  ;;  %v16204_v12 = vld [vmem:[#allocation7 + $0x1e50] sm:$0xf0]  ;;  %v18622_v33 = vld [vmem:[#allocation7 + $0x186c] sm:$0xf] }
 0x47c   : > { %9276 = vmatpush.bf16.msra.mxu2 %v13687_v22  ;;  %v9022_v22 = vpop.f32.mrf.mxu2  ;;  %v16780_v61 = vld [vmem:[#allocation7 + $0x22d0] sm:$0xf0]  ;;  %v16207_v5 = vor.u32 %v18802_v23, %v16204_v12  ;;  %v18586_v23 = vld [vmem:[#allocation7 + $0x174c] sm:$0xf] }
 0x47d   : > { %9289 = vmatpush.bf16.msra.mxu3 %v14263_v55  ;;  %v9035_v55 = vpop.f32.mrf.mxu3  ;;  %v18928_v22 = vld [vmem:[#allocation7 + $0x21fc] sm:$0xf]  ;;  %v15340_v12 = vld [vmem:[#allocation7 + $0x1790] sm:$0xf0] }
 0x47e   : > { %9252 = vmatpush.bf16.msra.mxu0 %v12391_v16  ;;  %9265 = vmatpush.bf16.msra.mxu1 %v12967_v21  ;;  %v16852_v16 = vld [vmem:[#allocation7 + $0x2360] sm:$0xf0]  ;;  %v9046_v28 = vpop.f32.mrf.mxu0 }
 0x47f   : > { %v14980_v21 = vld [vmem:[#allocation7 + $0x14c0] sm:$0xf0] }
 0x480   : > { %9277 = vmatpush.bf16.msra.mxu2 %v13615_v4  ;;  %v16855_v4 = vor.u32 %v18964_v50, %v16852_v16  ;;  %v14983_v29 = vor.u32 %v18496_v20, %v14980_v21  ;;  %v9059_v32 = vpop.f32.mrf.mxu1  ;;  %v14836_v55 = vld [vmem:[#allocation7 + $0x13a0] sm:$0xf0]  ;;  %v18766_v50 = vld [vmem:[#allocation7 + $0x1cec] sm:$0xf]  ;;  %v16060_v16 = vld [vmem:[#allocation7 + $0x1d30] sm:$0xf0] }
 0x481   : > { %9290 = vmatpush.bf16.msra.mxu3 %v14191_v34  ;;  %9253 = vmatmul.bf16.vlgmr.msra.gmra.mxu0 %v20064_v41  ;;  %v18946_v34 = vld [vmem:[#allocation7 + $0x228c] sm:$0xf]  ;;  %v16636_v21 = vld [vmem:[#allocation7 + $0x21b0] sm:$0xf0] }
 0x482   : > { %9297 = vmatpush.bf16.msrb.mxu0 %v15199_v57  ;;  %9310 = vmatpush.bf16.msrb.mxu1 %v15775_v19  ;;  %v16279_v57 = vor.u32 %v18820_v62, %v16276_v40  ;;  %v15556_v19 = vld [vmem:[#allocation7 + $0x1940] sm:$0xf0]  ;;  %v16783_v6 = vor.u32 %v18946_v34, %v16780_v61  ;;  %v18604_v62 = vld [vmem:[#allocation7 + $0x17dc] sm:$0xf]  ;;  %v18910_v20 = vld [vmem:[#allocation7 + $0x216c] sm:$0xf] }
 0x483   : > { %9266 = vmatmul.bf16.vlgmr.msra.gmra.mxu1 %v20066_v45  ;;  %v15559_v24 = vor.u32 %v18640_v18, %v15556_v19  ;;  %v15412_v40 = vld [vmem:[#allocation7 + $0x1820] sm:$0xf0]  ;;  %v18442_v18 = vld [vmem:[#allocation7 + $0x12cc] sm:$0xf]  ;;  %v14764_v19 = vld [vmem:[#allocation7 + $0x1310] sm:$0xf0]  ;;  %v16639_v34 = vor.u32 %v18910_v20, %v16636_v21 }
 0x484   : > { %9278 = vmatpush.bf16.msra.mxu2 %v13543_v44  ;;  %v16132_v44 = vld [vmem:[#allocation7 + $0x1dc0] sm:$0xf0]  ;;  %v18748_v61 = vld [vmem:[#allocation7 + $0x1c5c] sm:$0xf]  ;;  %v14767_v26 = vor.u32 %v18442_v18, %v14764_v19 }
 0x485   : > { %9291 = vmatpush.bf16.msra.mxu3 %v14119_v48  ;;  %v16708_v48 = vld [vmem:[#allocation7 + $0x2240] sm:$0xf0] }
 0x486   : > { %9298 = vmatpush.bf16.msrb.mxu0 %v15127_v11  ;;  %9311 = vmatpush.bf16.msrb.mxu1 %v15703_v39  ;;  %v15484_v11 = vld [vmem:[#allocation7 + $0x18b0] sm:$0xf0]  ;;  %v18784_v39 = vld [vmem:[#allocation7 + $0x1d7c] sm:$0xf] }
 0x487   : > { %9279 = vmatmul.bf16.vlgmr.msra.gmra.mxu2 %v20072_v2  ;;  %v15487_v52 = vor.u32 %v18622_v33, %v15484_v11  ;;  %v16564_v33 = vld [vmem:[#allocation7 + $0x2120] sm:$0xf0]  ;;  %v18424_v11 = vld [vmem:[#allocation7 + $0x123c] sm:$0xf] }
 0x488   : > { %9323 = vmatpush.bf16.msrb.mxu2 %v16351_v43  ;;  %9292 = vmatmul.bf16.vlgmr.msra.gmra.mxu3 %v20074_v8  ;;  %v9060_v43 = vadd.f32 %v9059_v32, %v9046_v28  ;;  %v9061_v60 = vpop.f32.mrf.mxu1  ;;  %v15343_v28 = vor.u32 %v18586_v23, %v15340_v12  ;;  %v17966_v23 = vld [vmem:[#allocation7 + $0x3e4] sm:$0xf0]  ;;  %v13402_v12 = vld [vmem:[#allocation7 + $0x820] sm:$0xf] }
 0x489   : > { %9336 = vmatpush.bf16.msrb.mxu3 %v16927_v56  ;;  %v16135_v56 = vor.u32 %v18784_v39, %v16132_v44  ;;  %v18568_v39 = vld [vmem:[#allocation7 + $0x16bc] sm:$0xf]  ;;  %v15268_v44 = vld [vmem:[#allocation7 + $0x1700] sm:$0xf0] }
 0x48a   : > { %9299 = vmatpush.bf16.msrb.mxu0 %v15055_v13  ;;  %9312 = vmatpush.bf16.msrb.mxu1 %v15631_v17  ;;  %v16711_v13 = vor.u32 %v18928_v22, %v16708_v48  ;;  %v14839_v17 = vor.u32 %v18460_v59, %v14836_v55  ;;  %v17984_v22 = vld [vmem:[#allocation7 + $0x474] sm:$0xf0]  ;;  %v13474_v48 = vld [vmem:[#allocation7 + $0x8b0] sm:$0xf]  ;;  %v15271_v20 = vor.u32 %v18568_v39, %v15268_v44  ;;  %v16420_v60 = vld [vmem:[#allocation7 + $0x2000] sm:$0xf0] }
 0x48b   : > { %v18128_v55 = vld [vmem:[#allocation7 + $0x8f4] sm:$0xf0]  ;;  %v12754_v44 = vld [vmem:[#allocation7 + $0x310] sm:$0xf] }
 0x48c   : > { %9324 = vmatpush.bf16.msrb.mxu2 %v16279_v57  ;;  %v15415_v57 = vor.u32 %v18604_v62, %v15412_v40  ;;  %v15916_v62 = vld [vmem:[#allocation7 + $0x1c10] sm:$0xf0]  ;;  %v13475_v19 = vor.u32 %v18128_v55, %v13474_v48 }
 0x48d   : > { %9337 = vmatpush.bf16.msrb.mxu3 %v16855_v4  ;;  %v16063_v4 = vor.u32 %v18766_v50, %v16060_v16  ;;  %v18874_v16 = vld [vmem:[#allocation7 + $0x204c] sm:$0xf] }
 0x48e   : > { %9300 = vmatpush.bf16.msrb.mxu0 %v14983_v29  ;;  %9313 = vmatpush.bf16.msrb.mxu1 %v15559_v24  ;;  %v9048_v29 = vpop.f32.mrf.mxu0  ;;  %v15988_v24 = vld [vmem:[#allocation7 + $0x1ca0] sm:$0xf0] }
 0x48f   : > { %v15991_v32 = vor.u32 %v18748_v61, %v15988_v24  ;;  %v18110_v29 = vld [vmem:[#allocation7 + $0x864] sm:$0xf0]  ;;  %v15844_v61 = vld [vmem:[#allocation7 + $0x1b80] sm:$0xf0]  ;;  %v18856_v24 = vld [vmem:[#allocation7 + $0x1fbc] sm:$0xf] }
 0x490   : > { %9325 = vmatpush.bf16.msrb.mxu2 %v16207_v5  ;;  %v18892_v5 = vld [vmem:[#allocation7 + $0x20dc] sm:$0xf] }
 0x491   : > { %9338 = vmatpush.bf16.msrb.mxu3 %v16783_v6  ;;  %v14692_v6 = vld [vmem:[#allocation7 + $0x1280] sm:$0xf0]  ;;  %v16567_v59 = vor.u32 %v18892_v5, %v16564_v33  ;;  %v18272_v5 = vld [vmem:[#allocation7 + $0xd74] sm:$0xf0] }
 0x492   : > { %9301 = vmatpush.bf16.msrb.mxu0 %v14911_v47  ;;  %9314 = vmatpush.bf16.msrb.mxu1 %v15487_v52  ;;  %v12898_v47 = vld [vmem:[#allocation7 + $0x430] sm:$0xf]  ;;  %v9072_v52 = vpop.f32.mrf.mxu2  ;;  %v14695_v50 = vor.u32 %v18424_v11, %v14692_v6  ;;  %v13403_v6 = vor.u32 %v18110_v29, %v13402_v12  ;;  %v18236_v29 = vld [vmem:[#allocation7 + $0xc54] sm:$0xf0] }
 0x493   : > { %v9073_v40 = vadd.f32 %v9072_v52, %v9060_v43  ;;  %v12899_v21 = vor.u32 %v17984_v22, %v12898_v47  ;;  %v18712_v43 = vld [vmem:[#allocation7 + $0x1b3c] sm:$0xf]  ;;  %v14626_v11 = vld [vmem:[#allocation7 + $0x11b0] sm:$0xf]  ;;  %v16423_v22 = vor.u32 %v18856_v24, %v16420_v60 }
 0x494   : > { %9326 = vmatpush.bf16.msrb.mxu2 %v16135_v56  ;;  %v18730_v56 = vld [vmem:[#allocation7 + $0x1bcc] sm:$0xf]  ;;  %v15847_v39 = vor.u32 %v18712_v43, %v15844_v61  ;;  %v13330_v52 = vld [vmem:[#allocation7 + $0x790] sm:$0xf]  ;;  %v18380_v61 = vld [vmem:[#allocation7 + $0x10d4] sm:$0xf0] }
 0x495   : > { %9339 = vmatpush.bf16.msrb.mxu3 %v16711_v13  ;;  %v9085_v13 = vpop.f32.mrf.mxu3  ;;  %v13906_v12 = vld [vmem:[#allocation7 + $0xc10] sm:$0xf] }
 0x496   : > { %9302 = vmatpush.bf16.msrb.mxu0 %v14839_v17  ;;  %9315 = vmatpush.bf16.msrb.mxu1 %v15415_v57  ;;  %v16492_v17 = vld [vmem:[#allocation7 + $0x2090] sm:$0xf0]  ;;  %v12826_v57 = vld [vmem:[#allocation7 + $0x3a0] sm:$0xf]  ;;  %v20284_v18 = vadd.f32 %v9085_v13, %v9073_v40  ;;  %v18254_v40 = vld [vmem:[#allocation7 + $0xce4] sm:$0xf0] }
 0x497   : > { %v12827_v33 = vor.u32 %v17966_v23, %v12826_v57  ;;  %v14482_v43 = vld [vmem:[#allocation7 + $0x1090] sm:$0xf] }
 0x498   : > { %9327 = vmatpush.bf16.msrb.mxu2 %v16063_v4  ;;  %v15919_v4 = vor.u32 %v18730_v56, %v15916_v62  ;;  %v13978_v62 = vld [vmem:[#allocation7 + $0xca0] sm:$0xf]  ;;  %v12610_v60 = vld [vmem:[#allocation7 + $0x1f0] sm:$0xf] }
 0x499   : > { %9340 = vmatpush.bf16.msrb.mxu3 %v16639_v34  ;;  %v16495_v34 = vor.u32 %v18874_v16, %v16492_v17  ;;  %v18398_v16 = vld [vmem:[#allocation7 + $0x1164] sm:$0xf0]  ;;  %v13979_v57 = vor.u32 %v18254_v40, %v13978_v62 }
 0x49a   : > { %9303 = vmatpush.bf16.msrb.mxu0 %v14767_v26  ;;  %9316 = vmatpush.bf16.msrb.mxu1 %v15343_v28  ;;  %v14050_v26 = vld [vmem:[#allocation7 + $0xd30] sm:$0xf]  ;;  %v18416_v28 = vld [vmem:[#allocation7 + $0x11f4] sm:$0xf0]  ;;  %v9074_v47 = vpop.f32.mrf.mxu2 }
 0x49b   : > { %v14051_v48 = vor.u32 %v18272_v5, %v14050_v26  ;;  %v14627_v56 = vor.u32 %v18416_v28, %v14626_v11  ;;  %v17912_v26 = vld [vmem:[#allocation7 + $0x234] sm:$0xf0]  ;;  %v13907_v5 = vor.u32 %v18236_v29, %v13906_v12  ;;  %v13042_v29 = vld [vmem:[#allocation7 + $0x550] sm:$0xf] }
 0x49c   : > { %9328 = vmatpush.bf16.msrb.mxu2 %v15991_v32  ;;  %v17948_v32 = vld [vmem:[#allocation7 + $0x354] sm:$0xf0] }
 0x49d   : > { %9341 = vmatpush.bf16.msrb.mxu3 %v16567_v59  ;;  %v18092_v59 = vld [vmem:[#allocation7 + $0x7d4] sm:$0xf0]  ;;  %v9087_v55 = vpop.f32.mrf.mxu3  ;;  %v12755_v13 = vor.u32 %v17948_v32, %v12754_v44  ;;  %v18218_v44 = vld [vmem:[#allocation7 + $0xbc4] sm:$0xf0] }
 0x49e   : > { %9304 = vmatpush.bf16.msrb.mxu0 %v14695_v50  ;;  %9317 = vmatpush.bf16.msrb.mxu1 %v15271_v20  ;;  %v14554_v50 = vld [vmem:[#allocation7 + $0x1120] sm:$0xf]  ;;  %v13331_v17 = vor.u32 %v18092_v59, %v13330_v52  ;;  %v18056_v11 = vld [vmem:[#allocation7 + $0x6b4] sm:$0xf0]  ;;  %v9098_v28 = vpop.f32.mrf.mxu0  ;;  %v18362_v52 = vld [vmem:[#allocation7 + $0x1044] sm:$0xf0] }
 0x49f   : > { %v12682_v20 = vld [vmem:[#allocation7 + $0x280] sm:$0xf]  ;;  %v14555_v23 = vor.u32 %v18398_v16, %v14554_v50  ;;  %v9099_v32 = vadd.f32 %v9098_v28, %v20284_v18  ;;  %v18038_v50 = vld [vmem:[#allocation7 + $0x624] sm:$0xf0] }
 0x4a0   : > { %9329 = vmatpush.bf16.msrb.mxu2 %v15919_v4  ;;  %v18074_v4 = vld [vmem:[#allocation7 + $0x744] sm:$0xf0]  ;;  %v9111_v47 = vpop.f32.mrf.mxu1  ;;  %v12538_v55 = vld [vmem:[#allocation7 + $0x160] sm:$0xf] }
 0x4a1   : > { %9342 = vmatpush.bf16.msrb.mxu3 %v16495_v34  ;;  %9305 = vmatmul.bf16.vlgmr.msrb.gmra.mxu0 %v20080_v38  ;;  %v9112_v62 = vadd.f32 %v9111_v47, %v9099_v32  ;;  %v12394_v28 = vld [vmem:[#allocation7 + $0x40] sm:$0xf]  ;;  %v18002_v32 = vld [vmem:[#allocation7 + $0x504] sm:$0xf0] }
 0x4a2   : > { %9349 = vmatpush.bf16.msra.mxu0 %v12899_v21  ;;  %9362 = vmatpush.bf16.msra.mxu1 %v13475_v19  ;;  %v17930_v21 = vld [vmem:[#allocation7 + $0x2c4] sm:$0xf0]  ;;  %v13258_v19 = vld [vmem:[#allocation7 + $0x700] sm:$0xf] }
 0x4a3   : > { %9318 = vmatmul.bf16.vlgmr.msrb.gmra.mxu1 %v20082_v46  ;;  %v12683_v34 = vor.u32 %v17930_v21, %v12682_v20  ;;  %v13259_v24 = vor.u32 %v18074_v4, %v13258_v19  ;;  %v18200_v20 = vld [vmem:[#allocation7 + $0xb34] sm:$0xf0]  ;;  %v14338_v21 = vld [vmem:[#allocation7 + $0xf70] sm:$0xf] }
 0x4a4   : > { %9330 = vmatpush.bf16.msrb.mxu2 %v15847_v39  ;;  %v13834_v39 = vld [vmem:[#allocation7 + $0xb80] sm:$0xf]  ;;  %v12466_v4 = vld [vmem:[#allocation7 + $0xd0] sm:$0xf] }
 0x4a5   : > { %9343 = vmatpush.bf16.msrb.mxu3 %v16423_v22  ;;  %v12611_v22 = vor.u32 %v17912_v26, %v12610_v60  ;;  %v13835_v40 = vor.u32 %v18218_v44, %v13834_v39  ;;  %v18182_v60 = vld [vmem:[#allocation7 + $0xaa4] sm:$0xf0]  ;;  %v12970_v44 = vld [vmem:[#allocation7 + $0x4c0] sm:$0xf] }
 0x4a6   : > { %9350 = vmatpush.bf16.msra.mxu0 %v12827_v33  ;;  %9363 = vmatpush.bf16.msra.mxu1 %v13403_v6  ;;  %v13186_v33 = vld [vmem:[#allocation7 + $0x670] sm:$0xf]  ;;  %v14483_v6 = vor.u32 %v18380_v61, %v14482_v43  ;;  %v9100_v43 = vpop.f32.mrf.mxu0  ;;  %v17858_v39 = vld [vmem:[#allocation7 + $0x84] sm:$0xf0] }
 0x4a7   : > { %9331 = vmatmul.bf16.vlgmr.msrb.gmra.mxu2 %v20088_v7  ;;  %v13187_v59 = vor.u32 %v18056_v11, %v13186_v33  ;;  %v14266_v33 = vld [vmem:[#allocation7 + $0xee0] sm:$0xf]  ;;  %v18326_v11 = vld [vmem:[#allocation7 + $0xf24] sm:$0xf0] }
 0x4a8   : > { %9375 = vmatpush.bf16.msra.mxu2 %v14051_v48  ;;  %9344 = vmatmul.bf16.vlgmr.msrb.gmra.mxu3 %v20090_v14  ;;  %v14410_v48 = vld [vmem:[#allocation7 + $0x1000] sm:$0xf]  ;;  %v9113_v26 = vpop.f32.mrf.mxu1  ;;  %v18686_v43 = vld [vmem:[#allocation7 + $0x1a64] sm:$0xf0] }
 0x4a9   : > { %9388 = vmatpush.bf16.msra.mxu3 %v14627_v56  ;;  %v17894_v56 = vld [vmem:[#allocation7 + $0x1a4] sm:$0xf0]  ;;  %v14411_v16 = vor.u32 %v18362_v52, %v14410_v48  ;;  %v18560_v48 = vld [vmem:[#allocation7 + $0x1674] sm:$0xf0]  ;;  %v15778_v52 = vld [vmem:[#allocation7 + $0x1ab0] sm:$0xf] }
 0x4aa   : > { %9351 = vmatpush.bf16.msra.mxu0 %v12755_v13  ;;  %9364 = vmatpush.bf16.msra.mxu1 %v13331_v17  ;;  %v13114_v13 = vld [vmem:[#allocation7 + $0x5e0] sm:$0xf]  ;;  %v13762_v17 = vld [vmem:[#allocation7 + $0xaf0] sm:$0xf]  ;;  %v12539_v18 = vor.u32 %v17894_v56, %v12538_v55  ;;  %v14267_v55 = vor.u32 %v18326_v11, %v14266_v33  ;;  %v18704_v56 = vld [vmem:[#allocation7 + $0x1af4] sm:$0xf0] }
 0x4ab   : > { %v13115_v19 = vor.u32 %v18038_v50, %v13114_v13  ;;  %v13763_v12 = vor.u32 %v18200_v20, %v13762_v17  ;;  %v18164_v13 = vld [vmem:[#allocation7 + $0xa14] sm:$0xf0]  ;;  %v12395_v17 = vor.u32 %v17858_v39, %v12394_v28  ;;  %v14194_v20 = vld [vmem:[#allocation7 + $0xe50] sm:$0xf]  ;;  %v18290_v26 = vld [vmem:[#allocation7 + $0xe04] sm:$0xf0] }
 0x4ac   : > { %9376 = vmatpush.bf16.msra.mxu2 %v13979_v57  ;;  %v18344_v57 = vld [vmem:[#allocation7 + $0xfb4] sm:$0xf0]  ;;  %v16930_v28 = vld [vmem:[#allocation7 + $0x23b0] sm:$0xf] }
 0x4ad   : > { %9389 = vmatpush.bf16.msra.mxu3 %v14555_v23  ;;  %v17876_v23 = vld [vmem:[#allocation7 + $0x114] sm:$0xf0]  ;;  %v14339_v61 = vor.u32 %v18344_v57, %v14338_v21  ;;  %v12971_v21 = vor.u32 %v18002_v32, %v12970_v44  ;;  %v15058_v32 = vld [vmem:[#allocation7 + $0x1510] sm:$0xf] }
 0x4ae   : > { %9352 = vmatpush.bf16.msra.mxu0 %v12683_v34  ;;  %9365 = vmatpush.bf16.msra.mxu1 %v13259_v24  ;;  %v18020_v34 = vld [vmem:[#allocation7 + $0x594] sm:$0xf0]  ;;  %v13690_v24 = vld [vmem:[#allocation7 + $0xa60] sm:$0xf] }
 0x4af   : > { %v13691_v47 = vor.u32 %v18182_v60, %v13690_v24  ;;  %v18146_v24 = vld [vmem:[#allocation7 + $0x984] sm:$0xf0]  ;;  %v14122_v60 = vld [vmem:[#allocation7 + $0xdc0] sm:$0xf]  ;;  %v18848_v33 = vld [vmem:[#allocation7 + $0x1f74] sm:$0xf0] }
 0x4b0   : > { %9377 = vmatpush.bf16.msra.mxu2 %v13907_v5  ;;  %v12467_v5 = vor.u32 %v17876_v23, %v12466_v4  ;;  %v15779_v23 = vor.u32 %v18704_v56, %v15778_v52 }
 0x4b1   : > { %9390 = vmatpush.bf16.msra.mxu3 %v14483_v6  ;;  %v13043_v6 = vor.u32 %v18020_v34, %v13042_v29  ;;  %v18542_v29 = vld [vmem:[#allocation7 + $0x15e4] sm:$0xf0]  ;;  %v15706_v34 = vld [vmem:[#allocation7 + $0x1a20] sm:$0xf] }
 0x4b2   : > { %9353 = vmatpush.bf16.msra.mxu0 %v12611_v22  ;;  %9366 = vmatpush.bf16.msra.mxu1 %v13187_v59  ;;  %v15202_v22 = vld [vmem:[#allocation7 + $0x1630] sm:$0xf]  ;;  %v9124_v59 = vpop.f32.mrf.mxu2  ;;  %v15707_v39 = vor.u32 %v18686_v43, %v15706_v34  ;;  %v18812_v43 = vld [vmem:[#allocation7 + $0x1e54] sm:$0xf0] }
 0x4b3   : > { %v9125_v50 = vadd.f32 %v9124_v59, %v9112_v62  ;;  %v15203_v57 = vor.u32 %v18560_v48, %v15202_v22  ;;  %v13546_v62 = vld [vmem:[#allocation7 + $0x940] sm:$0xf]  ;;  %v14123_v48 = vor.u32 %v18290_v26, %v14122_v60  ;;  %v15634_v59 = vld [vmem:[#allocation7 + $0x1990] sm:$0xf] }
 0x4b4   : > { %9378 = vmatpush.bf16.msra.mxu2 %v13835_v40  ;;  %v13618_v40 = vld [vmem:[#allocation7 + $0x9d0] sm:$0xf]  ;;  %v13547_v44 = vor.u32 %v18146_v24, %v13546_v62  ;;  %v18956_v24 = vld [vmem:[#allocation7 + $0x22d4] sm:$0xf0] }
 0x4b5   : > { %9391 = vmatpush.bf16.msra.mxu3 %v14411_v16  ;;  %v9137_v16 = vpop.f32.mrf.mxu3  ;;  %v16210_v34 = vld [vmem:[#allocation7 + $0x1e10] sm:$0xf] }
 0x4b6   : > { %9354 = vmatpush.bf16.msra.mxu0 %v12539_v18  ;;  %9367 = vmatpush.bf16.msra.mxu1 %v13115_v19  ;;  %v18308_v18 = vld [vmem:[#allocation7 + $0xe94] sm:$0xf0]  ;;  %v15130_v19 = vld [vmem:[#allocation7 + $0x15a0] sm:$0xf]  ;;  %v20291_v4 = vadd.f32 %v9137_v16, %v9125_v50  ;;  %v18830_v50 = vld [vmem:[#allocation7 + $0x1ee4] sm:$0xf0] }
 0x4b7   : > { %v15131_v11 = vor.u32 %v18542_v29, %v15130_v19  ;;  %v16786_v62 = vld [vmem:[#allocation7 + $0x2290] sm:$0xf] }
 0x4b8   : > { %9379 = vmatpush.bf16.msra.mxu2 %v13763_v12  ;;  %v13619_v12 = vor.u32 %v18164_v13, %v13618_v40  ;;  %v16282_v13 = vld [vmem:[#allocation7 + $0x1ea0] sm:$0xf]  ;;  %v14914_v26 = vld [vmem:[#allocation7 + $0x13f0] sm:$0xf] }
 0x4b9   : > { %9392 = vmatpush.bf16.msra.mxu3 %v14339_v61  ;;  %v14195_v61 = vor.u32 %v18308_v18, %v14194_v20  ;;  %v18974_v20 = vld [vmem:[#allocation7 + $0x2364] sm:$0xf0]  ;;  %v16283_v19 = vor.u32 %v18830_v50, %v16282_v13  ;;  %v15418_v50 = vld [vmem:[#allocation7 + $0x17e0] sm:$0xf] }
 0x4ba   : > { %9355 = vmatpush.bf16.msra.mxu0 %v12467_v5  ;;  %9368 = vmatpush.bf16.msra.mxu1 %v13043_v6  ;;  %v16354_v5 = vld [vmem:[#allocation7 + $0x1f30] sm:$0xf]  ;;  %v18992_v6 = vld [vmem:[#allocation7 + $0x23f4] sm:$0xf0]  ;;  %v9126_v22 = vpop.f32.mrf.mxu2 }
 0x4bb   : > { %v16355_v52 = vor.u32 %v18848_v33, %v16354_v5  ;;  %v16931_v40 = vor.u32 %v18992_v6, %v16930_v28  ;;  %v18488_v5 = vld [vmem:[#allocation7 + $0x1434] sm:$0xf0]  ;;  %v16211_v33 = vor.u32 %v18812_v43, %v16210_v34  ;;  %v15346_v43 = vld [vmem:[#allocation7 + $0x1750] sm:$0xf] }
 0x4bc   : > { %9380 = vmatpush.bf16.msra.mxu2 %v13691_v47  ;;  %v18524_v47 = vld [vmem:[#allocation7 + $0x1554] sm:$0xf0]  ;;  %v14915_v22 = vor.u32 %v18488_v5, %v14914_v26  ;;  %v18758_v26 = vld [vmem:[#allocation7 + $0x1ca4] sm:$0xf0] }
 0x4bd   : > { %9393 = vmatpush.bf16.msra.mxu3 %v14267_v55  ;;  %v18668_v55 = vld [vmem:[#allocation7 + $0x19d4] sm:$0xf0]  ;;  %v9139_v56 = vpop.f32.mrf.mxu3  ;;  %v15059_v16 = vor.u32 %v18524_v47, %v15058_v32  ;;  %v18794_v32 = vld [vmem:[#allocation7 + $0x1dc4] sm:$0xf0] }
 0x4be   : > { %9356 = vmatpush.bf16.msra.mxu0 %v12395_v17  ;;  %9369 = vmatpush.bf16.msra.mxu1 %v12971_v21  ;;  %v16858_v17 = vld [vmem:[#allocation7 + $0x2320] sm:$0xf]  ;;  %v15635_v18 = vor.u32 %v18668_v55, %v15634_v59  ;;  %v18632_v28 = vld [vmem:[#allocation7 + $0x18b4] sm:$0xf0]  ;;  %v9150_v6 = vpop.f32.mrf.mxu0 }
 0x4bf   : > { %v14986_v21 = vld [vmem:[#allocation7 + $0x1480] sm:$0xf]  ;;  %v16859_v29 = vor.u32 %v18974_v20, %v16858_v17  ;;  %v16066_v20 = vld [vmem:[#allocation7 + $0x1cf0] sm:$0xf] }
 0x4c0   : > { %9381 = vmatpush.bf16.msra.mxu2 %v13619_v12  ;;  %v18650_v12 = vld [vmem:[#allocation7 + $0x1944] sm:$0xf0]  ;;  %v9163_v47 = vpop.f32.mrf.mxu1  ;;  %v14842_v56 = vld [vmem:[#allocation7 + $0x1360] sm:$0xf] }
 0x4c1   : > { %9394 = vmatpush.bf16.msra.mxu3 %v14195_v61  ;;  %9357 = vmatmul.bf16.vlgmr.msra.gmra.mxu0 %v20064_v41  ;;  %v9164_v59 = vadd.f32 %v9163_v47, %v9150_v6  ;;  %v14698_v6 = vld [vmem:[#allocation7 + $0x1240] sm:$0xf]  ;;  %v18578_v47 = vld [vmem:[#allocation7 + $0x1704] sm:$0xf0] }
 0x4c2   : > { %9401 = vmatpush.bf16.msrb.mxu0 %v15203_v57  ;;  %9414 = vmatpush.bf16.msrb.mxu1 %v15779_v23  ;;  %v18506_v57 = vld [vmem:[#allocation7 + $0x14c4] sm:$0xf0]  ;;  %v15562_v23 = vld [vmem:[#allocation7 + $0x1900] sm:$0xf] }
 0x4c3   : > { %9370 = vmatmul.bf16.vlgmr.msra.gmra.mxu1 %v20066_v45  ;;  %v14987_v61 = vor.u32 %v18506_v57, %v14986_v21  ;;  %v15563_v60 = vor.u32 %v18650_v12, %v15562_v23  ;;  %v16642_v57 = vld [vmem:[#allocation7 + $0x2170] sm:$0xf] }
 0x4c4   : > { %9382 = vmatpush.bf16.msra.mxu2 %v13547_v44  ;;  %v16138_v44 = vld [vmem:[#allocation7 + $0x1d80] sm:$0xf]  ;;  %v14770_v12 = vld [vmem:[#allocation7 + $0x12d0] sm:$0xf] }
 0x4c5   : > { %9395 = vmatpush.bf16.msra.mxu3 %v14123_v48  ;;  %v16714_v48 = vld [vmem:[#allocation7 + $0x2200] sm:$0xf]  ;;  %v16139_v13 = vor.u32 %v18794_v32, %v16138_v44  ;;  %v18434_v44 = vld [vmem:[#allocation7 + $0x1284] sm:$0xf0] }
 0x4c6   : > { %9402 = vmatpush.bf16.msrb.mxu0 %v15131_v11  ;;  %9415 = vmatpush.bf16.msrb.mxu1 %v15707_v39  ;;  %v15490_v11 = vld [vmem:[#allocation7 + $0x1870] sm:$0xf]  ;;  %v16787_v39 = vor.u32 %v18956_v24, %v16786_v62  ;;  %v9152_v62 = vpop.f32.mrf.mxu0  ;;  %v15274_v32 = vld [vmem:[#allocation7 + $0x16c0] sm:$0xf] }
 0x4c7   : > { %9383 = vmatmul.bf16.vlgmr.msra.gmra.mxu2 %v20072_v2  ;;  %v15491_v55 = vor.u32 %v18632_v28, %v15490_v11  ;;  %v16570_v11 = vld [vmem:[#allocation7 + $0x20e0] sm:$0xf]  ;;  %v18902_v28 = vld [vmem:[#allocation7 + $0x2124] sm:$0xf0]  ;;  %v18101_v62 = vld [vmem:[#allocation7 + $0x824] sm:$0xf] }
 0x4c8   : > { %9427 = vmatpush.bf16.msrb.mxu2 %v16355_v52  ;;  %9396 = vmatmul.bf16.vlgmr.msra.gmra.mxu3 %v20074_v8  ;;  %v18938_v52 = vld [vmem:[#allocation7 + $0x2244] sm:$0xf0]  ;;  %v9165_v5 = vpop.f32.mrf.mxu1 }
 0x4c9   : > { %9440 = vmatpush.bf16.msrb.mxu3 %v16931_v40  ;;  %v18470_v40 = vld [vmem:[#allocation7 + $0x13a4] sm:$0xf0]  ;;  %v16715_v17 = vor.u32 %v18938_v52, %v16714_v48  ;;  %v17975_v48 = vld [vmem:[#allocation7 + $0x434] sm:$0xf]  ;;  %v12900_v52 = vld [vmem:[#allocation7 + $0x478] sm:$0xf0] }
 0x4ca   : > { %9403 = vmatpush.bf16.msrb.mxu0 %v15059_v16  ;;  %9416 = vmatpush.bf16.msrb.mxu1 %v15635_v18  ;;  %v18614_v16 = vld [vmem:[#allocation7 + $0x1824] sm:$0xf0]  ;;  %v18776_v18 = vld [vmem:[#allocation7 + $0x1d34] sm:$0xf0]  ;;  %v14843_v21 = vor.u32 %v18470_v40, %v14842_v56  ;;  %v9176_v56 = vpop.f32.mrf.mxu2  ;;  %v16571_v40 = vor.u32 %v18902_v28, %v16570_v11  ;;  %v16426_v5 = vld [vmem:[#allocation7 + $0x1fc0] sm:$0xf] }
 0x4cb   : > { %v15419_v23 = vor.u32 %v18614_v16, %v15418_v50  ;;  %v16067_v34 = vor.u32 %v18776_v18, %v16066_v20  ;;  %v15922_v50 = vld [vmem:[#allocation7 + $0x1bd0] sm:$0xf]  ;;  %v18740_v16 = vld [vmem:[#allocation7 + $0x1c14] sm:$0xf0]  ;;  %v9189_v20 = vpop.f32.mrf.mxu3  ;;  %v14699_v18 = vor.u32 %v18434_v44, %v14698_v6  ;;  %v18263_v11 = vld [vmem:[#allocation7 + $0xd34] sm:$0xf] }
 0x4cc   : > { %9428 = vmatpush.bf16.msrb.mxu2 %v16283_v19  ;;  %v18920_v19 = vld [vmem:[#allocation7 + $0x21b4] sm:$0xf0]  ;;  %v14052_v28 = vld [vmem:[#allocation7 + $0xd78] sm:$0xf0] }
 0x4cd   : > { %9441 = vmatpush.bf16.msrb.mxu3 %v16859_v29  ;;  %v18452_v29 = vld [vmem:[#allocation7 + $0x1314] sm:$0xf0]  ;;  %v16643_v24 = vor.u32 %v18920_v19, %v16642_v57  ;;  %v15275_v19 = vor.u32 %v18578_v47, %v15274_v32  ;;  %v14628_v44 = vld [vmem:[#allocation7 + $0x11f8] sm:$0xf0] }
 0x4ce   : > { %9404 = vmatpush.bf16.msrb.mxu0 %v14987_v61  ;;  %9417 = vmatpush.bf16.msrb.mxu1 %v15563_v60  ;;  %v18596_v61 = vld [vmem:[#allocation7 + $0x1794] sm:$0xf0]  ;;  %v15994_v60 = vld [vmem:[#allocation7 + $0x1c60] sm:$0xf] }
 0x4cf   : > { %v18884_v57 = vld [vmem:[#allocation7 + $0x2094] sm:$0xf0] }
 0x4d0   : > { %9429 = vmatpush.bf16.msrb.mxu2 %v16211_v33  ;;  %v14771_v33 = vor.u32 %v18452_v29, %v14770_v12  ;;  %v17957_v12 = vld [vmem:[#allocation7 + $0x3a4] sm:$0xf] }
 0x4d1   : > { %9442 = vmatpush.bf16.msrb.mxu3 %v16787_v39  ;;  %v15347_v39 = vor.u32 %v18596_v61, %v15346_v43  ;;  %v15923_v43 = vor.u32 %v18740_v16, %v15922_v50  ;;  %v12828_v61 = vld [vmem:[#allocation7 + $0x3e8] sm:$0xf0] }
 0x4d2   : > { %9405 = vmatpush.bf16.msrb.mxu0 %v14915_v22  ;;  %9418 = vmatpush.bf16.msrb.mxu1 %v15491_v55  ;;  %v15995_v22 = vor.u32 %v18758_v26, %v15994_v60  ;;  %v18119_v55 = vld [vmem:[#allocation7 + $0x8b4] sm:$0xf]  ;;  %v18722_v26 = vld [vmem:[#allocation7 + $0x1b84] sm:$0xf0]  ;;  %v12831_v6 = vor.u32 %v17957_v12, %v12828_v61  ;;  %v12684_v12 = vld [vmem:[#allocation7 + $0x2c8] sm:$0xf0] }
 0x4d3   : > { %v9191_v50 = vpop.f32.mrf.mxu3  ;;  %v13260_v61 = vld [vmem:[#allocation7 + $0x748] sm:$0xf0] }
 0x4d4   : > { %9430 = vmatpush.bf16.msrb.mxu2 %v16139_v13  ;;  %v13476_v13 = vld [vmem:[#allocation7 + $0x8f8] sm:$0xf0] }
 0x4d5   : > { %9443 = vmatpush.bf16.msrb.mxu3 %v16715_v17  ;;  %v9177_v17 = vadd.f32 %v9176_v56, %v9164_v59  ;;  %v15850_v59 = vld [vmem:[#allocation7 + $0x1b40] sm:$0xf]  ;;  %v14055_v56 = vor.u32 %v18263_v11, %v14052_v28  ;;  %v17903_v11 = vld [vmem:[#allocation7 + $0x1f4] sm:$0xf]  ;;  %v12612_v28 = vld [vmem:[#allocation7 + $0x238] sm:$0xf0] }
 0x4d6   : > { %9406 = vmatpush.bf16.msrb.mxu0 %v14843_v21  ;;  %9419 = vmatpush.bf16.msrb.mxu1 %v15419_v23  ;;  %v16498_v21 = vld [vmem:[#allocation7 + $0x2050] sm:$0xf]  ;;  %v12903_v23 = vor.u32 %v17975_v48, %v12900_v52  ;;  %v15851_v47 = vor.u32 %v18722_v26, %v15850_v59  ;;  %v12756_v48 = vld [vmem:[#allocation7 + $0x358] sm:$0xf0]  ;;  %v9178_v52 = vpop.f32.mrf.mxu2  ;;  %v18371_v26 = vld [vmem:[#allocation7 + $0x1094] sm:$0xf] }
 0x4d7   : > { %v20297_v29 = vadd.f32 %v9189_v20, %v9177_v17  ;;  %v16499_v60 = vor.u32 %v18884_v57, %v16498_v21  ;;  %v18245_v17 = vld [vmem:[#allocation7 + $0xca4] sm:$0xf]  ;;  %v13980_v20 = vld [vmem:[#allocation7 + $0xce8] sm:$0xf0] }
 0x4d8   : > { %9431 = vmatpush.bf16.msrb.mxu2 %v16067_v34  ;;  %v13479_v34 = vor.u32 %v18119_v55, %v13476_v13  ;;  %v13332_v13 = vld [vmem:[#allocation7 + $0x7d8] sm:$0xf0]  ;;  %v18389_v21 = vld [vmem:[#allocation7 + $0x1124] sm:$0xf]  ;;  %v14556_v57 = vld [vmem:[#allocation7 + $0x1168] sm:$0xf0] }
 0x4d9   : > { %9444 = vmatpush.bf16.msrb.mxu3 %v16643_v24  ;;  %v13404_v24 = vld [vmem:[#allocation7 + $0x868] sm:$0xf0] }
 0x4da   : > { %9407 = vmatpush.bf16.msrb.mxu0 %v14771_v33  ;;  %9420 = vmatpush.bf16.msrb.mxu1 %v15347_v39  ;;  %v18866_v33 = vld [vmem:[#allocation7 + $0x2004] sm:$0xf0]  ;;  %v18407_v39 = vld [vmem:[#allocation7 + $0x11b4] sm:$0xf]  ;;  %v13407_v32 = vor.u32 %v18101_v62, %v13404_v24  ;;  %v14559_v62 = vor.u32 %v18389_v21, %v14556_v57  ;;  %v18029_v21 = vld [vmem:[#allocation7 + $0x5e4] sm:$0xf] }
 0x4db   : > { %v16427_v55 = vor.u32 %v18866_v33, %v16426_v5  ;;  %v14631_v16 = vor.u32 %v18407_v39, %v14628_v44  ;;  %v18227_v24 = vld [vmem:[#allocation7 + $0xc14] sm:$0xf]  ;;  %v14484_v5 = vld [vmem:[#allocation7 + $0x10d8] sm:$0xf0]  ;;  %v13116_v57 = vld [vmem:[#allocation7 + $0x628] sm:$0xf0] }
 0x4dc   : > { %9432 = vmatpush.bf16.msrb.mxu2 %v15995_v22  ;;  %v17939_v22 = vld [vmem:[#allocation7 + $0x314] sm:$0xf]  ;;  %v13188_v44 = vld [vmem:[#allocation7 + $0x6b8] sm:$0xf0] }
 0x4dd   : > { %9445 = vmatpush.bf16.msrb.mxu3 %v16571_v40  ;;  %v18083_v40 = vld [vmem:[#allocation7 + $0x794] sm:$0xf] }
 0x4de   : > { %9408 = vmatpush.bf16.msrb.mxu0 %v14699_v18  ;;  %9421 = vmatpush.bf16.msrb.mxu1 %v15275_v19  ;;  %v12759_v18 = vor.u32 %v17939_v22, %v12756_v48  ;;  %v13335_v19 = vor.u32 %v18083_v40, %v13332_v13  ;;  %v18047_v39 = vld [vmem:[#allocation7 + $0x674] sm:$0xf]  ;;  %v18209_v22 = vld [vmem:[#allocation7 + $0xb84] sm:$0xf]  ;;  %v13836_v48 = vld [vmem:[#allocation7 + $0xbc8] sm:$0xf0] }
 0x4df   : > { %v18353_v40 = vld [vmem:[#allocation7 + $0x1004] sm:$0xf]  ;;  %v14412_v13 = vld [vmem:[#allocation7 + $0x1048] sm:$0xf0]  ;;  %v13191_v50 = vor.u32 %v18047_v39, %v13188_v44 }
 0x4e0   : > { %9433 = vmatpush.bf16.msrb.mxu2 %v15923_v43  ;;  %v18065_v43 = vld [vmem:[#allocation7 + $0x704] sm:$0xf] }
 0x4e1   : > { %9446 = vmatpush.bf16.msrb.mxu3 %v16499_v60  ;;  %9409 = vmatmul.bf16.vlgmr.msrb.gmra.mxu0 %v20080_v38  ;;  %v13908_v60 = vld [vmem:[#allocation7 + $0xc58] sm:$0xf0]  ;;  %v13263_v33 = vor.u32 %v18065_v43, %v13260_v61  ;;  %v13119_v61 = vor.u32 %v18029_v21, %v13116_v57  ;;  %v18317_v44 = vld [vmem:[#allocation7 + $0xee4] sm:$0xf]  ;;  %v18155_v21 = vld [vmem:[#allocation7 + $0x9d4] sm:$0xf] }
 0x4e2   : > { %9453 = vmatpush.bf16.msra.mxu0 %v12903_v23  ;;  %9466 = vmatpush.bf16.msra.mxu1 %v13479_v34  ;;  %v17921_v23 = vld [vmem:[#allocation7 + $0x284] sm:$0xf]  ;;  %v13983_v34 = vor.u32 %v18245_v17, %v13980_v20  ;;  %v12540_v17 = vld [vmem:[#allocation7 + $0x1a8] sm:$0xf0]  ;;  %v14340_v43 = vld [vmem:[#allocation7 + $0xfb8] sm:$0xf0] }
 0x4e3   : > { %9422 = vmatmul.bf16.vlgmr.msrb.gmra.mxu1 %v20082_v46  ;;  %v12687_v59 = vor.u32 %v17921_v23, %v12684_v12  ;;  %v18191_v23 = vld [vmem:[#allocation7 + $0xaf4] sm:$0xf]  ;;  %v13764_v12 = vld [vmem:[#allocation7 + $0xb38] sm:$0xf0] }
 0x4e4   : > { %9434 = vmatpush.bf16.msrb.mxu2 %v15851_v47  ;;  %v14487_v47 = vor.u32 %v18371_v26, %v14484_v5  ;;  %v13044_v26 = vld [vmem:[#allocation7 + $0x598] sm:$0xf0] }
 0x4e5   : > { %9447 = vmatpush.bf16.msrb.mxu3 %v16427_v55  ;;  %v9215_v55 = vpop.f32.mrf.mxu1  ;;  %v13620_v57 = vld [vmem:[#allocation7 + $0xa18] sm:$0xf0] }
 0x4e6   : > { %9454 = vmatpush.bf16.msra.mxu0 %v12831_v6  ;;  %9467 = vmatpush.bf16.msra.mxu1 %v13407_v32  ;;  %v13911_v6 = vor.u32 %v18227_v24, %v13908_v60  ;;  %v9202_v32 = vpop.f32.mrf.mxu0  ;;  %v12468_v24 = vld [vmem:[#allocation7 + $0x118] sm:$0xf0]  ;;  %v13767_v60 = vor.u32 %v18191_v23, %v13764_v12 }
 0x4e7   : > { %9435 = vmatmul.bf16.vlgmr.msrb.gmra.mxu2 %v20088_v7  ;;  %v9203_v52 = vadd.f32 %v9202_v32, %v20297_v29  ;;  %v14268_v32 = vld [vmem:[#allocation7 + $0xf28] sm:$0xf0] }
 0x4e8   : > { %9479 = vmatpush.bf16.msra.mxu2 %v14055_v56  ;;  %9448 = vmatmul.bf16.vlgmr.msrb.gmra.mxu3 %v20090_v14  ;;  %v12615_v56 = vor.u32 %v17903_v11, %v12612_v28  ;;  %v18173_v11 = vld [vmem:[#allocation7 + $0xa64] sm:$0xf]  ;;  %v13692_v28 = vld [vmem:[#allocation7 + $0xaa8] sm:$0xf0] }
 0x4e9   : > { %9492 = vmatpush.bf16.msra.mxu3 %v14631_v16  ;;  %v17885_v16 = vld [vmem:[#allocation7 + $0x164] sm:$0xf]  ;;  %v9216_v20 = vadd.f32 %v9215_v55, %v9203_v52  ;;  %v12972_v55 = vld [vmem:[#allocation7 + $0x508] sm:$0xf0] }
 0x4ea   : > { %9455 = vmatpush.bf16.msra.mxu0 %v12759_v18  ;;  %9468 = vmatpush.bf16.msra.mxu1 %v13335_v19  ;;  %v13839_v18 = vor.u32 %v18209_v22, %v13836_v48  ;;  %v14415_v19 = vor.u32 %v18353_v40, %v14412_v13  ;;  %v12543_v29 = vor.u32 %v17885_v16, %v12540_v17  ;;  %v12396_v48 = vld [vmem:[#allocation7 + $0x88] sm:$0xf0]  ;;  %v17993_v52 = vld [vmem:[#allocation7 + $0x4c4] sm:$0xf]  ;;  %v18551_v40 = vld [vmem:[#allocation7 + $0x1634] sm:$0xf]  ;;  %v9228_v16 = vpop.f32.mrf.mxu2 }
 0x4eb   : > { %v15204_v13 = vld [vmem:[#allocation7 + $0x1678] sm:$0xf0]  ;;  %v14271_v17 = vor.u32 %v18317_v44, %v14268_v32  ;;  %v9241_v23 = vpop.f32.mrf.mxu3  ;;  %v14124_v44 = vld [vmem:[#allocation7 + $0xe08] sm:$0xf0]  ;;  %v18839_v32 = vld [vmem:[#allocation7 + $0x1f34] sm:$0xf] }
 0x4ec   : > { %9480 = vmatpush.bf16.msra.mxu2 %v13983_v34  ;;  %v18335_v34 = vld [vmem:[#allocation7 + $0xf74] sm:$0xf] }
 0x4ed   : > { %9493 = vmatpush.bf16.msra.mxu3 %v14559_v62  ;;  %v17867_v62 = vld [vmem:[#allocation7 + $0xd4] sm:$0xf] }
 0x4ee   : > { %9456 = vmatpush.bf16.msra.mxu0 %v12687_v59  ;;  %9469 = vmatpush.bf16.msra.mxu1 %v13263_v33  ;;  %v18011_v59 = vld [vmem:[#allocation7 + $0x554] sm:$0xf]  ;;  %v9204_v5 = vpop.f32.mrf.mxu0  ;;  %v14343_v33 = vor.u32 %v18335_v34, %v14340_v43  ;;  %v12471_v39 = vor.u32 %v17867_v62, %v12468_v24  ;;  %v14196_v34 = vld [vmem:[#allocation7 + $0xe98] sm:$0xf0]  ;;  %v12975_v43 = vor.u32 %v17993_v52, %v12972_v55  ;;  %v18533_v62 = vld [vmem:[#allocation7 + $0x15a4] sm:$0xf] }
 0x4ef   : > { %v13047_v22 = vor.u32 %v18011_v59, %v13044_v26  ;;  %v13623_v59 = vor.u32 %v18155_v21, %v13620_v57  ;;  %v15132_v26 = vld [vmem:[#allocation7 + $0x15e8] sm:$0xf0]  ;;  %v18677_v5 = vld [vmem:[#allocation7 + $0x1a24] sm:$0xf]  ;;  %v16932_v52 = vld [vmem:[#allocation7 + $0x23f8] sm:$0xf0] }
 0x4f0   : > { %9481 = vmatpush.bf16.msra.mxu2 %v13911_v6  ;;  %v9217_v6 = vpop.f32.mrf.mxu1  ;;  %v15636_v21 = vld [vmem:[#allocation7 + $0x19d8] sm:$0xf0] }
 0x4f1   : > { %9494 = vmatpush.bf16.msra.mxu3 %v14487_v47  ;;  %v17849_v47 = vld [vmem:[#allocation7 + $0x44] sm:$0xf] }
 0x4f2   : > { %9457 = vmatpush.bf16.msra.mxu0 %v12615_v56  ;;  %9470 = vmatpush.bf16.msra.mxu1 %v13191_v50  ;;  %v13695_v56 = vor.u32 %v18173_v11, %v13692_v28  ;;  %v18695_v50 = vld [vmem:[#allocation7 + $0x1ab4] sm:$0xf]  ;;  %v12399_v12 = vor.u32 %v17849_v47, %v12396_v48  ;;  %v13548_v28 = vld [vmem:[#allocation7 + $0x988] sm:$0xf0]  ;;  %v18281_v6 = vld [vmem:[#allocation7 + $0xdc4] sm:$0xf] }
 0x4f3   : > { %v16356_v47 = vld [vmem:[#allocation7 + $0x1f78] sm:$0xf0]  ;;  %v18983_v48 = vld [vmem:[#allocation7 + $0x23b4] sm:$0xf]  ;;  %v9243_v57 = vpop.f32.mrf.mxu3 }
 0x4f4   : > { %9482 = vmatpush.bf16.msra.mxu2 %v13839_v18  ;;  %v15780_v18 = vld [vmem:[#allocation7 + $0x1af8] sm:$0xf0] }
 0x4f5   : > { %9495 = vmatpush.bf16.msra.mxu3 %v14415_v19  ;;  %v9229_v19 = vadd.f32 %v9228_v16, %v9216_v20  ;;  %v18137_v20 = vld [vmem:[#allocation7 + $0x944] sm:$0xf]  ;;  %v14127_v16 = vor.u32 %v18281_v6, %v14124_v44  ;;  %v18947_v6 = vld [vmem:[#allocation7 + $0x2294] sm:$0xf]  ;;  %v16788_v44 = vld [vmem:[#allocation7 + $0x22d8] sm:$0xf0] }
 0x4f6   : > { %9458 = vmatpush.bf16.msra.mxu0 %v12543_v29  ;;  %9471 = vmatpush.bf16.msra.mxu1 %v13119_v61  ;;  %v18299_v29 = vld [vmem:[#allocation7 + $0xe54] sm:$0xf]  ;;  %v15207_v61 = vor.u32 %v18551_v40, %v15204_v13  ;;  %v15060_v13 = vld [vmem:[#allocation7 + $0x1558] sm:$0xf0] }
 0x4f7   : > { %v20304_v24 = vadd.f32 %v9241_v23, %v9229_v19  ;;  %v14199_v11 = vor.u32 %v18299_v29, %v14196_v34  ;;  %v18515_v40 = vld [vmem:[#allocation7 + $0x1514] sm:$0xf]  ;;  %v16935_v19 = vor.u32 %v18983_v48, %v16932_v52  ;;  %v18821_v23 = vld [vmem:[#allocation7 + $0x1ea4] sm:$0xf] }
 0x4f8   : > { %9483 = vmatpush.bf16.msra.mxu2 %v13767_v60  ;;  %v15783_v60 = vor.u32 %v18695_v50, %v15780_v18  ;;  %v9230_v50 = vpop.f32.mrf.mxu2  ;;  %v18659_v18 = vld [vmem:[#allocation7 + $0x1994] sm:$0xf]  ;;  %v15063_v29 = vor.u32 %v18515_v40, %v15060_v13  ;;  %v18965_v34 = vld [vmem:[#allocation7 + $0x2324] sm:$0xf]  ;;  %v16791_v40 = vor.u32 %v18947_v6, %v16788_v44  ;;  %v15348_v44 = vld [vmem:[#allocation7 + $0x1798] sm:$0xf0] }
 0x4f9   : > { %9496 = vmatpush.bf16.msra.mxu3 %v14343_v33  ;;  %v15708_v33 = vld [vmem:[#allocation7 + $0x1a68] sm:$0xf0]  ;;  %v18623_v52 = vld [vmem:[#allocation7 + $0x1874] sm:$0xf]  ;;  %v18785_v13 = vld [vmem:[#allocation7 + $0x1d84] sm:$0xf] }
 0x4fa   : > { %9459 = vmatpush.bf16.msra.mxu0 %v12471_v39  ;;  %9472 = vmatpush.bf16.msra.mxu1 %v13047_v22  ;;  %v9563_v39 = vpack.c.bf16 %v20304_v24, %v20278_v51  ;;  %v15135_v22 = vor.u32 %v18533_v62, %v15132_v26  ;;  %v15711_v55 = vor.u32 %v18677_v5, %v15708_v33  ;;  %v18497_v62 = vld [vmem:[#allocation7 + $0x1484] sm:$0xf]  ;;  %v15564_v5 = vld [vmem:[#allocation7 + $0x1948] sm:$0xf0]  ;;  %v18587_v6 = vld [vmem:[#allocation7 + $0x1754] sm:$0xf] }
 0x4fb   : > { %v18641_v26 = vld [vmem:[#allocation7 + $0x1904] sm:$0xf]  ;;  %v16140_v50 = vld [vmem:[#allocation7 + $0x1dc8] sm:$0xf0] }
 0x4fc   : > { %9484 = vmatpush.bf16.msra.mxu2 %v13695_v56  ;;  %v13551_v56 = vor.u32 %v18137_v20, %v13548_v28  ;;  %v16212_v20 = vld [vmem:[#allocation7 + $0x1e58] sm:$0xf0] }
 0x4fd   : > { %9497 = vmatpush.bf16.msra.mxu3 %v14271_v17  ;;  %v16359_v17 = vor.u32 %v18839_v32, %v16356_v47  ;;  %v15567_v32 = vor.u32 %v18641_v26, %v15564_v5  ;;  %v18479_v47 = vld [vmem:[#allocation7 + $0x13f4] sm:$0xf]  ;;  %v16644_v5 = vld [vmem:[#allocation7 + $0x21b8] sm:$0xf0] }
 0x4fe   : > { %9460 = vmatpush.bf16.msra.mxu0 %v12399_v12  ;;  %9473 = vmatpush.bf16.msra.mxu1 %v12975_v43  ;;  %v16284_v12 = vld [vmem:[#allocation7 + $0x1ee8] sm:$0xf0]  ;;  %v18911_v26 = vld [vmem:[#allocation7 + $0x2174] sm:$0xf] }
 0x4ff   : > { %v16860_v43 = vld [vmem:[#allocation7 + $0x2368] sm:$0xf0] }
 0x500   : > { %9485 = vmatpush.bf16.msra.mxu2 %v13623_v59  ;;  %v16287_v59 = vor.u32 %v18821_v23, %v16284_v12  ;;  %v16863_v33 = vor.u32 %v18965_v34, %v16860_v43  ;;  %v18461_v23 = vld [vmem:[#allocation7 + $0x1364] sm:$0xf]  ;;  %v14844_v12 = vld [vmem:[#allocation7 + $0x13a8] sm:$0xf0] }
 0x501   : > { %9498 = vmatpush.bf16.msra.mxu3 %v14199_v11  ;;  %9461 = vmatmul.bf16.vlgmr.msra.gmra.mxu0 %v20064_v41  ;;  %v18803_v11 = vld [vmem:[#allocation7 + $0x1e14] sm:$0xf]  ;;  %v18605_v34 = vld [vmem:[#allocation7 + $0x17e4] sm:$0xf]  ;;  %v15420_v43 = vld [vmem:[#allocation7 + $0x1828] sm:$0xf0] }
 0x502   : > { %9505 = vmatpush.bf16.msrb.mxu0 %v15207_v61  ;;  %9518 = vmatpush.bf16.msrb.mxu1 %v15783_v60  ;;  %v15639_v61 = vor.u32 %v18659_v18, %v15636_v21  ;;  %v14988_v60 = vld [vmem:[#allocation7 + $0x14c8] sm:$0xf0]  ;;  %v16215_v48 = vor.u32 %v18803_v11, %v16212_v20  ;;  %v18929_v18 = vld [vmem:[#allocation7 + $0x2204] sm:$0xf]  ;;  %v18443_v11 = vld [vmem:[#allocation7 + $0x12d4] sm:$0xf] }
 0x503   : > { %9474 = vmatmul.bf16.vlgmr.msra.gmra.mxu1 %v20066_v45  ;;  %v14991_v28 = vor.u32 %v18497_v62, %v14988_v60  ;;  %v16716_v21 = vld [vmem:[#allocation7 + $0x2248] sm:$0xf0]  ;;  %v18767_v62 = vld [vmem:[#allocation7 + $0x1cf4] sm:$0xf]  ;;  %v16068_v60 = vld [vmem:[#allocation7 + $0x1d38] sm:$0xf0] }
 0x504   : > { %9486 = vmatpush.bf16.msra.mxu2 %v13551_v56  ;;  %v9254_v56 = vpop.f32.mrf.mxu0  ;;  %v14772_v20 = vld [vmem:[#allocation7 + $0x1318] sm:$0xf0] }
 0x505   : > { %9499 = vmatpush.bf16.msra.mxu3 %v14127_v16  ;;  %v9267_v16 = vpop.f32.mrf.mxu1 }
 0x506   : > { %9506 = vmatpush.bf16.msrb.mxu0 %v15135_v22  ;;  %9519 = vmatpush.bf16.msrb.mxu1 %v15711_v55  ;;  %v14916_v22 = vld [vmem:[#allocation7 + $0x1438] sm:$0xf0]  ;;  %v9268_v57 = vadd.f32 %v9267_v16, %v9254_v56  ;;  %v18893_v56 = vld [vmem:[#allocation7 + $0x20e4] sm:$0xf]  ;;  %v14700_v16 = vld [vmem:[#allocation7 + $0x1288] sm:$0xf0] }
 0x507   : > { %9487 = vmatmul.bf16.vlgmr.msra.gmra.mxu2 %v20072_v2  ;;  %v15492_v55 = vld [vmem:[#allocation7 + $0x18b8] sm:$0xf0] }
 0x508   : > { %9531 = vmatpush.bf16.msrb.mxu2 %v16359_v17  ;;  %9500 = vmatmul.bf16.vlgmr.msra.gmra.mxu3 %v20074_v8  ;;  %v14919_v17 = vor.u32 %v18479_v47, %v14916_v22  ;;  %v16647_v47 = vor.u32 %v18911_v26, %v16644_v5  ;;  %v18749_v22 = vld [vmem:[#allocation7 + $0x1c64] sm:$0xf] }
 0x509   : > { %9544 = vmatpush.bf16.msrb.mxu3 %v16935_v19  ;;  %v15495_v19 = vor.u32 %v18623_v52, %v15492_v55  ;;  %v14775_v55 = vor.u32 %v18443_v11, %v14772_v20  ;;  %v18713_v11 = vld [vmem:[#allocation7 + $0x1b44] sm:$0xf]  ;;  %v15852_v20 = vld [vmem:[#allocation7 + $0x1b88] sm:$0xf0] }
 0x50a   : > { %9507 = vmatpush.bf16.msrb.mxu0 %v15063_v29  ;;  %9520 = vmatpush.bf16.msrb.mxu1 %v15639_v61  ;;  %v16143_v29 = vor.u32 %v18785_v13, %v16140_v50  ;;  %v16719_v61 = vor.u32 %v18929_v18, %v16716_v21  ;;  %v15351_v13 = vor.u32 %v18587_v6, %v15348_v44  ;;  %v18425_v50 = vld [vmem:[#allocation7 + $0x1244] sm:$0xf]  ;;  %v15276_v21 = vld [vmem:[#allocation7 + $0x1708] sm:$0xf0] }
 0x50b   : > { %v18569_v18 = vld [vmem:[#allocation7 + $0x16c4] sm:$0xf]  ;;  %v16428_v6 = vld [vmem:[#allocation7 + $0x2008] sm:$0xf0] }
 0x50c   : > { %9532 = vmatpush.bf16.msrb.mxu2 %v16287_v59  ;;  %v14847_v59 = vor.u32 %v18461_v23, %v14844_v12  ;;  %v18731_v12 = vld [vmem:[#allocation7 + $0x1bd4] sm:$0xf] }
 0x50d   : > { %9545 = vmatpush.bf16.msrb.mxu3 %v16863_v33  ;;  %v15423_v33 = vor.u32 %v18605_v34, %v15420_v43  ;;  %v9269_v52 = vpop.f32.mrf.mxu1  ;;  %v9293_v43 = vpop.f32.mrf.mxu3 }
 0x50e   : > { %9508 = vmatpush.bf16.msrb.mxu0 %v14991_v28  ;;  %9521 = vmatpush.bf16.msrb.mxu1 %v15567_v32  ;;  %v16071_v28 = vor.u32 %v18767_v62, %v16068_v60  ;;  %v9256_v32 = vpop.f32.mrf.mxu0  ;;  %v18875_v62 = vld [vmem:[#allocation7 + $0x2054] sm:$0xf]  ;;  %v16500_v60 = vld [vmem:[#allocation7 + $0x2098] sm:$0xf0] }
 0x510   : > { %9533 = vmatpush.bf16.msrb.mxu2 %v16215_v48  ;;  %v15996_v48 = vld [vmem:[#allocation7 + $0x1ca8] sm:$0xf0] }
 0x511   : > { %9546 = vmatpush.bf16.msrb.mxu3 %v16791_v40  ;;  %v16572_v40 = vld [vmem:[#allocation7 + $0x2128] sm:$0xf0] }
 0x512   : > { %9509 = vmatpush.bf16.msrb.mxu0 %v14919_v17  ;;  %9522 = vmatpush.bf16.msrb.mxu1 %v15495_v19  ;;  %v15999_v17 = vor.u32 %v18749_v22, %v15996_v48  ;;  %v9280_v19 = vpop.f32.mrf.mxu2  ;;  %v16575_v23 = vor.u32 %v18893_v56, %v16572_v40 }
 0x513   : > { %v9281_v34 = vadd.f32 %v9280_v19, %v9268_v57  ;;  %v15855_v57 = vor.u32 %v18713_v11, %v15852_v20 }
 0x514   : > { %9534 = vmatpush.bf16.msrb.mxu2 %v16143_v29  ;;  %v15924_v29 = vld [vmem:[#allocation7 + $0x1c18] sm:$0xf0] }
 0x515   : > { %9547 = vmatpush.bf16.msrb.mxu3 %v16719_v61  ;;  %v14703_v61 = vor.u32 %v18425_v50, %v14700_v16  ;;  %v9294_v26 = vadd.f32 %v9293_v43, %v9281_v34  ;;  %v15927_v5 = vor.u32 %v18731_v12, %v15924_v29 }
 0x516   : > { %9510 = vmatpush.bf16.msrb.mxu0 %v14847_v59  ;;  %9523 = vmatpush.bf16.msrb.mxu1 %v15423_v33  ;;  %v15279_v59 = vor.u32 %v18569_v18, %v15276_v21  ;;  %v16503_v33 = vor.u32 %v18875_v62, %v16500_v60 }
 0x518   : > { %9535 = vmatpush.bf16.msrb.mxu2 %v16071_v28  ;;  %v18857_v28 = vld [vmem:[#allocation7 + $0x1fc4] sm:$0xf] }
 0x519   : > { %9548 = vmatpush.bf16.msrb.mxu3 %v16647_v47  ;;  %v16431_v32 = vor.u32 %v18857_v28, %v16428_v6  ;;  %v9295_v47 = vpop.f32.mrf.mxu3 }
 0x51a   : > { %9511 = vmatpush.bf16.msrb.mxu0 %v14775_v55  ;;  %9524 = vmatpush.bf16.msrb.mxu1 %v15351_v13  ;;  %v9282_v44 = vpop.f32.mrf.mxu2 }
 0x51c   : > { %9536 = vmatpush.bf16.msrb.mxu2 %v15999_v17 }
 0x51d   : > { %9549 = vmatpush.bf16.msrb.mxu3 %v16575_v23 }
 0x51e   : > { %9512 = vmatpush.bf16.msrb.mxu0 %v14703_v61  ;;  %9525 = vmatpush.bf16.msrb.mxu1 %v15279_v59  ;;  %v9306_v22 = vpop.f32.mrf.mxu0 }
 0x51f   : > { %v9307_v48 = vadd.f32 %v9306_v22, %v9294_v26 }
 0x520   : > { %9537 = vmatpush.bf16.msrb.mxu2 %v15927_v5  ;;  %v9319_v52 = vpop.f32.mrf.mxu1 }
 0x521   : > { %9550 = vmatpush.bf16.msrb.mxu3 %v16503_v33  ;;  %9513 = vmatmul.bf16.vlgmr.msrb.gmra.mxu0 %v20080_v38  ;;  %v9320_v55 = vadd.f32 %v9319_v52, %v9307_v48 }
 0x522   : > { %9526 = vmatmul.bf16.vlgmr.msrb.gmra.mxu1 %v20082_v46 }
 0x524   : > { %9538 = vmatpush.bf16.msrb.mxu2 %v15855_v57 }
 0x525   : > { %9551 = vmatpush.bf16.msrb.mxu3 %v16431_v32 }
 0x526   : > { %v9308_v56 = vpop.f32.mrf.mxu0 }
 0x527   : > { %9539 = vmatmul.bf16.vlgmr.msrb.gmra.mxu2 %v20088_v7 }
 0x528   : > { %9552 = vmatmul.bf16.vlgmr.msrb.gmra.mxu3 %v20090_v14  ;;  %v9321_v40 = vpop.f32.mrf.mxu1 }
 0x52a   : > { %v9332_v13 = vpop.f32.mrf.mxu2 }
 0x52b   : > { %v9333_v50 = vadd.f32 %v9332_v13, %v9320_v55  ;;  %v9345_v16 = vpop.f32.mrf.mxu3 }
 0x52d   : > { %v20316_v17 = vadd.f32 %v9345_v16, %v9333_v50  ;;  %v20333_v50 = vld [vmem:[#allocation8] sm:$0xf] }
 0x52f   : > { %v9564_v18 = vpack.c.bf16 %v20316_v17, %v20291_v4  ;;  %v16940_v4 = vld [vmem:[#allocation10] sm:$0xf]  ;;  %v18996_v17 = vld [vmem:[#allocation10 + $0x18] sm:$0xf0] }
 0x530   : > { %v16941_v9 = vor.u32 %v18996_v17, %v16940_v4  ;;  %v16950_v4 = vld [vmem:[#allocation10 + $0x24] sm:$0xf0] }
 0x532   : > { %v9334_v21 = vpop.f32.mrf.mxu2 }
 0x533   : > { %v9347_v19 = vpop.f32.mrf.mxu3 }
 0x53e   : > { %v9358_v23 = vpop.f32.mrf.mxu0 }
 0x540   : > { %v9371_v12 = vpop.f32.mrf.mxu1 }
 0x541   : > { %v9372_v59 = vadd.f32 %v9371_v12, %v9358_v23  ;;  %v17137_v12 = vor.u32 %v19045_v63, %v17136_v49  ;;  %v19010_v49 = vld [vmem:[#allocation10 + $0x88] sm:$0xf0]  ;;  %v19007_v63 = vld [vmem:[#allocation10 + $0x74] sm:$0xf] }
 0x543   : > { %10317 = vmatpush.bf16.msra.mxu2 %v17137_v12 }
 0x546   : > { %v9360_v29 = vpop.f32.mrf.mxu0 }
 0x547   : > { %v17138_v29 = vld [vmem:[#allocation10 + $0x1a4] sm:$0xf0] }
 0x548   : > { %v9373_v34 = vpop.f32.mrf.mxu1 }
 0x549   : > { %v17108_v34 = vld [vmem:[#allocation10 + $0x150] sm:$0xf] }
 0x54a   : > { %v9384_v43 = vpop.f32.mrf.mxu2 }
 0x54b   : > { %v9397_v61 = vpop.f32.mrf.mxu3  ;;  %v9385_v5 = vadd.f32 %v9384_v43, %v9372_v59  ;;  %v19038_v43 = vld [vmem:[#allocation10 + $0x168] sm:$0xf0]  ;;  %v17110_v59 = vld [vmem:[#allocation10 + $0x16c] sm:$0xf0] }
 0x54d   : > { %v9398_v11 = vadd.f32 %v9397_v61, %v9385_v5 }
 0x552   : > { %v9386_v62 = vpop.f32.mrf.mxu2 }
 0x553   : > { %v9399_v60 = vpop.f32.mrf.mxu3 }
 0x554   : > { %v19035_v60 = vld [vmem:[#allocation10 + $0x154] sm:$0xf] }
 0x55e   : > { %v9410_v26 = vpop.f32.mrf.mxu0 }
 0x55f   : > { %v9411_v20 = vadd.f32 %v9410_v26, %v9398_v11  ;;  %v17109_v26 = vor.u32 %v19038_v43, %v17108_v34  ;;  %v17080_v11 = vld [vmem:[#allocation10 + $0x118] sm:$0xf]  ;;  %v19003_v34 = vld [vmem:[#allocation10 + $0x50] sm:$0xf0]  ;;  %v19000_v43 = vld [vmem:[#allocation10 + $0x3c] sm:$0xf] }
 0x560   : > { %v9423_v33 = vpop.f32.mrf.mxu1 }
 0x561   : > { %v9424_v57 = vadd.f32 %v9423_v33, %v9411_v20  ;;  %v17113_v33 = vor.u32 %v19035_v60, %v17110_v59  ;;  %v19031_v20 = vld [vmem:[#allocation10 + $0x130] sm:$0xf0]  ;;  %10318 = vmatpush.bf16.msra.mxu2 %v17109_v26  ;;  %v16942_v59 = vld [vmem:[#allocation10 + $0x1c] sm:$0xf0]  ;;  %v17144_v26 = vld [vmem:[#allocation10 + $0x190] sm:$0xf] }
 0x566   : > { %v9412_v28 = vpop.f32.mrf.mxu0 }
 0x568   : > { %v9425_v6 = vpop.f32.mrf.mxu1 }
 0x569   : > { %v19028_v6 = vld [vmem:[#allocation10 + $0x11c] sm:$0xf] }
 0x56a   : > { %v9436_v44 = vpop.f32.mrf.mxu2 }
 0x56b   : > { %v9437_v32 = vadd.f32 %v9436_v44, %v9424_v57  ;;  %v9449_v47 = vpop.f32.mrf.mxu3  ;;  %v17082_v57 = vld [vmem:[#allocation10 + $0x134] sm:$0xf0] }
 0x56d   : > { %v9450_v22 = vadd.f32 %v9449_v47, %v9437_v32  ;;  %v17081_v47 = vor.u32 %v19031_v20, %v17080_v11  ;;  %v17146_v11 = vld [vmem:[#allocation10 + $0x1ac] sm:$0xf0] }
 0x56f   : > { %v9565_v48 = vpack.c.bf16 %v9450_v22, %v9450_v22  ;;  %10319 = vmatpush.bf16.msra.mxu2 %v17081_v47  ;;  %v19029_v47 = vld [vmem:[#allocation10 + $0x124] sm:$0xf] }
 0x571   : > { %v9580_v52 = vsel %vm9578_vm1, %v9565_v48, 0  ;;  %v17085_v48 = vor.u32 %v19028_v6, %v17082_v57  ;;  %v19039_v6 = vld [vmem:[#allocation10 + $0x170] sm:$0xf0]  ;;  %v17121_v57 = vor.u32 %v19036_v3, %v17118_v30  ;;  %v19084_v3 = vld [vmem:[#allocation10 + $0x2dc] sm:$0xf] }
 0x572   : > { %v9438_v55 = vpop.f32.mrf.mxu2  ;;  %9588 = vmatpush.bf16.msra.mxu0 %v9580_v52  ;;  %v17052_v52 = vld [vmem:[#allocation10 + $0xe0] sm:$0xf]  ;;  %v17306_v30 = vld [vmem:[#allocation10 + $0x2f4] sm:$0xf0] }
 0x573   : > { %v9451_v56 = vpop.f32.mrf.mxu3  ;;  %v19024_v55 = vld [vmem:[#allocation10 + $0xf8] sm:$0xf0] }
 0x574   : > { %v19021_v56 = vld [vmem:[#allocation10 + $0xe4] sm:$0xf] }
 0x576   : > { %9589 = vmatpush.bf16.msra.mxu0 %v9563_v39 }
 0x57a   : > { %9590 = vmatpush.bf16.msra.mxu0 %v9561_v1 }
 0x57e   : > { %v9462_v40 = vpop.f32.mrf.mxu0  ;;  %9591 = vmatpush.bf16.msra.mxu0 %v9559_v53 }
 0x580   : > { %v9475_v13 = vpop.f32.mrf.mxu1 }
 0x581   : > { %v9476_v39 = vadd.f32 %v9475_v13, %v9462_v40  ;;  %v17054_v40 = vld [vmem:[#allocation10 + $0xfc] sm:$0xf0] }
 0x582   : > { %9592 = vmatpush.bf16.msra.mxu0 %v9557_v15  ;;  %v19042_v15 = vld [vmem:[#allocation10 + $0x18c] sm:$0xf] }
 0x583   : > { %v17141_v62 = vor.u32 %v19042_v15, %v17138_v29  ;;  %v16998_v15 = vld [vmem:[#allocation10 + $0x8c] sm:$0xf0]  ;;  %v16968_v29 = vld [vmem:[#allocation10 + $0x38] sm:$0xf] }
 0x584   : > { %v17001_v12 = vor.u32 %v19007_v63, %v16998_v15  ;;  %v19001_v63 = vld [vmem:[#allocation10 + $0x44] sm:$0xf]  ;;  %v16978_v15 = vld [vmem:[#allocation10 + $0x5c] sm:$0xf0] }
 0x585   : > { %16936 = vmatmul.msk.bf16.vlgmr.msra.gmra.mxu0 %vm9574_vm2, %v20333_v50 }
 0x586   : > { %v9464_v16 = vpop.f32.mrf.mxu0  ;;  %10343 = vmatpush.bf16.msrb.mxu0 %v17141_v62  ;;  %v16969_v62 = vor.u32 %v19003_v34, %v16968_v29  ;;  %v18997_v29 = vld [vmem:[#allocation10 + $0x20] sm:$0xf0] }
 0x587   : > { %v17053_v16 = vor.u32 %v19024_v55, %v17052_v52  ;;  %v19022_v52 = vld [vmem:[#allocation10 + $0xec] sm:$0xf]  ;;  %v17062_v55 = vld [vmem:[#allocation10 + $0x104] sm:$0xf0] }
 0x588   : > { %v9477_v51 = vpop.f32.mrf.mxu1 }
 0x589   : > { %10320 = vmatpush.bf16.msra.mxu2 %v17053_v16  ;;  %v19015_v16 = vld [vmem:[#allocation10 + $0xb4] sm:$0xf] }
 0x58a   : > { %v9488_v31 = vpop.f32.mrf.mxu2  ;;  %10344 = vmatpush.bf16.msrb.mxu0 %v17113_v33  ;;  %v19043_v33 = vld [vmem:[#allocation10 + $0x194] sm:$0xf] }
 0x58b   : > { %v9501_v54 = vpop.f32.mrf.mxu3  ;;  %v9489_v35 = vadd.f32 %v9488_v31, %v9476_v39  ;;  %v17057_v31 = vor.u32 %v19021_v56, %v17054_v40  ;;  %v19014_v39 = vld [vmem:[#allocation10 + $0xac] sm:$0xf]  ;;  %v17149_v20 = vor.u32 %v19043_v33, %v17146_v11  ;;  %v17065_v56 = vor.u32 %v19022_v52, %v17062_v55  ;;  %v17032_v40 = vld [vmem:[#allocation10 + $0xb0] sm:$0xf]  ;;  %v17250_v55 = vld [vmem:[#allocation10 + $0x284] sm:$0xf0] }
 0x58c   : > { %v19094_v33 = vld [vmem:[#allocation10 + $0x328] sm:$0xf0] }
 0x58d   : > { %v9502_v53 = vadd.f32 %v9501_v54, %v9489_v35  ;;  %v17024_v54 = vld [vmem:[#allocation10 + $0xa8] sm:$0xf]  ;;  %v19070_v52 = vld [vmem:[#allocation10 + $0x26c] sm:$0xf] }
 0x58e   : > { %10345 = vmatpush.bf16.msrb.mxu0 %v17085_v48  ;;  %v19025_v48 = vld [vmem:[#allocation10 + $0x100] sm:$0xf0] }
 0x592   : > { %v9490_v1 = vpop.f32.mrf.mxu2  ;;  %10346 = vmatpush.bf16.msrb.mxu0 %v17057_v31 }
 0x593   : > { %v9503_v24 = vpop.f32.mrf.mxu3  ;;  %v19017_v1 = vld [vmem:[#allocation10 + $0xc0] sm:$0xf0] }
 0x59e   : > { %v9514_v21 = vpop.f32.mrf.mxu0 }
 0x59f   : > { %v9527_v42 = vpop.f32.mrf.mxu1  ;;  %v9515_v19 = vadd.f32 %v9514_v21, %v9502_v53  ;;  %v17026_v21 = vld [vmem:[#allocation10 + $0xc4] sm:$0xf0] }
 0x5a0   : > { %v17029_v53 = vor.u32 %v19014_v39, %v17026_v21  ;;  %v19008_v39 = vld [vmem:[#allocation10 + $0x7c] sm:$0xf]  ;;  %v17006_v21 = vld [vmem:[#allocation10 + $0x94] sm:$0xf0] }
 0x5a1   : > { %v9528_v5 = vadd.f32 %v9527_v42, %v9515_v19  ;;  %v17025_v42 = vor.u32 %v19017_v1, %v17024_v54  ;;  %v16996_v19 = vld [vmem:[#allocation10 + $0x70] sm:$0xf]  ;;  %v17004_v1 = vld [vmem:[#allocation10 + $0x78] sm:$0xf] }
 0x5a2   : > { %10347 = vmatpush.bf16.msrb.mxu0 %v17029_v53  ;;  %v16976_v53 = vld [vmem:[#allocation10 + $0x40] sm:$0xf] }
 0x5a3   : > { %10321 = vmatpush.bf16.msra.mxu2 %v17025_v42  ;;  %v17009_v42 = vor.u32 %v19008_v39, %v17006_v21  ;;  %v19056_v39 = vld [vmem:[#allocation10 + $0x1fc] sm:$0xf]  ;;  %v17194_v21 = vld [vmem:[#allocation10 + $0x214] sm:$0xf0] }
 0x5a6   : > { %v9516_v23 = vpop.f32.mrf.mxu0  ;;  %10348 = vmatpush.bf16.msrb.mxu0 %v17001_v12  ;;  %v16948_v12 = vld [vmem:[#allocation10 + $0x8] sm:$0xf] }
 0x5a7   : > { %v9529_v61 = vpop.f32.mrf.mxu1  ;;  %v16997_v23 = vor.u32 %v19010_v49, %v16996_v19  ;;  %v19004_v19 = vld [vmem:[#allocation10 + $0x58] sm:$0xf0]  ;;  %v16949_v34 = vor.u32 %v18997_v29, %v16948_v12  ;;  %v20352_v12 = vpop.permute.xlu0 %9571 }
 0x5a8   : > { %v16970_v61 = vld [vmem:[#allocation10 + $0x54] sm:$0xf0]  ;;  %v16977_v49 = vor.u32 %v19004_v19, %v16976_v53  ;;  %v17164_v53 = vld [vmem:[#allocation10 + $0x1c0] sm:$0xf]  ;;  %v19052_v19 = vld [vmem:[#allocation10 + $0x1d8] sm:$0xf0] }
 0x5a9   : > { %10322 = vmatpush.bf16.msra.mxu2 %v16997_v23  ;;  %v16973_v60 = vor.u32 %v19000_v43, %v16970_v61  ;;  %v16981_v23 = vor.u32 %v19001_v63, %v16978_v15  ;;  %v17360_v43 = vld [vmem:[#allocation10 + $0x348] sm:$0xf]  ;;  %v19101_v61 = vld [vmem:[#allocation10 + $0x360] sm:$0xf0]  ;;  %v19044_v63 = vld [vmem:[#allocation10 + $0x19c] sm:$0xf] }
 0x5aa   : > { %v9540_v28 = vpop.f32.mrf.mxu2  ;;  %v17154_v15 = vld [vmem:[#allocation10 + $0x1b4] sm:$0xf0] }
 0x5ab   : > { %v9541_v44 = vadd.f32 %v9540_v28, %v9528_v5  ;;  %v9553_v32 = vpop.f32.mrf.mxu3  ;;  %v19046_v5 = vld [vmem:[#allocation10 + $0x1a8] sm:$0xf0]  ;;  %10349 = vmatpush.bf16.msrb.mxu0 %v16973_v60  ;;  %v17116_v28 = vld [vmem:[#allocation10 + $0x158] sm:$0xf]  ;;  %v17361_v60 = vor.u32 %v19101_v61, %v17360_v43  ;;  %v17166_v43 = vld [vmem:[#allocation10 + $0x1dc] sm:$0xf0] }
 0x5ac   : > { %v17368_v61 = vld [vmem:[#allocation10 + $0x350] sm:$0xf] }
 0x5ad   : > { %v9554_v22 = vadd.f32 %v9553_v32, %v9541_v44  ;;  %10323 = vmatpush.bf16.msra.mxu2 %v16969_v62  ;;  %v17088_v44 = vld [vmem:[#allocation10 + $0x120] sm:$0xf]  ;;  %v19032_v32 = vld [vmem:[#allocation10 + $0x138] sm:$0xf0]  ;;  %v18994_v62 = vld [vmem:[#allocation10 + $0xc] sm:$0xf]  ;;  %10330 = vmatpush.bf16.msra.mxu3 %v17361_v60 }
 0x5ae   : > { %v17089_v10 = vor.u32 %v19032_v32, %v17088_v44  ;;  %v16953_v17 = vor.u32 %v18994_v62, %v16950_v4  ;;  %v19080_v44 = vld [vmem:[#allocation10 + $0x2b8] sm:$0xf0]  ;;  %v19102_v4 = vld [vmem:[#allocation10 + $0x368] sm:$0xf0] }
 0x5af   : > { %v9566_v13 = vpack.c.bf16 %v9554_v22, %v9554_v22  ;;  %v17060_v22 = vld [vmem:[#allocation10 + $0xe8] sm:$0xf] }
 0x5b1   : > { %v9583_v51 = vsel %vm9578_vm1, %v9566_v13, 0  ;;  %10324 = vmatpush.bf16.msra.mxu2 %v16941_v9  ;;  %v19018_v13 = vld [vmem:[#allocation10 + $0xc8] sm:$0xf0]  ;;  %v19091_v9 = vld [vmem:[#allocation10 + $0x314] sm:$0xf] }
 0x5b2   : > { %v9542_v24 = vpop.f32.mrf.mxu2  ;;  %9601 = vmatpush.bf16.msra.mxu1 %v9583_v51  ;;  %v17034_v51 = vld [vmem:[#allocation10 + $0xcc] sm:$0xf0]  ;;  %v17033_v31 = vor.u32 %v19018_v13, %v17032_v40  ;;  %v19066_v40 = vld [vmem:[#allocation10 + $0x248] sm:$0xf0] }
 0x5b3   : > { %v9555_v35 = vpop.f32.mrf.mxu3  ;;  %v17037_v54 = vor.u32 %v19015_v16, %v17034_v51  ;;  %v19011_v24 = vld [vmem:[#allocation10 + $0x90] sm:$0xf0]  ;;  %v17222_v51 = vld [vmem:[#allocation10 + $0x24c] sm:$0xf0] }
 0x5b4   : > { %v17005_v35 = vor.u32 %v19011_v24, %v17004_v1  ;;  %v19063_v16 = vld [vmem:[#allocation10 + $0x234] sm:$0xf] }
 0x5b5   : > { %v19059_v1 = vld [vmem:[#allocation10 + $0x210] sm:$0xf0] }
 0x5b6   : > { %9602 = vmatpush.bf16.msra.mxu1 %v9564_v18  ;;  %v18993_v18 = vld [vmem:[#allocation10 + $0x4] sm:$0xf] }
 0x5b7   : > { %v16945_v27 = vor.u32 %v18993_v18, %v16942_v59  ;;  %v19098_v18 = vld [vmem:[#allocation10 + $0x34c] sm:$0xf]  ;;  %v17362_v59 = vld [vmem:[#allocation10 + $0x364] sm:$0xf0] }
 0x5b9   : > { %10350 = vmatpush.bf16.msrb.mxu0 %v16945_v27  ;;  %v17334_v27 = vld [vmem:[#allocation10 + $0x32c] sm:$0xf0] }
 0x5ba   : > { %9603 = vmatpush.bf16.msra.mxu1 %v9562_v36  ;;  %v17145_v36 = vor.u32 %v19046_v5, %v17144_v26  ;;  %v17365_v26 = vor.u32 %v19098_v18, %v17362_v59  ;;  %v17332_v5 = vld [vmem:[#allocation10 + $0x310] sm:$0xf]  ;;  %v17157_v18 = vor.u32 %v19044_v63, %v17154_v15  ;;  %v17124_v59 = vld [vmem:[#allocation10 + $0x160] sm:$0xf]  ;;  %v19019_v63 = vld [vmem:[#allocation10 + $0xd0] sm:$0xf0] }
 0x5bb   : > { %v17333_v11 = vor.u32 %v19094_v33, %v17332_v5  ;;  %v17369_v5 = vor.u32 %v19102_v4, %v17368_v61  ;;  %v19099_v33 = vld [vmem:[#allocation10 + $0x354] sm:$0xf]  ;;  %v19016_v15 = vld [vmem:[#allocation10 + $0xbc] sm:$0xf] }
 0x5bc   : > { %10369 = vmatpush.bf16.msrb.mxu2 %v17145_v36  ;;  %v17337_v36 = vor.u32 %v19091_v9, %v17334_v27  ;;  %v19037_v9 = vld [vmem:[#allocation10 + $0x164] sm:$0xf]  ;;  %v17126_v27 = vld [vmem:[#allocation10 + $0x17c] sm:$0xf0] }
 0x5bd   : > { %10395 = vmatpush.bf16.msra.mxu0 %v17149_v20  ;;  %10331 = vmatpush.bf16.msra.mxu3 %v17333_v11  ;;  %v17304_v20 = vld [vmem:[#allocation10 + $0x2d8] sm:$0xf] }
 0x5be   : > { %9604 = vmatpush.bf16.msra.mxu1 %v9560_v37  ;;  %v17117_v37 = vor.u32 %v19039_v6, %v17116_v28  ;;  %v19087_v28 = vld [vmem:[#allocation10 + $0x2f0] sm:$0xf0] }
 0x5bf   : > { %v17305_v6 = vor.u32 %v19087_v28, %v17304_v20  ;;  %v17340_v28 = vld [vmem:[#allocation10 + $0x318] sm:$0xf] }
 0x5c0   : > { %10370 = vmatpush.bf16.msrb.mxu2 %v17117_v37  ;;  %v17309_v37 = vor.u32 %v19084_v3, %v17306_v30  ;;  %v19092_v30 = vld [vmem:[#allocation10 + $0x31c] sm:$0xf] }
 0x5c1   : > { %10396 = vmatpush.bf16.msra.mxu0 %v17121_v57  ;;  %10332 = vmatpush.bf16.msra.mxu3 %v17305_v6  ;;  %v17276_v57 = vld [vmem:[#allocation10 + $0x2a0] sm:$0xf]  ;;  %v19095_v6 = vld [vmem:[#allocation10 + $0x330] sm:$0xf0] }
 0x5c2   : > { %9605 = vmatpush.bf16.msra.mxu1 %v9558_v25  ;;  %v17093_v25 = vor.u32 %v19029_v47, %v17090_v58  ;;  %v17277_v32 = vor.u32 %v19080_v44, %v17276_v57  ;;  %v19077_v47 = vld [vmem:[#allocation10 + $0x2a4] sm:$0xf]  ;;  %v17278_v58 = vld [vmem:[#allocation10 + $0x2bc] sm:$0xf0]  ;;  %v17341_v3 = vor.u32 %v19095_v6, %v17340_v28  ;;  %v17129_v44 = vor.u32 %v19037_v9, %v17126_v27  ;;  %v17228_v9 = vld [vmem:[#allocation10 + $0x238] sm:$0xf] }
 0x5c3   : > { %v19067_v27 = vld [vmem:[#allocation10 + $0x250] sm:$0xf0]  ;;  %v17230_v28 = vld [vmem:[#allocation10 + $0x254] sm:$0xf0] }
 0x5c4   : > { %10371 = vmatpush.bf16.msrb.mxu2 %v17089_v10  ;;  %v17281_v10 = vor.u32 %v19077_v47, %v17278_v58  ;;  %v19033_v47 = vld [vmem:[#allocation10 + $0x140] sm:$0xf0]  ;;  %v19030_v58 = vld [vmem:[#allocation10 + $0x12c] sm:$0xf] }
 0x5c5   : > { %16937 = vmatmul.msk.bf16.vlgmr.msra.gmra.mxu1 %vm9574_vm2, %v20333_v50  ;;  %10397 = vmatpush.bf16.msra.mxu0 %v17093_v25  ;;  %v17061_v50 = vor.u32 %v19025_v48, %v17060_v22  ;;  %v17248_v25 = vld [vmem:[#allocation10 + $0x268] sm:$0xf]  ;;  %v19073_v22 = vld [vmem:[#allocation10 + $0x280] sm:$0xf0] }
 0x5c6   : > { %10356 = vmatpush.bf16.msrb.mxu1 %v17365_v26  ;;  %10333 = vmatpush.bf16.msra.mxu3 %v17277_v32  ;;  %v17249_v48 = vor.u32 %v19073_v22, %v17248_v25  ;;  %v19040_v26 = vld [vmem:[#allocation10 + $0x178] sm:$0xf0]  ;;  %v17096_v32 = vld [vmem:[#allocation10 + $0x128] sm:$0xf]  ;;  %v17312_v22 = vld [vmem:[#allocation10 + $0x2e0] sm:$0xf] }
 0x5c7   : > { %v17125_v57 = vor.u32 %v19040_v26, %v17124_v59  ;;  %v19012_v59 = vld [vmem:[#allocation10 + $0x98] sm:$0xf0]  ;;  %v19009_v26 = vld [vmem:[#allocation10 + $0x84] sm:$0xf] }
 0x5c8   : > { %10372 = vmatpush.bf16.msrb.mxu2 %v17061_v50  ;;  %v17253_v50 = vor.u32 %v19070_v52, %v17250_v55 }
 0x5c9   : > { %10398 = vmatpush.bf16.msra.mxu0 %v17065_v56  ;;  %v17220_v56 = vld [vmem:[#allocation10 + $0x230] sm:$0xf] }
 0x5ca   : > { %10357 = vmatpush.bf16.msrb.mxu1 %v17337_v36  ;;  %10334 = vmatpush.bf16.msra.mxu3 %v17249_v48  ;;  %v17221_v13 = vor.u32 %v19066_v40, %v17220_v56  ;;  %v17370_v36 = vld [vmem:[#allocation10 + $0x36c] sm:$0xf0]  ;;  %v19088_v48 = vld [vmem:[#allocation10 + $0x2f8] sm:$0xf0]  ;;  %v17314_v56 = vld [vmem:[#allocation10 + $0x2fc] sm:$0xf0]  ;;  %v17097_v40 = vor.u32 %v19033_v47, %v17096_v32 }
 0x5cb   : > { %v17373_v20 = vor.u32 %v19099_v33, %v17370_v36  ;;  %v17313_v52 = vor.u32 %v19088_v48, %v17312_v22  ;;  %v17229_v36 = vor.u32 %v19067_v27, %v17228_v9  ;;  %v17200_v47 = vld [vmem:[#allocation10 + $0x200] sm:$0xf]  ;;  %v16964_v9 = vld [vmem:[#allocation10 + $0x18] sm:$0xf]  ;;  %v18999_v27 = vld [vmem:[#allocation10 + $0x30] sm:$0xf0] }
 0x5cc   : > { %10373 = vmatpush.bf16.msrb.mxu2 %v17033_v31  ;;  %v17225_v31 = vor.u32 %v19063_v16, %v17222_v51  ;;  %v17068_v16 = vld [vmem:[#allocation10 + $0xf0] sm:$0xf]  ;;  %v19026_v51 = vld [vmem:[#allocation10 + $0x108] sm:$0xf0]  ;;  %v17202_v22 = vld [vmem:[#allocation10 + $0x21c] sm:$0xf0] }
 0x5cd   : > { %10399 = vmatpush.bf16.msra.mxu0 %v17037_v54  ;;  %v17192_v54 = vld [vmem:[#allocation10 + $0x1f8] sm:$0xf] }
 0x5ce   : > { %10358 = vmatpush.bf16.msrb.mxu1 %v17309_v37  ;;  %10335 = vmatpush.bf16.msra.mxu3 %v17221_v13  ;;  %v17193_v24 = vor.u32 %v19059_v1, %v17192_v54  ;;  %v17342_v37 = vld [vmem:[#allocation10 + $0x334] sm:$0xf0]  ;;  %v17070_v54 = vld [vmem:[#allocation10 + $0x10c] sm:$0xf0] }
 0x5cf   : > { %v17345_v25 = vor.u32 %v19092_v30, %v17342_v37  ;;  %v16984_v30 = vld [vmem:[#allocation10 + $0x48] sm:$0xf]  ;;  %v19005_v37 = vld [vmem:[#allocation10 + $0x60] sm:$0xf0] }
 0x5d0   : > { %10374 = vmatpush.bf16.msrb.mxu2 %v17005_v35  ;;  %v17197_v35 = vor.u32 %v19056_v39, %v17194_v21  ;;  %v19081_v39 = vld [vmem:[#allocation10 + $0x2c0] sm:$0xf0]  ;;  %v16985_v48 = vor.u32 %v19005_v37, %v16984_v30  ;;  %v16965_v37 = vor.u32 %v18999_v27, %v16964_v9 }
 0x5d1   : > { %10400 = vmatpush.bf16.msra.mxu0 %v17009_v42  ;;  %v17152_v42 = vld [vmem:[#allocation10 + $0x198] sm:$0xf] }
 0x5d2   : > { %10359 = vmatpush.bf16.msrb.mxu1 %v17281_v10  ;;  %10336 = vmatpush.bf16.msra.mxu3 %v17193_v24  ;;  %v17098_v10 = vld [vmem:[#allocation10 + $0x144] sm:$0xf0] }
 0x5d3   : > { %v17101_v13 = vor.u32 %v19030_v58, %v17098_v10  ;;  %v17284_v24 = vld [vmem:[#allocation10 + $0x2a8] sm:$0xf]  ;;  %v19060_v58 = vld [vmem:[#allocation10 + $0x218] sm:$0xf0] }
 0x5d4   : > { %10375 = vmatpush.bf16.msrb.mxu2 %v16977_v49  ;;  %v19047_v49 = vld [vmem:[#allocation10 + $0x1b0] sm:$0xf0]  ;;  %v17285_v21 = vor.u32 %v19081_v39, %v17284_v24  ;;  %v17201_v10 = vor.u32 %v19060_v58, %v17200_v47  ;;  %v19050_v24 = vld [vmem:[#allocation10 + $0x1cc] sm:$0xf]  ;;  %v17174_v39 = vld [vmem:[#allocation10 + $0x1e4] sm:$0xf0] }
 0x5d5   : > { %10401 = vmatpush.bf16.msra.mxu0 %v16981_v23  ;;  %v17165_v23 = vor.u32 %v19052_v19, %v17164_v53  ;;  %v17069_v53 = vor.u32 %v19026_v51, %v17068_v16  ;;  %v19048_v51 = vld [vmem:[#allocation10 + $0x1b8] sm:$0xf0]  ;;  %v17348_v47 = vld [vmem:[#allocation10 + $0x320] sm:$0xf] }
 0x5d6   : > { %10360 = vmatpush.bf16.msrb.mxu1 %v17253_v50  ;;  %v19085_v50 = vld [vmem:[#allocation10 + $0x2e4] sm:$0xf]  ;;  %v19096_v58 = vld [vmem:[#allocation10 + $0x338] sm:$0xf0] }
 0x5d7   : > { %10337 = vmatpush.bf16.msra.mxu3 %v17165_v23  ;;  %v17317_v1 = vor.u32 %v19085_v50, %v17314_v56  ;;  %v17042_v23 = vld [vmem:[#allocation10 + $0xd4] sm:$0xf0]  ;;  %v18998_v50 = vld [vmem:[#allocation10 + $0x28] sm:$0xf0]  ;;  %v18995_v56 = vld [vmem:[#allocation10 + $0x14] sm:$0xf] }
 0x5d8   : > { %10376 = vmatpush.bf16.msrb.mxu2 %v16949_v34  ;;  %v19049_v34 = vld [vmem:[#allocation10 + $0x1c4] sm:$0xf] }
 0x5d9   : > { %10402 = vmatpush.bf16.msra.mxu0 %v16953_v17  ;;  %v17169_v60 = vor.u32 %v19049_v34, %v17166_v43  ;;  %v17153_v17 = vor.u32 %v19047_v49, %v17152_v42  ;;  %v17286_v42 = vld [vmem:[#allocation10 + $0x2c4] sm:$0xf0]  ;;  %v17040_v49 = vld [vmem:[#allocation10 + $0xb8] sm:$0xf]  ;;  %v17256_v34 = vld [vmem:[#allocation10 + $0x270] sm:$0xf] }
 0x5da   : > { %10361 = vmatpush.bf16.msrb.mxu1 %v17225_v31  ;;  %v19023_v31 = vld [vmem:[#allocation10 + $0xf4] sm:$0xf]  ;;  %v19074_v43 = vld [vmem:[#allocation10 + $0x288] sm:$0xf0]  ;;  %v17041_v4 = vor.u32 %v19019_v63, %v17040_v49  ;;  %v19041_v49 = vld [vmem:[#allocation10 + $0x180] sm:$0xf0] }
 0x5db   : > { %10382 = vmatpush.bf16.msrb.mxu3 %v17369_v5  ;;  %v17073_v19 = vor.u32 %v19023_v31, %v17070_v54  ;;  %v17257_v61 = vor.u32 %v19074_v43, %v17256_v34  ;;  %v17014_v5 = vld [vmem:[#allocation10 + $0x9c] sm:$0xf0]  ;;  %v17172_v31 = vld [vmem:[#allocation10 + $0x1c8] sm:$0xf]  ;;  %v19053_v54 = vld [vmem:[#allocation10 + $0x1e0] sm:$0xf0] }
 0x5dc   : > { %v17076_v34 = vld [vmem:[#allocation10 + $0xf8] sm:$0xf]  ;;  %v19027_v43 = vld [vmem:[#allocation10 + $0x110] sm:$0xf0] }
 0x5de   : > { %10362 = vmatpush.bf16.msrb.mxu1 %v17197_v35  ;;  %v19078_v35 = vld [vmem:[#allocation10 + $0x2ac] sm:$0xf] }
 0x5df   : > { %10383 = vmatpush.bf16.msrb.mxu3 %v17341_v3  ;;  %v17017_v3 = vor.u32 %v19009_v26, %v17014_v5  ;;  %v16992_v26 = vld [vmem:[#allocation10 + $0x50] sm:$0xf]  ;;  %v19006_v5 = vld [vmem:[#allocation10 + $0x68] sm:$0xf0] }
 0x5e2   : > { %10363 = vmatpush.bf16.msrb.mxu1 %v17169_v60  ;;  %v17258_v60 = vld [vmem:[#allocation10 + $0x28c] sm:$0xf0] }
 0x5e3   : > { %10384 = vmatpush.bf16.msrb.mxu3 %v17313_v52 }
 0x5e6   : > { %10408 = vmatpush.bf16.msra.mxu1 %v17373_v20  ;;  %v19064_v20 = vld [vmem:[#allocation10 + $0x23c] sm:$0xf] }
 0x5e7   : > { %10385 = vmatpush.bf16.msrb.mxu3 %v17285_v21  ;;  %v17233_v32 = vor.u32 %v19064_v20, %v17230_v28  ;;  %v19103_v20 = vld [vmem:[#allocation10 + $0x370] sm:$0xf0] }
 0x5ea   : > { %10409 = vmatpush.bf16.msra.mxu1 %v17345_v25  ;;  %v19057_v25 = vld [vmem:[#allocation10 + $0x204] sm:$0xf] }
 0x5eb   : > { %10386 = vmatpush.bf16.msrb.mxu3 %v17257_v61  ;;  %v17205_v16 = vor.u32 %v19057_v25, %v17202_v22  ;;  %v17077_v61 = vor.u32 %v19027_v43, %v17076_v34  ;;  %v17350_v25 = vld [vmem:[#allocation10 + $0x33c] sm:$0xf0]  ;;  %v17349_v22 = vor.u32 %v19096_v58, %v17348_v47  ;;  %v17208_v34 = vld [vmem:[#allocation10 + $0x208] sm:$0xf]  ;;  %v19061_v43 = vld [vmem:[#allocation10 + $0x220] sm:$0xf0] }
 0x5ec   : > { %v17272_v58 = vld [vmem:[#allocation10 + $0x280] sm:$0xf] }
 0x5ee   : > { %10410 = vmatpush.bf16.msra.mxu1 %v17317_v1  ;;  %v17173_v1 = vor.u32 %v19053_v54, %v17172_v31  ;;  %v19079_v31 = vld [vmem:[#allocation10 + $0x2b4] sm:$0xf]  ;;  %v17294_v54 = vld [vmem:[#allocation10 + $0x2cc] sm:$0xf0] }
 0x5ef   : > { %10387 = vmatpush.bf16.msrb.mxu3 %v17229_v36  ;;  %v17376_v36 = vld [vmem:[#allocation10 + $0x358] sm:$0xf] }
 0x5f3   : > { %10388 = vmatpush.bf16.msrb.mxu3 %v17201_v10  ;;  %v19093_v10 = vld [vmem:[#allocation10 + $0x324] sm:$0xf] }
 0x5f7   : > { %10389 = vmatpush.bf16.msrb.mxu3 %v17173_v1 }
 0x602   : > { %v9594_v29 = vpop.f32.mrf.mxu0 }
 0x603   : > { %v9595_v62 = vadd.f32 %v9594_v29, %v20352_v12  ;;  %v17289_v29 = vor.u32 %v19078_v35, %v17286_v42 }
 0x605   : > { %v20355_v11 = vpack.c.bf16 %v9595_v62, %v9595_v62  ;;  %v19071_v62 = vld [vmem:[#allocation10 + $0x274] sm:$0xf]  ;;  %10411 = vmatpush.bf16.msra.mxu1 %v17289_v29 }
 0x606   : > { %v17261_v33 = vor.u32 %v19071_v62, %v17258_v60  ;;  %v17048_v62 = vld [vmem:[#allocation10 + $0xc0] sm:$0xf]  ;;  %v19020_v60 = vld [vmem:[#allocation10 + $0xd8] sm:$0xf0] }
 0x607   : > { %10325 = vmatmul.bf16.vlgmr.msra.gmra.mxu2 %v20355_v11  ;;  %10351 = vmatmul.bf16.vlgmr.msrb.gmra.mxu0 %v20355_v11 }
 0x608   : > { %10421 = vmatpush.bf16.msra.mxu2 %v17153_v17  ;;  %10447 = vmatpush.bf16.msrb.mxu0 %v17157_v18  ;;  %v17045_v17 = vor.u32 %v19016_v15, %v17042_v23  ;;  %v17012_v18 = vld [vmem:[#allocation10 + $0x80] sm:$0xf]  ;;  %v17104_v15 = vld [vmem:[#allocation10 + $0x130] sm:$0xf]  ;;  %v19034_v23 = vld [vmem:[#allocation10 + $0x148] sm:$0xf0] }
 0x609   : > { %v17013_v6 = vor.u32 %v19012_v59, %v17012_v18  ;;  %10412 = vmatpush.bf16.msra.mxu1 %v17261_v33  ;;  %v17105_v29 = vor.u32 %v19034_v23, %v17104_v15  ;;  %v19013_v18 = vld [vmem:[#allocation10 + $0xa0] sm:$0xf0]  ;;  %v16993_v33 = vor.u32 %v19006_v5, %v16992_v26  ;;  %v17238_v15 = vld [vmem:[#allocation10 + $0x25c] sm:$0xf0]  ;;  %v17182_v26 = vld [vmem:[#allocation10 + $0x1ec] sm:$0xf0] }
 0x60a   : > { %v9596_v55 = vpop.f32.mrf.mxu0  ;;  %v17384_v5 = vld [vmem:[#allocation10 + $0x360] sm:$0xf] }
 0x60b   : > { %v16956_v55 = vld [vmem:[#allocation10 + $0x10] sm:$0xf] }
 0x60c   : > { %10422 = vmatpush.bf16.msra.mxu2 %v17125_v57  ;;  %10448 = vmatpush.bf16.msrb.mxu0 %v17129_v44  ;;  %v19002_v57 = vld [vmem:[#allocation10 + $0x4c] sm:$0xf]  ;;  %v16986_v44 = vld [vmem:[#allocation10 + $0x64] sm:$0xf0]  ;;  %v16957_v21 = vor.u32 %v18998_v50, %v16956_v55 }
 0x60d   : > { %v16989_v52 = vor.u32 %v19002_v57, %v16986_v44  ;;  %10413 = vmatpush.bf16.msra.mxu1 %v17233_v32  ;;  %v17377_v57 = vor.u32 %v19103_v20, %v17376_v36  ;;  %v19086_v50 = vld [vmem:[#allocation10 + $0x2ec] sm:$0xf]  ;;  %v17356_v20 = vld [vmem:[#allocation10 + $0x328] sm:$0xf] }
 0x610   : > { %10423 = vmatpush.bf16.msra.mxu2 %v17097_v40  ;;  %10449 = vmatpush.bf16.msrb.mxu0 %v17101_v13  ;;  %v16958_v40 = vld [vmem:[#allocation10 + $0x2c] sm:$0xf0]  ;;  %v17160_v13 = vld [vmem:[#allocation10 + $0x1a0] sm:$0xf] }
 0x611   : > { %v16961_v35 = vor.u32 %v18995_v56, %v16958_v40  ;;  %v17161_v42 = vor.u32 %v19048_v51, %v17160_v13  ;;  %10414 = vmatpush.bf16.msra.mxu1 %v17205_v16  ;;  %v17322_v56 = vld [vmem:[#allocation10 + $0x304] sm:$0xf0]  ;;  %v17292_v16 = vld [vmem:[#allocation10 + $0x2b0] sm:$0xf]  ;;  %v19082_v51 = vld [vmem:[#allocation10 + $0x2c8] sm:$0xf0] }
 0x612   : > { %v17325_v13 = vor.u32 %v19086_v50, %v17322_v56  ;;  %v17293_v1 = vor.u32 %v19082_v51, %v17292_v16  ;;  %v17188_v56 = vld [vmem:[#allocation10 + $0x1d8] sm:$0xf] }
 0x614   : > { %10424 = vmatpush.bf16.msra.mxu2 %v17069_v53  ;;  %10450 = vmatpush.bf16.msrb.mxu0 %v17073_v19  ;;  %v17177_v53 = vor.u32 %v19050_v24, %v17174_v39  ;;  %v17132_v19 = vld [vmem:[#allocation10 + $0x168] sm:$0xf]  ;;  %v17297_v24 = vor.u32 %v19079_v31, %v17294_v54  ;;  %v17264_v39 = vld [vmem:[#allocation10 + $0x278] sm:$0xf] }
 0x615   : > { %v17133_v63 = vor.u32 %v19041_v49, %v17132_v19  ;;  %v17236_v19 = vld [vmem:[#allocation10 + $0x240] sm:$0xf]  ;;  %v19068_v49 = vld [vmem:[#allocation10 + $0x258] sm:$0xf0] }
 0x616   : > { %10415 = vmatpush.bf16.msra.mxu1 %v17177_v53  ;;  %v17237_v23 = vor.u32 %v19068_v49, %v17236_v19  ;;  %v17584_v19 = vld [vmem:[#allocation11 + $0x188] sm:$0xf]  ;;  %v19157_v49 = vld [vmem:[#allocation11 + $0x1a0] sm:$0xf0] }
 0x617   : > { %10377 = vmatmul.bf16.vlgmr.msrb.gmra.mxu2 %v20355_v11  ;;  %10403 = vmatmul.bf16.vlgmr.msra.gmra.mxu0 %v20355_v11 }
 0x618   : > { %10425 = vmatpush.bf16.msra.mxu2 %v17041_v4  ;;  %10451 = vmatpush.bf16.msrb.mxu0 %v17045_v17  ;;  %v17049_v4 = vor.u32 %v19020_v60, %v17048_v62  ;;  %v17020_v17 = vld [vmem:[#allocation10 + $0x88] sm:$0xf]  ;;  %v17209_v60 = vor.u32 %v19061_v43, %v17208_v34 }
 0x619   : > { %v17021_v59 = vor.u32 %v19013_v18, %v17020_v17  ;;  %v17210_v62 = vld [vmem:[#allocation10 + $0x224] sm:$0xf0]  ;;  %v17180_v17 = vld [vmem:[#allocation10 + $0x1d0] sm:$0xf]  ;;  %v19054_v18 = vld [vmem:[#allocation10 + $0x1e8] sm:$0xf0] }
 0x61a   : > { %v17181_v9 = vor.u32 %v19054_v18, %v17180_v17  ;;  %v17558_v17 = vld [vmem:[#allocation11 + $0x16c] sm:$0xf0]  ;;  %v17564_v18 = vld [vmem:[#allocation11 + $0x158] sm:$0xf] }
 0x61c   : > { %10426 = vmatpush.bf16.msra.mxu2 %v17013_v6  ;;  %10452 = vmatpush.bf16.msrb.mxu0 %v17017_v3  ;;  %v19100_v6 = vld [vmem:[#allocation10 + $0x35c] sm:$0xf]  ;;  %v17378_v3 = vld [vmem:[#allocation10 + $0x374] sm:$0xf0] }
 0x61d   : > { %v17381_v32 = vor.u32 %v19100_v6, %v17378_v3  ;;  %v17328_v3 = vld [vmem:[#allocation10 + $0x2f0] sm:$0xf] }
 0x620   : > { %10427 = vmatpush.bf16.msra.mxu2 %v16985_v48  ;;  %10453 = vmatpush.bf16.msrb.mxu0 %v16989_v52  ;;  %v17353_v48 = vor.u32 %v19093_v10, %v17350_v25  ;;  %v19089_v52 = vld [vmem:[#allocation10 + $0x300] sm:$0xf0]  ;;  %v19076_v10 = vld [vmem:[#allocation10 + $0x298] sm:$0xf0] }
 0x621   : > { %v17273_v25 = vor.u32 %v19076_v10, %v17272_v58  ;;  %v17500_v58 = vld [vmem:[#allocation11 + $0xe0] sm:$0xf]  ;;  %v19136_v10 = vld [vmem:[#allocation11 + $0xf8] sm:$0xf0] }
 0x624   : > { %10428 = vmatpush.bf16.msra.mxu2 %v16957_v21  ;;  %10454 = vmatpush.bf16.msrb.mxu0 %v16961_v35  ;;  %v19075_v21 = vld [vmem:[#allocation10 + $0x290] sm:$0xf0]  ;;  %v19072_v35 = vld [vmem:[#allocation10 + $0x27c] sm:$0xf] }
 0x627   : > { %10429 = vmatmul.bf16.vlgmr.msra.gmra.mxu2 %v20355_v11  ;;  %10455 = vmatmul.bf16.vlgmr.msrb.gmra.mxu0 %v20355_v11 }
 0x628   : > { %10473 = vmatpush.bf16.msrb.mxu2 %v17161_v42  ;;  %v17266_v42 = vld [vmem:[#allocation10 + $0x294] sm:$0xf0] }
 0x629   : > { %v17269_v53 = vor.u32 %v19072_v35, %v17266_v42 }
 0x62c   : > { %10474 = vmatpush.bf16.msrb.mxu2 %v17133_v63  ;;  %v19065_v63 = vld [vmem:[#allocation10 + $0x244] sm:$0xf] }
 0x630   : > { %10475 = vmatpush.bf16.msrb.mxu2 %v17105_v29  ;;  %v17241_v29 = vor.u32 %v19065_v63, %v17238_v15  ;;  %v19154_v63 = vld [vmem:[#allocation11 + $0x18c] sm:$0xf]  ;;  %v17586_v15 = vld [vmem:[#allocation11 + $0x1a4] sm:$0xf0] }
 0x631   : > { %v17589_v34 = vor.u32 %v19154_v63, %v17586_v15  ;;  %v19130_v63 = vld [vmem:[#allocation11 + $0xc8] sm:$0xf0]  ;;  %v19148_v15 = vld [vmem:[#allocation11 + $0x15c] sm:$0xf] }
 0x634   : > { %10476 = vmatpush.bf16.msrb.mxu2 %v17077_v61  ;;  %v19058_v61 = vld [vmem:[#allocation10 + $0x20c] sm:$0xf] }
 0x638   : > { %10477 = vmatpush.bf16.msrb.mxu2 %v17049_v4  ;;  %v17213_v4 = vor.u32 %v19058_v61, %v17210_v62  ;;  %v17556_v61 = vld [vmem:[#allocation11 + $0x150] sm:$0xf]  ;;  %v19150_v62 = vld [vmem:[#allocation11 + $0x168] sm:$0xf0] }
 0x63c   : > { %10478 = vmatpush.bf16.msrb.mxu2 %v17021_v59  ;;  %v19051_v59 = vld [vmem:[#allocation10 + $0x1d4] sm:$0xf] }
 0x63d   : > { %v17185_v27 = vor.u32 %v19051_v59, %v17182_v26  ;;  %v19151_v59 = vld [vmem:[#allocation11 + $0x170] sm:$0xf0] }
 0x640   : > { %10479 = vmatpush.bf16.msrb.mxu2 %v16993_v33  ;;  %v19104_v33 = vld [vmem:[#allocation10 + $0x378] sm:$0xf0] }
 0x641   : > { %v17385_v36 = vor.u32 %v19104_v33, %v17384_v5  ;;  %v17565_v33 = vor.u32 %v19151_v59, %v17564_v18  ;;  %v19123_v18 = vld [vmem:[#allocation11 + $0x90] sm:$0xf0] }
 0x642   : > { %v9607_v28 = vpop.f32.mrf.mxu1 }
 0x643   : > { %v9608_v30 = vadd.f32 %v9607_v28, %v20352_v12  ;;  %v17320_v12 = vld [vmem:[#allocation10 + $0x2e8] sm:$0xf]  ;;  %v19097_v28 = vld [vmem:[#allocation10 + $0x340] sm:$0xf0] }
 0x644   : > { %10480 = vmatpush.bf16.msrb.mxu2 %v16965_v37  ;;  %v17321_v40 = vor.u32 %v19089_v52, %v17320_v12  ;;  %v17357_v6 = vor.u32 %v19097_v28, %v17356_v20  ;;  %v17216_v52 = vld [vmem:[#allocation10 + $0x210] sm:$0xf]  ;;  %v17530_v28 = vld [vmem:[#allocation11 + $0x134] sm:$0xf0] }
 0x645   : > { %v20364_v44 = vpack.c.bf16 %v9608_v30, %v9608_v30  ;;  %v19090_v30 = vld [vmem:[#allocation10 + $0x308] sm:$0xf0] }
 0x646   : > { %v17329_v37 = vor.u32 %v19090_v30, %v17328_v3  ;;  %v19144_v3 = vld [vmem:[#allocation11 + $0x138] sm:$0xf0] }
 0x647   : > { %10338 = vmatmul.bf16.vlgmr.msra.gmra.mxu3 %v20364_v44  ;;  %10364 = vmatmul.bf16.vlgmr.msrb.gmra.mxu1 %v20364_v44 }
 0x648   : > { %10434 = vmatpush.bf16.msra.mxu3 %v17377_v57  ;;  %10460 = vmatpush.bf16.msrb.mxu1 %v17381_v32  ;;  %v17300_v57 = vld [vmem:[#allocation10 + $0x2b8] sm:$0xf]  ;;  %v19083_v32 = vld [vmem:[#allocation10 + $0x2d0] sm:$0xf0] }
 0x649   : > { %10481 = vmatmul.bf16.vlgmr.msrb.gmra.mxu2 %v20355_v11  ;;  %v17265_v11 = vor.u32 %v19075_v21, %v17264_v39  ;;  %v17301_v47 = vor.u32 %v19083_v32, %v17300_v57 }
 0x64a   : > { %v9609_v55 = vpop.f32.mrf.mxu1 }
 0x64b   : > { %v19062_v55 = vld [vmem:[#allocation10 + $0x228] sm:$0xf0] }
 0x64c   : > { %10435 = vmatpush.bf16.msra.mxu3 %v17349_v22  ;;  %10461 = vmatpush.bf16.msrb.mxu1 %v17353_v48  ;;  %v17244_v22 = vld [vmem:[#allocation10 + $0x248] sm:$0xf]  ;;  %v19069_v48 = vld [vmem:[#allocation10 + $0x260] sm:$0xf0]  ;;  %v17217_v50 = vor.u32 %v19062_v55, %v17216_v52 }
 0x64d   : > { %v17245_v12 = vor.u32 %v19069_v48, %v17244_v22  ;;  %v17501_v22 = vor.u32 %v19136_v10, %v17500_v58  ;;  %v17502_v48 = vld [vmem:[#allocation11 + $0xfc] sm:$0xf0]  ;;  %v19137_v52 = vld [vmem:[#allocation11 + $0x100] sm:$0xf0]  ;;  %v19134_v58 = vld [vmem:[#allocation11 + $0xec] sm:$0xf] }
 0x650   : > { %10436 = vmatpush.bf16.msra.mxu3 %v17321_v40  ;;  %10462 = vmatpush.bf16.msrb.mxu1 %v17325_v13  ;;  %v19055_v40 = vld [vmem:[#allocation10 + $0x1f0] sm:$0xf0] }
 0x651   : > { %v17189_v13 = vor.u32 %v19055_v40, %v17188_v56 }
 0x654   : > { %10437 = vmatpush.bf16.msra.mxu3 %v17293_v1  ;;  %10463 = vmatpush.bf16.msrb.mxu1 %v17297_v24 }
 0x657   : > { %10390 = vmatmul.bf16.vlgmr.msrb.gmra.mxu3 %v20364_v44  ;;  %10416 = vmatmul.bf16.vlgmr.msra.gmra.mxu1 %v20364_v44 }
 0x658   : > { %10438 = vmatpush.bf16.msra.mxu3 %v17265_v11  ;;  %10464 = vmatpush.bf16.msrb.mxu1 %v17269_v53 }
 0x65c   : > { %10439 = vmatpush.bf16.msra.mxu3 %v17237_v23  ;;  %10465 = vmatpush.bf16.msrb.mxu1 %v17241_v29  ;;  %v17592_v23 = vld [vmem:[#allocation11 + $0x190] sm:$0xf]  ;;  %v19158_v29 = vld [vmem:[#allocation11 + $0x1a8] sm:$0xf0] }
 0x65d   : > { %v17593_v43 = vor.u32 %v19158_v29, %v17592_v23  ;;  %v17566_v23 = vld [vmem:[#allocation11 + $0x174] sm:$0xf0] }
 0x65e   : > { %v17569_v29 = vor.u32 %v19148_v15, %v17566_v23  ;;  %v17608_v15 = vld [vmem:[#allocation11 + $0x1a0] sm:$0xf]  ;;  %v19160_v23 = vld [vmem:[#allocation11 + $0x1b8] sm:$0xf0] }
 0x65f   : > { %10884 = vmatpush.bf16.msra.mxu2 %v17593_v43  ;;  %v17444_v43 = vld [vmem:[#allocation11 + $0x70] sm:$0xf] }
 0x660   : > { %10440 = vmatpush.bf16.msra.mxu3 %v17209_v60  ;;  %10466 = vmatpush.bf16.msrb.mxu1 %v17213_v4  ;;  %v19147_v60 = vld [vmem:[#allocation11 + $0x154] sm:$0xf]  ;;  %v17557_v4 = vor.u32 %v19150_v62, %v17556_v61  ;;  %v19122_v61 = vld [vmem:[#allocation11 + $0x88] sm:$0xf0] }
 0x661   : > { %v17561_v5 = vor.u32 %v19147_v60, %v17558_v17  ;;  %v19119_v62 = vld [vmem:[#allocation11 + $0x74] sm:$0xf]  ;;  %v17445_v60 = vor.u32 %v19122_v61, %v17444_v43  ;;  %v17452_v17 = vld [vmem:[#allocation11 + $0x78] sm:$0xf]  ;;  %v19120_v43 = vld [vmem:[#allocation11 + $0x7c] sm:$0xf] }
 0x662   : > { %v17454_v61 = vld [vmem:[#allocation11 + $0x94] sm:$0xf0] }
 0x663   : > { %10885 = vmatpush.bf16.msra.mxu2 %v17565_v33  ;;  %v17538_v33 = vld [vmem:[#allocation11 + $0x13c] sm:$0xf0] }
 0x664   : > { %10441 = vmatpush.bf16.msra.mxu3 %v17181_v9  ;;  %10467 = vmatpush.bf16.msrb.mxu1 %v17185_v27  ;;  %v17528_v9 = vld [vmem:[#allocation11 + $0x118] sm:$0xf]  ;;  %v19143_v27 = vld [vmem:[#allocation11 + $0x130] sm:$0xf0] }
 0x665   : > { %v17529_v20 = vor.u32 %v19143_v27, %v17528_v9  ;;  %v17416_v9 = vld [vmem:[#allocation11 + $0x38] sm:$0xf] }
 0x667   : > { %10442 = vmatmul.bf16.vlgmr.msra.gmra.mxu3 %v20364_v44  ;;  %10468 = vmatmul.bf16.vlgmr.msrb.gmra.mxu1 %v20364_v44 }
 0x668   : > { %10486 = vmatpush.bf16.msrb.mxu3 %v17385_v36  ;;  %10871 = vmatpush.bf16.msra.mxu1 %v17589_v34  ;;  %v19140_v36 = vld [vmem:[#allocation11 + $0x11c] sm:$0xf] }
 0x669   : > { %v17533_v30 = vor.u32 %v19140_v36, %v17530_v28  ;;  %v19115_v28 = vld [vmem:[#allocation11 + $0x50] sm:$0xf0] }
 0x66c   : > { %10487 = vmatpush.bf16.msrb.mxu3 %v17357_v6  ;;  %10872 = vmatpush.bf16.msra.mxu1 %v17561_v5  ;;  %v17536_v6 = vld [vmem:[#allocation11 + $0x120] sm:$0xf]  ;;  %v19141_v5 = vld [vmem:[#allocation11 + $0x124] sm:$0xf] }
 0x670   : > { %10488 = vmatpush.bf16.msrb.mxu3 %v17329_v37  ;;  %v17537_v37 = vor.u32 %v19144_v3, %v17536_v6  ;;  %10873 = vmatpush.bf16.msra.mxu1 %v17533_v30  ;;  %v19112_v6 = vld [vmem:[#allocation11 + $0x3c] sm:$0xf]  ;;  %v17418_v3 = vld [vmem:[#allocation11 + $0x54] sm:$0xf0]  ;;  %v17417_v30 = vor.u32 %v19115_v28, %v17416_v9  ;;  %v19153_v9 = vld [vmem:[#allocation11 + $0x180] sm:$0xf0] }
 0x671   : > { %v17421_v10 = vor.u32 %v19112_v6, %v17418_v3  ;;  %v17426_v28 = vld [vmem:[#allocation11 + $0x5c] sm:$0xf0]  ;;  %v17544_v6 = vld [vmem:[#allocation11 + $0x128] sm:$0xf] }
 0x672   : > { %10886 = vmatpush.bf16.msra.mxu2 %v17537_v37  ;;  %v17424_v37 = vld [vmem:[#allocation11 + $0x40] sm:$0xf] }
 0x674   : > { %10489 = vmatpush.bf16.msrb.mxu3 %v17301_v47 }
 0x678   : > { %10490 = vmatpush.bf16.msrb.mxu3 %v17273_v25  ;;  %v19133_v25 = vld [vmem:[#allocation11 + $0xe4] sm:$0xf] }
 0x679   : > { %v17505_v40 = vor.u32 %v19133_v25, %v17502_v48  ;;  %v17388_v48 = vld [vmem:[#allocation11] sm:$0xf] }
 0x67b   : > { %10874 = vmatpush.bf16.msra.mxu1 %v17505_v40  ;;  %v17390_v40 = vld [vmem:[#allocation11 + $0x1c] sm:$0xf0] }
 0x67c   : > { %10491 = vmatpush.bf16.msrb.mxu3 %v17245_v12  ;;  %v17508_v12 = vld [vmem:[#allocation11 + $0xe8] sm:$0xf] }
 0x680   : > { %10492 = vmatpush.bf16.msrb.mxu3 %v17217_v50 }
 0x684   : > { %10493 = vmatpush.bf16.msrb.mxu3 %v17189_v13  ;;  %v10352_v16 = vpop.f32.mrf.mxu0  ;;  %v17509_v13 = vor.u32 %v19137_v52, %v17508_v12  ;;  %v19108_v12 = vld [vmem:[#allocation11 + $0x18] sm:$0xf0] }
 0x686   : > { %10887 = vmatpush.bf16.msra.mxu2 %v17509_v13  ;;  %v17396_v13 = vld [vmem:[#allocation11 + $0x8] sm:$0xf] }
 0x687   : > { %10494 = vmatmul.bf16.vlgmr.msrb.gmra.mxu3 %v20364_v44  ;;  %v17585_v44 = vor.u32 %v19157_v49, %v17584_v19  ;;  %v17480_v49 = vld [vmem:[#allocation11 + $0xb0] sm:$0xf] }
 0x689   : > { %10858 = vmatpush.bf16.msra.mxu0 %v17585_v44  ;;  %v17481_v44 = vor.u32 %v19130_v63, %v17480_v49 }
 0x68a   : > { %v10326_v51 = vpop.f32.mrf.mxu2 }
 0x68b   : > { %10888 = vmatpush.bf16.msra.mxu2 %v17481_v44  ;;  %v17602_v44 = vld [vmem:[#allocation11 + $0x1b4] sm:$0xf0] }
 0x68c   : > { %v10354_v31 = vpop.f32.mrf.mxu0 }
 0x68d   : > { %10859 = vmatpush.bf16.msra.mxu0 %v17557_v4  ;;  %v17472_v31 = vld [vmem:[#allocation11 + $0xa8] sm:$0xf]  ;;  %v17446_v4 = vld [vmem:[#allocation11 + $0x8c] sm:$0xf0] }
 0x68e   : > { %v17449_v59 = vor.u32 %v19119_v62, %v17446_v4 }
 0x691   : > { %10860 = vmatpush.bf16.msra.mxu0 %v17529_v20  ;;  %v17541_v20 = vor.u32 %v19141_v5, %v17538_v33  ;;  %v17574_v5 = vld [vmem:[#allocation11 + $0x17c] sm:$0xf0]  ;;  %v17580_v33 = vld [vmem:[#allocation11 + $0x168] sm:$0xf] }
 0x692   : > { %v10328_v54 = vpop.f32.mrf.mxu2 }
 0x694   : > { %v20374_v1 = vpop.f32.mrf.mxu0 }
 0x695   : > { %10861 = vmatpush.bf16.msra.mxu0 %v17501_v22  ;;  %v17510_v22 = vld [vmem:[#allocation11 + $0x104] sm:$0xf0] }
 0x696   : > { %v17513_v52 = vor.u32 %v19134_v58, %v17510_v22  ;;  %v17546_v58 = vld [vmem:[#allocation11 + $0x144] sm:$0xf0]  ;;  %v17552_v22 = vld [vmem:[#allocation11 + $0x130] sm:$0xf] }
 0x69a   : > { %v20376_v24 = vpop.f32.mrf.mxu2 }
 0x69c   : > { %v10406_v39 = vpop.f32.mrf.mxu0 }
 0x69d   : > { %v19129_v39 = vld [vmem:[#allocation11 + $0xc0] sm:$0xf0] }
 0x6a2   : > { %v10380_v21 = vpop.f32.mrf.mxu2 }
 0x6a3   : > { %v19126_v21 = vld [vmem:[#allocation11 + $0xac] sm:$0xf] }
 0x6a4   : > { %v20378_v35 = vpop.f32.mrf.mxu0 }
 0x6aa   : > { %v20380_v42 = vpop.f32.mrf.mxu2 }
 0x6ac   : > { %v10458_v11 = vpop.f32.mrf.mxu0 }
 0x6ad   : > { %v17474_v11 = vld [vmem:[#allocation11 + $0xc4] sm:$0xf0] }
 0x6ae   : > { %v17477_v19 = vor.u32 %v19126_v21, %v17474_v11  ;;  %v17600_v21 = vld [vmem:[#allocation11 + $0x198] sm:$0xf]  ;;  %v19159_v11 = vld [vmem:[#allocation11 + $0x1b0] sm:$0xf0] }
 0x6b0   : > { %10875 = vmatpush.bf16.msra.mxu1 %v17477_v19 }
 0x6b2   : > { %v10432_v53 = vpop.f32.mrf.mxu2 }
 0x6b3   : > { %v17473_v53 = vor.u32 %v19129_v39, %v17472_v31  ;;  %v17482_v31 = vld [vmem:[#allocation11 + $0xcc] sm:$0xf0]  ;;  %v17389_v39 = vor.u32 %v19108_v12, %v17388_v48  ;;  %v19146_v48 = vld [vmem:[#allocation11 + $0x148] sm:$0xf0] }
 0x6b4   : > { %10876 = vmatpush.bf16.msra.mxu1 %v17449_v59  ;;  %v19152_v59 = vld [vmem:[#allocation11 + $0x178] sm:$0xf0]  ;;  %v17553_v12 = vor.u32 %v19146_v48, %v17552_v22  ;;  %v19111_v22 = vld [vmem:[#allocation11 + $0x30] sm:$0xf0] }
 0x6b5   : > { %10862 = vmatpush.bf16.msra.mxu0 %v17473_v53  ;;  %v19156_v53 = vld [vmem:[#allocation11 + $0x19c] sm:$0xf] }
 0x6b6   : > { %v17605_v4 = vor.u32 %v19156_v53, %v17602_v44  ;;  %v19139_v53 = vld [vmem:[#allocation11 + $0x110] sm:$0xf0] }
 0x6b8   : > { %10877 = vmatpush.bf16.msra.mxu1 %v17421_v10 }
 0x6b9   : > { %10863 = vmatpush.bf16.msra.mxu0 %v17445_v60 }
 0x6bd   : > { %10864 = vmatpush.bf16.msra.mxu0 %v17417_v30 }
 0x6c1   : > { %10865 = vmatpush.bf16.msra.mxu0 %v17389_v39 }
 0x6c4   : > { %v10365_v26 = vpop.f32.mrf.mxu1 }
 0x6c5   : > { %v20382_v32 = vadd.f32 %v10365_v26, %v10352_v16  ;;  %v19155_v16 = vld [vmem:[#allocation11 + $0x194] sm:$0xf]  ;;  %v17453_v26 = vor.u32 %v19123_v18, %v17452_v17  ;;  %v17609_v17 = vor.u32 %v19160_v23, %v17608_v15  ;;  %v17572_v18 = vld [vmem:[#allocation11 + $0x160] sm:$0xf]  ;;  %v17488_v23 = vld [vmem:[#allocation11 + $0xb8] sm:$0xf] }
 0x6c7   : > { %10889 = vmatpush.bf16.msra.mxu2 %v17453_v26  ;;  %v19149_v26 = vld [vmem:[#allocation11 + $0x164] sm:$0xf] }
 0x6ca   : > { %v10339_v57 = vpop.f32.mrf.mxu3 }
 0x6cb   : > { %v20384_v47 = vadd.f32 %v10339_v57, %v10326_v51  ;;  %v17594_v51 = vld [vmem:[#allocation11 + $0x1ac] sm:$0xf0]  ;;  %v19116_v57 = vld [vmem:[#allocation11 + $0x58] sm:$0xf0] }
 0x6cc   : > { %v10367_v50 = vpop.f32.mrf.mxu1  ;;  %v20388_v56 = vpop.f32.mrf.mxu2  ;;  %v17597_v54 = vor.u32 %v19155_v16, %v17594_v51  ;;  %v17425_v25 = vor.u32 %v19116_v57, %v17424_v37  ;;  %v19109_v16 = vld [vmem:[#allocation11 + $0x20] sm:$0xf0]  ;;  %v19127_v51 = vld [vmem:[#allocation11 + $0xb4] sm:$0xf]  ;;  %v19142_v57 = vld [vmem:[#allocation11 + $0x12c] sm:$0xf] }
 0x6cd   : > { %v10499_v55 = vmax.f32 %v20384_v47, %v20382_v32  ;;  %v19105_v50 = vld [vmem:[#allocation11 + $0x4] sm:$0xf]  ;;  %v17397_v63 = vor.u32 %v19109_v16, %v17396_v13  ;;  %v17577_v32 = vor.u32 %v19149_v26, %v17574_v5  ;;  %v17581_v47 = vor.u32 %v19153_v9, %v17580_v33  ;;  %v19138_v16 = vld [vmem:[#allocation11 + $0x108] sm:$0xf0]  ;;  %v17468_v5 = vld [vmem:[#allocation11 + $0x88] sm:$0xf] }
 0x6ce   : > { %10897 = vmatpush.bf16.msra.mxu3 %v17597_v54  ;;  %10890 = vmatpush.bf16.msra.mxu2 %v17425_v25  ;;  %v17393_v49 = vor.u32 %v19105_v50, %v17390_v40  ;;  %v19145_v37 = vld [vmem:[#allocation11 + $0x140] sm:$0xf0]  ;;  %v17549_v25 = vor.u32 %v19142_v57, %v17546_v58  ;;  %v17398_v50 = vld [vmem:[#allocation11 + $0x24] sm:$0xf0]  ;;  %v17516_v40 = vld [vmem:[#allocation11 + $0xf0] sm:$0xf] }
 0x6cf   : > { %v17545_v10 = vor.u32 %v19145_v37, %v17544_v6  ;;  %v17517_v39 = vor.u32 %v19138_v16, %v17516_v40  ;;  %v19125_v33 = vld [vmem:[#allocation11 + $0xa0] sm:$0xf0]  ;;  %v17404_v37 = vld [vmem:[#allocation11 + $0x10] sm:$0xf]  ;;  %v19110_v57 = vld [vmem:[#allocation11 + $0x28] sm:$0xf0] }
 0x6d0   : > { %10878 = vmatpush.bf16.msra.mxu1 %v17393_v49  ;;  %v19107_v58 = vld [vmem:[#allocation11 + $0x14] sm:$0xf]  ;;  %v17405_v48 = vor.u32 %v19110_v57, %v17404_v37  ;;  %v20431_v37 = vld [vmem:[#allocation13 + $0x148] sm:$0x11] }
 0x6d2   : > { %v10341_v34 = vpop.f32.mrf.mxu3  ;;  %10898 = vmatpush.bf16.msra.mxu3 %v17569_v29  ;;  %v17485_v29 = vor.u32 %v19127_v51, %v17482_v31  ;;  %10891 = vmatpush.bf16.msra.mxu2 %v17397_v63  ;;  %v19135_v51 = vld [vmem:[#allocation11 + $0xf4] sm:$0xf]  ;;  %v17518_v31 = vld [vmem:[#allocation11 + $0x10c] sm:$0xf0] }
 0x6d3   : > { %v17601_v34 = vor.u32 %v19159_v11, %v17600_v21  ;;  %v17521_v21 = vor.u32 %v19135_v51, %v17518_v31  ;;  %v17524_v11 = vld [vmem:[#allocation11 + $0xf8] sm:$0xf] }
 0x6d4   : > { %v10417_v27 = vpop.f32.mrf.mxu1  ;;  %v10484_v36 = vpop.f32.mrf.mxu2  ;;  %10923 = vmatpush.bf16.msrb.mxu1 %v17605_v4  ;;  %v17525_v49 = vor.u32 %v19139_v53, %v17524_v11 }
 0x6d5   : > { %v20392_v62 = vadd.f32 %v10417_v27, %v20374_v1  ;;  %10910 = vmatpush.bf16.msrb.mxu0 %v17601_v34  ;;  %v17457_v1 = vor.u32 %v19120_v43, %v17454_v61  ;;  %v17573_v27 = vor.u32 %v19152_v59, %v17572_v18  ;;  %v19128_v34 = vld [vmem:[#allocation11 + $0xbc] sm:$0xf]  ;;  %v17490_v61 = vld [vmem:[#allocation11 + $0xd4] sm:$0xf0]  ;;  %v19121_v59 = vld [vmem:[#allocation11 + $0x84] sm:$0xf] }
 0x6d6   : > { %10899 = vmatpush.bf16.msra.mxu3 %v17541_v20  ;;  %10936 = vmatpush.bf16.msrb.mxu2 %v17609_v17  ;;  %v19113_v20 = vld [vmem:[#allocation11 + $0x44] sm:$0xf]  ;;  %v17493_v4 = vor.u32 %v19128_v34, %v17490_v61  ;;  %v19124_v18 = vld [vmem:[#allocation11 + $0x98] sm:$0xf0] }
 0x6d7   : > { %v17429_v30 = vor.u32 %v19113_v20, %v17426_v28  ;;  %v17440_v20 = vld [vmem:[#allocation11 + $0x50] sm:$0xf]  ;;  %v19118_v28 = vld [vmem:[#allocation11 + $0x68] sm:$0xf0] }
 0x6d8   : > { %10924 = vmatpush.bf16.msrb.mxu1 %v17577_v32  ;;  %v19114_v32 = vld [vmem:[#allocation11 + $0x4c] sm:$0xf] }
 0x6d9   : > { %10911 = vmatpush.bf16.msrb.mxu0 %v17573_v27  ;;  %v19117_v27 = vld [vmem:[#allocation11 + $0x60] sm:$0xf0] }
 0x6da   : > { %v10391_v54 = vpop.f32.mrf.mxu3  ;;  %10900 = vmatpush.bf16.msra.mxu3 %v17513_v52  ;;  %10937 = vmatpush.bf16.msrb.mxu2 %v17581_v47  ;;  %v19106_v52 = vld [vmem:[#allocation11 + $0xc] sm:$0xf] }
 0x6db   : > { %v10392_v19 = vadd.f32 %v10391_v54, %v20376_v24  ;;  %v17401_v13 = vor.u32 %v19106_v52, %v17398_v50 }
 0x6dc   : > { %v10419_v24 = vpop.f32.mrf.mxu1  ;;  %10925 = vmatpush.bf16.msrb.mxu1 %v17549_v25  ;;  %v17412_v25 = vld [vmem:[#allocation11 + $0x18] sm:$0xf] }
 0x6dd   : > { %v10500_v60 = vmax.f32 %v10499_v55, %v10392_v19  ;;  %10912 = vmatpush.bf16.msrb.mxu0 %v17545_v10  ;;  %v17406_v10 = vld [vmem:[#allocation11 + $0x2c] sm:$0xf0]  ;;  %v17413_v52 = vor.u32 %v19111_v22, %v17412_v25  ;;  %v20435_v25 = vsel %vm11362_vm4, 65535, %v19765_v0 }
 0x6de   : > { %10901 = vmatpush.bf16.msra.mxu3 %v17485_v29  ;;  %10938 = vmatpush.bf16.msrb.mxu2 %v17553_v12  ;;  %v19131_v29 = vld [vmem:[#allocation11 + $0xd0] sm:$0xf0]  ;;  %v17409_v12 = vor.u32 %v19107_v58, %v17406_v10  ;;  %v11264_v10 = vunpack.c.l.b16 %v20431_v37 }
 0x6df   : > { %v10501_v36 = vmax.f32 %v10500_v60, %v20392_v62  ;;  %v17489_v43 = vor.u32 %v19131_v29, %v17488_v23  ;;  %v17496_v62 = vld [vmem:[#allocation11 + $0xc0] sm:$0xf]  ;;  %v19132_v60 = vld [vmem:[#allocation11 + $0xd8] sm:$0xf0] }
 0x6e0   : > { %10926 = vmatpush.bf16.msrb.mxu1 %v17521_v21  ;;  %v17497_v17 = vor.u32 %v19132_v60, %v17496_v62 }
 0x6e1   : > { %10913 = vmatpush.bf16.msrb.mxu0 %v17517_v39 }
 0x6e2   : > { %v10393_v55 = vpop.f32.mrf.mxu3  ;;  %10902 = vmatpush.bf16.msra.mxu3 %v17457_v1  ;;  %10939 = vmatpush.bf16.msrb.mxu2 %v17525_v49  ;;  %v17432_v1 = vld [vmem:[#allocation11 + $0x48] sm:$0xf] }
 0x6e3   : > { %v17434_v55 = vld [vmem:[#allocation11 + $0x64] sm:$0xf0]  ;;  %v17433_v6 = vor.u32 %v19117_v27, %v17432_v1 }
 0x6e4   : > { %v10469_v3 = vpop.f32.mrf.mxu1  ;;  %10927 = vmatpush.bf16.msrb.mxu1 %v17493_v4 }
 0x6e5   : > { %v10470_v63 = vadd.f32 %v10469_v3, %v20378_v35  ;;  %10914 = vmatpush.bf16.msrb.mxu0 %v17489_v43  ;;  %v17462_v35 = vld [vmem:[#allocation11 + $0x9c] sm:$0xf0]  ;;  %v17437_v3 = vor.u32 %v19114_v32, %v17434_v55 }
 0x6e6   : > { %10903 = vmatpush.bf16.msra.mxu3 %v17429_v30  ;;  %10940 = vmatpush.bf16.msrb.mxu2 %v17497_v17  ;;  %v17465_v9 = vor.u32 %v19121_v59, %v17462_v35  ;;  %v17441_v30 = vor.u32 %v19118_v28, %v17440_v20  ;;  %v19161_v17 = vld [vmem:[%s20781_s8] sm:$0xff]  ;;  %v11519_v59 = vsel %vm9578_vm1, %v20082_v46, 0  ;;  %v19163_v35 = vld [vmem:[%s20781_s8 + $0x10] sm:$0xff] }
 0x6e7   : > { %v10964_v46 = vld [vmem:[%s20781_s8 + $0x20] sm:$0xf] }
 0x6e8   : > { %10928 = vmatpush.bf16.msrb.mxu1 %v17465_v9 }
 0x6ea   : > { %v10443_v54 = vpop.f32.mrf.mxu3  ;;  %10904 = vmatpush.bf16.msra.mxu3 %v17401_v13 }
 0x6eb   : > { %v10444_v19 = vadd.f32 %v10443_v54, %v20380_v42  ;;  %v17460_v42 = vld [vmem:[#allocation11 + $0x80] sm:$0xf] }
 0x6ec   : > { %v10471_v15 = vpop.f32.mrf.mxu1  ;;  %v17461_v26 = vor.u32 %v19124_v18, %v17460_v42  ;;  %10929 = vmatpush.bf16.msrb.mxu1 %v17437_v3  ;;  %v11507_v42 = vsel %vm9578_vm1, %v20066_v45, 0  ;;  %v19164_v45 = vld [vmem:[%s20781_s8 + $0x18] sm:$0xff] }
 0x6ed   : > { %v10502_v44 = vmax.f32 %v10501_v36, %v10444_v19  ;;  %v17469_v36 = vor.u32 %v19125_v33, %v17468_v5  ;;  %v10982_v5 = vunpack.c.l.b16 %v10964_v46  ;;  %v17673_v46 = vld [vmem:[#allocation13 + $0x48] sm:$0xf] }
 0x6ee   : > { %10915 = vmatpush.bf16.msrb.mxu0 %v17461_v26  ;;  %v19162_v26 = vld [vmem:[%s20781_s8 + $0x8] sm:$0xff] }
 0x6ef   : > { %v10503_v24 = vmax.f32 %v10502_v44, %v10470_v63  ;;  %10941 = vmatpush.bf16.msrb.mxu2 %v17469_v36  ;;  %v10987_v33 = vpack.c.b16 %v10982_v5, %v10982_v5  ;;  %v19178_v5 = vld [vmem:[#allocation13 + $0x64] sm:$0xf0] }
 0x6f0   : > { %10930 = vmatpush.bf16.msrb.mxu1 %v17409_v12  ;;  %v11312_v12 = vpack.c.b16 %v11264_v10, %v11264_v10 }
 0x6f2   : > { %v10445_v47 = vpop.f32.mrf.mxu3  ;;  %10916 = vmatpush.bf16.msrb.mxu0 %v17433_v6  ;;  %v11649_v6 = vld [vmem:[%s20787_s14] sm:$0xff] }
 0x6f3   : > { %10942 = vmatpush.bf16.msrb.mxu2 %v17441_v30  ;;  %v11128_v30 = vld [vmem:[#allocation13 + $0x140] sm:$0x11] }
 0x6f4   : > { %v11262_v57 = vunpack.c.l.b16 %v11128_v30  ;;  %v11263_v58 = vunpack.c.h.b16 %v11128_v30 }
 0x6f6   : > { %10917 = vmatpush.bf16.msrb.mxu0 %v17405_v48  ;;  %v11310_v22 = vpack.c.b16 %v11262_v57, %v11262_v57  ;;  %v11311_v48 = vpack.c.b16 %v11263_v58, %v11263_v58  ;;  %v11130_v58 = vld [vmem:[#allocation13 + $0x150] sm:$0x11] }
 0x6f7   : > { %10943 = vmatpush.bf16.msrb.mxu2 %v17413_v52  ;;  %v17761_v52 = vld [vmem:[#allocation13 + $0x100] sm:$0xf]  ;;  %v11266_v10 = vunpack.c.l.b16 %v11130_v58 }
 0x70a   : > { %v10495_v50 = vpop.f32.mrf.mxu3 }
 0x70b   : > { %v10496_v40 = vadd.f32 %v10495_v50, %v20388_v56  ;;  %v19201_v50 = vld [vmem:[#allocation13 + $0x11c] sm:$0xf0] }
 0x70d   : > { %v10504_v13 = vmax.f32 %v10503_v24, %v10496_v40  ;;  %v19197_v40 = vld [vmem:[#allocation13 + $0x104] sm:$0xf] }
 0x70f   : > { %v10505_v16 = vpack.c.bf16 %v10504_v13, %v10504_v13  ;;  %v17763_v13 = vld [vmem:[#allocation13 + $0x120] sm:$0xf0] }
 0x710   : > { %v17766_v0 = vor.u32 %v19197_v40, %v17763_v13  ;;  %v19198_v40 = vld [vmem:[#allocation13 + $0x10c] sm:$0xf] }
 0x711   : > { %10866 = vmatmul.bf16.vlgmr.msra.gmra.mxu0 %v10505_v16  ;;  %10879 = vmatmul.bf16.vlgmr.msra.gmra.mxu1 %v10505_v16  ;;  %v17771_v13 = vld [vmem:[#allocation13 + $0x128] sm:$0xf0] }
 0x712   : > { %10892 = vmatmul.bf16.vlgmr.msra.gmra.mxu2 %v10505_v16  ;;  %10905 = vmatmul.bf16.vlgmr.msra.gmra.mxu3 %v10505_v16  ;;  %v10497_v51 = vpop.f32.mrf.mxu3 }
 0x713   : > { %v11369_v51 = vand.u32 %v20435_v25, %v11311_v48 }
 0x715   : > { %11404 = vmatpush.bf16.msra.mxu1 %v11369_v51  ;;  %v17774_v51 = vor.u32 %v19198_v40, %v17771_v13 }
 0x719   : > { %11405 = vmatpush.bf16.msra.mxu1 %v17766_v0 }
 0x721   : > { %10918 = vmatmul.bf16.vlgmr.msrb.gmra.mxu0 %v10505_v16  ;;  %10931 = vmatmul.bf16.vlgmr.msrb.gmra.mxu1 %v10505_v16 }
 0x722   : > { %10944 = vmatmul.bf16.vlgmr.msrb.gmra.mxu2 %v10505_v16  ;;  %v11366_v16 = vand.u32 %v20435_v25, %v11310_v22  ;;  %v11267_v22 = vunpack.c.h.b16 %v11130_v58  ;;  %v11132_v58 = vld [vmem:[%s20813_s6] sm:$0xff]  ;;  %s12154_s6 = sshll.u32 %s20565_s29, 4  ;;  %s12155_s6 = int_to_ptr.vmem [resolvable:$true] %s12154_s6 }
 0x724   : > { %11391 = vmatpush.bf16.msra.mxu0 %v11366_v16  ;;  %v17777_v16 = vld [vmem:[#allocation13 + $0x110] sm:$0xf] }
 0x78e   : > { %v10867_v31 = vpop.f32.mrf.mxu0  ;;  %v10880_v54 = vpop.f32.mrf.mxu1 }
 0x78f   : > { %v10949_v19 = vmax.f32 %v10867_v31, %v10880_v54  ;;  %v11372_v31 = vand.u32 %v20435_v25, %v11312_v12  ;;  %v17769_v54 = vld [vmem:[#allocation13 + $0x108] sm:$0xf]  ;;  %v11314_v12 = vpack.c.b16 %v11266_v10, %v11266_v10 }
 0x791   : > { %11417 = vmatpush.bf16.msra.mxu2 %v11372_v31  ;;  %v19203_v31 = vld [vmem:[#allocation13 + $0x12c] sm:$0xf0] }
 0x795   : > { %v10893_v39 = vpop.f32.mrf.mxu2  ;;  %v10906_v21 = vpop.f32.mrf.mxu3 }
 0x796   : > { %v10869_v11 = vpop.f32.mrf.mxu0  ;;  %v10882_v53 = vpop.f32.mrf.mxu1  ;;  %v10950_v49 = vmax.f32 %v10949_v19, %v10893_v39  ;;  %v19202_v39 = vld [vmem:[#allocation13 + $0x124] sm:$0xf0]  ;;  %v19193_v19 = vld [vmem:[#allocation13 + $0xdc] sm:$0xf0] }
 0x797   : > { %v17770_v11 = vor.u32 %v19202_v39, %v17769_v54  ;;  %v17729_v53 = vld [vmem:[#allocation13 + $0xc0] sm:$0xf]  ;;  %v19199_v54 = vld [vmem:[#allocation13 + $0x114] sm:$0xf] }
 0x798   : > { %v10951_v44 = vmax.f32 %v10950_v49, %v10906_v21  ;;  %v17762_v21 = vor.u32 %v19201_v50, %v17761_v52  ;;  %v19189_v49 = vld [vmem:[#allocation13 + $0xc4] sm:$0xf]  ;;  %v11315_v52 = vpack.c.b16 %v11267_v22, %v11267_v22  ;;  %v17779_v39 = vld [vmem:[#allocation13 + $0x130] sm:$0xf0] }
 0x799   : > { %11418 = vmatpush.bf16.msra.mxu2 %v17770_v11  ;;  %v17782_v0 = vor.u32 %v19199_v54, %v17779_v39  ;;  %v19190_v11 = vld [vmem:[#allocation13 + $0xcc] sm:$0xf] }
 0x79a   : > { %11392 = vmatpush.bf16.msra.mxu0 %v17762_v21  ;;  %v11381_v50 = vand.u32 %v20435_v25, %v11315_v52  ;;  %v17778_v21 = vor.u32 %v19203_v31, %v17777_v16 }
 0x79d   : > { %v10895_v63 = vpop.f32.mrf.mxu2  ;;  %v10908_v56 = vpop.f32.mrf.mxu3 }
 0x79e   : > { %v10919_v15 = vpop.f32.mrf.mxu0  ;;  %v10932_v23 = vpop.f32.mrf.mxu1  ;;  %v17730_v63 = vor.u32 %v19193_v19, %v17729_v53  ;;  %v17731_v56 = vld [vmem:[#allocation13 + $0xe0] sm:$0xf0]  ;;  %v17739_v53 = vld [vmem:[#allocation13 + $0xe8] sm:$0xf0]  ;;  %v17745_v19 = vld [vmem:[#allocation13 + $0xd0] sm:$0xf] }
 0x79f   : > { %v10952_v29 = vmax.f32 %v10951_v44, %v10919_v15  ;;  %v17737_v44 = vld [vmem:[#allocation13 + $0xc8] sm:$0xf] }
 0x7a0   : > { %v19194_v15 = vld [vmem:[#allocation13 + $0xe4] sm:$0xf0]  ;;  %11393 = vmatpush.bf16.msra.mxu0 %v17730_v63  ;;  %v19191_v63 = vld [vmem:[#allocation13 + $0xd4] sm:$0xf] }
 0x7a1   : > { %v10953_v34 = vmax.f32 %v10952_v29, %v10932_v23  ;;  %v17734_v23 = vor.u32 %v19189_v49, %v17731_v56  ;;  %v17738_v29 = vor.u32 %v19194_v15, %v17737_v44  ;;  %v19195_v49 = vld [vmem:[#allocation13 + $0xec] sm:$0xf0]  ;;  %v17747_v56 = vld [vmem:[#allocation13 + $0xf0] sm:$0xf0]  ;;  %v17742_v44 = vor.u32 %v19190_v11, %v17739_v53  ;;  %v19182_v15 = vld [vmem:[#allocation13 + $0x8c] sm:$0xf] }
 0x7a3   : > { %11406 = vmatpush.bf16.msra.mxu1 %v17734_v23  ;;  %11419 = vmatpush.bf16.msra.mxu2 %v17738_v29  ;;  %v17707_v23 = vld [vmem:[#allocation13 + $0xa8] sm:$0xf0]  ;;  %v17746_v29 = vor.u32 %v19195_v49, %v17745_v19 }
 0x7a5   : > { %v10945_v43 = vpop.f32.mrf.mxu2 }
 0x7a6   : > { %v10954_v61 = vmax.f32 %v10953_v34, %v10945_v43  ;;  %v10921_v62 = vpop.f32.mrf.mxu0  ;;  %v10934_v60 = vpop.f32.mrf.mxu1  ;;  %v17697_v34 = vld [vmem:[#allocation13 + $0x80] sm:$0xf] }
 0x7a7   : > { %v19185_v43 = vld [vmem:[#allocation13 + $0x9c] sm:$0xf0]  ;;  %v17699_v60 = vld [vmem:[#allocation13 + $0xa0] sm:$0xf0] }
 0x7a8   : > { %v10955_v24 = vpack.c.bf16 %v10954_v61, %v10954_v61  ;;  %v19181_v61 = vld [vmem:[#allocation13 + $0x84] sm:$0xf]  ;;  %v17698_v62 = vor.u32 %v19185_v43, %v17697_v34  ;;  %v17750_v34 = vor.u32 %v19191_v63, %v17747_v56  ;;  %v17713_v43 = vld [vmem:[#allocation13 + $0x90] sm:$0xf]  ;;  %v17785_v56 = vld [vmem:[#allocation13 + $0x118] sm:$0xf] }
 0x7aa   : > { %v11005_v4 = vsel %vm9578_vm1, %v10955_v24, 0  ;;  %v17705_v24 = vld [vmem:[#allocation13 + $0x88] sm:$0xf]  ;;  %11394 = vmatpush.bf16.msra.mxu0 %v17698_v62  ;;  %v19187_v62 = vld [vmem:[#allocation13 + $0xac] sm:$0xf0] }
 0x7ab   : > { %11014 = vmatpush.bf16.msrb.mxu3 %v11005_v4  ;;  %v19186_v4 = vld [vmem:[#allocation13 + $0xa4] sm:$0xf0] }
 0x7ad   : > { %v10947_v18 = vpop.f32.mrf.mxu2 }
 0x7ae   : > { %17626 = vmatmul.msk.bf16.vlgmr.msrb.gmra.mxu3 %vm10988_vm3, %v19161_v17  ;;  %v17702_v17 = vor.u32 %v19181_v61, %v17699_v60  ;;  %v17665_v18 = vld [vmem:[#allocation13 + $0x40] sm:$0xf]  ;;  %v19183_v60 = vld [vmem:[#allocation13 + $0x94] sm:$0xf] }
 0x7af   : > { %11547 = vmatpush.bf16.msra.mxu3 %v11507_v42  ;;  %v17706_v42 = vor.u32 %v19186_v4, %v17705_v24  ;;  %v20444_v61 = vld [vmem:[#allocation14] sm:$0xf]  ;;  %v17715_v24 = vld [vmem:[#allocation13 + $0xb0] sm:$0xf0]  ;;  %v17710_v4 = vor.u32 %v19182_v15, %v17707_v23  ;;  %v19200_v15 = vld [vmem:[#allocation13 + $0x11c] sm:$0xf] }
 0x7b0   : > { %11407 = vmatpush.bf16.msra.mxu1 %v17702_v17  ;;  %v19174_v17 = vld [vmem:[#allocation13 + $0x4c] sm:$0xf]  ;;  %v17787_v23 = vld [vmem:[#allocation13 + $0x138] sm:$0xf0] }
 0x7b1   : > { %11420 = vmatpush.bf16.msra.mxu2 %v17706_v42  ;;  %v17675_v42 = vld [vmem:[#allocation13 + $0x68] sm:$0xf0] }
 0x7b3   : > { %11599 = vmatpush.bf16.msrb.mxu3 %v11519_v59  ;;  %v19177_v59 = vld [vmem:[#allocation13 + $0x5c] sm:$0xf0] }
 0x7be   : > { %17627 = vmatmul.msk.bf16.gmra.mxu3 %vm10988_vm3, %v19162_v26  ;;  %v19173_v26 = vld [vmem:[#allocation13 + $0x44] sm:$0xf] }
 0x7ce   : > { %17628 = vmatmul.msk.bf16.gmra.mxu3 %vm10988_vm3, %v19163_v35  ;;  %v17666_v35 = vor.u32 %v19177_v59, %v17665_v18  ;;  %v17714_v18 = vor.u32 %v19187_v62, %v17713_v43  ;;  %v17718_v59 = vor.u32 %v19183_v60, %v17715_v24  ;;  %v17753_v43 = vld [vmem:[#allocation13 + $0xd8] sm:$0xf]  ;;  %v19192_v24 = vld [vmem:[#allocation13 + $0xdc] sm:$0xf] }
 0x7cf   : > { %v19196_v62 = vld [vmem:[#allocation13 + $0xf4] sm:$0xf0] }
 0x7d0   : > { %11395 = vmatpush.bf16.msra.mxu0 %v17666_v35  ;;  %v19179_v35 = vld [vmem:[#allocation13 + $0x6c] sm:$0xf0] }
 0x7de   : > { %17629 = vmatmul.msk.bf16.gmra.mxu3 %vm10988_vm3, %v19164_v45  ;;  %v17667_v45 = vld [vmem:[#allocation13 + $0x60] sm:$0xf0] }
 0x7ee   : > { %17630 = vmatmul.msk.bf16.gmra.mxu3 %vm10988_vm3, %v10987_v33  ;;  %v17670_v33 = vor.u32 %v19173_v26, %v17667_v45  ;;  %v17681_v26 = vld [vmem:[#allocation13 + $0x50] sm:$0xf]  ;;  %v19175_v45 = vld [vmem:[#allocation13 + $0x54] sm:$0xf] }
 0x7f0   : > { %11408 = vmatpush.bf16.msra.mxu1 %v17670_v33  ;;  %v17682_v33 = vor.u32 %v19179_v35, %v17681_v26  ;;  %v17723_v26 = vld [vmem:[#allocation13 + $0xb8] sm:$0xf0] }
 0x7fe   : > { %17800 = vmatmul.msk.bf16.vlgmr.msra.gmra.mxu3 %vm10988_vm3, %v20444_v61 }
 0x80e   : > { %17804 = vmatmul.msk.bf16.vlgmr.msrb.gmra.mxu3 %vm10988_vm3, %v20444_v61 }
 0x831   : > { %v20426_v9 = vpop.f32.mrf.mxu3 }
 0x839   : > { %v11018_v36 = vpop.f32.mrf.mxu3 }
 0x83a   : > { %11041 = vrot.lane.b32.xlu1 %v11018_v36, %s19766_s26  ;;  %v17674_v36 = vor.u32 %v19178_v5, %v17673_v46  ;;  %v17683_v46 = vld [vmem:[#allocation13 + $0x70] sm:$0xf0]  ;;  %v17678_v5 = vor.u32 %v19174_v17, %v17675_v42  ;;  %v17754_v17 = vor.u32 %v19196_v62, %v17753_v43  ;;  %s12156_s26 = sshll.u32 %s12153_s25, 4  ;;  %s12157_s26 = int_to_ptr.hbm [resolvable:$true] %s12156_s26 }
 0x83c   : > { %11421 = vmatpush.bf16.msra.mxu2 %v17674_v36  ;;  %v17686_v36 = vor.u32 %v19175_v45, %v17683_v46  ;;  %v17689_v46 = vld [vmem:[#allocation13 + $0x58] sm:$0xf] }
 0x841   : > { %v11021_v1 = vpop.f32.mrf.mxu3 }
 0x842   : > { %11045 = vrot.lane.b32.xlu1 %v11021_v1, %s19767_s17  ;;  %v17633_v1 = vld [vmem:[#allocation13] sm:$0xf]  ;;  %s12142_s17 = scalar_lea.sflag [#allocation4], %s19989_s13 }
 0x849   : > { %v11023_v27 = vpop.f32.mrf.mxu3 }
 0x84a   : > { %11049 = vrot.lane.b32.xlu2 %v11023_v27, %s19768_s23  ;;  %v19169_v27 = vld [vmem:[#allocation13 + $0x1c] sm:$0xf0]  ;;  %s20814_s23 = sld [smem:[#allocation30_spill]] }
 0x850   : > { %v11494_v60 = vld [vmem:[%s20814_s23] sm:$0xff]  ;;  %s19680_s23 = sshra.s32 %s12157_s26, 4  ;;  %s19681_s23 = int_to_ptr.hbm [resolvable:$true] %s19680_s23 }
 0x851   : > { %v11026_v32 = vpop.f32.mrf.mxu3  ;;  %p19687_p13 = scmp.lt.s32.totalorder %s19681_s23, %s20826_s10 }
 0x852   : > { %11053 = vrot.lane.b32.xlu2 %v11026_v32, %s19769_s15  ;;  %v19165_v32 = vld [vmem:[#allocation13 + $0x4] sm:$0xf]  ;;  %s19682_s15 = scalar_lea.hbm %s19681_s23, 128 }
 0x853   : > { %p19683_p1 = scmp.ne.s32.totalorder %s19681_s23, %s19682_s15 }
 0x855   : > { %p19684_p3 = pnand %p19683_p1, %p19956_p0 }
 0x857   : > { %p19685_p4 = pneg %p19684_p3 }
 0x859   : > { %v11028_v47 = vpop.f32.mrf.mxu3 }
 0x85a   : > { %11057 = vrot.lane.b32.xlu0 %v11028_v47, %s19770_s27  ;;  %v11265_v47 = vunpack.c.h.b16 %v20431_v37  ;;  %v11378_v37 = vand.u32 %v20435_v25, %v11314_v12  ;;  %v11131_v12 = vld [vmem:[#allocation13 + $0x158] sm:$0x11] }
 0x85b   : > { %v11268_v40 = vunpack.c.l.b16 %v11131_v12  ;;  %v11269_v16 = vunpack.c.h.b16 %v11131_v12 }
 0x85c   : > { %v11313_v57 = vpack.c.b16 %v11265_v47, %v11265_v47 }
 0x85d   : > { %v11316_v39 = vpack.c.b16 %v11268_v40, %v11268_v40 }
 0x85e   : > { %v11375_v48 = vand.u32 %v20435_v25, %v11313_v57 }
 0x85f   : > { %v11384_v19 = vand.u32 %v20435_v25, %v11316_v39 }
 0x861   : > { %v11031_v55 = vpop.f32.mrf.mxu3 }
 0x862   : > { %11061 = vrot.lane.b32.xlu1 %v11031_v55, %s19771_s1  ;;  %v17634_v55 = vor.u32 %v19169_v27, %v17633_v1  ;;  %v19166_v1 = vld [vmem:[#allocation13 + $0xc] sm:$0xf] }
 0x863   : > { %v17643_v27 = vld [vmem:[#allocation13 + $0x28] sm:$0xf0] }
 0x864   : > { %11396 = vmatpush.bf16.msra.mxu0 %v17634_v55  ;;  %v17646_v47 = vor.u32 %v19166_v1, %v17643_v27  ;;  %v19171_v55 = vld [vmem:[#allocation13 + $0x2c] sm:$0xf0] }
 0x868   : > { %11430 = vmatpush.bf16.msrb.mxu0 %v11375_v48 }
 0x869   : > { %v11033_v20 = vpop.f32.mrf.mxu3 }
 0x86a   : > { %11065 = vrot.lane.b32.xlu2 %v11033_v20, %s19772_s16  ;;  %v17635_v20 = vld [vmem:[#allocation13 + $0x20] sm:$0xf0]  ;;  %11135 = vperm.xlu1 %19344, %v11132_v58   ;;  %v11513_v58 = vsel %vm9578_vm1, %v20074_v8, 0  ;;  %s19686_s16 = scalar_lea.hbm %s20826_s10, 256 }
 0x86b   : > { %p19688_p7 = scmp.lt.s32.totalorder %s19686_s16, %s19682_s15 }
 0x86c   : > { %11431 = vmatpush.bf16.msrb.mxu0 %v17774_v51 }
 0x86d   : > { %p19689_p8 = por %p19688_p7, %p19687_p13 }
 0x86f   : > { %p19690_p9 = pnand %p19689_p8, %p19685_p4 }
 0x870   : > { %11432 = vmatpush.bf16.msrb.mxu0 %v17742_v44  ;;  %v19204_v44 = vld [vmem:[#allocation13 + $0x134] sm:$0xf0] }
 0x871   : > { %v11036_v28 = vpop.f32.mrf.mxu3 }
 0x872   : > { %11069 = vrot.lane.b32.xlu0 %v11036_v28, %s19773_s9  ;;  %v17641_v28 = vld [vmem:[#allocation13 + $0x8] sm:$0xf]  ;;  %11497 = vperm.xlu2 %19345, %v11494_v60   ;;  %s20815_s9 = sld [smem:[#allocation31_spill]] }
 0x874   : > { %11433 = vmatpush.bf16.msrb.mxu0 %v17710_v4  ;;  %v17755_v4 = vld [vmem:[#allocation13 + $0xf8] sm:$0xf0] }
 0x875   : > { %v17758_v42 = vor.u32 %v19192_v24, %v17755_v4 }
 0x878   : > { %11434 = vmatpush.bf16.msrb.mxu0 %v17678_v5  ;;  %v19180_v5 = vld [vmem:[#allocation13 + $0x74] sm:$0xf0] }
 0x879   : > { %v11038_v3 = vpop.f32.mrf.mxu3  ;;  %v17690_v1 = vor.u32 %v19180_v5, %v17689_v46 }
 0x87a   : > { %11653 = vperm.xlu0 %19343, %v11649_v6   ;;  %v19170_v6 = vld [vmem:[#allocation13 + $0x24] sm:$0xf0]  ;;  %v17638_v3 = vor.u32 %v19165_v32, %v17635_v20  ;;  %v17649_v32 = vld [vmem:[#allocation13 + $0x10] sm:$0xf]  ;;  %v19167_v20 = vld [vmem:[#allocation13 + $0x14] sm:$0xf] }
 0x87b   : > { %v17642_v30 = vor.u32 %v19170_v6, %v17641_v28  ;;  %v17651_v28 = vld [vmem:[#allocation13 + $0x30] sm:$0xf0]  ;;  %v17650_v6 = vor.u32 %v19171_v55, %v17649_v32  ;;  %v17657_v32 = vld [vmem:[#allocation13 + $0x18] sm:$0xf]  ;;  %v19168_v55 = vld [vmem:[#allocation13 + $0x1c] sm:$0xf] }
 0x87c   : > { %11409 = vmatpush.bf16.msra.mxu1 %v17638_v3  ;;  %v17654_v3 = vor.u32 %v19167_v20, %v17651_v28  ;;  %11435 = vmatpush.bf16.msrb.mxu0 %v17646_v47  ;;  %v19172_v47 = vld [vmem:[#allocation13 + $0x34] sm:$0xf0]  ;;  %v17659_v20 = vld [vmem:[#allocation13 + $0x38] sm:$0xf0]  ;;  %v11516_v28 = vsel %vm9578_vm1, %v20080_v38, 0  ;;  %v11522_v38 = vsel %vm9578_vm1, %v20088_v7, 0 }
 0x87d   : > { %11422 = vmatpush.bf16.msra.mxu2 %v17642_v30 }
 0x880   : > { %11443 = vmatpush.bf16.msrb.mxu1 %v11378_v37 }
 0x881   : > { %11456 = vmatpush.bf16.msrb.mxu2 %v11381_v50  ;;  %v11549_v8 = vpop.f32.mrf.mxu3 }
 0x884   : > { %11444 = vmatpush.bf16.msrb.mxu1 %v17778_v21  ;;  %v11317_v21 = vpack.c.b16 %v11269_v16, %v11269_v16 }
 0x885   : > { %11457 = vmatpush.bf16.msrb.mxu2 %v17782_v0 }
 0x886   : > { %v11387_v63 = vand.u32 %v20435_v25, %v11317_v21  ;;  %v17790_v25 = vor.u32 %v19200_v15, %v17787_v23 }
 0x888   : > { %11445 = vmatpush.bf16.msrb.mxu1 %v17746_v29  ;;  %v11504_v29 = vsel %vm9578_vm1, %v20064_v41, 0  ;;  %v19184_v41 = vld [vmem:[#allocation13 + $0x9c] sm:$0xf] }
 0x889   : > { %11458 = vmatpush.bf16.msrb.mxu2 %v17750_v34  ;;  %v17786_v34 = vor.u32 %v19204_v44, %v17785_v56  ;;  %v17726_v45 = vor.u32 %v19184_v41, %v17723_v26  ;;  %v11551_v7 = vpop.f32.mrf.mxu3 }
 0x88c   : > { %11446 = vmatpush.bf16.msrb.mxu1 %v17714_v18  ;;  %v17721_v18 = vld [vmem:[#allocation13 + $0x98] sm:$0xf] }
 0x88d   : > { %11459 = vmatpush.bf16.msrb.mxu2 %v17718_v59  ;;  %v19188_v59 = vld [vmem:[#allocation13 + $0xb4] sm:$0xf0] }
 0x88e   : > { %v17722_v35 = vor.u32 %v19188_v59, %v17721_v18 }
 0x890   : > { %11447 = vmatpush.bf16.msrb.mxu1 %v17682_v33  ;;  %v19176_v33 = vld [vmem:[#allocation13 + $0x5c] sm:$0xf] }
 0x891   : > { %11460 = vmatpush.bf16.msrb.mxu2 %v17686_v36  ;;  %v17691_v36 = vld [vmem:[#allocation13 + $0x78] sm:$0xf0] }
 0x892   : > { %v17694_v27 = vor.u32 %v19176_v33, %v17691_v36 }
 0x894   : > { %11448 = vmatpush.bf16.msrb.mxu1 %v17650_v6  ;;  %v17658_v6 = vor.u32 %v19172_v47, %v17657_v32 }
 0x895   : > { %11461 = vmatpush.bf16.msrb.mxu2 %v17654_v3  ;;  %v11650_v3 = vld [vmem:[%s20787_s14 + $0x8] sm:$0xff] }
 0x896   : > { %11658 = vperm.xlu1 %19344, %v11650_v3  }
 0x8a4   : > { %v11050_v57 = vpop.permute.xlu2 %11049 }
 0x8ac   : > { %v11042_v30 = vpop.permute.xlu1 %11041  ;;  %v11054_v52 = vpop.permute.xlu2 %11053 }
 0x8ad   : > { %v11073_v22 = vsel %vm11072_vm5, %v20426_v9, %v11042_v30  ;;  %v17662_v30 = vor.u32 %v19168_v55, %v17659_v20 }
 0x8b4   : > { %v11046_v10 = vpop.permute.xlu1 %11045 }
 0x8b5   : > { %v11075_v48 = vsel %vm11074_vm6, %v11073_v22, %v11046_v10  ;;  %v11601_v10 = vpop.f32.mrf.mxu3 }
 0x8b6   : > { %v11077_v37 = vsel %vm11076_vm7, %v11075_v48, %v11050_v57  ;;  %v11510_v57 = vsel %vm9578_vm1, %v20072_v2, 0  ;;  %v11525_v2 = vsel %vm9578_vm1, %v20090_v14, 0 }
 0x8b7   : > { %v11079_v51 = vsel %vm11078_vm8, %v11077_v37, %v11054_v52 }
 0x8c4   : > { %v11066_v0 = vpop.permute.xlu2 %11065 }
 0x8cc   : > { %v11058_v50 = vpop.permute.xlu0 %11057  ;;  %v20505_v14 = vpop.permute.xlu2 %11497 }
 0x8cd   : > { %v11081_v31 = vsel %vm11080_vm9, %v11079_v51, %v11058_v50  ;;  %v11550_v48 = vadd.f32 %v11549_v8, %v20505_v14  ;;  %v11603_v50 = vpop.f32.mrf.mxu3 }
 0x8d4   : > { %v11062_v13 = vpop.permute.xlu1 %11061 }
 0x8d5   : > { %v11083_v54 = vsel %vm11082_vm10, %v11081_v31, %v11062_v13 }
 0x8d6   : > { %v11085_v9 = vsel %vm11084_vm11, %v11083_v54, %v11066_v0 }
 0x8dc   : > { %v20507_v22 = vpop.permute.xlu1 %11135 }
 0x8e4   : > { %v11070_v11 = vpop.permute.xlu0 %11069 }
 0x8e5   : > { %v11086_v53 = vsel %vm9574_vm2, %v11085_v9, %v11070_v11  ;;  %v11602_v9 = vadd.f32 %v11601_v10, %v20505_v14 }
 0x8e6   : > { %v20456_v49 = vpack.c.bf16 %v11086_v53, %v11086_v53 }
 0x8e8   : > { %17791 = vmatmul.msk.bf16.vlgmr.msra.gmra.mxu0 %vm11358_vm12, %v20456_v49  ;;  %17792 = vmatmul.msk.bf16.vlgmr.msra.gmra.mxu1 %vm11358_vm12, %v20456_v49 }
 0x8e9   : > { %17793 = vmatmul.msk.bf16.vlgmr.msra.gmra.mxu2 %vm11358_vm12, %v20456_v49  ;;  %11469 = vmatpush.bf16.msra.mxu0 %v11384_v19 }
 0x8ea   : > { %11482 = vmatpush.bf16.msra.mxu1 %v11387_v63  ;;  %11534 = vmatpush.bf16.msra.mxu2 %v11504_v29 }
 0x8ed   : > { %11470 = vmatpush.bf16.msra.mxu0 %v17786_v34 }
 0x8ee   : > { %11483 = vmatpush.bf16.msra.mxu1 %v17790_v25 }
 0x8f1   : > { %11471 = vmatpush.bf16.msra.mxu0 %v17754_v17 }
 0x8f2   : > { %11484 = vmatpush.bf16.msra.mxu1 %v17758_v42 }
 0x8f5   : > { %11472 = vmatpush.bf16.msra.mxu0 %v17722_v35 }
 0x8f6   : > { %11485 = vmatpush.bf16.msra.mxu1 %v17726_v45 }
 0x8f8   : > { %17794 = vmatmul.msk.bf16.vlgmr.msrb.gmra.mxu0 %vm11358_vm12, %v20456_v49  ;;  %17795 = vmatmul.msk.bf16.vlgmr.msrb.gmra.mxu1 %vm11358_vm12, %v20456_v49 }
 0x8f9   : > { %17796 = vmatmul.msk.bf16.vlgmr.msrb.gmra.mxu2 %vm11358_vm12, %v20456_v49  ;;  %11473 = vmatpush.bf16.msra.mxu0 %v17690_v1 }
 0x8fa   : > { %11486 = vmatpush.bf16.msra.mxu1 %v17694_v27  ;;  %11586 = vmatpush.bf16.msrb.mxu2 %v11516_v28 }
 0x8fd   : > { %11474 = vmatpush.bf16.msra.mxu0 %v17658_v6 }
 0x8fe   : > { %11487 = vmatpush.bf16.msra.mxu1 %v17662_v30 }
 0x901   : > { %11560 = vmatpush.bf16.msrb.mxu0 %v11510_v57 }
 0x902   : > { %11573 = vmatpush.bf16.msrb.mxu1 %v11513_v58 }
 0x908   : > { %17797 = vmatmul.msk.bf16.vlgmr.msra.gmra.mxu0 %vm11358_vm12, %v20456_v49  ;;  %17798 = vmatmul.msk.bf16.vlgmr.msra.gmra.mxu1 %vm11358_vm12, %v20456_v49 }
 0x909   : > { %17799 = vmatmul.msk.bf16.vlgmr.msra.gmra.mxu2 %vm10988_vm3, %v20444_v61  ;;  %11612 = vmatpush.bf16.msra.mxu0 %v11522_v38 }
 0x90a   : > { %11625 = vmatpush.bf16.msra.mxu1 %v11525_v2 }
 0x918   : > { %17801 = vmatmul.msk.bf16.vlgmr.msrb.gmra.mxu0 %vm10988_vm3, %v20444_v61  ;;  %17802 = vmatmul.msk.bf16.vlgmr.msrb.gmra.mxu1 %vm10988_vm3, %v20444_v61 }
 0x919   : > { %17803 = vmatmul.msk.bf16.vlgmr.msrb.gmra.mxu2 %vm10988_vm3, %v20444_v61 }
 0x928   : > { %17805 = vmatmul.msk.bf16.vlgmr.msra.gmra.mxu0 %vm10988_vm3, %v20444_v61  ;;  %17806 = vmatmul.msk.bf16.vlgmr.msra.gmra.mxu1 %vm10988_vm3, %v20444_v61  ;;  %v20515_v61 = vld [vmem:[%s20815_s9] sm:$0xff] }
 0x965   : > { %v11398_v12 = vpop.f32.mrf.mxu0  ;;  %v11411_v52 = vpop.f32.mrf.mxu1 }
 0x966   : > { %v11412_v37 = vadd.f32 %v11411_v52, %v20507_v22  ;;  %v11399_v25 = vadd.f32 %v11398_v12, %v20507_v22 }
 0x968   : > { %v11634_v40 = vadd.f32 %v11550_v48, %v11412_v37 }
 0x96a   : > { %v11642_v13 = vpack.c.bf16 %v11634_v40, %v11634_v40 }
 0x96c   : > { %v11424_v16 = vpop.f32.mrf.mxu2  ;;  %v11673_v51 = vsel %vm9578_vm1, %v11642_v13, 0 }
 0x96d   : > { %v11400_v31 = vpop.f32.mrf.mxu0  ;;  %v11413_v54 = vpop.f32.mrf.mxu1  ;;  %11714 = vmatpush.bf16.msra.mxu3 %v11673_v51  ;;  %v11425_v41 = vadd.f32 %v11424_v16, %v20507_v22 }
 0x96e   : > { %v20557_v54 = vpop.permute.xlu1 %11658 }
 0x970   : > { %17812 = vmatmul.msk.bf16.vlgmr.msra.gmra.mxu3 %vm10988_vm3, %v20515_v61 }
 0x974   : > { %v11426_v39 = vpop.f32.mrf.mxu2 }
 0x975   : > { %v11437_v21 = vpop.f32.mrf.mxu0  ;;  %v11450_v0 = vpop.f32.mrf.mxu1 }
 0x976   : > { %v11438_v26 = vadd.f32 %v11437_v21, %v20507_v22  ;;  %v11451_v47 = vadd.f32 %v11450_v0, %v20507_v22 }
 0x97c   : > { %v11463_v11 = vpop.f32.mrf.mxu2 }
 0x97d   : > { %v11464_v53 = vadd.f32 %v11463_v11, %v20507_v22  ;;  %v11439_v19 = vpop.f32.mrf.mxu0  ;;  %v11452_v49 = vpop.f32.mrf.mxu1 }
 0x97f   : > { %v11638_v63 = vadd.f32 %v11602_v9, %v11464_v53 }
 0x981   : > { %v11646_v56 = vpack.c.bf16 %v11638_v63, %v11638_v63 }
 0x983   : > { %v11685_v44 = vsel %vm9578_vm1, %v11646_v56, 0 }
 0x984   : > { %v11465_v15 = vpop.f32.mrf.mxu2  ;;  %11770 = vmatpush.bf16.msrb.mxu3 %v11685_v44 }
 0x985   : > { %v11476_v23 = vpop.f32.mrf.mxu0  ;;  %v11489_v29 = vpop.f32.mrf.mxu1 }
 0x986   : > { %v11477_v2 = vadd.f32 %v11476_v23, %v20507_v22  ;;  %v11490_v8 = vadd.f32 %v11489_v29, %v20507_v22 }
 0x987   : > { %17816 = vmatmul.msk.bf16.vlgmr.msrb.gmra.mxu3 %vm10988_vm3, %v20515_v61 }
 0x98c   : > { %v11536_v34 = vpop.f32.mrf.mxu2 }
 0x98d   : > { %v11537_v43 = vadd.f32 %v11536_v34, %v20505_v14  ;;  %v11478_v62 = vpop.f32.mrf.mxu0  ;;  %v11491_v60 = vpop.f32.mrf.mxu1 }
 0x98f   : > { %v11633_v24 = vadd.f32 %v11537_v43, %v11399_v25 }
 0x991   : > { %v11641_v4 = vpack.c.bf16 %v11633_v24, %v11633_v24 }
 0x993   : > { %v11670_v17 = vsel %vm9578_vm1, %v11641_v4, 0 }
 0x994   : > { %v11538_v42 = vpop.f32.mrf.mxu2  ;;  %11700 = vmatpush.bf16.msra.mxu2 %v11670_v17  ;;  %v19410_v17 = vld [vmem:[%s19995_s3 + $0x8] sm:$0xff] }
 0x995   : > { %v11562_v18 = vpop.f32.mrf.mxu0  ;;  %v11575_v59 = vpop.f32.mrf.mxu1 }
 0x996   : > { %v11563_v35 = vadd.f32 %v11562_v18, %v20505_v14  ;;  %v11576_v45 = vadd.f32 %v11575_v59, %v20505_v14 }
 0x997   : > { %17811 = vmatmul.msk.bf16.vlgmr.msra.gmra.mxu2 %vm10988_vm3, %v20515_v61 }
 0x998   : > { %v11635_v46 = vadd.f32 %v11563_v35, %v11425_v41  ;;  %v11636_v5 = vadd.f32 %v11576_v45, %v11438_v26 }
 0x99a   : > { %v11643_v33 = vpack.c.bf16 %v11635_v46, %v11635_v46  ;;  %v11644_v36 = vpack.c.bf16 %v11636_v5, %v11636_v5 }
 0x99c   : > { %v11588_v1 = vpop.f32.mrf.mxu2  ;;  %v11676_v27 = vsel %vm9578_vm1, %v11643_v33, 0  ;;  %v11679_v32 = vsel %vm9578_vm1, %v11644_v36, 0 }
 0x99d   : > { %v11589_v55 = vadd.f32 %v11588_v1, %v20505_v14  ;;  %v11564_v20 = vpop.f32.mrf.mxu0  ;;  %v11577_v28 = vpop.f32.mrf.mxu1  ;;  %11728 = vmatpush.bf16.msrb.mxu0 %v11676_v27  ;;  %11742 = vmatpush.bf16.msrb.mxu1 %v11679_v32 }
 0x99f   : > { %v11637_v6 = vadd.f32 %v11589_v55, %v11451_v47  ;;  %v19411_v47 = vld [vmem:[%s19995_s3 + $0x48] sm:$0xff] }
 0x9a0   : > { %17813 = vmatmul.msk.bf16.vlgmr.msrb.gmra.mxu0 %vm10988_vm3, %v20515_v61  ;;  %17814 = vmatmul.msk.bf16.vlgmr.msrb.gmra.mxu1 %vm10988_vm3, %v20515_v61 }
 0x9a1   : > { %v11645_v3 = vpack.c.bf16 %v11637_v6, %v11637_v6 }
 0x9a3   : > { %v11682_v30 = vsel %vm9578_vm1, %v11645_v3, 0 }
 0x9a4   : > { %v11590_v57 = vpop.f32.mrf.mxu2  ;;  %11756 = vmatpush.bf16.msrb.mxu2 %v11682_v30 }
 0x9a5   : > { %v11614_v58 = vpop.f32.mrf.mxu0  ;;  %v11627_v38 = vpop.f32.mrf.mxu1 }
 0x9a6   : > { %v11615_v7 = vadd.f32 %v11614_v58, %v20505_v14  ;;  %v11628_v10 = vadd.f32 %v11627_v38, %v20505_v14  ;;  %v20554_v14 = vpop.permute.xlu0 %11653 }
 0x9a7   : > { %17815 = vmatmul.msk.bf16.vlgmr.msrb.gmra.mxu2 %vm10988_vm3, %v20515_v61 }
 0x9a8   : > { %v11639_v48 = vadd.f32 %v11615_v7, %v11477_v2  ;;  %v11640_v12 = vadd.f32 %v11628_v10, %v11490_v8 }
 0x9aa   : > { %v11647_v52 = vpack.c.bf16 %v11639_v48, %v11639_v48  ;;  %v11648_v37 = vpack.c.bf16 %v11640_v12, %v11640_v12 }
 0x9ac   : > { %v11688_v50 = vsel %vm9578_vm1, %v11647_v52, 0  ;;  %v11691_v40 = vsel %vm9578_vm1, %v11648_v37, 0 }
 0x9ad   : > { %v11616_v13 = vpop.f32.mrf.mxu0  ;;  %v11629_v16 = vpop.f32.mrf.mxu1  ;;  %11784 = vmatpush.bf16.msra.mxu0 %v11688_v50  ;;  %11798 = vmatpush.bf16.msra.mxu1 %v11691_v40 }
 0x9b0   : > { %17817 = vmatmul.msk.bf16.vlgmr.msra.gmra.mxu0 %vm10988_vm3, %v20515_v61  ;;  %17818 = vmatmul.msk.bf16.vlgmr.msra.gmra.mxu1 %vm10988_vm3, %v20515_v61 }
 0x9f3   : > { %v11716_v22 = vpop.f32.mrf.mxu3 }
 0x9f4   : > { %v11717_v51 = vadd.f32 %v11716_v22, %v20554_v14 }
 0x9f6   : > { %v17820_v31 = vmul.f32 -1.442695, %v11717_v51 }
 0x9f8   : > { %19346 = vpow2.f32 %v17820_v31 }
 0x9fb   : > { %v11718_v39 = vpop.f32.mrf.mxu3 }
 0x9fc   : > { %v11719_v21 = vadd.f32 %v11718_v39, %v20557_v54 }
 0x9fe   : > { %v19347_v0 = vpop.eup %19346  ;;  %v17828_v9 = vmul.f32 -1.442695, %v11719_v21 }
 0x9ff   : > { %v11854_v11 = vadd.f32 1.0, %v19347_v0 }
 0xa00   : > { %19348 = vpow2.f32 %v17828_v9 }
 0xa01   : > { %19350 = vrcp.f32 %v11854_v11  ;;  %v11895_v44 = vand.u32 2147483648, %v11854_v11  ;;  %v11893_v29 = vand.u32 2147483647, %v11854_v11  ;;  %vm11889_vm14 = vweird.f32 %v11854_v11 }
 0xa03   : > { %v11896_v62 = vor.u32 1.1754944e-38, %v11895_v44  ;;  %vm11894_vm0 = vcmp.eq.f32.partialorder %v11893_v29, 8.507059e+37 }
 0xa06   : > { %v19349_v53 = vpop.eup %19348 }
 0xa07   : > { %v19351_v19 = vpop.eup %19350  ;;  %v11862_v61 = vadd.f32 1.0, %v19349_v53 }
 0xa08   : > { %v11885_v49 = vmul.f32 %v19351_v19, %v11854_v11  ;;  %vm11890_vm13 = vweird.f32 %v19351_v19 }
 0xa09   : > { %19352 = vrcp.f32 %v11862_v61  ;;  %vm11891_vm15 = vmor %vm11889_vm14, %vm11890_vm13  ;;  %v12015_v41 = vand.u32 2147483648, %v11862_v61  ;;  %v12013_v45 = vand.u32 2147483647, %v11862_v61  ;;  %vm12009_vm2 = vweird.f32 %v11862_v61 }
 0xa0a   : > { %v11886_v63 = vsub.f32 1.0, %v11885_v49  ;;  %v11772_v56 = vpop.f32.mrf.mxu3 }
 0xa0b   : > { %v11773_v15 = vadd.f32 %v11772_v56, %v20554_v14  ;;  %v12016_v1 = vor.u32 1.1754944e-38, %v12015_v41  ;;  %vm12014_vm4 = vcmp.eq.f32.partialorder %v12013_v45, 8.507059e+37 }
 0xa0c   : > { %v11887_v23 = vmul.f32 %v19351_v19, %v11886_v63  ;;  %v19412_v63 = vld [vmem:[%s19995_s3 + $0x28] sm:$0xff] }
 0xa0d   : > { %v17824_v34 = vmul.f32 -1.442695, %v11773_v15 }
 0xa0e   : > { %v11888_v25 = vadd.f32 %v19351_v19, %v11887_v23 }
 0xa0f   : > { %v19353_v43 = vpop.eup %19352  ;;  %19354 = vpow2.f32 %v17824_v34 }
 0xa10   : > { %v11892_v60 = vsel %vm11891_vm15, %v19351_v19, %v11888_v25  ;;  %v12005_v24 = vmul.f32 %v19353_v43, %v11862_v61  ;;  %vm12010_vm1 = vweird.f32 %v19353_v43 }
 0xa11   : > { %v11897_v4 = vsel %vm11894_vm0, %v11896_v62, %v11892_v60  ;;  %vm12011_vm3 = vmor %vm12009_vm2, %vm12010_vm1 }
 0xa12   : > { %v12110_v42 = vmul.f32 %v19410_v17, %v11897_v4  ;;  %v12006_v18 = vsub.f32 1.0, %v12005_v24  ;;  %v11774_v59 = vpop.f32.mrf.mxu3 }
 0xa13   : > { %v11775_v26 = vadd.f32 %v11774_v59, %v20557_v54 }
 0xa14   : > { %12126 = vst [vmem:[%s20565_s29 + $0x8] sm:$0xff] %v12110_v42  ;;  %v12007_v35 = vmul.f32 %v19353_v43, %v12006_v18 }
 0xa15   : > { %v19355_v46 = vpop.eup %19354  ;;  %v17832_v5 = vmul.f32 -1.442695, %v11775_v26 }
 0xa16   : > { %v12008_v33 = vadd.f32 %v19353_v43, %v12007_v35  ;;  %v11858_v36 = vadd.f32 1.0, %v19355_v46 }
 0xa17   : > { %19356 = vpow2.f32 %v17832_v5 }
 0xa18   : > { %v12012_v27 = vsel %vm12011_vm3, %v19353_v43, %v12008_v33  ;;  %19358 = vrcp.f32 %v11858_v36  ;;  %v11953_v52 = vand.u32 2147483647, %v11858_v36  ;;  %v11955_v37 = vand.u32 2147483648, %v11858_v36 }
 0xa19   : > { %v12017_v32 = vsel %vm12014_vm4, %v12016_v1, %v12012_v27  ;;  %vm11949_vm6 = vweird.f32 %v11858_v36 }
 0xa1a   : > { %v12118_v55 = vmul.f32 %v19411_v47, %v12017_v32  ;;  %v11702_v20 = vpop.f32.mrf.mxu2  ;;  %v11956_v21 = vor.u32 1.1754944e-38, %v11955_v37  ;;  %vm11954_vm8 = vcmp.eq.f32.partialorder %v11953_v52, 8.507059e+37  ;;  %v19413_v47 = vld [vmem:[%s19995_s3 + $0x68] sm:$0xff] }
 0xa1b   : > { %v11703_v28 = vadd.f32 %v11702_v20, %v20554_v14 }
 0xa1c   : > { %12134 = vst [vmem:[%s20565_s29 + $0x48] sm:$0xff] %v12118_v55 }
 0xa1d   : > { %v19357_v6 = vpop.eup %19356  ;;  %v17819_v3 = vmul.f32 -1.442695, %v11703_v28  ;;  %v11730_v30 = vpop.f32.mrf.mxu0 }
 0xa1e   : > { %v11744_v57 = vpop.f32.mrf.mxu1  ;;  %v19359_v58 = vpop.eup %19358  ;;  %v11866_v38 = vadd.f32 1.0, %v19357_v6  ;;  %v11731_v2 = vadd.f32 %v11730_v30, %v20554_v14 }
 0xa1f   : > { %v11745_v8 = vadd.f32 %v11744_v57, %v20554_v14  ;;  %v11945_v7 = vmul.f32 %v19359_v58, %v11858_v36  ;;  %19360 = vpow2.f32 %v17819_v3  ;;  %vm11950_vm5 = vweird.f32 %v19359_v58 }
 0xa20   : > { %19362 = vrcp.f32 %v11866_v38  ;;  %v17821_v48 = vmul.f32 -1.442695, %v11731_v2  ;;  %vm11951_vm7 = vmor %vm11949_vm6, %vm11950_vm5  ;;  %v12073_v15 = vand.u32 2147483647, %v11866_v38  ;;  %v12075_v34 = vand.u32 2147483648, %v11866_v38 }
 0xa21   : > { %v11946_v10 = vsub.f32 1.0, %v11945_v7  ;;  %v17822_v12 = vmul.f32 -1.442695, %v11745_v8  ;;  %vm12069_vm10 = vweird.f32 %v11866_v38 }
 0xa22   : > { %v11704_v50 = vpop.f32.mrf.mxu2  ;;  %19364 = vpow2.f32 %v17821_v48  ;;  %vm12074_vm11 = vcmp.eq.f32.partialorder %v12073_v15, 8.507059e+37  ;;  %v12076_v59 = vor.u32 1.1754944e-38, %v12075_v34 }
 0xa23   : > { %v11947_v40 = vmul.f32 %v19359_v58, %v11946_v10  ;;  %v11705_v13 = vadd.f32 %v11704_v50, %v20557_v54  ;;  %19366 = vpow2.f32 %v17822_v12 }
 0xa25   : > { %v19361_v16 = vpop.eup %19360  ;;  %v11948_v22 = vadd.f32 %v19359_v58, %v11947_v40  ;;  %v17827_v51 = vmul.f32 -1.442695, %v11705_v13  ;;  %v11732_v31 = vpop.f32.mrf.mxu0 }
 0xa26   : > { %v19363_v39 = vpop.eup %19362  ;;  %v20574_v0 = vadd.f32 1.0, %v19361_v16  ;;  %v11733_v9 = vadd.f32 %v11732_v31, %v20557_v54  ;;  %v11746_v19 = vpop.f32.mrf.mxu1 }
 0xa27   : > { %v11952_v11 = vsel %vm11951_vm7, %v19359_v58, %v11948_v22  ;;  %v12065_v53 = vmul.f32 %v19363_v39, %v11866_v38  ;;  %19368 = vpow2.f32 %v17827_v51  ;;  %v11747_v43 = vadd.f32 %v11746_v19, %v20557_v54 }
 0xa28   : > { %v11957_v61 = vsel %vm11954_vm8, %v11956_v21, %v11952_v11  ;;  %19370 = vrcp.f32 %v20574_v0  ;;  %v19365_v49 = vpop.eup %19364  ;;  %v17829_v23 = vmul.f32 -1.442695, %v11733_v9  ;;  %vm12070_vm9 = vweird.f32 %v19363_v39 }
 0xa29   : > { %v12114_v56 = vmul.f32 %v19412_v63, %v11957_v61  ;;  %v12066_v44 = vsub.f32 1.0, %v12065_v53  ;;  %v19367_v29 = vpop.eup %19366  ;;  %v20579_v25 = vadd.f32 1.0, %v19365_v49  ;;  %v11878_v24 = vand.u32 2147483647, %v20574_v0  ;;  %vm12071_vm12 = vmor %vm12069_vm10, %vm12070_vm9 }
 0xa2a   : > { %v20583_v60 = vadd.f32 1.0, %v19367_v29  ;;  %19372 = vpow2.f32 %v17829_v23  ;;  %v11880_v4 = vand.u32 2147483648, %v20574_v0  ;;  %v17830_v35 = vmul.f32 -1.442695, %v11747_v43  ;;  %v11758_v45 = vpop.f32.mrf.mxu2 }
 0xa2b   : > { %12130 = vst [vmem:[%s20565_s29 + $0x28] sm:$0xff] %v12114_v56  ;;  %v12067_v62 = vmul.f32 %v19363_v39, %v12066_v44  ;;  %19374 = vrcp.f32 %v20579_v25  ;;  %v11910_v41 = vand.u32 2147483648, %v20579_v25  ;;  %vm11874_vm13 = vweird.f32 %v20574_v0  ;;  %v19414_v44 = vld [vmem:[%s19995_s3] sm:$0xff] }
 0xa2c   : > { %19376 = vrcp.f32 %v20583_v60  ;;  %v11908_v33 = vand.u32 2147483647, %v20579_v25  ;;  %vm20595_vm14 = vcmp.eq.f32.partialorder %v11878_v24, 8.507059e+37  ;;  %v11881_v27 = vor.u32 1.1754944e-38, %v11880_v4 }
 0xa2d   : > { %v19369_v17 = vpop.eup %19368  ;;  %v12068_v42 = vadd.f32 %v19363_v39, %v12067_v62  ;;  %vm11904_vm15 = vweird.f32 %v20579_v25  ;;  %v11923_v28 = vand.u32 2147483647, %v20583_v60  ;;  %v11925_v6 = vand.u32 2147483648, %v20583_v60  ;;  %v11786_v3 = vpop.f32.mrf.mxu0 }
 0xa2e   : > { %v19371_v18 = vpop.eup %19370  ;;  %v20590_v26 = vadd.f32 1.0, %v19369_v17  ;;  %v11911_v57 = vor.u32 1.1754944e-38, %v11910_v41  ;;  %vm11919_vm0 = vweird.f32 %v20583_v60  ;;  %v11759_v38 = vadd.f32 %v11758_v45, %v20554_v14  ;;  %v11800_v22 = vpop.f32.mrf.mxu1 }
 0xa2f   : > { %v12072_v46 = vsel %vm12071_vm12, %v19363_v39, %v12068_v42  ;;  %v11870_v5 = vmul.f32 %v19371_v18, %v20574_v0  ;;  %vm11875_vm1 = vweird.f32 %v19371_v18  ;;  %vm20610_vm2 = vcmp.eq.f32.partialorder %v11908_v33, 8.507059e+37  ;;  %v19416_v33 = vld [vmem:[%s19995_s3 + $0x18] sm:$0xff] }
 0xa30   : > { %v12077_v36 = vsel %vm12074_vm11, %v12076_v59, %v12072_v46  ;;  %19378 = vrcp.f32 %v20590_v26  ;;  %v19373_v32 = vpop.eup %19372  ;;  %v11998_v48 = vand.u32 2147483647, %v20590_v26  ;;  %v12000_v52 = vand.u32 2147483648, %v20590_v26  ;;  %vm11876_vm4 = vmor %vm11874_vm13, %vm11875_vm1 }
 0xa31   : > { %v12122_v55 = vmul.f32 %v19413_v47, %v12077_v36  ;;  %v11871_v20 = vsub.f32 1.0, %v11870_v5  ;;  %v19375_v30 = vpop.eup %19374  ;;  %v20605_v58 = vadd.f32 1.0, %v19373_v32  ;;  %19380 = vpow2.f32 %v17830_v35 }
 0xa32   : > { %v19377_v2 = vpop.eup %19376  ;;  %v11900_v7 = vmul.f32 %v19375_v30, %v20579_v25  ;;  %v11787_v37 = vadd.f32 %v11786_v3, %v20554_v14  ;;  %vm20619_vm3 = vcmp.eq.f32.partialorder %v11923_v28, 8.507059e+37  ;;  %v11926_v16 = vor.u32 1.1754944e-38, %v11925_v6  ;;  %v11760_v56 = vpop.f32.mrf.mxu2  ;;  %v19417_v3 = vld [vmem:[%s19995_s3 + $0x40] sm:$0xff] }
 0xa33   : > { %12138 = vst [vmem:[%s20565_s29 + $0x68] sm:$0xff] %v12122_v55  ;;  %v11872_v8 = vmul.f32 %v19371_v18, %v11871_v20  ;;  %v11915_v12 = vmul.f32 %v19377_v2, %v20583_v60  ;;  %19382 = vrcp.f32 %v20605_v58  ;;  %vm11905_vm5 = vweird.f32 %v19375_v30 }
 0xa34   : > { %v11901_v40 = vsub.f32 1.0, %v11900_v7  ;;  %vm11994_vm6 = vweird.f32 %v20590_v26  ;;  %v17823_v39 = vmul.f32 -1.442695, %v11759_v38  ;;  %vm11920_vm7 = vweird.f32 %v19377_v2  ;;  %vm11906_vm9 = vmor %vm11904_vm15, %vm11905_vm5 }
 0xa35   : > { %v11873_v50 = vadd.f32 %v19371_v18, %v11872_v8  ;;  %v11916_v31 = vsub.f32 1.0, %v11915_v12  ;;  %vm20627_vm8 = vcmp.eq.f32.partialorder %v11998_v48, 8.507059e+37  ;;  %v12001_v49 = vor.u32 1.1754944e-38, %v12000_v52  ;;  %vm11921_vm11 = vmor %vm11919_vm0, %vm11920_vm7  ;;  %v11788_v5 = vpop.f32.mrf.mxu0 }
 0xa36   : > { %v19379_v51 = vpop.eup %19378  ;;  %v11902_v9 = vmul.f32 %v19375_v30, %v11901_v40  ;;  %v17825_v63 = vmul.f32 -1.442695, %v11787_v37  ;;  %19384 = vpow2.f32 %v17823_v39  ;;  %v11801_v24 = vadd.f32 %v11800_v22, %v20554_v14  ;;  %v19415_v14 = vld [vmem:[%s19995_s3 + $0x10] sm:$0xff]  ;;  %v11802_v20 = vpop.f32.mrf.mxu1 }
 0xa37   : > { %v11877_v21 = vsel %vm11876_vm4, %v19371_v18, %v11873_v50  ;;  %v11990_v11 = vmul.f32 %v19379_v51, %v20590_v26  ;;  %v19381_v19 = vpop.eup %19380  ;;  %v11917_v61 = vmul.f32 %v19377_v2, %v11916_v31  ;;  %vm11995_vm10 = vweird.f32 %v19379_v51  ;;  %v19418_v37 = vld [vmem:[%s19995_s3 + $0x50] sm:$0xff] }
 0xa38   : > { %v11882_v0 = vsel %vm20595_vm14, %v11881_v27, %v11877_v21  ;;  %v11903_v23 = vadd.f32 %v19375_v30, %v11902_v9  ;;  %v20634_v34 = vadd.f32 1.0, %v19381_v19  ;;  %v11761_v18 = vadd.f32 %v11760_v56, %v20557_v54  ;;  %vm11996_vm12 = vmor %vm11994_vm6, %vm11995_vm10 }
 0xa39   : > { %v12109_v15 = vmul.f32 %v19414_v44, %v11882_v0  ;;  %v11991_v29 = vsub.f32 1.0, %v11990_v11  ;;  %v19383_v43 = vpop.eup %19382  ;;  %v11918_v62 = vadd.f32 %v19377_v2, %v11917_v61  ;;  %v12028_v41 = vand.u32 2147483647, %v20605_v58 }
 0xa3a   : > { %v11907_v4 = vsel %vm11906_vm9, %v19375_v30, %v11903_v23  ;;  %v12020_v42 = vmul.f32 %v19383_v43, %v20605_v58  ;;  %19386 = vrcp.f32 %v20634_v34  ;;  %vm12025_vm13 = vweird.f32 %v19383_v43 }
 0xa3b   : > { %12125 = vst [vmem:[%s20565_s29] sm:$0xff] %v12109_v15  ;;  %v11992_v17 = vmul.f32 %v19379_v51, %v11991_v29  ;;  %v11912_v25 = vsel %vm20610_vm2, %v11911_v57, %v11907_v4  ;;  %v11922_v59 = vsel %vm11921_vm11, %v19377_v2, %v11918_v62  ;;  %v12030_v1 = vand.u32 2147483648, %v20605_v58  ;;  %v19419_v29 = vld [vmem:[%s19995_s3 + $0x58] sm:$0xff] }
 0xa3c   : > { %v12111_v35 = vmul.f32 %v19415_v14, %v11912_v25  ;;  %v11927_v60 = vsel %vm20619_vm3, %v11926_v16, %v11922_v59  ;;  %v12021_v46 = vsub.f32 1.0, %v12020_v42  ;;  %19388 = vpow2.f32 %v17825_v63  ;;  %v19385_v28 = vpop.eup %19384 }
 0xa3d   : > { %v11993_v45 = vadd.f32 %v19379_v51, %v11992_v17  ;;  %v12112_v36 = vmul.f32 %v19416_v33, %v11927_v60  ;;  %v17826_v47 = vmul.f32 -1.442695, %v11801_v24  ;;  %v17831_v55 = vmul.f32 -1.442695, %v11761_v18 }
 0xa3e   : > { %12127 = vst [vmem:[%s20565_s29 + $0x10] sm:$0xff] %v12111_v35  ;;  %v12022_v32 = vmul.f32 %v19383_v43, %v12021_v46  ;;  %vm12024_vm14 = vweird.f32 %v20605_v58  ;;  %v11789_v26 = vadd.f32 %v11788_v5, %v20557_v54  ;;  %v20665_v38 = vadd.f32 1.0, %v19385_v28 }
 0xa3f   : > { %v11997_v27 = vsel %vm11996_vm12, %v19379_v51, %v11993_v45  ;;  %12128 = vst [vmem:[%s20565_s29 + $0x18] sm:$0xff] %v12112_v36  ;;  %19390 = vpow2.f32 %v17826_v47  ;;  %vm12026_vm15 = vmor %vm12024_vm14, %vm12025_vm13  ;;  %v12031_v8 = vor.u32 1.1754944e-38, %v12030_v1  ;;  %v11803_v10 = vadd.f32 %v11802_v20, %v20557_v54 }
 0xa40   : > { %v12002_v6 = vsel %vm20627_vm8, %v12001_v49, %v11997_v27  ;;  %v12023_v57 = vadd.f32 %v19383_v43, %v12022_v32  ;;  %v19387_v2 = vpop.eup %19386  ;;  %19392 = vpow2.f32 %v17831_v55  ;;  %v17833_v7 = vmul.f32 -1.442695, %v11789_v26  ;;  %v19420_v32 = vld [vmem:[%s19995_s3 + $0x20] sm:$0xff] }
 0xa41   : > { %v12117_v30 = vmul.f32 %v19417_v3, %v12002_v6  ;;  %vm12029_vm0 = vcmp.eq.f32.partialorder %v12028_v41, 8.507059e+37  ;;  %v12035_v48 = vmul.f32 %v19387_v2, %v20634_v34  ;;  %19394 = vrcp.f32 %v20665_v38 }
 0xa42   : > { %v12027_v58 = vsel %vm12026_vm15, %v19383_v43, %v12023_v57  ;;  %v19389_v12 = vpop.eup %19388  ;;  %v12045_v16 = vand.u32 2147483648, %v20634_v34  ;;  %19396 = vpow2.f32 %v17833_v7  ;;  %v17834_v22 = vmul.f32 -1.442695, %v11803_v10  ;;  %v19421_v10 = vld [vmem:[%s19995_s3 + $0x30] sm:$0xff] }
 0xa43   : > { %12133 = vst [vmem:[%s20565_s29 + $0x40] sm:$0xff] %v12117_v30  ;;  %v12032_v52 = vsel %vm12029_vm0, %v12031_v8, %v12027_v58  ;;  %v12036_v40 = vsub.f32 1.0, %v12035_v48  ;;  %v20673_v13 = vadd.f32 1.0, %v19389_v12  ;;  %vm12040_vm1 = vweird.f32 %v19387_v2 }
 0xa44   : > { %v12119_v50 = vmul.f32 %v19418_v37, %v12032_v52  ;;  %v12043_v31 = vand.u32 2147483647, %v20634_v34  ;;  %vm12039_vm2 = vweird.f32 %v20634_v34  ;;  %v12046_v19 = vor.u32 1.1754944e-38, %v12045_v16 }
 0xa45   : > { %v19391_v54 = vpop.eup %19390  ;;  %v12037_v51 = vmul.f32 %v19387_v2, %v12036_v40  ;;  %19398 = vrcp.f32 %v20673_v13  ;;  %vm12041_vm3 = vmor %vm12039_vm2, %vm12040_vm1  ;;  %v11938_v49 = vand.u32 2147483647, %v20665_v38  ;;  %v11940_v15 = vand.u32 2147483648, %v20665_v38 }
 0xa46   : > { %12135 = vst [vmem:[%s20565_s29 + $0x50] sm:$0xff] %v12119_v50  ;;  %v19393_v39 = vpop.eup %19392  ;;  %v20679_v21 = vadd.f32 1.0, %v19391_v54  ;;  %19400 = vpow2.f32 %v17834_v22  ;;  %vm12044_vm4 = vcmp.eq.f32.partialorder %v12043_v31, 8.507059e+37  ;;  %v11968_v4 = vand.u32 2147483647, %v20673_v13  ;;  %v19422_v22 = vld [vmem:[%s19995_s3 + $0x38] sm:$0xff] }
 0xa47   : > { %v19395_v9 = vpop.eup %19394  ;;  %v12038_v11 = vadd.f32 %v19387_v2, %v12037_v51  ;;  %v20682_v53 = vadd.f32 1.0, %v19393_v39  ;;  %vm11934_vm6 = vweird.f32 %v20665_v38  ;;  %v11970_v17 = vand.u32 2147483648, %v20673_v13 }
 0xa48   : > { %v11930_v0 = vmul.f32 %v19395_v9, %v20665_v38  ;;  %19402 = vrcp.f32 %v20679_v21  ;;  %v19397_v63 = vpop.eup %19396  ;;  %vm11935_vm5 = vweird.f32 %v19395_v9  ;;  %vm11939_vm7 = vcmp.eq.f32.partialorder %v11938_v49, 8.507059e+37 }
 0xa49   : > { %v12042_v61 = vsel %vm12041_vm3, %v19387_v2, %v12038_v11  ;;  %19404 = vrcp.f32 %v20682_v53  ;;  %v20695_v42 = vadd.f32 1.0, %v19397_v63  ;;  %v11941_v59 = vor.u32 1.1754944e-38, %v11940_v15  ;;  %vm11936_vm8 = vmor %vm11934_vm6, %vm11935_vm5 }
 0xa4a   : > { %v12047_v56 = vsel %vm12044_vm4, %v12046_v19, %v12042_v61  ;;  %v11931_v44 = vsub.f32 1.0, %v11930_v0  ;;  %vm11964_vm9 = vweird.f32 %v20673_v13  ;;  %vm20702_vm11 = vcmp.eq.f32.partialorder %v11968_v4, 8.507059e+37 }
 0xa4b   : > { %v19399_v23 = vpop.eup %19398  ;;  %v12120_v34 = vmul.f32 %v19419_v29, %v12047_v56  ;;  %19406 = vrcp.f32 %v20695_v42  ;;  %v11971_v36 = vor.u32 1.1754944e-38, %v11970_v17  ;;  %v11983_v20 = vand.u32 2147483647, %v20679_v21  ;;  %v19424_v29 = vld [vmem:[%s19995_s3 + $0x70] sm:$0xff]  ;;  %v19425_v17 = vld [vmem:[%s19995_s3 + $0x78] sm:$0xff] }
 0xa4c   : > { %v19401_v43 = vpop.eup %19400  ;;  %v11932_v62 = vmul.f32 %v19395_v9, %v11931_v44  ;;  %v11960_v24 = vmul.f32 %v19399_v23, %v20673_v13  ;;  %vm11965_vm10 = vweird.f32 %v19399_v23  ;;  %v11985_v28 = vand.u32 2147483648, %v20679_v21 }
 0xa4d   : > { %12136 = vst [vmem:[%s20565_s29 + $0x58] sm:$0xff] %v12120_v34  ;;  %v20700_v35 = vadd.f32 1.0, %v19401_v43  ;;  %vm11966_vm12 = vmor %vm11964_vm9, %vm11965_vm10  ;;  %vm11979_vm14 = vweird.f32 %v20679_v21  ;;  %v12058_v30 = vand.u32 2147483647, %v20682_v53  ;;  %v12060_v57 = vand.u32 2147483648, %v20682_v53 }
 0xa4e   : > { %v19403_v18 = vpop.eup %19402  ;;  %v11933_v25 = vadd.f32 %v19395_v9, %v11932_v62  ;;  %v11961_v41 = vsub.f32 1.0, %v11960_v24  ;;  %v11986_v48 = vor.u32 1.1754944e-38, %v11985_v28  ;;  %vm11984_vm1 = vcmp.eq.f32.partialorder %v11983_v20, 8.507059e+37 }
 0xa4f   : > { %v11975_v14 = vmul.f32 %v19403_v18, %v20679_v21  ;;  %v19405_v60 = vpop.eup %19404  ;;  %vm11980_vm13 = vweird.f32 %v19403_v18  ;;  %19408 = vrcp.f32 %v20700_v35  ;;  %vm12054_vm2 = vweird.f32 %v20682_v53 }
 0xa50   : > { %v11937_v45 = vsel %vm11936_vm8, %v19395_v9, %v11933_v25  ;;  %v11962_v46 = vmul.f32 %v19399_v23, %v11961_v41  ;;  %v12050_v27 = vmul.f32 %v19405_v60, %v20682_v53  ;;  %vm12055_vm15 = vweird.f32 %v19405_v60  ;;  %vm11981_vm0 = vmor %vm11979_vm14, %vm11980_vm13  ;;  %v19423_v53 = vld [vmem:[%s19995_s3 + $0x60] sm:$0xff] }
 0xa51   : > { %v11942_v33 = vsel %vm11939_vm7, %v11941_v59, %v11937_v45  ;;  %v11976_v1 = vsub.f32 1.0, %v11975_v14  ;;  %v19407_v38 = vpop.eup %19406  ;;  %vm12056_vm3 = vmor %vm12054_vm2, %vm12055_vm15  ;;  %vm12059_vm4 = vcmp.eq.f32.partialorder %v12058_v30, 8.507059e+37  ;;  %v12061_v40 = vor.u32 1.1754944e-38, %v12060_v57 }
 0xa52   : > { %v12113_v47 = vmul.f32 %v19420_v32, %v11942_v33  ;;  %v11963_v55 = vadd.f32 %v19399_v23, %v11962_v46  ;;  %v12051_v26 = vsub.f32 1.0, %v12050_v27  ;;  %v12080_v12 = vmul.f32 %v19407_v38, %v20695_v42 }
 0xa53   : > { %v11977_v6 = vmul.f32 %v19403_v18, %v11976_v1  ;;  %v12088_v31 = vand.u32 2147483647, %v20695_v42  ;;  %v12090_v39 = vand.u32 2147483648, %v20695_v42  ;;  %vm12085_vm5 = vweird.f32 %v19407_v38 }
 0xa54   : > { %12129 = vst [vmem:[%s20565_s29 + $0x20] sm:$0xff] %v12113_v47  ;;  %v11967_v3 = vsel %vm11966_vm12, %v19399_v23, %v11963_v55  ;;  %v12052_v7 = vmul.f32 %v19405_v60, %v12051_v26  ;;  %v12081_v13 = vsub.f32 1.0, %v12080_v12  ;;  %vm12084_vm6 = vweird.f32 %v20695_v42 }
 0xa55   : > { %v11972_v2 = vsel %vm20702_vm11, %v11971_v36, %v11967_v3  ;;  %v11978_v8 = vadd.f32 %v19403_v18, %v11977_v6  ;;  %v19409_v16 = vpop.eup %19408  ;;  %vm12086_vm7 = vmor %vm12084_vm6, %vm12085_vm5  ;;  %vm12089_vm8 = vcmp.eq.f32.partialorder %v12088_v31, 8.507059e+37  ;;  %v12091_v49 = vor.u32 1.1754944e-38, %v12090_v39 }
 0xa56   : > { %v12115_v58 = vmul.f32 %v19421_v10, %v11972_v2  ;;  %v12053_v37 = vadd.f32 %v19405_v60, %v12052_v7  ;;  %v12082_v9 = vmul.f32 %v19407_v38, %v12081_v13  ;;  %v12095_v11 = vmul.f32 %v19409_v16, %v20700_v35 }
 0xa57   : > { %v11982_v52 = vsel %vm11981_vm0, %v19403_v18, %v11978_v8  ;;  %v12105_v63 = vand.u32 2147483648, %v20700_v35  ;;  %vm12100_vm9 = vweird.f32 %v19409_v16  ;;  %v12103_v15 = vand.u32 2147483647, %v20700_v35 }
 0xa58   : > { %12131 = vst [vmem:[%s20565_s29 + $0x30] sm:$0xff] %v12115_v58  ;;  %v11987_v50 = vsel %vm11984_vm1, %v11986_v48, %v11982_v52  ;;  %v12057_v51 = vsel %vm12056_vm3, %v19405_v60, %v12053_v37  ;;  %v12083_v0 = vadd.f32 %v19407_v38, %v12082_v9  ;;  %v12096_v61 = vsub.f32 1.0, %v12095_v11 }
 0xa59   : > { %v12116_v54 = vmul.f32 %v19422_v22, %v11987_v50  ;;  %v12062_v21 = vsel %vm12059_vm4, %v12061_v40, %v12057_v51  ;;  %vm12099_vm10 = vweird.f32 %v20700_v35  ;;  %v12106_v62 = vor.u32 1.1754944e-38, %v12105_v63 }
 0xa5a   : > { %v12121_v19 = vmul.f32 %v19423_v53, %v12062_v21  ;;  %v12087_v56 = vsel %vm12086_vm7, %v19407_v38, %v12083_v0  ;;  %v12097_v44 = vmul.f32 %v19409_v16, %v12096_v61  ;;  %vm12101_vm11 = vmor %vm12099_vm10, %vm12100_vm9  ;;  %vm12104_vm12 = vcmp.eq.f32.partialorder %v12103_v15, 8.507059e+37 }
 0xa5b   : > { %12132 = vst [vmem:[%s20565_s29 + $0x38] sm:$0xff] %v12116_v54  ;;  %v12092_v23 = vsel %vm12089_vm8, %v12091_v49, %v12087_v56 }
 0xa5c   : > { %12137 = vst [vmem:[%s20565_s29 + $0x60] sm:$0xff] %v12121_v19  ;;  %v12123_v34 = vmul.f32 %v19424_v29, %v12092_v23  ;;  %v12098_v43 = vadd.f32 %v19409_v16, %v12097_v44 }
 0xa5e   : > { %12139 = vst [vmem:[%s20565_s29 + $0x70] sm:$0xff] %v12123_v34  ;;  %v12102_v24 = vsel %vm12101_vm11, %v19409_v16, %v12098_v43 }
 0xa5f   : > { %v12107_v4 = vsel %vm12104_vm12, %v12106_v62, %v12102_v24 }
 0xa60   : > { %v12124_v42 = vmul.f32 %v19425_v17, %v12107_v4 }
 0xa62   : > { %12140 = vst [vmem:[%s20565_s29 + $0x78] sm:$0xff] %v12124_v42 }
 0xa63   : > { %19693 = shalt.err (!%p19690_p9)
}
 0xa64   : > { %s19774_s13 = smov 1024   ;;  %s19775_s3 = smov 64  }
 0xa65   : > { %19237 = dma.vmem_to_hbm [thread:$0]  (%p19956_p0), %s12155_s6, 2048, %s12157_s26, %s12142_s17, %s19774_s13, %s19774_s13, %s19775_s3  }
 0xa66 PF: > { %s12171_s29 = sand.u32 1, %s19736_s18   ;;  %p20827_p10 = scmp.ge.s32.totalorder %s19748_s21, 2 }
 0xa67   : > { %s12172_s24 = scalar_lea.sflag [#allocation4], %s12171_s29 }
 0xa68   : > { %p19266_p11 = pnand %p20827_p10, %p19962_p6 }
 0xa6a   : > { %p19267_p12 = pneg %p19266_p11 }
 0xa6c   : > { %19731 = dma.done.wait (%p19267_p12), %s12172_s24, 2048  }
 0xa6d   : > { %19733 = vsyncadd (%p19267_p12), %s12172_s24, 4294965248  ;;  %p32_p2 = scmp.ge.s32.totalorder %s19932_s30, 4   ;;  %s20828_s18 = smov %s19740_s19 }
 0xa6e   : > { %s20829_s19 = smov %s19744_s20  ;;  %s20830_s20 = smov %s19944_s4 }
 0xa6f   : > { %s20831_s21 = smov %s19932_s30  ;;  %34 = sbr.rel (!%p32_p2) target bundleno = 20 (0x14), region = 153 }
 0xa74   :  { %12178 = vsyncpa [#allocation3], 1 }
 0xa75   :  { %12180 = vsyncpa [#allocation3 + $0x1], 1 }
 0xa76   :  { %12181 = vsyncpa [#allocation6], 1 }
 0xa77   :  { %12182 = vsyncpa [#allocation9], 1 }
 0xa78   :  { %12183 = vsyncpa [#allocation12], 1 }
 0xa79   :  { %12184 = vsyncpa [#allocation15], 1 }
 0xa7a   :  { %12185 = vsyncpa [#allocation4], 1 }
 0xa7b   :  { %12187 = vsyncpa [#allocation4 + $0x1], 1 }

</bundles_post_ra>
